<compile_context>
chip_gen: v5e
topology: v5e:2x2
jax: 0.10.0
libtpu: 0.0.40
codegen_flags: <defaults>
</compile_context>

<pallas_src>
import jax
import jax.numpy as jnp
from jax.experimental import pallas as pl
from jax.experimental.pallas import tpu as pltpu


def _round_up(x, m):
    return (x + m - 1) // m * m


# ---------------------------------------------------------------------------
# Fused kernel: one grid step == one batch tile of B images, end to end.
#
# Layout of the activation slab (2-D, flat over the batch tile):
#   stage-1 input : row = 32*b + h          , lane = 3*w + c         (96 lanes)
#   conv1 output  : row = 32*b + h          , lane = 6*w + co        (168 lanes, w<28)
#   pool1 value   : row = 32*b + 2*ph       , lane = 12*pw + c       (162 lanes)
#   conv2 output  : row = 32*b + 2*h2       , lane = 16*w2 + co      (160 lanes, w2<10)
#   pool2 value   : row = 32*b + 4*ph2      , lane = 32*pw2 + co     (144 lanes)
# Rows/lanes in between hold finite don't-care values that are never consumed
# by a valid output (selection is folded into zero rows of the next weights).
# ---------------------------------------------------------------------------
def _lenet_kernel(x_ref, band1_ref, bias1_ref, band2_ref, bias2_ref,
                  wf1_ref, bf1_ref, wf2_ref, bf2_ref, wf3_ref, bf3_ref,
                  out_ref):
    f32 = jnp.float32
    B = x_ref.shape[0]          # batch tile (static)
    R = 32 * B                  # rows in the flat activation slab

    # Flatten the batch tile into one tall lane-dense slab; pad 8 zero rows so
    # the vertical-tap slices of the last image stay in bounds.
    x2d = x_ref[...].reshape(R, 96)
    x2d = jnp.concatenate([x2d, jnp.zeros((8, 96), f32)], axis=0)      # (R+8, 96)

    # ---- conv1 (5x5, 3->6) as 5 banded MXU matmuls + ReLU -----------------
    acc1 = jnp.zeros((R, 168), f32)
    for i in range(5):                                                 # vertical taps
        acc1 = acc1 + jnp.dot(x2d[i:i + R, :], band1_ref[i],
                              preferred_element_type=f32)
    c1 = jnp.maximum(acc1 + bias1_ref[...], 0.0)                       # (R, 168)

    # ---- pool1 (2x2 / 2), compaction-free ---------------------------------
    c1p = jnp.concatenate([c1, jnp.zeros((16, 168), f32)], axis=0)     # (R+16, 168)
    vv = jnp.maximum(c1p[0:R + 8, :], c1p[1:R + 9, :])                 # vertical max
    p1 = jnp.maximum(vv[:, 0:162], vv[:, 6:168])                       # horizontal max
    # pooled (b, ph, pw, c) now lives at row 32*b + 2*ph, lane 12*pw + c.

    # ---- conv2 (5x5, 6->16) as 5 banded MXU matmuls + ReLU -----------------
    acc2 = jnp.zeros((R, 160), f32)
    for i in range(5):
        acc2 = acc2 + jnp.dot(p1[2 * i:2 * i + R, :], band2_ref[i],
                              preferred_element_type=f32)
    c2 = jnp.maximum(acc2 + bias2_ref[...], 0.0)                       # (R, 160)

    # ---- pool2 (2x2 / 2), compaction-free ----------------------------------
    c2p = jnp.concatenate([c2, jnp.zeros((2, 160), f32)], axis=0)      # (R+2, 160)
    p2a = jnp.maximum(c2p[0:R, :], c2p[2:R + 2, :])                    # vertical max
    p2 = jnp.maximum(p2a[:, 0:144], p2a[:, 16:160])                    # (R, 144)
    p2r = p2.reshape(B, 32, 144)                                       # layout-preserving
    # pooled2 (b, ph2, pw2, co) lives at p2r[b, 4*ph2, 32*pw2 + co].

    # ---- fc1 (400 -> 120): masked weights pick the valid 16x5x5 features ----
    accf = jnp.zeros((B, 120), f32)
    for p in range(5):                                                 # pooled rows ph2
        accf = accf + jnp.dot(p2r[:, 4 * p, :], wf1_ref[p],
                              preferred_element_type=f32)
    h1 = jnp.maximum(accf + bf1_ref[...], 0.0)

    # ---- fc2 / fc3 ----------------------------------------------------------
    h2 = jnp.maximum(jnp.dot(h1, wf2_ref[...], preferred_element_type=f32)
                     + bf2_ref[...], 0.0)
    y = jnp.dot(h2, wf3_ref[...], preferred_element_type=f32) + bf3_ref[...]
    out_ref[...] = y.astype(out_ref.dtype)


# ---------------------------------------------------------------------------
# Wrapper: one-time layout / banded-weight prep (tiny tensors) + one pallas_call.
# ---------------------------------------------------------------------------
def net_forward(params, x, *, batch_tile=32):
    """Forward pass of the PyTorch `Net`. x: (N, 3, 32, 32) NCHW float32 (finite)."""
    N, C, H, W = x.shape
    assert (C, H, W) == (3, 32, 32), "Net's fc1 requires 32x32 RGB input"
    f32 = jnp.float32

    # Batch tile: multiple of 8 (output block sublane alignment); pad N up.
    bt = _round_up(max(8, min(batch_tile, N)), 8)
    n_pad = _round_up(N, bt)

    # Input: NCHW -> lane-dense (N, 32, 96) with lane = 3*w + c; pad batch.
    xr = x.astype(f32).transpose(0, 2, 3, 1).reshape(N, 32, 96)
    xr = jnp.pad(xr, ((0, n_pad - N), (0, 0), (0, 0)))

    # -- banded conv1 weights: band1[i, 3*w_in + c, 6*w_out + co] = w1[co,c,i,w_in-w_out]
    w1 = params["w1"].astype(f32)                              # (6, 3, 5, 5) OIHW
    kk1 = jnp.transpose(w1, (2, 1, 3, 0))                      # (i, c, j, co)
    jm1 = jnp.arange(32)[:, None] - jnp.arange(28)[None, :]    # (w_in, w_out)
    m1 = ((jm1 >= 0) & (jm1 <= 4)).astype(f32)
    band1 = kk1[:, :, jnp.clip(jm1, 0, 4), :] * m1[None, None, :, :, None]
    band1 = jnp.transpose(band1, (0, 2, 1, 3, 4)).reshape(5, 96, 168)

    # -- banded conv2 weights on the un-compacted pool1 layout (lane = 12*pw + c)
    w2 = params["w2"].astype(f32)                              # (16, 6, 5, 5)
    kk2 = jnp.transpose(w2, (2, 1, 3, 0))                      # (i, c, j, co)
    jm2 = jnp.arange(14)[:, None] - jnp.arange(10)[None, :]    # (pw_in, w2_out)
    m2 = ((jm2 >= 0) & (jm2 <= 4)).astype(f32)
    band2 = kk2[:, :, jnp.clip(jm2, 0, 4), :] * m2[None, None, :, :, None]
    band2 = jnp.transpose(band2, (0, 2, 1, 3, 4))              # (5, 14, 6, 10, 16)
    band2 = jnp.pad(band2, ((0, 0), (0, 0), (0, 6), (0, 0), (0, 0)))
    band2 = band2.reshape(5, 168, 160)[:, :162, :]             # (5, 162, 160)

    # -- fc1 weights, per pooled row ph2, on the un-compacted pool2 layout
    #    (lane = 32*pw2 + co); unused lane slots are zero.
    fw1 = params["fw1"].astype(f32).reshape(120, 16, 5, 5)     # (o, co, ph2, pw2)
    wf1 = jnp.transpose(fw1, (2, 3, 1, 0))                     # (ph2, pw2, co, o)
    wf1 = jnp.pad(wf1, ((0, 0), (0, 0), (0, 16), (0, 0)))      # (5, 5, 32, 120)
    wf1m = wf1.reshape(5, 160, 120)[:, :144, :]                # (5, 144, 120)

    wf2m = params["fw2"].astype(f32).T                         # (120, 84)
    wf3m = params["fw3"].astype(f32).T                         # (84, 10)

    bias1 = jnp.tile(params["b1"].astype(f32), 28)[None, :]    # (1, 168): b1[co] at 6*w+co
    bias2 = jnp.tile(params["b2"].astype(f32), 10)[None, :]    # (1, 160)
    bf1 = params["fb1"].astype(f32).reshape(1, 120)
    bf2 = params["fb2"].astype(f32).reshape(1, 84)
    bf3 = params["fb3"].astype(f32).reshape(1, 10)

    rep3 = lambda n: (0, 0, 0)                                 # resident weights
    rep2 = lambda n: (0, 0)
    out = pl.pallas_call(
        _lenet_kernel,
        out_shape=jax.ShapeDtypeStruct((n_pad, 10), f32),
        grid=(n_pad // bt,),
        in_specs=[
            pl.BlockSpec((bt, 32, 96), lambda n: (n, 0, 0)),   # batch tile of images
            pl.BlockSpec((5, 96, 168), rep3),
            pl.BlockSpec((1, 168), rep2),
            pl.BlockSpec((5, 162, 160), rep3),
            pl.BlockSpec((1, 160), rep2),
            pl.BlockSpec((5, 144, 120), rep3),
            pl.BlockSpec((1, 120), rep2),
            pl.BlockSpec((120, 84), rep2),
            pl.BlockSpec((1, 84), rep2),
            pl.BlockSpec((84, 10), rep2),
            pl.BlockSpec((1, 10), rep2),
        ],
        out_specs=pl.BlockSpec((bt, 10), lambda n: (n, 0)),
        compiler_params=pltpu.CompilerParams(
            dimension_semantics=("parallel",),
            vmem_limit_bytes=40 * 1024 * 1024),
    )(xr, band1, bias1, band2, bias2, wf1m, bf1, wf2m, bf2, wf3m, bf3)
    return out[:N]


# ---------------------------------------------------------------------------
# Params (PyTorch-default-style init) and a pure-JAX reference for checking.
# ---------------------------------------------------------------------------
def init_params(key):
    def uniform(k, shape, fan_in):
        bound = 1.0 / (fan_in ** 0.5)
        return jax.random.uniform(k, shape, jnp.float32, -bound, bound)

    ks = jax.random.split(key, 10)
    return {
        "w1":  uniform(ks[0], (6, 3, 5, 5), 3 * 5 * 5),
        "b1":  uniform(ks[1], (6,), 3 * 5 * 5),
        "w2":  uniform(ks[2], (16, 6, 5, 5), 6 * 5 * 5),
        "b2":  uniform(ks[3], (16,), 6 * 5 * 5),
        "fw1": uniform(ks[4], (120, 16 * 5 * 5), 16 * 5 * 5),
        "fb1": uniform(ks[5], (120,), 16 * 5 * 5),
        "fw2": uniform(ks[6], (84, 120), 120),
        "fb2": uniform(ks[7], (84,), 120),
        "fw3": uniform(ks[8], (10, 84), 84),
        "fb3": uniform(ks[9], (10,), 84),
    }


def reference_forward(params, x):
    hp = jax.lax.Precision.HIGHEST

    def conv(x, w, b):
        y = jax.lax.conv_general_dilated(
            x, w, (1, 1), "VALID",
            dimension_numbers=("NCHW", "OIHW", "NCHW"), precision=hp)
        return y + b[None, :, None, None]

    def pool(x):
        return jax.lax.reduce_window(x, -jnp.inf, jax.lax.max,
                                     (1, 1, 2, 2), (1, 1, 2, 2), "VALID")

    x = pool(jax.nn.relu(conv(x, params["w1"], params["b1"])))
    x = pool(jax.nn.relu(conv(x, params["w2"], params["b2"])))
    x = x.reshape(x.shape[0], -1)
    x = jax.nn.relu(jnp.dot(x, params["fw1"].T, precision=hp) + params["fb1"])
    x = jax.nn.relu(jnp.dot(x, params["fw2"].T, precision=hp) + params["fb2"])
    x = jnp.dot(x, params["fw3"].T, precision=hp) + params["fb3"]
    return x


if __name__ == "__main__":
    key = jax.random.PRNGKey(0)
    kx, kp = jax.random.split(key)
    # Shapes dictated by the module: fc1 expects 16*5*5 => 32x32 RGB input.
    x = jax.random.normal(kx, (2, 3, 32, 32), jnp.float32)
    params = init_params(kp)

    out = jax.jit(net_forward)(params, x)
    out = jax.block_until_ready(out)
    assert out.shape == (2, 10)

    ref = reference_forward(params, x)
    assert bool(jnp.allclose(out, ref, atol=2e-2, rtol=2e-2)), \
        float(jnp.max(jnp.abs(out - ref)))

    print("KERNEL_OK")
</pallas_src>

<mosaic_0001>
module attributes {stable_mosaic.version = 11 : i64} {
  func.func @_lenet_kernel(%arg0: i32, %arg1: memref<8x32x96xf32, #tpu.memory_space<vmem>>, %arg2: memref<5x96x168xf32, #tpu.memory_space<vmem>>, %arg3: memref<1x168xf32, #tpu.memory_space<vmem>>, %arg4: memref<5x162x160xf32, #tpu.memory_space<vmem>>, %arg5: memref<1x160xf32, #tpu.memory_space<vmem>>, %arg6: memref<5x144x120xf32, #tpu.memory_space<vmem>>, %arg7: memref<1x120xf32, #tpu.memory_space<vmem>>, %arg8: memref<120x84xf32, #tpu.memory_space<vmem>>, %arg9: memref<1x84xf32, #tpu.memory_space<vmem>>, %arg10: memref<84x10xf32, #tpu.memory_space<vmem>>, %arg11: memref<1x10xf32, #tpu.memory_space<vmem>>, %arg12: memref<8x10xf32, #tpu.memory_space<vmem>>) attributes {dimension_semantics = [#tpu.dimension_semantics<parallel>], iteration_bounds = array<i64: 1>, scalar_prefetch = 0 : i64, scratch_operands = 0 : i64, tpu.core_type = #tpu.core_type<tc>, window_params = [{transform_indices = @transform_0, window_bounds = array<i64: 8, 32, 96>}, {pipeline_mode = #tpu.pipeline_mode<synchronous>, transform_indices = @transform_1, window_bounds = array<i64: 5, 96, 168>}, {pipeline_mode = #tpu.pipeline_mode<synchronous>, transform_indices = @transform_2, window_bounds = array<i64: 1, 168>}, {pipeline_mode = #tpu.pipeline_mode<synchronous>, transform_indices = @transform_3, window_bounds = array<i64: 5, 162, 160>}, {pipeline_mode = #tpu.pipeline_mode<synchronous>, transform_indices = @transform_4, window_bounds = array<i64: 1, 160>}, {pipeline_mode = #tpu.pipeline_mode<synchronous>, transform_indices = @transform_5, window_bounds = array<i64: 5, 144, 120>}, {pipeline_mode = #tpu.pipeline_mode<synchronous>, transform_indices = @transform_6, window_bounds = array<i64: 1, 120>}, {pipeline_mode = #tpu.pipeline_mode<synchronous>, transform_indices = @transform_7, window_bounds = array<i64: 120, 84>}, {pipeline_mode = #tpu.pipeline_mode<synchronous>, transform_indices = @transform_8, window_bounds = array<i64: 1, 84>}, {pipeline_mode = #tpu.pipeline_mode<synchronous>, transform_indices = @transform_9, window_bounds = array<i64: 84, 10>}, {pipeline_mode = #tpu.pipeline_mode<synchronous>, transform_indices = @transform_10, window_bounds = array<i64: 1, 10>}, {transform_indices = @transform_11, window_bounds = array<i64: 8, 10>}]} {
    %c0 = arith.constant 0 : index
    %c0_0 = arith.constant 0 : index
    %c0_1 = arith.constant 0 : index
    %0 = vector.load %arg1[%c0, %c0_0, %c0_1] : memref<8x32x96xf32, #tpu.memory_space<vmem>>, vector<8x32x96xf32>
    %1 = vector.shape_cast %0 : vector<8x32x96xf32> to vector<256x96xf32>
    %cst = arith.constant 0.000000e+00 : f32
    %2 = vector.broadcast %cst : f32 to vector<8x96xf32>
    %3 = tpu.concatenate %1, %2 in 0 : vector<256x96xf32>, vector<8x96xf32> -> vector<264x96xf32>
    %cst_2 = arith.constant 0.000000e+00 : f32
    %4 = vector.broadcast %cst_2 : f32 to vector<256x168xf32>
    %5 = vector.extract_strided_slice %3 {offsets = [0, 0], sizes = [256, 96], strides = [1, 1]} : vector<264x96xf32> to vector<256x96xf32>
    %c0_3 = arith.constant 0 : index
    %c0_4 = arith.constant 0 : index
    %c0_5 = arith.constant 0 : index
    %6 = vector.load %arg2[%c0_3, %c0_4, %c0_5] : memref<5x96x168xf32, #tpu.memory_space<vmem>>, vector<1x96x168xf32>
    %7 = vector.shape_cast %6 : vector<1x96x168xf32> to vector<96x168xf32>
    %cst_6 = arith.constant dense<0.000000e+00> : vector<256x168xf32>
    %8 = tpu.matmul %5, %7, %cst_6 {dimension_numbers = #tpu.dot_dimension_numbers<[1], [0], [0], [1], [0, 0, 1, 1], [], []>} : vector<256x96xf32>, vector<96x168xf32>, vector<256x168xf32> -> vector<256x168xf32>
    %9 = arith.addf %4, %8 : vector<256x168xf32>
    %10 = vector.extract_strided_slice %3 {offsets = [1, 0], sizes = [256, 96], strides = [1, 1]} : vector<264x96xf32> to vector<256x96xf32>
    %c1 = arith.constant 1 : index
    %c0_7 = arith.constant 0 : index
    %c0_8 = arith.constant 0 : index
    %11 = vector.load %arg2[%c1, %c0_7, %c0_8] : memref<5x96x168xf32, #tpu.memory_space<vmem>>, vector<1x96x168xf32>
    %12 = vector.shape_cast %11 : vector<1x96x168xf32> to vector<96x168xf32>
    %cst_9 = arith.constant dense<0.000000e+00> : vector<256x168xf32>
    %13 = tpu.matmul %10, %12, %cst_9 {dimension_numbers = #tpu.dot_dimension_numbers<[1], [0], [0], [1], [0, 0, 1, 1], [], []>} : vector<256x96xf32>, vector<96x168xf32>, vector<256x168xf32> -> vector<256x168xf32>
    %14 = arith.addf %9, %13 : vector<256x168xf32>
    %15 = vector.extract_strided_slice %3 {offsets = [2, 0], sizes = [256, 96], strides = [1, 1]} : vector<264x96xf32> to vector<256x96xf32>
    %c2 = arith.constant 2 : index
    %c0_10 = arith.constant 0 : index
    %c0_11 = arith.constant 0 : index
    %16 = vector.load %arg2[%c2, %c0_10, %c0_11] : memref<5x96x168xf32, #tpu.memory_space<vmem>>, vector<1x96x168xf32>
    %17 = vector.shape_cast %16 : vector<1x96x168xf32> to vector<96x168xf32>
    %cst_12 = arith.constant dense<0.000000e+00> : vector<256x168xf32>
    %18 = tpu.matmul %15, %17, %cst_12 {dimension_numbers = #tpu.dot_dimension_numbers<[1], [0], [0], [1], [0, 0, 1, 1], [], []>} : vector<256x96xf32>, vector<96x168xf32>, vector<256x168xf32> -> vector<256x168xf32>
    %19 = arith.addf %14, %18 : vector<256x168xf32>
    %20 = vector.extract_strided_slice %3 {offsets = [3, 0], sizes = [256, 96], strides = [1, 1]} : vector<264x96xf32> to vector<256x96xf32>
    %c3 = arith.constant 3 : index
    %c0_13 = arith.constant 0 : index
    %c0_14 = arith.constant 0 : index
    %21 = vector.load %arg2[%c3, %c0_13, %c0_14] : memref<5x96x168xf32, #tpu.memory_space<vmem>>, vector<1x96x168xf32>
    %22 = vector.shape_cast %21 : vector<1x96x168xf32> to vector<96x168xf32>
    %cst_15 = arith.constant dense<0.000000e+00> : vector<256x168xf32>
    %23 = tpu.matmul %20, %22, %cst_15 {dimension_numbers = #tpu.dot_dimension_numbers<[1], [0], [0], [1], [0, 0, 1, 1], [], []>} : vector<256x96xf32>, vector<96x168xf32>, vector<256x168xf32> -> vector<256x168xf32>
    %24 = arith.addf %19, %23 : vector<256x168xf32>
    %25 = vector.extract_strided_slice %3 {offsets = [4, 0], sizes = [256, 96], strides = [1, 1]} : vector<264x96xf32> to vector<256x96xf32>
    %c4 = arith.constant 4 : index
    %c0_16 = arith.constant 0 : index
    %c0_17 = arith.constant 0 : index
    %26 = vector.load %arg2[%c4, %c0_16, %c0_17] : memref<5x96x168xf32, #tpu.memory_space<vmem>>, vector<1x96x168xf32>
    %27 = vector.shape_cast %26 : vector<1x96x168xf32> to vector<96x168xf32>
    %cst_18 = arith.constant dense<0.000000e+00> : vector<256x168xf32>
    %28 = tpu.matmul %25, %27, %cst_18 {dimension_numbers = #tpu.dot_dimension_numbers<[1], [0], [0], [1], [0, 0, 1, 1], [], []>} : vector<256x96xf32>, vector<96x168xf32>, vector<256x168xf32> -> vector<256x168xf32>
    %29 = arith.addf %24, %28 : vector<256x168xf32>
    %c0_19 = arith.constant 0 : index
    %c0_20 = arith.constant 0 : index
    %30 = vector.load %arg3[%c0_19, %c0_20] : memref<1x168xf32, #tpu.memory_space<vmem>>, vector<1x168xf32>
    %31 = vector.broadcast %30 : vector<1x168xf32> to vector<256x168xf32>
    %32 = arith.addf %29, %31 : vector<256x168xf32>
    %cst_21 = arith.constant 0.000000e+00 : f32
    %33 = vector.broadcast %cst_21 : f32 to vector<256x168xf32>
    %34 = arith.maximumf %32, %33 : vector<256x168xf32>
    %cst_22 = arith.constant 0.000000e+00 : f32
    %35 = vector.broadcast %cst_22 : f32 to vector<16x168xf32>
    %36 = tpu.concatenate %34, %35 in 0 : vector<256x168xf32>, vector<16x168xf32> -> vector<272x168xf32>
    %37 = vector.extract_strided_slice %36 {offsets = [0, 0], sizes = [264, 168], strides = [1, 1]} : vector<272x168xf32> to vector<264x168xf32>
    %38 = vector.extract_strided_slice %36 {offsets = [1, 0], sizes = [264, 168], strides = [1, 1]} : vector<272x168xf32> to vector<264x168xf32>
    %39 = arith.maximumf %37, %38 : vector<264x168xf32>
    %40 = vector.extract_strided_slice %39 {offsets = [0, 0], sizes = [264, 162], strides = [1, 1]} : vector<264x168xf32> to vector<264x162xf32>
    %41 = vector.extract_strided_slice %39 {offsets = [0, 6], sizes = [264, 162], strides = [1, 1]} : vector<264x168xf32> to vector<264x162xf32>
    %42 = arith.maximumf %40, %41 : vector<264x162xf32>
    %cst_23 = arith.constant 0.000000e+00 : f32
    %43 = vector.broadcast %cst_23 : f32 to vector<256x160xf32>
    %44 = vector.extract_strided_slice %42 {offsets = [0, 0], sizes = [256, 162], strides = [1, 1]} : vector<264x162xf32> to vector<256x162xf32>
    %c0_24 = arith.constant 0 : index
    %c0_25 = arith.constant 0 : index
    %c0_26 = arith.constant 0 : index
    %45 = vector.load %arg4[%c0_24, %c0_25, %c0_26] : memref<5x162x160xf32, #tpu.memory_space<vmem>>, vector<1x162x160xf32>
    %46 = vector.shape_cast %45 : vector<1x162x160xf32> to vector<162x160xf32>
    %cst_27 = arith.constant dense<0.000000e+00> : vector<256x160xf32>
    %47 = tpu.matmul %44, %46, %cst_27 {dimension_numbers = #tpu.dot_dimension_numbers<[1], [0], [0], [1], [0, 0, 1, 1], [], []>} : vector<256x162xf32>, vector<162x160xf32>, vector<256x160xf32> -> vector<256x160xf32>
    %48 = arith.addf %43, %47 : vector<256x160xf32>
    %49 = vector.extract_strided_slice %42 {offsets = [2, 0], sizes = [256, 162], strides = [1, 1]} : vector<264x162xf32> to vector<256x162xf32>
    %c1_28 = arith.constant 1 : index
    %c0_29 = arith.constant 0 : index
    %c0_30 = arith.constant 0 : index
    %50 = vector.load %arg4[%c1_28, %c0_29, %c0_30] : memref<5x162x160xf32, #tpu.memory_space<vmem>>, vector<1x162x160xf32>
    %51 = vector.shape_cast %50 : vector<1x162x160xf32> to vector<162x160xf32>
    %cst_31 = arith.constant dense<0.000000e+00> : vector<256x160xf32>
    %52 = tpu.matmul %49, %51, %cst_31 {dimension_numbers = #tpu.dot_dimension_numbers<[1], [0], [0], [1], [0, 0, 1, 1], [], []>} : vector<256x162xf32>, vector<162x160xf32>, vector<256x160xf32> -> vector<256x160xf32>
    %53 = arith.addf %48, %52 : vector<256x160xf32>
    %54 = vector.extract_strided_slice %42 {offsets = [4, 0], sizes = [256, 162], strides = [1, 1]} : vector<264x162xf32> to vector<256x162xf32>
    %c2_32 = arith.constant 2 : index
    %c0_33 = arith.constant 0 : index
    %c0_34 = arith.constant 0 : index
    %55 = vector.load %arg4[%c2_32, %c0_33, %c0_34] : memref<5x162x160xf32, #tpu.memory_space<vmem>>, vector<1x162x160xf32>
    %56 = vector.shape_cast %55 : vector<1x162x160xf32> to vector<162x160xf32>
    %cst_35 = arith.constant dense<0.000000e+00> : vector<256x160xf32>
    %57 = tpu.matmul %54, %56, %cst_35 {dimension_numbers = #tpu.dot_dimension_numbers<[1], [0], [0], [1], [0, 0, 1, 1], [], []>} : vector<256x162xf32>, vector<162x160xf32>, vector<256x160xf32> -> vector<256x160xf32>
    %58 = arith.addf %53, %57 : vector<256x160xf32>
    %59 = vector.extract_strided_slice %42 {offsets = [6, 0], sizes = [256, 162], strides = [1, 1]} : vector<264x162xf32> to vector<256x162xf32>
    %c3_36 = arith.constant 3 : index
    %c0_37 = arith.constant 0 : index
    %c0_38 = arith.constant 0 : index
    %60 = vector.load %arg4[%c3_36, %c0_37, %c0_38] : memref<5x162x160xf32, #tpu.memory_space<vmem>>, vector<1x162x160xf32>
    %61 = vector.shape_cast %60 : vector<1x162x160xf32> to vector<162x160xf32>
    %cst_39 = arith.constant dense<0.000000e+00> : vector<256x160xf32>
    %62 = tpu.matmul %59, %61, %cst_39 {dimension_numbers = #tpu.dot_dimension_numbers<[1], [0], [0], [1], [0, 0, 1, 1], [], []>} : vector<256x162xf32>, vector<162x160xf32>, vector<256x160xf32> -> vector<256x160xf32>
    %63 = arith.addf %58, %62 : vector<256x160xf32>
    %64 = vector.extract_strided_slice %42 {offsets = [8, 0], sizes = [256, 162], strides = [1, 1]} : vector<264x162xf32> to vector<256x162xf32>
    %c4_40 = arith.constant 4 : index
    %c0_41 = arith.constant 0 : index
    %c0_42 = arith.constant 0 : index
    %65 = vector.load %arg4[%c4_40, %c0_41, %c0_42] : memref<5x162x160xf32, #tpu.memory_space<vmem>>, vector<1x162x160xf32>
    %66 = vector.shape_cast %65 : vector<1x162x160xf32> to vector<162x160xf32>
    %cst_43 = arith.constant dense<0.000000e+00> : vector<256x160xf32>
    %67 = tpu.matmul %64, %66, %cst_43 {dimension_numbers = #tpu.dot_dimension_numbers<[1], [0], [0], [1], [0, 0, 1, 1], [], []>} : vector<256x162xf32>, vector<162x160xf32>, vector<256x160xf32> -> vector<256x160xf32>
    %68 = arith.addf %63, %67 : vector<256x160xf32>
    %c0_44 = arith.constant 0 : index
    %c0_45 = arith.constant 0 : index
    %69 = vector.load %arg5[%c0_44, %c0_45] : memref<1x160xf32, #tpu.memory_space<vmem>>, vector<1x160xf32>
    %70 = vector.broadcast %69 : vector<1x160xf32> to vector<256x160xf32>
    %71 = arith.addf %68, %70 : vector<256x160xf32>
    %cst_46 = arith.constant 0.000000e+00 : f32
    %72 = vector.broadcast %cst_46 : f32 to vector<256x160xf32>
    %73 = arith.maximumf %71, %72 : vector<256x160xf32>
    %cst_47 = arith.constant 0.000000e+00 : f32
    %74 = vector.broadcast %cst_47 : f32 to vector<2x160xf32>
    %75 = tpu.concatenate %73, %74 in 0 : vector<256x160xf32>, vector<2x160xf32> -> vector<258x160xf32>
    %76 = vector.extract_strided_slice %75 {offsets = [0, 0], sizes = [256, 160], strides = [1, 1]} : vector<258x160xf32> to vector<256x160xf32>
    %77 = vector.extract_strided_slice %75 {offsets = [2, 0], sizes = [256, 160], strides = [1, 1]} : vector<258x160xf32> to vector<256x160xf32>
    %78 = arith.maximumf %76, %77 : vector<256x160xf32>
    %79 = vector.extract_strided_slice %78 {offsets = [0, 0], sizes = [256, 144], strides = [1, 1]} : vector<256x160xf32> to vector<256x144xf32>
    %80 = vector.extract_strided_slice %78 {offsets = [0, 16], sizes = [256, 144], strides = [1, 1]} : vector<256x160xf32> to vector<256x144xf32>
    %81 = arith.maximumf %79, %80 : vector<256x144xf32>
    %82 = vector.shape_cast %81 : vector<256x144xf32> to vector<8x32x144xf32>
    %cst_48 = arith.constant 0.000000e+00 : f32
    %83 = vector.broadcast %cst_48 : f32 to vector<8x120xf32>
    %84 = vector.extract_strided_slice %82 {offsets = [0, 0, 0], sizes = [8, 1, 144], strides = [1, 1, 1]} : vector<8x32x144xf32> to vector<8x1x144xf32>
    %85 = vector.shape_cast %84 : vector<8x1x144xf32> to vector<8x144xf32>
    %c0_49 = arith.constant 0 : index
    %c0_50 = arith.constant 0 : index
    %c0_51 = arith.constant 0 : index
    %86 = vector.load %arg6[%c0_49, %c0_50, %c0_51] : memref<5x144x120xf32, #tpu.memory_space<vmem>>, vector<1x144x120xf32>
    %87 = vector.shape_cast %86 : vector<1x144x120xf32> to vector<144x120xf32>
    %cst_52 = arith.constant dense<0.000000e+00> : vector<8x120xf32>
    %88 = tpu.matmul %85, %87, %cst_52 {dimension_numbers = #tpu.dot_dimension_numbers<[1], [0], [0], [1], [0, 0, 1, 1], [], []>} : vector<8x144xf32>, vector<144x120xf32>, vector<8x120xf32> -> vector<8x120xf32>
    %89 = arith.addf %83, %88 : vector<8x120xf32>
    %90 = vector.extract_strided_slice %82 {offsets = [0, 4, 0], sizes = [8, 1, 144], strides = [1, 1, 1]} : vector<8x32x144xf32> to vector<8x1x144xf32>
    %91 = vector.shape_cast %90 : vector<8x1x144xf32> to vector<8x144xf32>
    %c1_53 = arith.constant 1 : index
    %c0_54 = arith.constant 0 : index
    %c0_55 = arith.constant 0 : index
    %92 = vector.load %arg6[%c1_53, %c0_54, %c0_55] : memref<5x144x120xf32, #tpu.memory_space<vmem>>, vector<1x144x120xf32>
    %93 = vector.shape_cast %92 : vector<1x144x120xf32> to vector<144x120xf32>
    %cst_56 = arith.constant dense<0.000000e+00> : vector<8x120xf32>
    %94 = tpu.matmul %91, %93, %cst_56 {dimension_numbers = #tpu.dot_dimension_numbers<[1], [0], [0], [1], [0, 0, 1, 1], [], []>} : vector<8x144xf32>, vector<144x120xf32>, vector<8x120xf32> -> vector<8x120xf32>
    %95 = arith.addf %89, %94 : vector<8x120xf32>
    %96 = vector.extract_strided_slice %82 {offsets = [0, 8, 0], sizes = [8, 1, 144], strides = [1, 1, 1]} : vector<8x32x144xf32> to vector<8x1x144xf32>
    %97 = vector.shape_cast %96 : vector<8x1x144xf32> to vector<8x144xf32>
    %c2_57 = arith.constant 2 : index
    %c0_58 = arith.constant 0 : index
    %c0_59 = arith.constant 0 : index
    %98 = vector.load %arg6[%c2_57, %c0_58, %c0_59] : memref<5x144x120xf32, #tpu.memory_space<vmem>>, vector<1x144x120xf32>
    %99 = vector.shape_cast %98 : vector<1x144x120xf32> to vector<144x120xf32>
    %cst_60 = arith.constant dense<0.000000e+00> : vector<8x120xf32>
    %100 = tpu.matmul %97, %99, %cst_60 {dimension_numbers = #tpu.dot_dimension_numbers<[1], [0], [0], [1], [0, 0, 1, 1], [], []>} : vector<8x144xf32>, vector<144x120xf32>, vector<8x120xf32> -> vector<8x120xf32>
    %101 = arith.addf %95, %100 : vector<8x120xf32>
    %102 = vector.extract_strided_slice %82 {offsets = [0, 12, 0], sizes = [8, 1, 144], strides = [1, 1, 1]} : vector<8x32x144xf32> to vector<8x1x144xf32>
    %103 = vector.shape_cast %102 : vector<8x1x144xf32> to vector<8x144xf32>
    %c3_61 = arith.constant 3 : index
    %c0_62 = arith.constant 0 : index
    %c0_63 = arith.constant 0 : index
    %104 = vector.load %arg6[%c3_61, %c0_62, %c0_63] : memref<5x144x120xf32, #tpu.memory_space<vmem>>, vector<1x144x120xf32>
    %105 = vector.shape_cast %104 : vector<1x144x120xf32> to vector<144x120xf32>
    %cst_64 = arith.constant dense<0.000000e+00> : vector<8x120xf32>
    %106 = tpu.matmul %103, %105, %cst_64 {dimension_numbers = #tpu.dot_dimension_numbers<[1], [0], [0], [1], [0, 0, 1, 1], [], []>} : vector<8x144xf32>, vector<144x120xf32>, vector<8x120xf32> -> vector<8x120xf32>
    %107 = arith.addf %101, %106 : vector<8x120xf32>
    %108 = vector.extract_strided_slice %82 {offsets = [0, 16, 0], sizes = [8, 1, 144], strides = [1, 1, 1]} : vector<8x32x144xf32> to vector<8x1x144xf32>
    %109 = vector.shape_cast %108 : vector<8x1x144xf32> to vector<8x144xf32>
    %c4_65 = arith.constant 4 : index
    %c0_66 = arith.constant 0 : index
    %c0_67 = arith.constant 0 : index
    %110 = vector.load %arg6[%c4_65, %c0_66, %c0_67] : memref<5x144x120xf32, #tpu.memory_space<vmem>>, vector<1x144x120xf32>
    %111 = vector.shape_cast %110 : vector<1x144x120xf32> to vector<144x120xf32>
    %cst_68 = arith.constant dense<0.000000e+00> : vector<8x120xf32>
    %112 = tpu.matmul %109, %111, %cst_68 {dimension_numbers = #tpu.dot_dimension_numbers<[1], [0], [0], [1], [0, 0, 1, 1], [], []>} : vector<8x144xf32>, vector<144x120xf32>, vector<8x120xf32> -> vector<8x120xf32>
    %113 = arith.addf %107, %112 : vector<8x120xf32>
    %c0_69 = arith.constant 0 : index
    %c0_70 = arith.constant 0 : index
    %114 = vector.load %arg7[%c0_69, %c0_70] : memref<1x120xf32, #tpu.memory_space<vmem>>, vector<1x120xf32>
    %115 = vector.broadcast %114 : vector<1x120xf32> to vector<8x120xf32>
    %116 = arith.addf %113, %115 : vector<8x120xf32>
    %cst_71 = arith.constant 0.000000e+00 : f32
    %117 = vector.broadcast %cst_71 : f32 to vector<8x120xf32>
    %118 = arith.maximumf %116, %117 : vector<8x120xf32>
    %c0_72 = arith.constant 0 : index
    %c0_73 = arith.constant 0 : index
    %119 = vector.load %arg8[%c0_72, %c0_73] : memref<120x84xf32, #tpu.memory_space<vmem>>, vector<120x84xf32>
    %cst_74 = arith.constant dense<0.000000e+00> : vector<8x84xf32>
    %120 = tpu.matmul %118, %119, %cst_74 {dimension_numbers = #tpu.dot_dimension_numbers<[1], [0], [0], [1], [0, 0, 1, 1], [], []>} : vector<8x120xf32>, vector<120x84xf32>, vector<8x84xf32> -> vector<8x84xf32>
    %c0_75 = arith.constant 0 : index
    %c0_76 = arith.constant 0 : index
    %121 = vector.load %arg9[%c0_75, %c0_76] : memref<1x84xf32, #tpu.memory_space<vmem>>, vector<1x84xf32>
    %122 = vector.broadcast %121 : vector<1x84xf32> to vector<8x84xf32>
    %123 = arith.addf %120, %122 : vector<8x84xf32>
    %cst_77 = arith.constant 0.000000e+00 : f32
    %124 = vector.broadcast %cst_77 : f32 to vector<8x84xf32>
    %125 = arith.maximumf %123, %124 : vector<8x84xf32>
    %c0_78 = arith.constant 0 : index
    %c0_79 = arith.constant 0 : index
    %126 = vector.load %arg10[%c0_78, %c0_79] : memref<84x10xf32, #tpu.memory_space<vmem>>, vector<84x10xf32>
    %cst_80 = arith.constant dense<0.000000e+00> : vector<8x10xf32>
    %127 = tpu.matmul %125, %126, %cst_80 {dimension_numbers = #tpu.dot_dimension_numbers<[1], [0], [0], [1], [0, 0, 1, 1], [], []>} : vector<8x84xf32>, vector<84x10xf32>, vector<8x10xf32> -> vector<8x10xf32>
    %c0_81 = arith.constant 0 : index
    %c0_82 = arith.constant 0 : index
    %128 = vector.load %arg11[%c0_81, %c0_82] : memref<1x10xf32, #tpu.memory_space<vmem>>, vector<1x10xf32>
    %129 = vector.broadcast %128 : vector<1x10xf32> to vector<8x10xf32>
    %130 = arith.addf %127, %129 : vector<8x10xf32>
    %c0_83 = arith.constant 0 : index
    %c0_84 = arith.constant 0 : index
    %131 = vector.load %arg12[%c0_83, %c0_84] : memref<8x10xf32, #tpu.memory_space<vmem>>, vector<8x10xf32>
    tpu.vector_store %arg12[%c0_83, %c0_84], %130 {strides = array<i32>} : memref<8x10xf32, #tpu.memory_space<vmem>>, vector<8x10xf32>,
    return
  }
  func.func @transform_0(%arg0: i32) -> (i32, i32, i32) {
    %c0_i32 = arith.constant 0 : i32
    %c0_i32_0 = arith.constant 0 : i32
    %c0_i32_1 = arith.constant 0 : i32
    return %arg0, %c0_i32, %c0_i32_0 : i32, i32, i32
  }
  func.func @transform_1(%arg0: i32) -> (i32, i32, i32) {
    %c0_i32 = arith.constant 0 : i32
    %c0_i32_0 = arith.constant 0 : i32
    %c0_i32_1 = arith.constant 0 : i32
    %c0_i32_2 = arith.constant 0 : i32
    return %c0_i32, %c0_i32_0, %c0_i32_1 : i32, i32, i32
  }
  func.func @transform_2(%arg0: i32) -> (i32, i32) {
    %c0_i32 = arith.constant 0 : i32
    %c0_i32_0 = arith.constant 0 : i32
    %c0_i32_1 = arith.constant 0 : i32
    return %c0_i32, %c0_i32_0 : i32, i32
  }
  func.func @transform_3(%arg0: i32) -> (i32, i32, i32) {
    %c0_i32 = arith.constant 0 : i32
    %c0_i32_0 = arith.constant 0 : i32
    %c0_i32_1 = arith.constant 0 : i32
    %c0_i32_2 = arith.constant 0 : i32
    return %c0_i32, %c0_i32_0, %c0_i32_1 : i32, i32, i32
  }
  func.func @transform_4(%arg0: i32) -> (i32, i32) {
    %c0_i32 = arith.constant 0 : i32
    %c0_i32_0 = arith.constant 0 : i32
    %c0_i32_1 = arith.constant 0 : i32
    return %c0_i32, %c0_i32_0 : i32, i32
  }
  func.func @transform_5(%arg0: i32) -> (i32, i32, i32) {
    %c0_i32 = arith.constant 0 : i32
    %c0_i32_0 = arith.constant 0 : i32
    %c0_i32_1 = arith.constant 0 : i32
    %c0_i32_2 = arith.constant 0 : i32
    return %c0_i32, %c0_i32_0, %c0_i32_1 : i32, i32, i32
  }
  func.func @transform_6(%arg0: i32) -> (i32, i32) {
    %c0_i32 = arith.constant 0 : i32
    %c0_i32_0 = arith.constant 0 : i32
    %c0_i32_1 = arith.constant 0 : i32
    return %c0_i32, %c0_i32_0 : i32, i32
  }
  func.func @transform_7(%arg0: i32) -> (i32, i32) {
    %c0_i32 = arith.constant 0 : i32
    %c0_i32_0 = arith.constant 0 : i32
    %c0_i32_1 = arith.constant 0 : i32
    return %c0_i32, %c0_i32_0 : i32, i32
  }
  func.func @transform_8(%arg0: i32) -> (i32, i32) {
    %c0_i32 = arith.constant 0 : i32
    %c0_i32_0 = arith.constant 0 : i32
    %c0_i32_1 = arith.constant 0 : i32
    return %c0_i32, %c0_i32_0 : i32, i32
  }
  func.func @transform_9(%arg0: i32) -> (i32, i32) {
    %c0_i32 = arith.constant 0 : i32
    %c0_i32_0 = arith.constant 0 : i32
    %c0_i32_1 = arith.constant 0 : i32
    return %c0_i32, %c0_i32_0 : i32, i32
  }
  func.func @transform_10(%arg0: i32) -> (i32, i32) {
    %c0_i32 = arith.constant 0 : i32
    %c0_i32_0 = arith.constant 0 : i32
    %c0_i32_1 = arith.constant 0 : i32
    return %c0_i32, %c0_i32_0 : i32, i32
  }
  func.func @transform_11(%arg0: i32) -> (i32, i32) {
    %c0_i32 = arith.constant 0 : i32
    %c0_i32_0 = arith.constant 0 : i32
    return %arg0, %c0_i32 : i32, i32
  }
}

</mosaic_0001>

<bundles_post_ra>
// kernel: tile.13
= control target key start
LH: loop header
LB: loop body
LE: loop exit
PB: predicated region body
PF: predicated region fallthrough
CT: control target
= control target key end

     0   :  { %s40_s0 = inlined_call_operand.vmem [shape: f32[6], index: 0, kind: input, shape index: {}]   ;;  %s41_s1 = inlined_call_operand.vmem [shape: f32[28,6], index: 1, kind: output, shape index: {}]  }
   0x1   :  { %v4_v0 = vld [vmem:[%s40_s0] ss:$0 sm:$0xff] }
   0x2   :  { %5 = vst [vmem:[%s41_s1] sm:$0xff] %v4_v0 }
   0x3   :  { %12 = vst [vmem:[%s41_s1 + $0x8] sm:$0xff] %v4_v0 }
   0x4   :  { %13 = vst [vmem:[%s41_s1 + $0x10] sm:$0xff] %v4_v0 }
   0x5   :  { %14 = vst [vmem:[%s41_s1 + $0x18] sm:$0xff] %v4_v0 }

// kernel: tile.14
= control target key start
LH: loop header
LB: loop body
LE: loop exit
PB: predicated region body
PF: predicated region fallthrough
CT: control target
= control target key end

     0   :  { %vm9_vm0 = vcmask 15360   ;;  %s248_s12 = smov 126   ;;  %s249_s13 = smov 114   ;;  %vm3_vm1 = vcmask 48128   ;;  %vm13_vm2 = vcmask 31744   ;;  %vm16_vm3 = vcmask 1048560   ;;  %s378_s0 = inlined_call_operand.vmem [shape: f32[28,6], index: 0, kind: input, shape index: {}]   ;;  %s379_s1 = inlined_call_operand.vmem [shape: f32[1,168], index: 1, kind: output, shape index: {}]  }
   0x1   :  { %v192_v0 = vld [vmem:[%s378_s0 + $0x15] sm:$0x1]   ;;  %v195_v3 = vld [vmem:[%s378_s0 + $0x13] sm:$0x1]   ;;  %v197_v4 = vld [vmem:[%s378_s0 + $0x11] sm:$0x1]  }
   0x2   :  { %v193_v1 = vld [vmem:[%s378_s0 + $0x15] sm:$0x1]   ;;  %26 = vrot.lane.b32.xlu1 %v195_v3, %s249_s13  ;;  %s250_s16 = smov 102   ;;  %v194_v5 = vld [vmem:[%s378_s0 + $0x14] sm:$0x1]   ;;  %s251_s21 = smov 120  }
   0x3   :  { %v10_v2 = vsel %vm9_vm0, %v193_v1, %v192_v0  ;;  %38 = vrot.lane.b32.xlu2 %v197_v4, %s250_s16  ;;  %v196_v6 = vld [vmem:[%s378_s0 + $0x12] sm:$0x1]   ;;  %s252_s22 = smov 108   ;;  %v198_v7 = vld [vmem:[%s378_s0 + $0x10] sm:$0x1]   ;;  %s253_s25 = smov 96  }
   0x4   :  { %11 = vrot.lane.b32.xlu0 %v10_v2, %s248_s12  ;;  %v199_v8 = vld [vmem:[%s378_s0 + $0xf] sm:$0x1]   ;;  %v200_v9 = vld [vmem:[%s378_s0 + $0xe] sm:$0x1]   ;;  %s254_s30 = smov 90   ;;  %s255_s2 = smov 84  }
   0x5   :  { %v201_v10 = vld [vmem:[%s378_s0 + $0xd] sm:$0x1]   ;;  %s256_s5 = smov 78   ;;  %v202_v11 = vld [vmem:[%s378_s0 + $0xc] sm:$0x1]   ;;  %s257_s10 = smov 72  }
   0x6   :  { %v203_v12 = vld [vmem:[%s378_s0 + $0xb] sm:$0x1]   ;;  %s258_s11 = smov 66   ;;  %v204_v13 = vld [vmem:[%s378_s0 + $0xa] sm:$0x1]   ;;  %s259_s14 = smov 60  }
   0x7   :  { %v205_v14 = vld [vmem:[%s378_s0 + $0x9] sm:$0x1]   ;;  %v206_v15 = vld [vmem:[%s378_s0 + $0x8] sm:$0x1]   ;;  %s260_s19 = smov 54   ;;  %s261_s20 = smov 48  }
   0x8   :  { %v207_v16 = vld [vmem:[%s378_s0 + $0x7] sm:$0x1]   ;;  %s262_s23 = smov 42   ;;  %v208_v17 = vld [vmem:[%s378_s0 + $0x6] sm:$0x1]   ;;  %s263_s28 = smov 36  }
   0x9   :  { %v209_v18 = vld [vmem:[%s378_s0 + $0x1b] sm:$0x1]   ;;  %s264_s29 = smov 34   ;;  %v210_v19 = vld [vmem:[%s378_s0 + $0x5] sm:$0x1]   ;;  %s265_s3 = smov 30  }
   0xa   :  { %32 = vrot.lane.b32.xlu1 %v196_v6, %s252_s22  ;;  %v211_v20 = vld [vmem:[%s378_s0 + $0x1a] sm:$0x1]   ;;  %v212_v21 = vld [vmem:[%s378_s0 + $0x4] sm:$0x1]   ;;  %s266_s8 = smov 28   ;;  %s267_s9 = smov 24  }
   0xb   :  { %44 = vrot.lane.b32.xlu2 %v198_v7, %s253_s25  ;;  %v213_v22 = vld [vmem:[%s378_s0 + $0x19] sm:$0x1]   ;;  %s268_s12 = smov 22   ;;  %v214_v23 = vld [vmem:[%s378_s0 + $0x3] sm:$0x1]   ;;  %s269_s17 = smov 18  }
   0xc   :  { %20 = vrot.lane.b32.xlu0 %v194_v5, %s251_s21  ;;  %v215_v24 = vld [vmem:[%s378_s0 + $0x18] sm:$0x1]   ;;  %s270_s18 = smov 16   ;;  %v216_v25 = vld [vmem:[%s378_s0 + $0x2] sm:$0x1]   ;;  %s271_s21 = smov 12  }
   0xd   :  { %v217_v26 = vld [vmem:[%s378_s0 + $0x17] sm:$0x1]   ;;  %v218_v27 = vld [vmem:[%s378_s0 + $0x1] sm:$0x1]   ;;  %s272_s26 = smov 10   ;;  %s273_s27 = smov 6  }
   0xe   :  { %v219_v28 = vld [vmem:[%s378_s0 + $0x16] sm:$0x1]   ;;  %v2_v29 = vld [vmem:[%s378_s0] sm:$0x1]   ;;  %vm22_vm4 = vcmask 1032128   ;;  %vm28_vm5 = vcmask 982928  }
   0xf   :  { %4 = vst.msk [vmem:[#allocation0] sm:$0x1] %vm3_vm1, %v2_v29   ;;  %vm34_vm6 = vcmask 933728   ;;  %vm40_vm7 = vcmask 884528   ;;  %vm46_vm8 = vcmask 835328   ;;  %vm52_vm9 = vcmask 786128  }
  0x10   :  { %vm58_vm10 = vcmask 736928   ;;  %vm64_vm11 = vcmask 687728   ;;  %vm70_vm12 = vcmask 638528   ;;  %vm76_vm13 = vcmask 589328  }
  0x11   :  { %vm82_vm14 = vcmask 540128   ;;  %vm88_vm15 = vcmask 490928   ;;  %vm94_vm0 = vcmask 441728   ;;  %vm100_vm1 = vcmask 392528  }
  0x12   :  { %56 = vrot.lane.b32.xlu1 %v200_v9, %s255_s2 }
  0x13   :  { %62 = vrot.lane.b32.xlu2 %v201_v10, %s256_s5 }
  0x14   :  { %50 = vrot.lane.b32.xlu0 %v199_v8, %s254_s30  ;;  %s274_s30 = smov 4  }
  0x1a   :  { %74 = vrot.lane.b32.xlu1 %v203_v12, %s258_s11 }
  0x1b   :  { %80 = vrot.lane.b32.xlu2 %v204_v13, %s259_s14 }
  0x1c   :  { %68 = vrot.lane.b32.xlu0 %v202_v11, %s257_s10 }
  0x22   :  { %92 = vrot.lane.b32.xlu1 %v206_v15, %s261_s20 }
  0x23   :  { %98 = vrot.lane.b32.xlu2 %v207_v16, %s262_s23 }
  0x24   :  { %86 = vrot.lane.b32.xlu0 %v205_v14, %s260_s19 }
  0x2a   :  { %110 = vrot.lane.b32.xlu1 %v209_v18, %s264_s29 }
  0x2b   :  { %117 = vrot.lane.b32.xlu2 %v210_v19, %s265_s3 }
  0x2c   :  { %104 = vrot.lane.b32.xlu0 %v208_v17, %s263_s28 }
  0x32   :  { %130 = vrot.lane.b32.xlu1 %v212_v21, %s267_s9 }
  0x33   :  { %136 = vrot.lane.b32.xlu2 %v213_v22, %s268_s12 }
  0x34   :  { %123 = vrot.lane.b32.xlu0 %v211_v20, %s266_s8 }
  0x3a   :  { %149 = vrot.lane.b32.xlu1 %v215_v24, %s270_s18 }
  0x3b   :  { %156 = vrot.lane.b32.xlu2 %v216_v25, %s271_s21 }
  0x3c   :  { %143 = vrot.lane.b32.xlu0 %v214_v23, %s269_s17 }
  0x42   :  { %169 = vrot.lane.b32.xlu1 %v218_v27, %s273_s27 }
  0x43   :  { %175 = vrot.lane.b32.xlu2 %v219_v28, %s274_s30 }
  0x44   :  { %162 = vrot.lane.b32.xlu0 %v217_v26, %s272_s26 }
  0x5d   :  { %v39_v30 = vpop.permute.xlu2 %38  }
  0x65   :  { %v45_v31 = vpop.permute.xlu2 %44  }
  0x6d   :  { %v63_v32 = vpop.permute.xlu2 %62  }
  0x74   :  { %v27_v34 = vpop.permute.xlu1 %26  }
  0x75   :  { %v81_v35 = vpop.permute.xlu2 %80  }
  0x76   :  { %v12_v33 = vpop.permute.xlu0 %11  }
  0x77   :  { %15 = vst.msk [vmem:[#allocation0 + $0x8] sm:$0x1] %vm13_vm2, %v12_v33   ;;  %vm106_vm2 = vcmask 343328  }
  0x78   :  { %17 = vst.msk [vmem:[#allocation0] sm:$0x1] %vm16_vm3, %v12_v33   ;;  %vm119_vm3 = vcmask 294128  }
  0x7c   :  { %v33_v37 = vpop.permute.xlu1 %32  }
  0x7d   :  { %v99_v38 = vpop.permute.xlu2 %98  }
  0x7e   :  { %v21_v36 = vpop.permute.xlu0 %20  }
  0x7f   :  { %23 = vst.msk [vmem:[#allocation0] sm:$0x1] %vm22_vm4, %v21_v36   ;;  %vm112_vm4 = vcmask 326928  }
  0x80   :  { %29 = vst.msk [vmem:[#allocation0] sm:$0x1] %vm28_vm5, %v27_v34   ;;  %vm125_vm5 = vcmask 277728  }
  0x81   :  { %35 = vst.msk [vmem:[#allocation0] sm:$0x1] %vm34_vm6, %v33_v37   ;;  %vm138_vm6 = vcmask 228528  }
  0x82   :  { %41 = vst.msk [vmem:[#allocation0] sm:$0x1] %vm40_vm7, %v39_v30   ;;  %vm132_vm7 = vcmask 244928  }
  0x83   :  { %47 = vst.msk [vmem:[#allocation0] sm:$0x1] %vm46_vm8, %v45_v31   ;;  %vm145_vm8 = vcmask 195728  }
  0x84   :  { %v57_v40 = vpop.permute.xlu1 %56  }
  0x85   :  { %v118_v41 = vpop.permute.xlu2 %117  }
  0x86   :  { %v51_v39 = vpop.permute.xlu0 %50  }
  0x87   :  { %53 = vst.msk [vmem:[#allocation0] sm:$0x1] %vm52_vm9, %v51_v39   ;;  %vm158_vm9 = vcmask 146528  }
  0x88   :  { %59 = vst.msk [vmem:[#allocation0] sm:$0x1] %vm58_vm10, %v57_v40   ;;  %vm151_vm10 = vcmask 179328  }
  0x89   :  { %65 = vst.msk [vmem:[#allocation0] sm:$0x1] %vm64_vm11, %v63_v32   ;;  %vm164_vm11 = vcmask 130128  }
  0x8c   :  { %v75_v43 = vpop.permute.xlu1 %74  }
  0x8d   :  { %v137_v44 = vpop.permute.xlu2 %136  }
  0x8e   :  { %v69_v42 = vpop.permute.xlu0 %68  }
  0x8f   :  { %71 = vst.msk [vmem:[#allocation0] sm:$0x1] %vm70_vm12, %v69_v42   ;;  %vm177_vm12 = vcmask 80928  }
  0x90   :  { %77 = vst.msk [vmem:[#allocation0] sm:$0x1] %vm76_vm13, %v75_v43   ;;  %vm171_vm13 = vcmask 97328  }
  0x91   :  { %83 = vst.msk [vmem:[#allocation0] sm:$0x1] %vm82_vm14, %v81_v35  }
  0x94   :  { %v93_v46 = vpop.permute.xlu1 %92  }
  0x95   :  { %v157_v47 = vpop.permute.xlu2 %156  }
  0x96   :  { %v87_v45 = vpop.permute.xlu0 %86  }
  0x97   :  { %89 = vst.msk [vmem:[#allocation0] sm:$0x1] %vm88_vm15, %v87_v45  }
  0x98   :  { %95 = vst.msk [vmem:[#allocation0] sm:$0x1] %vm94_vm0, %v93_v46  }
  0x99   :  { %101 = vst.msk [vmem:[#allocation0] sm:$0x1] %vm100_vm1, %v99_v38  }
  0x9c   :  { %v111_v49 = vpop.permute.xlu1 %110  }
  0x9d   :  { %114 = vst.msk [vmem:[#allocation0 + $0x8] sm:$0x1] %vm112_vm4, %v111_v49   ;;  %v176_v50 = vpop.permute.xlu2 %175  }
  0x9e   :  { %v105_v48 = vpop.permute.xlu0 %104  }
  0x9f   :  { %107 = vst.msk [vmem:[#allocation0] sm:$0x1] %vm106_vm2, %v105_v48  }
  0xa0   :  { %120 = vst.msk [vmem:[#allocation0] sm:$0x1] %vm119_vm3, %v118_v41  }
  0xa4   :  { %v131_v52 = vpop.permute.xlu1 %130  }
  0xa5   :  { %133 = vst.msk [vmem:[#allocation0] sm:$0x1] %vm132_vm7, %v131_v52  }
  0xa6   :  { %v124_v51 = vpop.permute.xlu0 %123  }
  0xa7   :  { %127 = vst.msk [vmem:[#allocation0 + $0x8] sm:$0x1] %vm125_vm5, %v124_v51  }
  0xa8   :  { %140 = vst.msk [vmem:[#allocation0 + $0x8] sm:$0x1] %vm138_vm6, %v137_v44  }
  0xac   :  { %v150_v54 = vpop.permute.xlu1 %149  }
  0xad   :  { %153 = vst.msk [vmem:[#allocation0 + $0x8] sm:$0x1] %vm151_vm10, %v150_v54  }
  0xae   :  { %v144_v53 = vpop.permute.xlu0 %143  }
  0xaf   :  { %146 = vst.msk [vmem:[#allocation0] sm:$0x1] %vm145_vm8, %v144_v53  }
  0xb0   :  { %159 = vst.msk [vmem:[#allocation0] sm:$0x1] %vm158_vm9, %v157_v47  }
  0xb4   :  { %v170_v56 = vpop.permute.xlu1 %169  }
  0xb5   :  { %172 = vst.msk [vmem:[#allocation0] sm:$0x1] %vm171_vm13, %v170_v56  }
  0xb6   :  { %v163_v55 = vpop.permute.xlu0 %162  }
  0xb7   :  { %166 = vst.msk [vmem:[#allocation0 + $0x8] sm:$0x1] %vm164_vm11, %v163_v55  }
  0xb8   :  { %179 = vst.msk [vmem:[#allocation0 + $0x8] sm:$0x1] %vm177_vm12, %v176_v50  }
  0xbc   :  { %v182_v58 = vld [vmem:[#allocation0] sm:$0x1] }
  0xbd   :  { %185 = vst [vmem:[%s379_s1] sm:$0x1] %v182_v58 }
  0xbf   :  { %v187_v57 = vld [vmem:[#allocation0 + $0x8] sm:$0x1] }
  0xc0   :  { %220 = vst [vmem:[%s379_s1 + $0x1] sm:$0x1] %v187_v57 }

// kernel: tile.18
= control target key start
LH: loop header
LB: loop body
LE: loop exit
PB: predicated region body
PF: predicated region fallthrough
CT: control target
= control target key end

     0   :  { %s28_s0 = inlined_call_operand.vmem [shape: f32[16], index: 0, kind: input, shape index: {}]   ;;  %s29_s1 = inlined_call_operand.vmem [shape: f32[10,16], index: 1, kind: output, shape index: {}]  }
   0x1   :  { %v4_v0 = vld [vmem:[%s28_s0] ss:$0 sm:$0xff] }
   0x2   :  { %5 = vst [vmem:[%s29_s1] sm:$0xff] %v4_v0 }
   0x3   :  { %8 = vst [vmem:[%s29_s1 + $0x8] sm:$0xff] %v4_v0 }

// kernel: tile.19
= control target key start
LH: loop header
LB: loop body
LE: loop exit
PB: predicated region body
PF: predicated region fallthrough
CT: control target
= control target key end

     0   :  { %s76_s10 = smov 112   ;;  %s77_s11 = smov 80   ;;  %vm4_vm0 = vcmask 130048   ;;  %vm10_vm1 = vcmask 1048448   ;;  %vm16_vm2 = vcmask 917248   ;;  %vm22_vm3 = vcmask 786048   ;;  %s123_s0 = inlined_call_operand.vmem [shape: f32[10,16], index: 0, kind: input, shape index: {}]   ;;  %s124_s1 = inlined_call_operand.vmem [shape: f32[1,160], index: 1, kind: output, shape index: {}]  }
   0x1   :  { %v61_v0 = vld [vmem:[%s123_s0 + $0x7] sm:$0x1]   ;;  %v63_v1 = vld [vmem:[%s123_s0 + $0x5] sm:$0x1]   ;;  %v65_v2 = vld [vmem:[%s123_s0 + $0x3] sm:$0x1]  }
   0x2   :  { %8 = vrot.lane.b32.xlu0 %v61_v0, %s76_s10  ;;  %20 = vrot.lane.b32.xlu1 %v63_v1, %s77_s11  ;;  %s78_s14 = smov 48   ;;  %v62_v3 = vld [vmem:[%s123_s0 + $0x6] sm:$0x1]   ;;  %v64_v4 = vld [vmem:[%s123_s0 + $0x4] sm:$0x1]   ;;  %s79_s19 = smov 96  }
   0x3   :  { %32 = vrot.lane.b32.xlu2 %v65_v2, %s78_s14  ;;  %s80_s20 = smov 64   ;;  %v66_v5 = vld [vmem:[%s123_s0 + $0x2] sm:$0x1]   ;;  %s43_s23 = smov 3  ;;  %vm28_vm4 = vcmask 654848   ;;  %vm34_vm5 = vcmask 523648  }
   0x4   :  { %s81_s24 = smov 32   ;;  %v67_v6 = vld [vmem:[%s123_s0 + $0x1] ss:$8 sm:%s43_s23]   ;;  %s82_s27 = smov 16   ;;  %vm40_vm6 = vcmask 392448   ;;  %vm47_vm7 = vcmask 261248  }
   0x5   :  { %s2_s28 = smov 3 }
   0x6   :  { %v3_v7 = vld [vmem:[%s123_s0] ss:$8 sm:%s2_s28]  }
   0x7   :  { %5 = vst.msk [vmem:[#allocation0] ss:$8 sm:$0x3] %vm4_vm0, %v3_v7  }
   0xa   :  { %14 = vrot.lane.b32.xlu0 %v62_v3, %s79_s19  ;;  %26 = vrot.lane.b32.xlu1 %v64_v4, %s80_s20 }
   0xb   :  { %38 = vrot.lane.b32.xlu2 %v66_v5, %s81_s24 }
  0x12   :  { %45 = vrot.lane.b32.xlu0 %v67_v6, %s82_s27 }
  0x5d   :  { %v33_v8 = vpop.permute.xlu2 %32  }
  0x65   :  { %v39_v9 = vpop.permute.xlu2 %38  }
  0x74   :  { %v9_v10 = vpop.permute.xlu0 %8   ;;  %v21_v11 = vpop.permute.xlu1 %20  }
  0x75   :  { %11 = vst.msk [vmem:[#allocation0] sm:$0x1] %vm10_vm1, %v9_v10  }
  0x7c   :  { %v15_v12 = vpop.permute.xlu0 %14   ;;  %v27_v13 = vpop.permute.xlu1 %26  }
  0x7d   :  { %17 = vst.msk [vmem:[#allocation0] sm:$0x1] %vm16_vm2, %v15_v12  }
  0x7e   :  { %23 = vst.msk [vmem:[#allocation0] sm:$0x1] %vm22_vm3, %v21_v11  }
  0x7f   :  { %29 = vst.msk [vmem:[#allocation0] sm:$0x1] %vm28_vm4, %v27_v13  }
  0x80   :  { %35 = vst.msk [vmem:[#allocation0] sm:$0x1] %vm34_vm5, %v33_v8  }
  0x81   :  { %41 = vst.msk [vmem:[#allocation0] sm:$0x1] %vm40_vm6, %v39_v9  }
  0x84   :  { %v46_v14 = vpop.permute.xlu0 %45  }
  0x85   :  { %48 = vst.msk [vmem:[#allocation0] ss:$8 sm:$0x3] %vm47_vm7, %v46_v14  }
  0x8c   :  { %v51_v15 = vld [vmem:[#allocation0] sm:$0x1]  ;;  %v56_v16 = vld [vmem:[#allocation0 + $0x8] sm:$0x1] }
  0x8d   :  { %54 = vst [vmem:[%s124_s1] sm:$0x1] %v51_v15 }
  0x8e   :  { %68 = vst [vmem:[%s124_s1 + $0x1] sm:$0x1] %v56_v16 }

// kernel: net_forward.1
= control target key start
LH: loop header
LB: loop body
LE: loop exit
PB: predicated region body
PF: predicated region fallthrough
CT: control target
= control target key end

     0   :  { %vm152_vm0 = vcmask 1046528   ;;  %vm218_vm1 = vcmask 785408   ;;  %vm824_vm2 = vcmask 1045504   ;;  %vm1269_vm3 = vcmask 1044480   ;;  %s8860_s14 = smov 122   ;;  %s15533_s1 = inlined_call_operand.vmem [shape: f32[5,96,168], index: 1, kind: input, shape index: {}]   ;;  %s15534_s0 = inlined_call_operand.vmem [shape: f32[8,32,96], index: 0, kind: input, shape index: {}]   ;;  %s15535_s3 = inlined_call_operand.vmem [shape: f32[5,162,160], index: 3, kind: input, shape index: {}]   ;;  %s15536_s2 = inlined_call_operand.vmem [shape: f32[1,168], index: 2, kind: input, shape index: {}]   ;;  %s15537_s4 = inlined_call_operand.vmem [shape: f32[1,160], index: 4, kind: input, shape index: {}]   ;;  %s15538_s5 = inlined_call_operand.vmem [shape: f32[5,144,120], index: 5, kind: input, shape index: {}]   ;;  %s15539_s6 = inlined_call_operand.vmem [shape: f32[1,120], index: 6, kind: input, shape index: {}]   ;;  %s15540_s8 = inlined_call_operand.vmem [shape: f32[1,84], index: 8, kind: input, shape index: {}]   ;;  %s15541_s7 = inlined_call_operand.vmem [shape: f32[120,84], index: 7, kind: input, shape index: {}]   ;;  %s15542_s9 = inlined_call_operand.vmem [shape: f32[84,10], index: 9, kind: input, shape index: {}]   ;;  %s15543_s10 = inlined_call_operand.vmem [shape: f32[1,10], index: 10, kind: input, shape index: {}]   ;;  %s15544_s11 = inlined_call_operand.vmem [shape: f32[8,10], index: 11, kind: output, shape index: {}]  }
   0x1   :  { %v7752_v0 = vld [vmem:[%s15533_s1 + $0x170] sm:$0xff]  ;;  %v7753_v1 = vld [vmem:[%s15533_s1 + $0x178] sm:$0xff]  ;;  %v7750_v2 = vld [vmem:[%s15533_s1 + $0x160] sm:$0xff]  ;;  %vm1714_vm4 = vcmask 1043456   ;;  %vm3325_vm5 = vcmask 1041408   ;;  %vm2786_vm6 = vcmask 998400  }
   0x2   :  { %287 = vmatpush.msra.mxu0 %v7752_v0  ;;  %8724 = vmatpush.msra.mxu3 %v7752_v0  ;;  %v7751_v3 = vld [vmem:[%s15533_s1 + $0x168] sm:$0xff]  ;;  %v7748_v4 = vld [vmem:[%s15533_s1 + $0x150] sm:$0xff]  ;;  %v7749_v5 = vld [vmem:[%s15533_s1 + $0x158] sm:$0xff]  ;;  %vm3260_vm7 = vcmask 277504   ;;  %vm7179_vm8 = vcmask 1041409   ;;  %vm7182_vm9 = vcmask 1042434  }
   0x3   :  { %400 = vmatpush.msra.mxu1 %v7753_v1  ;;  %8736 = vmatpush.msra.mxu2 %v7753_v1  ;;  %v7746_v6 = vld [vmem:[%s15533_s1 + $0x140] sm:$0xff]  ;;  %v7747_v7 = vld [vmem:[%s15533_s1 + $0x148] sm:$0xff]  ;;  %v7744_v8 = vld [vmem:[%s15533_s1 + $0x130] sm:$0xff]  ;;  %vm7185_vm10 = vcmask 1043459   ;;  %vm7187_vm11 = vcmask 1044484   ;;  %vm7190_vm12 = vcmask 1045509  }
   0x4   :  { %288 = vmatpush.msra.mxu0 %v7750_v2  ;;  %8725 = vmatpush.msra.mxu3 %v7750_v2  ;;  %v7745_v9 = vld [vmem:[%s15533_s1 + $0x138] sm:$0xff]  ;;  %v7742_v10 = vld [vmem:[%s15533_s1 + $0x120] sm:$0xff]  ;;  %v7743_v11 = vld [vmem:[%s15533_s1 + $0x128] sm:$0xff]  ;;  %vm7193_vm13 = vcmask 1046534   ;;  %vm7196_vm14 = vcmask 1047559   ;;  %vm7213_vm15 = vcmask 130048  }
   0x5   :  { %401 = vmatpush.msra.mxu1 %v7751_v3  ;;  %8737 = vmatpush.msra.mxu2 %v7751_v3  ;;  %v7740_v12 = vld [vmem:[%s15533_s1 + $0x110] sm:$0xff]  ;;  %v7741_v13 = vld [vmem:[%s15533_s1 + $0x118] sm:$0xff]  ;;  %v7738_v14 = vld [vmem:[%s15533_s1 + $0x100] sm:$0xff] }
   0x6   :  { %289 = vmatpush.msra.mxu0 %v7748_v4  ;;  %8726 = vmatpush.msra.mxu3 %v7748_v4  ;;  %v7739_v15 = vld [vmem:[%s15533_s1 + $0x108] sm:$0xff]  ;;  %v7736_v16 = vld [vmem:[%s15533_s1 + $0xf0] sm:$0xff]  ;;  %v7737_v17 = vld [vmem:[%s15533_s1 + $0xf8] sm:$0xff] }
   0x7   :  { %402 = vmatpush.msra.mxu1 %v7749_v5  ;;  %8738 = vmatpush.msra.mxu2 %v7749_v5  ;;  %v8979_v18 = vld [vmem:[%s15534_s0] sm:$0xff]  ;;  %v8984_v19 = vld [vmem:[%s15534_s0 + $0x8] sm:$0xff]  ;;  %v7732_v24 = vld [vmem:[%s15533_s1 + $0xd0] sm:$0xff] }
   0x8   :  { %290 = vmatpush.msra.mxu0 %v7746_v6  ;;  %8727 = vmatpush.msra.mxu3 %v7746_v6  ;;  %v8989_v20 = vld [vmem:[%s15534_s0 + $0xc0] sm:$0xff]  ;;  %v8994_v21 = vld [vmem:[%s15534_s0 + $0xc8] sm:$0xff]  ;;  %v153_v25 = vrot.slane %v8979_v18, 1  ;;  %v154_v26 = vrot.slane %v8984_v19, 1  ;;  %v7733_v29 = vld [vmem:[%s15533_s1 + $0xd8] sm:$0xff] }
   0x9   :  { %403 = vmatpush.msra.mxu1 %v7747_v7  ;;  %8739 = vmatpush.msra.mxu2 %v7747_v7  ;;  %v7734_v22 = vld [vmem:[%s15533_s1 + $0xe0] sm:$0xff]  ;;  %v7735_v23 = vld [vmem:[%s15533_s1 + $0xe8] sm:$0xff]  ;;  %v15547_v27 = vrot.slane %v8989_v20, 1  ;;  %v202_v28 = vrot.slane %v8994_v21, 1  ;;  %v9025_v34 = vld [vmem:[%s15534_s0 + $0x10] sm:$0xff] }
   0xa   :  { %291 = vmatpush.msra.mxu0 %v7744_v8  ;;  %8728 = vmatpush.msra.mxu3 %v7744_v8  ;;  %v7730_v30 = vld [vmem:[%s15533_s1 + $0xc0] sm:$0xff]  ;;  %v7731_v31 = vld [vmem:[%s15533_s1 + $0xc8] sm:$0xff]  ;;  %v155_v32 = vsel %vm152_vm0, %v153_v25, %v154_v26  ;;  %v9030_v35 = vld [vmem:[%s15534_s0 + $0xd0] sm:$0xff]  ;;  %v156_v38 = vrot.slane %v9025_v34, 1 }
   0xb   :  { %404 = vmatpush.msra.mxu1 %v7745_v9  ;;  %8740 = vmatpush.msra.mxu2 %v7745_v9  ;;  %v203_v33 = vsel %vm152_vm0, %v15547_v27, %v202_v28  ;;  %v7904_v36 = vld [vmem:[%s15533_s1 + $0x230] sm:$0xff]  ;;  %v7905_v37 = vld [vmem:[%s15533_s1 + $0x238] sm:$0xff]  ;;  %v204_v39 = vrot.slane %v9030_v35, 1  ;;  %v7902_v40 = vld [vmem:[%s15533_s1 + $0x220] sm:$0xff] }
   0xc   :  { %292 = vmatpush.msra.mxu0 %v7742_v10  ;;  %8729 = vmatpush.msra.mxu3 %v7742_v10  ;;  %v7903_v41 = vld [vmem:[%s15533_s1 + $0x228] sm:$0xff]  ;;  %v7900_v42 = vld [vmem:[%s15533_s1 + $0x210] sm:$0xff]  ;;  %v157_v43 = vsel %vm152_vm0, %v154_v26, %v156_v38  ;;  %v9058_v45 = vld [vmem:[%s15534_s0 + $0x18] sm:$0xff] }
   0xd   :  { %405 = vmatpush.msra.mxu1 %v7743_v11  ;;  %8741 = vmatpush.msra.mxu2 %v7743_v11  ;;  %v205_v44 = vsel %vm152_vm0, %v202_v28, %v204_v39  ;;  %v9063_v46 = vld [vmem:[%s15534_s0 + $0xd8] sm:$0xff]  ;;  %v158_v47 = vrot.slane %v9058_v45, 1  ;;  %v92_v49 = vld [vmem:[%s15533_s1 + $0xb0] sm:$0xff]  ;;  %v90_v52 = vld [vmem:[%s15533_s1 + $0xa0] sm:$0xff] }
   0xe   :  { %293 = vmatpush.msra.mxu0 %v7740_v12  ;;  %8730 = vmatpush.msra.mxu3 %v7740_v12  ;;  %v206_v48 = vrot.slane %v9063_v46, 1  ;;  %v93_v50 = vld [vmem:[%s15533_s1 + $0xb8] sm:$0xff]  ;;  %v91_v53 = vld [vmem:[%s15533_s1 + $0xa8] sm:$0xff]  ;;  %v88_v54 = vld [vmem:[%s15533_s1 + $0x90] sm:$0xff] }
   0xf   :  { %406 = vmatpush.msra.mxu1 %v7741_v13  ;;  %8742 = vmatpush.msra.mxu2 %v7741_v13  ;;  %v7901_v51 = vld [vmem:[%s15533_s1 + $0x218] sm:$0xff]  ;;  %v159_v56 = vsel %vm152_vm0, %v156_v38, %v158_v47  ;;  %v9097_v58 = vld [vmem:[%s15534_s0 + $0x20] sm:$0xff]  ;;  %v87_v61 = vld [vmem:[%s15533_s1 + $0x88] sm:$0xff] }
  0x10   :  { %294 = vmatpush.msra.mxu0 %v7738_v14  ;;  %8731 = vmatpush.msra.mxu3 %v7738_v14  ;;  %v89_v55 = vld [vmem:[%s15533_s1 + $0x98] sm:$0xff]  ;;  %v207_v57 = vsel %vm152_vm0, %v204_v39, %v206_v48  ;;  %v9102_v59 = vld [vmem:[%s15534_s0 + $0xe0] sm:$0xff]  ;;  %v160_v62 = vrot.slane %v9097_v58, 1  ;;  %v84_v1 = vld [vmem:[%s15533_s1 + $0x70] sm:$0xff] }
  0x11   :  { %407 = vmatpush.msra.mxu1 %v7739_v15  ;;  %8743 = vmatpush.msra.mxu2 %v7739_v15  ;;  %v86_v60 = vld [vmem:[%s15533_s1 + $0x80] sm:$0xff]  ;;  %v208_v63 = vrot.slane %v9102_v59, 1  ;;  %v85_v2 = vld [vmem:[%s15533_s1 + $0x78] sm:$0xff]  ;;  %v83_v4 = vld [vmem:[%s15533_s1 + $0x68] sm:$0xff] }
  0x12   :  { %295 = vmatpush.msra.mxu0 %v7736_v16  ;;  %8732 = vmatpush.msra.mxu3 %v7736_v16  ;;  %v7898_v0 = vld [vmem:[%s15533_s1 + $0x200] sm:$0xff]  ;;  %v161_v5 = vsel %vm152_vm0, %v158_v47, %v160_v62  ;;  %v9136_v7 = vld [vmem:[%s15534_s0 + $0x28] sm:$0xff]  ;;  %v80_v9 = vld [vmem:[%s15533_s1 + $0x50] sm:$0xff] }
  0x13   :  { %408 = vmatpush.msra.mxu1 %v7737_v17  ;;  %8744 = vmatpush.msra.mxu2 %v7737_v17  ;;  %v82_v3 = vld [vmem:[%s15533_s1 + $0x60] sm:$0xff]  ;;  %v209_v6 = vsel %vm152_vm0, %v206_v48, %v208_v63  ;;  %v9141_v8 = vld [vmem:[%s15534_s0 + $0xe8] sm:$0xff]  ;;  %v81_v10 = vld [vmem:[%s15533_s1 + $0x58] sm:$0xff]  ;;  %v162_v11 = vrot.slane %v9136_v7, 1 }
  0x14   :  { %296 = vmatpush.msra.mxu0 %v7734_v22  ;;  %8733 = vmatpush.msra.mxu3 %v7734_v22  ;;  %v210_v12 = vrot.slane %v9141_v8, 1  ;;  %v78_v13 = vld [vmem:[%s15533_s1 + $0x40] sm:$0xff]  ;;  %v79_v14 = vld [vmem:[%s15533_s1 + $0x48] sm:$0xff]  ;;  %v76_v16 = vld [vmem:[%s15533_s1 + $0x30] sm:$0xff] }
  0x15   :  { %409 = vmatpush.msra.mxu1 %v7735_v23  ;;  %8745 = vmatpush.msra.mxu2 %v7735_v23  ;;  %v7899_v15 = vld [vmem:[%s15533_s1 + $0x208] sm:$0xff]  ;;  %v77_v17 = vld [vmem:[%s15533_s1 + $0x38] sm:$0xff]  ;;  %v163_v22 = vsel %vm152_vm0, %v160_v62, %v162_v11  ;;  %v9180_v25 = vld [vmem:[%s15534_s0 + $0xf0] sm:$0xff] }
  0x16   :  { %297 = vmatpush.msra.mxu0 %v7732_v24  ;;  %8734 = vmatpush.msra.mxu3 %v7732_v24  ;;  %v211_v23 = vsel %vm152_vm0, %v208_v63, %v210_v12  ;;  %v9175_v24 = vld [vmem:[%s15534_s0 + $0x30] sm:$0xff]  ;;  %v74_v26 = vld [vmem:[%s15533_s1 + $0x20] sm:$0xff]  ;;  %v75_v28 = vld [vmem:[%s15533_s1 + $0x28] sm:$0xff] }
  0x17   :  { %410 = vmatpush.msra.mxu1 %v7733_v29  ;;  %8746 = vmatpush.msra.mxu2 %v7733_v29  ;;  %v164_v29 = vrot.slane %v9175_v24, 1  ;;  %v9268_v62 = vld [vmem:[%s15534_s0 + $0x50] sm:$0xff] }
  0x18   :  { %298 = vmatpush.msra.mxu0 %v7730_v30  ;;  %8735 = vmatpush.msra.mxu3 %v7730_v30  ;;  %v212_v30 = vrot.slane %v9180_v25, 1  ;;  %v172_v63 = vrot.slane %v9268_v62, 1 }
  0x19   :  { %411 = vmatpush.msra.mxu1 %v7731_v31  ;;  %8747 = vmatpush.msra.mxu2 %v7731_v31  ;;  %v72_v31 = vld [vmem:[%s15533_s1 + $0x10] sm:$0xff]  ;;  %v165_v38 = vsel %vm152_vm0, %v162_v11, %v164_v29 }
  0x1a   :  { %7754 = vmatmul.msk.f32.vlgmr.msra.gmra.mxu0 %vm218_vm1, %v155_v32  ;;  %7778 = vmatmul.msk.f32.vlgmr.msra.gmra.mxu3 %vm218_vm1, %v203_v33  ;;  %v213_v39 = vsel %vm152_vm0, %v210_v12, %v212_v30  ;;  %v9316_v12 = vld [vmem:[%s15534_s0 + $0x68] sm:$0xff] }
  0x1b   :  { %7786 = vmatmul.msk.f32.vlgmr.msra.gmra.mxu1 %vm218_vm1, %v155_v32  ;;  %7810 = vmatmul.msk.f32.vlgmr.msra.gmra.mxu2 %vm218_vm1, %v203_v33  ;;  %v73_v32 = vld [vmem:[%s15533_s1 + $0x18] sm:$0xff]  ;;  %v7896_v33 = vld [vmem:[%s15533_s1 + $0x1f0] sm:$0xff] }
  0x1c   :  { %958 = vmatpush.msrb.mxu0 %v7904_v36  ;;  %1071 = vmatpush.msrb.mxu1 %v7905_v37  ;;  %v70_v36 = vld [vmem:[%s15533_s1] sm:$0xff]  ;;  %v71_v37 = vld [vmem:[%s15533_s1 + $0x8] sm:$0xff] }
  0x1d   :  { %577 = vmatpush.msrb.mxu2 %v92_v49  ;;  %690 = vmatpush.msrb.mxu3 %v93_v50  ;;  %v9235_v49 = vld [vmem:[%s15534_s0 + $0x40] sm:$0xff] }
  0x1e   :  { %959 = vmatpush.msrb.mxu0 %v7902_v40  ;;  %1072 = vmatpush.msrb.mxu1 %v7903_v41  ;;  %v9214_v40 = vld [vmem:[%s15534_s0 + $0x38] sm:$0xff]  ;;  %v168_v50 = vrot.slane %v9235_v49, 1 }
  0x1f   :  { %578 = vmatpush.msrb.mxu2 %v90_v52  ;;  %691 = vmatpush.msrb.mxu3 %v91_v53  ;;  %v9219_v41 = vld [vmem:[%s15534_s0 + $0xf8] sm:$0xff]  ;;  %v7894_v53 = vld [vmem:[%s15533_s1 + $0x1e0] sm:$0xff] }
  0x20   :  { %960 = vmatpush.msrb.mxu0 %v7900_v42  ;;  %1073 = vmatpush.msrb.mxu1 %v7901_v51  ;;  %v166_v42 = vrot.slane %v9214_v40, 1  ;;  %v15545_v51 = vmov 0.0  }
  0x21   :  { %579 = vmatpush.msrb.mxu2 %v88_v54  ;;  %692 = vmatpush.msrb.mxu3 %v89_v55  ;;  %v9243_v52 = vrot.slane %v15545_v51, 1 }
  0x22   :  { %7755 = vmatmul.msk.f32.gmra.mxu0 %vm218_vm1, %v157_v43  ;;  %7779 = vmatmul.msk.f32.gmra.mxu3 %vm218_vm1, %v205_v44  ;;  %v167_v47 = vsel %vm152_vm0, %v164_v29, %v166_v42  ;;  %v169_v54 = vsel %vm152_vm0, %v166_v42, %v168_v50  ;;  %v7889_v29 = vld [vmem:[%s15533_s1 + $0x1b8] sm:$0xff] }
  0x23   :  { %7787 = vmatmul.msk.f32.gmra.mxu1 %vm218_vm1, %v157_v43  ;;  %7811 = vmatmul.msk.f32.gmra.mxu2 %vm218_vm1, %v205_v44  ;;  %v214_v43 = vrot.slane %v9219_v41, 1  ;;  %v7897_v44 = vld [vmem:[%s15533_s1 + $0x1f8] sm:$0xff]  ;;  %15745 = vst [vmem:[#allocation2_spill] sm:$0xff] %v9243_v52 }
  0x24   :  { %580 = vmatpush.msrb.mxu2 %v86_v60  ;;  %693 = vmatpush.msrb.mxu3 %v87_v61  ;;  %v7895_v60 = vld [vmem:[%s15533_s1 + $0x1e8] sm:$0xff] }
  0x25   :  { %961 = vmatpush.msrb.mxu0 %v7898_v0  ;;  %1074 = vmatpush.msrb.mxu1 %v7899_v15  ;;  %v215_v48 = vsel %vm152_vm0, %v212_v30, %v214_v43  ;;  %v217_v55 = vsel %vm152_vm0, %v214_v43, %v9243_v52  ;;  %v7892_v0 = vld [vmem:[%s15533_s1 + $0x1d0] sm:$0xff] }
  0x26   :  { %581 = vmatpush.msrb.mxu2 %v84_v1  ;;  %694 = vmatpush.msrb.mxu3 %v85_v2  ;;  %v9284_v2 = vld [vmem:[%s15534_s0 + $0x58] sm:$0xff] }
  0x27   :  { %962 = vmatpush.msrb.mxu0 %v7896_v33  ;;  %1075 = vmatpush.msrb.mxu1 %v7897_v44  ;;  %v7886_v33 = vld [vmem:[%s15533_s1 + $0x1a0] sm:$0xff] }
  0x28   :  { %582 = vmatpush.msrb.mxu2 %v82_v3  ;;  %695 = vmatpush.msrb.mxu3 %v83_v4  ;;  %v174_v3 = vrot.slane %v9284_v2, 1  ;;  %v7893_v4 = vld [vmem:[%s15533_s1 + $0x1d8] sm:$0xff] }
  0x29   :  { %963 = vmatpush.msrb.mxu0 %v7894_v53  ;;  %1076 = vmatpush.msrb.mxu1 %v7895_v60 }
  0x2a   :  { %7756 = vmatmul.msk.f32.gmra.mxu0 %vm218_vm1, %v159_v56  ;;  %7780 = vmatmul.msk.f32.gmra.mxu3 %vm218_vm1, %v207_v57 }
  0x2b   :  { %7788 = vmatmul.msk.f32.gmra.mxu1 %vm218_vm1, %v159_v56  ;;  %7812 = vmatmul.msk.f32.gmra.mxu2 %vm218_vm1, %v207_v57  ;;  %v9254_v56 = vld [vmem:[%s15534_s0 + $0x48] sm:$0xff] }
  0x2c   :  { %583 = vmatpush.msrb.mxu2 %v80_v9  ;;  %696 = vmatpush.msrb.mxu3 %v81_v10  ;;  %v170_v57 = vrot.slane %v9254_v56, 1  ;;  %v7890_v10 = vld [vmem:[%s15533_s1 + $0x1c0] sm:$0xff] }
  0x2d   :  { %964 = vmatpush.msrb.mxu0 %v7892_v0  ;;  %1077 = vmatpush.msrb.mxu1 %v7893_v4  ;;  %v7885_v0 = vld [vmem:[%s15533_s1 + $0x198] sm:$0xff] }
  0x2e   :  { %584 = vmatpush.msrb.mxu2 %v78_v13  ;;  %697 = vmatpush.msrb.mxu3 %v79_v14  ;;  %v171_v61 = vsel %vm152_vm0, %v168_v50, %v170_v57  ;;  %v173_v1 = vsel %vm152_vm0, %v170_v57, %v172_v63  ;;  %v178_v13 = vrot.slane %v9316_v12, 1  ;;  %v7891_v14 = vld [vmem:[%s15533_s1 + $0x1c8] sm:$0xff]  ;;  %v7884_v50 = vld [vmem:[%s15533_s1 + $0x190] sm:$0xff] }
  0x2f   :  { %965 = vmatpush.msrb.mxu0 %v7890_v10  ;;  %1078 = vmatpush.msrb.mxu1 %v7891_v14  ;;  %v9448_v10 = vld [vmem:[%s15534_s0 + $0xa0] sm:$0xff] }
  0x30   :  { %585 = vmatpush.msrb.mxu2 %v76_v16  ;;  %698 = vmatpush.msrb.mxu3 %v77_v17  ;;  %v9332_v16 = vld [vmem:[%s15534_s0 + $0x70] sm:$0xff] }
  0x31   :  { %v180_v17 = vrot.slane %v9332_v16, 1  ;;  %1079 = vmatpush.msrb.mxu1 %v7889_v29 }
  0x32   :  { %7757 = vmatmul.msk.f32.gmra.mxu0 %vm218_vm1, %v161_v5  ;;  %7781 = vmatmul.msk.f32.gmra.mxu3 %vm218_vm1, %v209_v6 }
  0x33   :  { %7789 = vmatmul.msk.f32.gmra.mxu1 %vm218_vm1, %v161_v5  ;;  %7813 = vmatmul.msk.f32.gmra.mxu2 %vm218_vm1, %v209_v6  ;;  %v175_v5 = vsel %vm152_vm0, %v172_v63, %v174_v3  ;;  %v9300_v6 = vld [vmem:[%s15534_s0 + $0x60] sm:$0xff] }
  0x34   :  { %586 = vmatpush.msrb.mxu2 %v74_v26  ;;  %699 = vmatpush.msrb.mxu3 %v75_v28  ;;  %v176_v9 = vrot.slane %v9300_v6, 1  ;;  %v9348_v26 = vld [vmem:[%s15534_s0 + $0x78] sm:$0xff] }
  0x35   :  { %v182_v28 = vrot.slane %v9348_v26, 1 }
  0x36   :  { %587 = vmatpush.msrb.mxu2 %v72_v31  ;;  %700 = vmatpush.msrb.mxu3 %v73_v32  ;;  %v177_v11 = vsel %vm152_vm0, %v174_v3, %v176_v9  ;;  %v179_v15 = vsel %vm152_vm0, %v176_v9, %v178_v13  ;;  %v9364_v31 = vld [vmem:[%s15534_s0 + $0x80] sm:$0xff] }
  0x37   :  { %v183_v30 = vsel %vm152_vm0, %v180_v17, %v182_v28  ;;  %v184_v32 = vrot.slane %v9364_v31, 1 }
  0x38   :  { %588 = vmatpush.msrb.mxu2 %v70_v36  ;;  %701 = vmatpush.msrb.mxu3 %v71_v37  ;;  %v9380_v37 = vld [vmem:[%s15534_s0 + $0x88] sm:$0xff] }
  0x39   :  { %v185_v36 = vsel %vm152_vm0, %v182_v28, %v184_v32  ;;  %v9472_v28 = vld [vmem:[%s15534_s0 + $0xa8] sm:$0xff] }
  0x3a   :  { %7758 = vmatmul.msk.f32.gmra.mxu0 %vm218_vm1, %v163_v22  ;;  %7782 = vmatmul.msk.f32.gmra.mxu3 %vm218_vm1, %v211_v23  ;;  %v194_v29 = vrot.slane %v9472_v28, 1 }
  0x3b   :  { %7790 = vmatmul.msk.f32.gmra.mxu1 %vm218_vm1, %v163_v22  ;;  %7814 = vmatmul.msk.f32.gmra.mxu2 %vm218_vm1, %v211_v23  ;;  %v7888_v22 = vld [vmem:[%s15533_s1 + $0x1b0] sm:$0xff]  ;;  %v181_v23 = vsel %vm152_vm0, %v178_v13, %v180_v17  ;;  %v7882_v13 = vld [vmem:[%s15533_s1 + $0x180] sm:$0xff] }
  0x3c   :  { %966 = vmatpush.msrb.mxu0 %v7888_v22 }
  0x3e   :  { %967 = vmatpush.msrb.mxu0 %v7886_v33 }
  0x40   :  { %968 = vmatpush.msrb.mxu0 %v7884_v50 }
  0x42   :  { %7759 = vmatmul.msk.f32.gmra.mxu0 %vm218_vm1, %v165_v38  ;;  %7783 = vmatmul.msk.f32.gmra.mxu3 %vm218_vm1, %v213_v39 }
  0x43   :  { %7791 = vmatmul.msk.f32.gmra.mxu1 %vm218_vm1, %v165_v38  ;;  %7815 = vmatmul.msk.f32.gmra.mxu2 %vm218_vm1, %v213_v39  ;;  %v186_v38 = vrot.slane %v9380_v37, 1  ;;  %v7887_v39 = vld [vmem:[%s15533_s1 + $0x1a8] sm:$0xff] }
  0x44   :  { %1080 = vmatpush.msrb.mxu1 %v7887_v39  ;;  %969 = vmatpush.msrb.mxu0 %v7882_v13 }
  0x45   :  { %v187_v43 = vsel %vm152_vm0, %v184_v32, %v186_v38  ;;  %v7883_v32 = vld [vmem:[%s15533_s1 + $0x188] sm:$0xff] }
  0x46   :  { %1081 = vmatpush.msrb.mxu1 %v7885_v0 }
  0x48   :  { %1082 = vmatpush.msrb.mxu1 %v7883_v32 }
  0x4a   :  { %7760 = vmatmul.msk.f32.gmra.mxu0 %vm218_vm1, %v167_v47  ;;  %7784 = vmatmul.msk.f32.gmra.mxu3 %vm218_vm1, %v215_v48 }
  0x4b   :  { %7792 = vmatmul.msk.f32.gmra.mxu1 %vm218_vm1, %v167_v47  ;;  %7816 = vmatmul.msk.f32.gmra.mxu2 %vm218_vm1, %v215_v48  ;;  %v9400_v47 = vld [vmem:[%s15534_s0 + $0x90] sm:$0xff] }
  0x4c   :  { %v188_v48 = vrot.slane %v9400_v47, 1 }
  0x4e   :  { %v189_v57 = vsel %vm152_vm0, %v186_v38, %v188_v48 }
  0x52   :  { %7761 = vmatmul.msk.f32.gmra.mxu0 %vm218_vm1, %v169_v54  ;;  %7785 = vmatmul.msk.f32.gmra.mxu3 %vm218_vm1, %v217_v55 }
  0x53   :  { %7793 = vmatmul.msk.f32.gmra.mxu1 %vm218_vm1, %v169_v54  ;;  %7817 = vmatmul.msk.f32.gmra.mxu2 %vm218_vm1, %v217_v55 }
  0x5a   :  { %7762 = vmatmul.msk.f32.gmra.mxu0 %vm218_vm1, %v171_v61  ;;  %7850 = vmatmul.msk.f32.vlgmr.msrb.gmra.mxu3 %vm218_vm1, %v8979_v18 }
  0x5b   :  { %7794 = vmatmul.msk.f32.gmra.mxu1 %vm218_vm1, %v171_v61  ;;  %7818 = vmatmul.msk.f32.vlgmr.msrb.gmra.mxu2 %vm218_vm1, %v8979_v18  ;;  %v9424_v61 = vld [vmem:[%s15534_s0 + $0x98] sm:$0xff] }
  0x5c   :  { %v190_v63 = vrot.slane %v9424_v61, 1 }
  0x62   :  { %7763 = vmatmul.msk.f32.gmra.mxu0 %vm218_vm1, %v173_v1  ;;  %7851 = vmatmul.msk.f32.gmra.mxu3 %vm218_vm1, %v8984_v19 }
  0x63   :  { %7795 = vmatmul.msk.f32.gmra.mxu1 %vm218_vm1, %v173_v1  ;;  %7819 = vmatmul.msk.f32.gmra.mxu2 %vm218_vm1, %v8984_v19 }
  0x6a   :  { %7764 = vmatmul.msk.f32.gmra.mxu0 %vm218_vm1, %v175_v5  ;;  %7852 = vmatmul.msk.f32.gmra.mxu3 %vm218_vm1, %v9025_v34 }
  0x6b   :  { %7796 = vmatmul.msk.f32.gmra.mxu1 %vm218_vm1, %v175_v5  ;;  %7820 = vmatmul.msk.f32.gmra.mxu2 %vm218_vm1, %v9025_v34  ;;  %v191_v5 = vsel %vm152_vm0, %v188_v48, %v190_v63  ;;  %v9499_v48 = vld [vmem:[%s15534_s0 + $0xb0] sm:$0xff] }
  0x6c   :  { %v196_v50 = vrot.slane %v9499_v48, 1 }
  0x6e   :  { %v197_v13 = vsel %vm152_vm0, %v194_v29, %v196_v50 }
  0x72   :  { %7765 = vmatmul.msk.f32.gmra.mxu0 %vm218_vm1, %v177_v11  ;;  %7853 = vmatmul.msk.f32.gmra.mxu3 %vm218_vm1, %v9058_v45 }
  0x73   :  { %7797 = vmatmul.msk.f32.gmra.mxu1 %vm218_vm1, %v177_v11  ;;  %7821 = vmatmul.msk.f32.gmra.mxu2 %vm218_vm1, %v9058_v45  ;;  %v192_v11 = vrot.slane %v9448_v10, 1 }
  0x75   :  { %v193_v22 = vsel %vm152_vm0, %v190_v63, %v192_v11  ;;  %v195_v39 = vsel %vm152_vm0, %v192_v11, %v194_v29  ;;  %v7993_v63 = vld [vmem:[%s15533_s1 + $0x2f8] sm:$0xff] }
  0x76   :  { %1516 = vmatpush.msra.mxu3 %v7993_v63  ;;  %v8081_v29 = vld [vmem:[%s15533_s1 + $0x3b8] sm:$0xff] }
  0x77   :  { %1961 = vmatpush.msra.mxu1 %v8081_v29 }
  0x7a   :  { %7766 = vmatmul.msk.f32.gmra.mxu0 %vm218_vm1, %v179_v15  ;;  %7854 = vmatmul.msk.f32.gmra.mxu3 %vm218_vm1, %v9097_v58 }
  0x7b   :  { %7798 = vmatmul.msk.f32.gmra.mxu1 %vm218_vm1, %v179_v15  ;;  %7822 = vmatmul.msk.f32.gmra.mxu2 %vm218_vm1, %v9097_v58 }
  0x82   :  { %7767 = vmatmul.msk.f32.gmra.mxu0 %vm218_vm1, %v181_v23  ;;  %7855 = vmatmul.msk.f32.gmra.mxu3 %vm218_vm1, %v9136_v7 }
  0x83   :  { %7799 = vmatmul.msk.f32.gmra.mxu1 %vm218_vm1, %v181_v23  ;;  %7823 = vmatmul.msk.f32.gmra.mxu2 %vm218_vm1, %v9136_v7 }
  0x8a   :  { %7768 = vmatmul.msk.f32.gmra.mxu0 %vm218_vm1, %v183_v30  ;;  %7856 = vmatmul.msk.f32.gmra.mxu3 %vm218_vm1, %v9175_v24 }
  0x8b   :  { %7800 = vmatmul.msk.f32.gmra.mxu1 %vm218_vm1, %v183_v30  ;;  %7824 = vmatmul.msk.f32.gmra.mxu2 %vm218_vm1, %v9175_v24  ;;  %v7992_v30 = vld [vmem:[%s15533_s1 + $0x2f0] sm:$0xff] }
  0x8c   :  { %1403 = vmatpush.msra.mxu2 %v7992_v30  ;;  %v9526_v30 = vld [vmem:[%s15534_s0 + $0xb8] sm:$0xff] }
  0x8d   :  { %v198_v32 = vrot.slane %v9526_v30, 1 }
  0x8f   :  { %v199_v51 = vsel %vm152_vm0, %v196_v50, %v198_v32 }
  0x92   :  { %7769 = vmatmul.msk.f32.gmra.mxu0 %vm218_vm1, %v185_v36  ;;  %7857 = vmatmul.msk.f32.gmra.mxu3 %vm218_vm1, %v9214_v40 }
  0x93   :  { %7801 = vmatmul.msk.f32.gmra.mxu1 %vm218_vm1, %v185_v36  ;;  %7825 = vmatmul.msk.f32.gmra.mxu2 %vm218_vm1, %v9214_v40 }
  0x97   :  { %v9392_v42 = vpop.f32.mrf.mxu0 }
  0x98   :  { %v9395_v44 = vpop.f32.mrf.mxu1 }
  0x9a   :  { %7770 = vmatmul.msk.f32.gmra.mxu0 %vm218_vm1, %v187_v43  ;;  %7858 = vmatmul.msk.f32.gmra.mxu3 %vm218_vm1, %v9235_v49 }
  0x9b   :  { %7802 = vmatmul.msk.f32.gmra.mxu1 %vm218_vm1, %v187_v43  ;;  %7826 = vmatmul.msk.f32.gmra.mxu2 %vm218_vm1, %v9235_v49 }
  0x9d   :  { %v9412_v53 = vpop.f32.mrf.mxu3 }
  0x9e   :  { %15746 = vst [vmem:[#allocation3_spill] sm:$0xff] %v9412_v53  ;;  %v9414_v54 = vpop.f32.mrf.mxu2 }
  0x9f   :  { %15747 = vst [vmem:[#allocation4_spill] sm:$0xff] %v9414_v54  ;;  %v9416_v55 = vpop.f32.mrf.mxu0 }
  0xa0   :  { %v9419_v60 = vpop.f32.mrf.mxu1 }
  0xa2   :  { %7771 = vmatmul.msk.f32.gmra.mxu0 %vm218_vm1, %v189_v57  ;;  %7859 = vmatmul.msk.f32.gmra.mxu3 %vm218_vm1, %v9254_v56 }
  0xa3   :  { %7803 = vmatmul.msk.f32.gmra.mxu1 %vm218_vm1, %v189_v57  ;;  %7827 = vmatmul.msk.f32.gmra.mxu2 %vm218_vm1, %v9254_v56  ;;  %v8080_v57 = vld [vmem:[%s15533_s1 + $0x3b0] sm:$0xff] }
  0xa4   :  { %1848 = vmatpush.msra.mxu0 %v8080_v57 }
  0xa5   :  { %v9436_v1 = vpop.f32.mrf.mxu3 }
  0xa6   :  { %15748 = vst [vmem:[#allocation5_spill] sm:$0xff] %v9436_v1  ;;  %v9438_v3 = vpop.f32.mrf.mxu2 }
  0xa7   :  { %15749 = vst [vmem:[#allocation6_spill] sm:$0xff] %v9438_v3  ;;  %v9440_v4 = vpop.f32.mrf.mxu0 }
  0xa8   :  { %v9443_v9 = vpop.f32.mrf.mxu1 }
  0xaa   :  { %7772 = vmatmul.msk.f32.gmra.mxu0 %vm218_vm1, %v191_v5  ;;  %7860 = vmatmul.msk.f32.gmra.mxu3 %vm218_vm1, %v9268_v62 }
  0xab   :  { %7804 = vmatmul.msk.f32.gmra.mxu1 %vm218_vm1, %v191_v5  ;;  %7828 = vmatmul.msk.f32.gmra.mxu2 %vm218_vm1, %v9268_v62 }
  0xad   :  { %v9460_v14 = vpop.f32.mrf.mxu3 }
  0xae   :  { %15750 = vst [vmem:[#allocation7_spill] sm:$0xff] %v9460_v14  ;;  %v9462_v15 = vpop.f32.mrf.mxu2 }
  0xaf   :  { %15751 = vst [vmem:[#allocation8_spill] sm:$0xff] %v9462_v15  ;;  %v9464_v17 = vpop.f32.mrf.mxu0  ;;  %v8076_v15 = vld [vmem:[%s15533_s1 + $0x390] sm:$0xff] }
  0xb0   :  { %v9467_v23 = vpop.f32.mrf.mxu1 }
  0xb2   :  { %7773 = vmatmul.msk.f32.gmra.mxu0 %vm218_vm1, %v193_v22  ;;  %7861 = vmatmul.msk.f32.gmra.mxu3 %vm218_vm1, %v9284_v2 }
  0xb3   :  { %7805 = vmatmul.msk.f32.gmra.mxu1 %vm218_vm1, %v193_v22  ;;  %7829 = vmatmul.msk.f32.gmra.mxu2 %vm218_vm1, %v9284_v2 }
  0xb5   :  { %v9487_v33 = vpop.f32.mrf.mxu3 }
  0xb6   :  { %15752 = vst [vmem:[#allocation9_spill] sm:$0xff] %v9487_v33  ;;  %v9489_v36 = vpop.f32.mrf.mxu2 }
  0xb7   :  { %15753 = vst [vmem:[#allocation10_spill] sm:$0xff] %v9489_v36  ;;  %v9491_v38 = vpop.f32.mrf.mxu0 }
  0xb8   :  { %v9494_v43 = vpop.f32.mrf.mxu1 }
  0xba   :  { %7774 = vmatmul.msk.f32.gmra.mxu0 %vm218_vm1, %v195_v39  ;;  %7862 = vmatmul.msk.f32.gmra.mxu3 %vm218_vm1, %v9300_v6 }
  0xbb   :  { %7806 = vmatmul.msk.f32.gmra.mxu1 %vm218_vm1, %v195_v39  ;;  %7830 = vmatmul.msk.f32.gmra.mxu2 %vm218_vm1, %v9300_v6 }
  0xbd   :  { %v9514_v0 = vpop.f32.mrf.mxu3 }
  0xbe   :  { %15754 = vst [vmem:[#allocation11_spill] sm:$0xff] %v9514_v0  ;;  %v9516_v5 = vpop.f32.mrf.mxu2 }
  0xbf   :  { %15755 = vst [vmem:[#allocation12_spill] sm:$0xff] %v9516_v5  ;;  %v9518_v11 = vpop.f32.mrf.mxu0  ;;  %v8078_v5 = vld [vmem:[%s15533_s1 + $0x3a0] sm:$0xff] }
  0xc0   :  { %v9521_v22 = vpop.f32.mrf.mxu1  ;;  %1849 = vmatpush.msra.mxu0 %v8078_v5 }
  0xc2   :  { %7775 = vmatmul.msk.f32.gmra.mxu0 %vm218_vm1, %v197_v13  ;;  %7863 = vmatmul.msk.f32.gmra.mxu3 %vm218_vm1, %v9316_v12 }
  0xc3   :  { %7807 = vmatmul.msk.f32.gmra.mxu1 %vm218_vm1, %v197_v13  ;;  %7831 = vmatmul.msk.f32.gmra.mxu2 %vm218_vm1, %v9316_v12  ;;  %v7990_v13 = vld [vmem:[%s15533_s1 + $0x2e0] sm:$0xff] }
  0xc4   :  { %1404 = vmatpush.msra.mxu2 %v7990_v13  ;;  %1850 = vmatpush.msra.mxu0 %v8076_v15 }
  0xc5   :  { %v9538_v39 = vpop.f32.mrf.mxu3 }
  0xc6   :  { %15756 = vst [vmem:[#allocation13_spill] sm:$0xff] %v9538_v39  ;;  %v9540_v57 = vpop.f32.mrf.mxu2 }
  0xc7   :  { %15757 = vst [vmem:[#allocation14_spill] sm:$0xff] %v9540_v57  ;;  %v9542_v63 = vpop.f32.mrf.mxu0  ;;  %v15760_v57 = vrot.slane %v8989_v20, 1 }
  0xc8   :  { %v9545_v27 = vpop.f32.mrf.mxu1 }
  0xc9   :  { %v201_v13 = vsel %vm152_vm0, %v198_v32, %v15760_v57  ;;  %v826_v32 = vrot.slane %v8984_v19, 2  ;;  %v7991_v57 = vld [vmem:[%s15533_s1 + $0x2e8] sm:$0xff] }
  0xca   :  { %7776 = vmatmul.msk.f32.gmra.mxu0 %vm218_vm1, %v199_v51  ;;  %7864 = vmatmul.msk.f32.gmra.mxu3 %vm218_vm1, %v9332_v16  ;;  %v8079_v19 = vld [vmem:[%s15533_s1 + $0x3a8] sm:$0xff] }
  0xcb   :  { %7808 = vmatmul.msk.f32.gmra.mxu1 %vm218_vm1, %v199_v51  ;;  %7832 = vmatmul.msk.f32.gmra.mxu2 %vm218_vm1, %v9332_v16  ;;  %v825_v51 = vrot.slane %v8979_v18, 2  ;;  %v828_v18 = vrot.slane %v9025_v34, 2  ;;  %v7988_v34 = vld [vmem:[%s15533_s1 + $0x2d0] sm:$0xff] }
  0xcc   :  { %1517 = vmatpush.msra.mxu3 %v7991_v57  ;;  %1962 = vmatpush.msra.mxu1 %v8079_v19 }
  0xcd   :  { %v9556_v29 = vpop.f32.mrf.mxu3  ;;  %v829_v33 = vsel %vm824_vm2, %v826_v32, %v828_v18  ;;  %1405 = vmatpush.msra.mxu2 %v7988_v34 }
  0xce   :  { %15758 = vst [vmem:[#allocation15_spill] sm:$0xff] %v9556_v29  ;;  %v9558_v50 = vpop.f32.mrf.mxu2 }
  0xcf   :  { %15759 = vst [vmem:[#allocation16_spill] sm:$0xff] %v9558_v50  ;;  %v9560_v52 = vpop.f32.mrf.mxu0 }
  0xd0   :  { %v9565_v39 = vpop.f32.mrf.mxu1 }
  0xd2   :  { %7777 = vmatmul.msk.f32.gmra.mxu0 %vm218_vm1, %v201_v13  ;;  %7865 = vmatmul.msk.f32.gmra.mxu3 %vm218_vm1, %v9348_v26 }
  0xd3   :  { %7809 = vmatmul.msk.f32.gmra.mxu1 %vm218_vm1, %v201_v13  ;;  %7833 = vmatmul.msk.f32.gmra.mxu2 %vm218_vm1, %v9348_v26  ;;  %v827_v13 = vsel %vm824_vm2, %v825_v51, %v826_v32 }
  0xd5   :  { %v9581_v5 = vpop.f32.mrf.mxu3 }
  0xd6   :  { %15761 = vst [vmem:[#allocation17_spill] sm:$0xff] %v9581_v5  ;;  %v9583_v50 = vpop.f32.mrf.mxu2 }
  0xd7   :  { %15762 = vst [vmem:[#allocation18_spill] sm:$0xff] %v9583_v50  ;;  %v9585_v29 = vpop.f32.mrf.mxu0 }
  0xd8   :  { %v9588_v0 = vpop.f32.mrf.mxu1 }
  0xda   :  { %7866 = vmatmul.msk.f32.gmra.mxu3 %vm218_vm1, %v9364_v31  ;;  %7906 = vmatmul.msk.f32.vlgmr.msrb.gmra.mxu0 %vm218_vm1, %v827_v13 }
  0xdb   :  { %7834 = vmatmul.msk.f32.gmra.mxu2 %vm218_vm1, %v9364_v31  ;;  %7938 = vmatmul.msk.f32.vlgmr.msrb.gmra.mxu1 %vm218_vm1, %v827_v13 }
  0xdd   :  { %v703_v51 = vpop.f32.mrf.mxu3 }
  0xde   :  { %v590_v57 = vpop.f32.mrf.mxu2  ;;  %v9601_v50 = vadd.f32 %v703_v51, %v9395_v44 }
  0xdf   :  { %v9604_v5 = vadd.f32 %v590_v57, %v9392_v42  ;;  %v9606_v36 = vpop.f32.mrf.mxu0  ;;  %v830_v42 = vrot.slane %v9058_v45, 2  ;;  %v7989_v45 = vld [vmem:[%s15533_s1 + $0x2d8] sm:$0xff] }
  0xe0   :  { %v9612_v13 = vpop.f32.mrf.mxu1  ;;  %1518 = vmatpush.msra.mxu3 %v7989_v45 }
  0xe1   :  { %v831_v34 = vsel %vm824_vm2, %v828_v18, %v830_v42 }
  0xe2   :  { %7867 = vmatmul.msk.f32.gmra.mxu3 %vm218_vm1, %v9380_v37  ;;  %7907 = vmatmul.msk.f32.gmra.mxu0 %vm218_vm1, %v829_v33 }
  0xe3   :  { %7835 = vmatmul.msk.f32.gmra.mxu2 %vm218_vm1, %v9380_v37  ;;  %7939 = vmatmul.msk.f32.gmra.mxu1 %vm218_vm1, %v829_v33 }
  0xe5   :  { %v706_v44 = vpop.f32.mrf.mxu3 }
  0xe6   :  { %v593_v32 = vpop.f32.mrf.mxu2  ;;  %v9622_v19 = vadd.f32 %v706_v44, %v9419_v60 }
  0xe7   :  { %v9625_v51 = vadd.f32 %v593_v32, %v9416_v55  ;;  %v9627_v57 = vpop.f32.mrf.mxu0  ;;  %v832_v55 = vrot.slane %v9097_v58, 2  ;;  %v834_v58 = vrot.slane %v9136_v7, 2  ;;  %v836_v7 = vrot.slane %v9175_v24, 2 }
  0xe8   :  { %v9633_v14 = vpop.f32.mrf.mxu1 }
  0xe9   :  { %v833_v32 = vsel %vm824_vm2, %v830_v42, %v832_v55  ;;  %v835_v3 = vsel %vm824_vm2, %v832_v55, %v834_v58  ;;  %v837_v24 = vsel %vm824_vm2, %v834_v58, %v836_v7 }
  0xea   :  { %7868 = vmatmul.msk.f32.gmra.mxu3 %vm218_vm1, %v9400_v47  ;;  %7908 = vmatmul.msk.f32.gmra.mxu0 %vm218_vm1, %v831_v34 }
  0xeb   :  { %7836 = vmatmul.msk.f32.gmra.mxu2 %vm218_vm1, %v9400_v47  ;;  %7940 = vmatmul.msk.f32.gmra.mxu1 %vm218_vm1, %v831_v34  ;;  %v8077_v34 = vld [vmem:[%s15533_s1 + $0x398] sm:$0xff] }
  0xec   :  { %1963 = vmatpush.msra.mxu1 %v8077_v34 }
  0xed   :  { %v709_v60 = vpop.f32.mrf.mxu3 }
  0xee   :  { %v596_v33 = vpop.f32.mrf.mxu2  ;;  %v9646_v15 = vadd.f32 %v709_v60, %v9443_v9 }
  0xef   :  { %v9649_v18 = vadd.f32 %v596_v33, %v9440_v4  ;;  %v9651_v44 = vpop.f32.mrf.mxu0  ;;  %v7986_v4 = vld [vmem:[%s15533_s1 + $0x2c0] sm:$0xff] }
  0xf0   :  { %v9654_v45 = vpop.f32.mrf.mxu1  ;;  %1406 = vmatpush.msra.mxu2 %v7986_v4 }
  0xf2   :  { %7869 = vmatmul.msk.f32.gmra.mxu3 %vm218_vm1, %v9424_v61  ;;  %7909 = vmatmul.msk.f32.gmra.mxu0 %vm218_vm1, %v833_v32 }
  0xf3   :  { %7837 = vmatmul.msk.f32.gmra.mxu2 %vm218_vm1, %v9424_v61  ;;  %7941 = vmatmul.msk.f32.gmra.mxu1 %vm218_vm1, %v833_v32 }
  0xf5   :  { %v712_v9 = vpop.f32.mrf.mxu3 }
  0xf6   :  { %v599_v42 = vpop.f32.mrf.mxu2  ;;  %v9670_v60 = vadd.f32 %v712_v9, %v9467_v23  ;;  %v7987_v23 = vld [vmem:[%s15533_s1 + $0x2c8] sm:$0xff] }
  0xf7   :  { %v9673_v33 = vadd.f32 %v599_v42, %v9464_v17  ;;  %v9675_v34 = vpop.f32.mrf.mxu0  ;;  %v8074_v17 = vld [vmem:[%s15533_s1 + $0x380] sm:$0xff]  ;;  %1519 = vmatpush.msra.mxu3 %v7987_v23 }
  0xf8   :  { %v9678_v32 = vpop.f32.mrf.mxu1  ;;  %1851 = vmatpush.msra.mxu0 %v8074_v17 }
  0xfa   :  { %7870 = vmatmul.msk.f32.gmra.mxu3 %vm218_vm1, %v9448_v10  ;;  %7910 = vmatmul.msk.f32.gmra.mxu0 %vm218_vm1, %v835_v3 }
  0xfb   :  { %7838 = vmatmul.msk.f32.gmra.mxu2 %vm218_vm1, %v9448_v10  ;;  %7942 = vmatmul.msk.f32.gmra.mxu1 %vm218_vm1, %v835_v3 }
  0xfd   :  { %v715_v55 = vpop.f32.mrf.mxu3 }
  0xfe   :  { %v602_v4 = vpop.f32.mrf.mxu2  ;;  %v9694_v9 = vadd.f32 %v715_v55, %v9494_v43  ;;  %v838_v43 = vrot.slane %v9214_v40, 2  ;;  %v7984_v40 = vld [vmem:[%s15533_s1 + $0x2b0] sm:$0xff] }
  0xff   :  { %v9697_v42 = vadd.f32 %v602_v4, %v9491_v38  ;;  %v9699_v3 = vpop.f32.mrf.mxu0  ;;  %v8075_v38 = vld [vmem:[%s15533_s1 + $0x388] sm:$0xff]  ;;  %1407 = vmatpush.msra.mxu2 %v7984_v40 }
 0x100   :  { %v9702_v1 = vpop.f32.mrf.mxu1  ;;  %1964 = vmatpush.msra.mxu1 %v8075_v38  ;;  %v839_v54 = vsel %vm824_vm2, %v836_v7, %v838_v43 }
 0x102   :  { %7871 = vmatmul.msk.f32.gmra.mxu3 %vm218_vm1, %v9472_v28  ;;  %7911 = vmatmul.msk.f32.gmra.mxu0 %vm218_vm1, %v837_v24 }
 0x103   :  { %7839 = vmatmul.msk.f32.gmra.mxu2 %vm218_vm1, %v9472_v28  ;;  %7943 = vmatmul.msk.f32.gmra.mxu1 %vm218_vm1, %v837_v24 }
 0x105   :  { %v718_v58 = vpop.f32.mrf.mxu3 }
 0x106   :  { %v605_v17 = vpop.f32.mrf.mxu2  ;;  %v9715_v23 = vadd.f32 %v718_v58, %v9521_v22 }
 0x107   :  { %v9718_v55 = vadd.f32 %v605_v17, %v9518_v11  ;;  %v9720_v4 = vpop.f32.mrf.mxu0  ;;  %v840_v11 = vrot.slane %v9235_v49, 2  ;;  %v7985_v49 = vld [vmem:[%s15533_s1 + $0x2b8] sm:$0xff] }
 0x108   :  { %v9723_v24 = vpop.f32.mrf.mxu1  ;;  %1520 = vmatpush.msra.mxu3 %v7985_v49 }
 0x109   :  { %v841_v40 = vsel %vm824_vm2, %v838_v43, %v840_v11 }
 0x10a   :  { %7872 = vmatmul.msk.f32.gmra.mxu3 %vm218_vm1, %v9499_v48  ;;  %7912 = vmatmul.msk.f32.gmra.mxu0 %vm218_vm1, %v839_v54 }
 0x10b   :  { %7840 = vmatmul.msk.f32.gmra.mxu2 %vm218_vm1, %v9499_v48  ;;  %7944 = vmatmul.msk.f32.gmra.mxu1 %vm218_vm1, %v839_v54  ;;  %v8072_v54 = vld [vmem:[%s15533_s1 + $0x370] sm:$0xff] }
 0x10c   :  { %1852 = vmatpush.msra.mxu0 %v8072_v54 }
 0x10d   :  { %v721_v22 = vpop.f32.mrf.mxu3 }
 0x10e   :  { %v608_v7 = vpop.f32.mrf.mxu2  ;;  %v9736_v38 = vadd.f32 %v721_v22, %v9545_v27  ;;  %v842_v27 = vrot.slane %v9254_v56, 2  ;;  %v844_v56 = vrot.slane %v9268_v62, 2  ;;  %v7982_v62 = vld [vmem:[%s15533_s1 + $0x2a0] sm:$0xff] }
 0x10f   :  { %v9739_v58 = vadd.f32 %v608_v7, %v9542_v63  ;;  %v9741_v17 = vpop.f32.mrf.mxu0  ;;  %1408 = vmatpush.msra.mxu2 %v7982_v62 }
 0x110   :  { %15763 = vst [vmem:[#allocation19_spill] sm:$0xff] %v9736_v38  ;;  %v9744_v53 = vpop.f32.mrf.mxu1  ;;  %v843_v38 = vsel %vm824_vm2, %v840_v11, %v842_v27 }
 0x111   :  { %15764 = vst [vmem:[#allocation20_spill] sm:$0xff] %v9739_v58 }
 0x112   :  { %7873 = vmatmul.msk.f32.gmra.mxu3 %vm218_vm1, %v9526_v30  ;;  %7913 = vmatmul.msk.f32.gmra.mxu0 %vm218_vm1, %v841_v40 }
 0x113   :  { %7841 = vmatmul.msk.f32.gmra.mxu2 %vm218_vm1, %v9526_v30  ;;  %7945 = vmatmul.msk.f32.gmra.mxu1 %vm218_vm1, %v841_v40 }
 0x115   :  { %v724_v63 = vpop.f32.mrf.mxu3 }
 0x116   :  { %v611_v43 = vpop.f32.mrf.mxu2  ;;  %v9760_v22 = vadd.f32 %v724_v63, %v9565_v39 }
 0x117   :  { %v9763_v7 = vadd.f32 %v611_v43, %v9560_v52  ;;  %v9765_v54 = vpop.f32.mrf.mxu0  ;;  %v8073_v52 = vld [vmem:[%s15533_s1 + $0x378] sm:$0xff] }
 0x118   :  { %15765 = vst [vmem:[#allocation21_spill] sm:$0xff] %v9760_v22  ;;  %v9768_v40 = vpop.f32.mrf.mxu1  ;;  %1965 = vmatpush.msra.mxu1 %v8073_v52  ;;  %v15829_v22 = vmov 0.0  }
 0x119   :  { %15766 = vst [vmem:[#allocation22_spill] sm:$0xff] %v9763_v7  ;;  %v8176_v7 = vld [vmem:[%s15535_s3 + $0x240] sm:$0xff] }
 0x11a   :  { %7874 = vmatmul.msk.f32.gmra.mxu3 %vm218_vm1, %v8989_v20  ;;  %7914 = vmatmul.msk.f32.gmra.mxu0 %vm218_vm1, %v843_v38 }
 0x11b   :  { %7842 = vmatmul.msk.f32.gmra.mxu2 %vm218_vm1, %v8989_v20  ;;  %7946 = vmatmul.msk.f32.gmra.mxu1 %vm218_vm1, %v843_v38  ;;  %v845_v20 = vsel %vm824_vm2, %v842_v27, %v844_v56 }
 0x11d   :  { %v727_v39 = vpop.f32.mrf.mxu3 }
 0x11e   :  { %v614_v11 = vpop.f32.mrf.mxu2  ;;  %v9781_v49 = vadd.f32 %v727_v39, %v9588_v0  ;;  %v846_v0 = vrot.slane %v9284_v2, 2  ;;  %v7983_v2 = vld [vmem:[%s15533_s1 + $0x2a8] sm:$0xff] }
 0x11f   :  { %v9784_v63 = vadd.f32 %v614_v11, %v9585_v29  ;;  %v9786_v43 = vpop.f32.mrf.mxu0  ;;  %1521 = vmatpush.msra.mxu3 %v7983_v2  ;;  %v850_v2 = vrot.slane %v9316_v12, 2 }
 0x120   :  { %15767 = vst [vmem:[#allocation23_spill] sm:$0xff] %v9781_v49  ;;  %v9792_v38 = vpop.f32.mrf.mxu1  ;;  %v847_v62 = vsel %vm824_vm2, %v844_v56, %v846_v0 }
 0x121   :  { %15768 = vst [vmem:[#allocation24_spill] sm:$0xff] %v9784_v63 }
 0x122   :  { %7875 = vmatmul.msk.f32.gmra.mxu3 %vm218_vm1, %v8994_v21  ;;  %7915 = vmatmul.msk.f32.gmra.mxu0 %vm218_vm1, %v845_v20 }
 0x123   :  { %7843 = vmatmul.msk.f32.gmra.mxu2 %vm218_vm1, %v8994_v21  ;;  %7947 = vmatmul.msk.f32.gmra.mxu1 %vm218_vm1, %v845_v20  ;;  %v8070_v21 = vld [vmem:[%s15533_s1 + $0x360] sm:$0xff] }
 0x124   :  { %1853 = vmatpush.msra.mxu0 %v8070_v21 }
 0x125   :  { %v730_v29 = vpop.f32.mrf.mxu3 }
 0x126   :  { %v617_v27 = vpop.f32.mrf.mxu2  ;;  %v9802_v52 = vadd.f32 %v730_v29, %v9612_v13 }
 0x127   :  { %v9805_v39 = vadd.f32 %v617_v27, %v9606_v36  ;;  %v9807_v11 = vpop.f32.mrf.mxu0  ;;  %v848_v36 = vrot.slane %v9300_v6, 2  ;;  %v7981_v6 = vld [vmem:[%s15533_s1 + $0x298] sm:$0xff] }
 0x128   :  { %15769 = vst [vmem:[#allocation25_spill] sm:$0xff] %v9802_v52  ;;  %v9813_v49 = vpop.f32.mrf.mxu1  ;;  %1522 = vmatpush.msra.mxu3 %v7981_v6  ;;  %v7974_v6 = vld [vmem:[%s15533_s1 + $0x260] sm:$0xff] }
 0x129   :  { %15770 = vst [vmem:[#allocation26_spill] sm:$0xff] %v9805_v39  ;;  %v849_v21 = vsel %vm824_vm2, %v846_v0, %v848_v36  ;;  %v7979_v0 = vld [vmem:[%s15533_s1 + $0x288] sm:$0xff] }
 0x12a   :  { %7876 = vmatmul.msk.f32.gmra.mxu3 %vm218_vm1, %v9030_v35  ;;  %7916 = vmatmul.msk.f32.gmra.mxu0 %vm218_vm1, %v847_v62 }
 0x12b   :  { %7844 = vmatmul.msk.f32.gmra.mxu2 %vm218_vm1, %v9030_v35  ;;  %7948 = vmatmul.msk.f32.gmra.mxu1 %vm218_vm1, %v847_v62  ;;  %v7980_v35 = vld [vmem:[%s15533_s1 + $0x290] sm:$0xff] }
 0x12c   :  { %1409 = vmatpush.msra.mxu2 %v7980_v35  ;;  %1523 = vmatpush.msra.mxu3 %v7979_v0  ;;  %v851_v0 = vsel %vm824_vm2, %v848_v36, %v850_v2  ;;  %v7970_v36 = vld [vmem:[%s15533_s1 + $0x240] sm:$0xff] }
 0x12d   :  { %v733_v13 = vpop.f32.mrf.mxu3 }
 0x12e   :  { %v620_v56 = vpop.f32.mrf.mxu2  ;;  %v9826_v20 = vadd.f32 %v733_v13, %v9633_v14  ;;  %v8071_v14 = vld [vmem:[%s15533_s1 + $0x368] sm:$0xff]  ;;  %v7976_v13 = vld [vmem:[%s15533_s1 + $0x270] sm:$0xff] }
 0x12f   :  { %v9829_v29 = vadd.f32 %v620_v56, %v9627_v57  ;;  %v9831_v27 = vpop.f32.mrf.mxu0  ;;  %1966 = vmatpush.msra.mxu1 %v8071_v14  ;;  %v7978_v57 = vld [vmem:[%s15533_s1 + $0x280] sm:$0xff]  ;;  %v7977_v56 = vld [vmem:[%s15533_s1 + $0x278] sm:$0xff] }
 0x130   :  { %15771 = vst [vmem:[#allocation27_spill] sm:$0xff] %v9826_v20  ;;  %v9840_v62 = vpop.f32.mrf.mxu1  ;;  %1410 = vmatpush.msra.mxu2 %v7978_v57  ;;  %1524 = vmatpush.msra.mxu3 %v7977_v56  ;;  %v8068_v56 = vld [vmem:[%s15533_s1 + $0x350] sm:$0xff] }
 0x131   :  { %15772 = vst [vmem:[#allocation28_spill] sm:$0xff] %v9829_v29  ;;  %v7972_v29 = vld [vmem:[%s15533_s1 + $0x250] sm:$0xff]  ;;  %1854 = vmatpush.msra.mxu0 %v8068_v56 }
 0x132   :  { %7877 = vmatmul.msk.f32.gmra.mxu3 %vm218_vm1, %v9063_v46  ;;  %7917 = vmatmul.msk.f32.gmra.mxu0 %vm218_vm1, %v849_v21 }
 0x133   :  { %7845 = vmatmul.msk.f32.gmra.mxu2 %vm218_vm1, %v9063_v46  ;;  %7949 = vmatmul.msk.f32.gmra.mxu1 %vm218_vm1, %v849_v21  ;;  %v7975_v46 = vld [vmem:[%s15533_s1 + $0x268] sm:$0xff] }
 0x134   :  { %1411 = vmatpush.msra.mxu2 %v7976_v13  ;;  %1525 = vmatpush.msra.mxu3 %v7975_v46  ;;  %v7971_v13 = vld [vmem:[%s15533_s1 + $0x248] sm:$0xff] }
 0x135   :  { %v736_v35 = vpop.f32.mrf.mxu3 }
 0x136   :  { %v623_v12 = vpop.f32.mrf.mxu2  ;;  %v9871_v21 = vadd.f32 %v736_v35, %v9654_v45  ;;  %1412 = vmatpush.msra.mxu2 %v7974_v6  ;;  %v7973_v45 = vld [vmem:[%s15533_s1 + $0x258] sm:$0xff] }
 0x137   :  { %v9874_v14 = vadd.f32 %v623_v12, %v9651_v44  ;;  %v9876_v57 = vpop.f32.mrf.mxu0  ;;  %v852_v44 = vrot.slane %v9332_v16, 2  ;;  %1526 = vmatpush.msra.mxu3 %v7973_v45 }
 0x138   :  { %15773 = vst [vmem:[#allocation29_spill] sm:$0xff] %v9871_v21  ;;  %v9879_v20 = vpop.f32.mrf.mxu1  ;;  %1413 = vmatpush.msra.mxu2 %v7972_v29 }
 0x139   :  { %15774 = vst [vmem:[#allocation30_spill] sm:$0xff] %v9874_v14  ;;  %1527 = vmatpush.msra.mxu3 %v7971_v13  ;;  %v853_v12 = vsel %vm824_vm2, %v850_v2, %v852_v44  ;;  %v8058_v14 = vld [vmem:[%s15533_s1 + $0x300] sm:$0xff] }
 0x13a   :  { %7878 = vmatmul.msk.f32.gmra.mxu3 %vm218_vm1, %v9102_v59  ;;  %7918 = vmatmul.msk.f32.gmra.mxu0 %vm218_vm1, %v851_v0 }
 0x13b   :  { %7846 = vmatmul.msk.f32.gmra.mxu2 %vm218_vm1, %v9102_v59  ;;  %7950 = vmatmul.msk.f32.gmra.mxu1 %vm218_vm1, %v851_v0 }
 0x13c   :  { %1414 = vmatpush.msra.mxu2 %v7970_v36 }
 0x13d   :  { %v739_v35 = vpop.f32.mrf.mxu3 }
 0x13e   :  { %v626_v59 = vpop.f32.mrf.mxu2  ;;  %v9904_v6 = vadd.f32 %v739_v35, %v9678_v32  ;;  %v854_v32 = vrot.slane %v9348_v26, 2  ;;  %v856_v26 = vrot.slane %v9364_v31, 2  ;;  %v858_v31 = vrot.slane %v9380_v37, 2  ;;  %3332 = vmatpush.msrb.mxu2 %v8176_v7 }
 0x13f   :  { %v9907_v16 = vadd.f32 %v626_v59, %v9675_v34  ;;  %v9909_v46 = vpop.f32.mrf.mxu0  ;;  %v8069_v34 = vld [vmem:[%s15533_s1 + $0x358] sm:$0xff] }
 0x140   :  { %15775 = vst [vmem:[#allocation31_spill] sm:$0xff] %v9904_v6  ;;  %v9912_v0 = vpop.f32.mrf.mxu1  ;;  %1967 = vmatpush.msra.mxu1 %v8069_v34 }
 0x141   :  { %15776 = vst [vmem:[#allocation32_spill] sm:$0xff] %v9907_v16 }
 0x142   :  { %7879 = vmatmul.msk.f32.gmra.mxu3 %vm218_vm1, %v9141_v8  ;;  %7919 = vmatmul.msk.f32.gmra.mxu0 %vm218_vm1, %v853_v12 }
 0x143   :  { %7847 = vmatmul.msk.f32.gmra.mxu2 %vm218_vm1, %v9141_v8  ;;  %7951 = vmatmul.msk.f32.gmra.mxu1 %vm218_vm1, %v853_v12  ;;  %v855_v8 = vsel %vm824_vm2, %v852_v44, %v854_v32  ;;  %v857_v12 = vsel %vm824_vm2, %v854_v32, %v856_v26  ;;  %v9972_v32 = vld [vmem:[%s15534_s0 + $0x8] sm:$0xff] }
 0x145   :  { %v742_v29 = vpop.f32.mrf.mxu3 }
 0x146   :  { %v629_v2 = vpop.f32.mrf.mxu2  ;;  %v9925_v45 = vadd.f32 %v742_v29, %v9702_v1  ;;  %v1271_v29 = vrot.slane %v9972_v32, 3 }
 0x147   :  { %v9928_v36 = vadd.f32 %v629_v2, %v9699_v3  ;;  %v9930_v13 = vpop.f32.mrf.mxu0 }
 0x148   :  { %15777 = vst [vmem:[#allocation33_spill] sm:$0xff] %v9925_v45  ;;  %v9933_v56 = vpop.f32.mrf.mxu1  ;;  %v8060_v45 = vld [vmem:[%s15533_s1 + $0x310] sm:$0xff] }
 0x149   :  { %15778 = vst [vmem:[#allocation34_spill] sm:$0xff] %v9928_v36 }
 0x14a   :  { %7880 = vmatmul.msk.f32.gmra.mxu3 %vm218_vm1, %v9180_v25  ;;  %7920 = vmatmul.msk.f32.gmra.mxu0 %vm218_vm1, %v855_v8 }
 0x14b   :  { %7848 = vmatmul.msk.f32.gmra.mxu2 %vm218_vm1, %v9180_v25  ;;  %7952 = vmatmul.msk.f32.gmra.mxu1 %vm218_vm1, %v855_v8  ;;  %v8066_v25 = vld [vmem:[%s15533_s1 + $0x340] sm:$0xff] }
 0x14c   :  { %1855 = vmatpush.msra.mxu0 %v8066_v25  ;;  %v8067_v25 = vld [vmem:[%s15533_s1 + $0x348] sm:$0xff] }
 0x14d   :  { %v745_v1 = vpop.f32.mrf.mxu3  ;;  %1968 = vmatpush.msra.mxu1 %v8067_v25 }
 0x14e   :  { %v632_v3 = vpop.f32.mrf.mxu2  ;;  %v9943_v35 = vadd.f32 %v745_v1, %v9723_v24 }
 0x14f   :  { %v9946_v44 = vadd.f32 %v632_v3, %v9720_v4  ;;  %v9948_v59 = vpop.f32.mrf.mxu0  ;;  %v9966_v4 = vld [vmem:[%s15534_s0] sm:$0xff]  ;;  %v859_v3 = vsel %vm824_vm2, %v856_v26, %v858_v31 }
 0x150   :  { %15779 = vst [vmem:[#allocation35_spill] sm:$0xff] %v9943_v35  ;;  %v9951_v34 = vpop.f32.mrf.mxu1  ;;  %v1270_v24 = vrot.slane %v9966_v4, 3 }
 0x151   :  { %15780 = vst [vmem:[#allocation36_spill] sm:$0xff] %v9946_v44 }
 0x152   :  { %7881 = vmatmul.msk.f32.gmra.mxu3 %vm218_vm1, %v9219_v41  ;;  %7921 = vmatmul.msk.f32.gmra.mxu0 %vm218_vm1, %v857_v12 }
 0x153   :  { %7849 = vmatmul.msk.f32.gmra.mxu2 %vm218_vm1, %v9219_v41  ;;  %7953 = vmatmul.msk.f32.gmra.mxu1 %vm218_vm1, %v857_v12  ;;  %v1272_v12 = vsel %vm1269_vm3, %v1270_v24, %v1271_v29 }
 0x155   :  { %v748_v41 = vpop.f32.mrf.mxu3 }
 0x156   :  { %v635_v2 = vpop.f32.mrf.mxu2  ;;  %v9976_v37 = vadd.f32 %v748_v41, %v9744_v53  ;;  %v860_v53 = vrot.slane %v9400_v47, 2 }
 0x157   :  { %v9979_v8 = vadd.f32 %v635_v2, %v9741_v17  ;;  %v9981_v1 = vpop.f32.mrf.mxu0  ;;  %v9995_v17 = vld [vmem:[%s15534_s0 + $0x10] sm:$0xff] }
 0x158   :  { %15781 = vst [vmem:[#allocation37_spill] sm:$0xff] %v9976_v37  ;;  %v9985_v35 = vpop.f32.mrf.mxu1  ;;  %v1273_v26 = vrot.slane %v9995_v17, 3 }
 0x159   :  { %15782 = vst [vmem:[#allocation38_spill] sm:$0xff] %v9979_v8  ;;  %v1181_v7 = vadd.f32 %v9985_v35, %v9601_v50  ;;  %v10446_v50 = vld [vmem:[%s15534_s0 + $0x98] sm:$0xff] }
 0x15a   :  { %7922 = vmatmul.msk.f32.gmra.mxu0 %vm218_vm1, %v859_v3  ;;  %8026 = vmatmul.msk.f32.vlgmr.msra.gmra.mxu3 %vm218_vm1, %v1272_v12  ;;  %v1274_v37 = vsel %vm1269_vm3, %v1271_v29, %v1273_v26 }
 0x15b   :  { %7954 = vmatmul.msk.f32.gmra.mxu1 %vm218_vm1, %v859_v3  ;;  %7994 = vmatmul.msk.f32.vlgmr.msra.gmra.mxu2 %vm218_vm1, %v1272_v12  ;;  %v861_v12 = vsel %vm824_vm2, %v858_v31, %v860_v53 }
 0x15d   :  { %v751_v24 = vpop.f32.mrf.mxu3 }
 0x15e   :  { %v638_v41 = vpop.f32.mrf.mxu2  ;;  %v10002_v2 = vadd.f32 %v751_v24, %v9768_v40  ;;  %v862_v40 = vrot.slane %v9424_v61, 2 }
 0x15f   :  { %v10005_v3 = vadd.f32 %v638_v41, %v9765_v54  ;;  %v10007_v47 = vpop.f32.mrf.mxu0  ;;  %v10021_v54 = vld [vmem:[%s15534_s0 + $0x18] sm:$0xff] }
 0x160   :  { %15783 = vst [vmem:[#allocation39_spill] sm:$0xff] %v10002_v2  ;;  %v10011_v8 = vpop.f32.mrf.mxu1  ;;  %v1275_v31 = vrot.slane %v10021_v54, 3  ;;  %v8064_v2 = vld [vmem:[%s15533_s1 + $0x330] sm:$0xff]  ;;  %v1720_v35 = vrot.slane %v10021_v54, 4 }
 0x161   :  { %15784 = vst [vmem:[#allocation40_spill] sm:$0xff] %v10005_v3  ;;  %1856 = vmatpush.msra.mxu0 %v8064_v2  ;;  %v8174_v54 = vld [vmem:[%s15535_s3 + $0x230] sm:$0xff] }
 0x162   :  { %7923 = vmatmul.msk.f32.gmra.mxu0 %vm218_vm1, %v861_v12  ;;  %8027 = vmatmul.msk.f32.gmra.mxu3 %vm218_vm1, %v1274_v37  ;;  %v1276_v61 = vsel %vm1269_vm3, %v1273_v26, %v1275_v31 }
 0x163   :  { %7955 = vmatmul.msk.f32.gmra.mxu1 %vm218_vm1, %v861_v12  ;;  %7995 = vmatmul.msk.f32.gmra.mxu2 %vm218_vm1, %v1274_v37  ;;  %v863_v37 = vsel %vm824_vm2, %v860_v53, %v862_v40 }
 0x164   :  { %3333 = vmatpush.msrb.mxu2 %v8174_v54  ;;  %v8172_v54 = vld [vmem:[%s15535_s3 + $0x220] sm:$0xff] }
 0x165   :  { %v754_v29 = vpop.f32.mrf.mxu3 }
 0x166   :  { %v641_v25 = vpop.f32.mrf.mxu2  ;;  %v10025_v24 = vadd.f32 %v754_v29, %v9792_v38  ;;  %v10047_v38 = vld [vmem:[%s15534_s0 + $0x20] sm:$0xff]  ;;  %3334 = vmatpush.msrb.mxu2 %v8172_v54 }
 0x167   :  { %v10028_v41 = vadd.f32 %v641_v25, %v9786_v43  ;;  %v10030_v12 = vpop.f32.mrf.mxu0  ;;  %v864_v43 = vrot.slane %v9448_v10, 2  ;;  %v1277_v53 = vrot.slane %v10047_v38, 3 }
 0x168   :  { %15785 = vst [vmem:[#allocation41_spill] sm:$0xff] %v10025_v24  ;;  %v10037_v3 = vpop.f32.mrf.mxu1 }
 0x169   :  { %15786 = vst [vmem:[#allocation42_spill] sm:$0xff] %v10028_v41  ;;  %v1278_v10 = vsel %vm1269_vm3, %v1275_v31, %v1277_v53  ;;  %v8065_v41 = vld [vmem:[%s15533_s1 + $0x338] sm:$0xff] }
 0x16a   :  { %7924 = vmatmul.msk.f32.gmra.mxu0 %vm218_vm1, %v863_v37  ;;  %8028 = vmatmul.msk.f32.gmra.mxu3 %vm218_vm1, %v1276_v61 }
 0x16b   :  { %7956 = vmatmul.msk.f32.gmra.mxu1 %vm218_vm1, %v863_v37  ;;  %7996 = vmatmul.msk.f32.gmra.mxu2 %vm218_vm1, %v1276_v61  ;;  %v865_v61 = vsel %vm824_vm2, %v862_v40, %v864_v43 }
 0x16c   :  { %1969 = vmatpush.msra.mxu1 %v8065_v41 }
 0x16d   :  { %v757_v26 = vpop.f32.mrf.mxu3 }
 0x16e   :  { %v644_v29 = vpop.f32.mrf.mxu2  ;;  %v10051_v2 = vadd.f32 %v757_v26, %v9813_v49  ;;  %v866_v49 = vrot.slane %v9472_v28, 2 }
 0x16f   :  { %v10054_v25 = vadd.f32 %v644_v29, %v9807_v11  ;;  %v10056_v37 = vpop.f32.mrf.mxu0  ;;  %v10073_v11 = vld [vmem:[%s15534_s0 + $0x28] sm:$0xff] }
 0x170   :  { %15787 = vst [vmem:[#allocation43_spill] sm:$0xff] %v10051_v2  ;;  %v10060_v24 = vpop.f32.mrf.mxu1  ;;  %v1279_v40 = vrot.slane %v10073_v11, 3  ;;  %v867_v28 = vsel %vm824_vm2, %v864_v43, %v866_v49  ;;  %v8062_v43 = vld [vmem:[%s15533_s1 + $0x320] sm:$0xff] }
 0x171   :  { %15788 = vst [vmem:[#allocation44_spill] sm:$0xff] %v10054_v25  ;;  %1857 = vmatpush.msra.mxu0 %v8062_v43 }
 0x172   :  { %7925 = vmatmul.msk.f32.gmra.mxu0 %vm218_vm1, %v865_v61  ;;  %8029 = vmatmul.msk.f32.gmra.mxu3 %vm218_vm1, %v1278_v10 }
 0x173   :  { %7957 = vmatmul.msk.f32.gmra.mxu1 %vm218_vm1, %v865_v61  ;;  %7997 = vmatmul.msk.f32.gmra.mxu2 %vm218_vm1, %v1278_v10  ;;  %v1280_v10 = vsel %vm1269_vm3, %v1277_v53, %v1279_v40 }
 0x174   :  { %1858 = vmatpush.msra.mxu0 %v8060_v45  ;;  %v10206_v45 = vld [vmem:[%s15534_s0 + $0xd0] sm:$0xff] }
 0x175   :  { %v760_v31 = vpop.f32.mrf.mxu3 }
 0x176   :  { %v647_v26 = vpop.f32.mrf.mxu2  ;;  %v10077_v29 = vadd.f32 %v760_v31, %v9840_v62  ;;  %v868_v62 = vrot.slane %v9499_v48, 2  ;;  %1859 = vmatpush.msra.mxu0 %v8058_v14 }
 0x177   :  { %v10080_v2 = vadd.f32 %v647_v26, %v9831_v27  ;;  %v10082_v61 = vpop.f32.mrf.mxu0  ;;  %v10096_v27 = vld [vmem:[%s15534_s0 + $0x30] sm:$0xff] }
 0x178   :  { %15789 = vst [vmem:[#allocation45_spill] sm:$0xff] %v10077_v29  ;;  %v10086_v25 = vpop.f32.mrf.mxu1  ;;  %v1281_v41 = vrot.slane %v10096_v27, 3 }
 0x179   :  { %15790 = vst [vmem:[#allocation46_spill] sm:$0xff] %v10080_v2 }
 0x17a   :  { %7926 = vmatmul.msk.f32.gmra.mxu0 %vm218_vm1, %v867_v28  ;;  %8030 = vmatmul.msk.f32.gmra.mxu3 %vm218_vm1, %v1280_v10  ;;  %v1282_v29 = vsel %vm1269_vm3, %v1279_v40, %v1281_v41  ;;  %v8063_v40 = vld [vmem:[%s15533_s1 + $0x328] sm:$0xff] }
 0x17b   :  { %7958 = vmatmul.msk.f32.gmra.mxu1 %vm218_vm1, %v867_v28  ;;  %7998 = vmatmul.msk.f32.gmra.mxu2 %vm218_vm1, %v1280_v10  ;;  %v869_v10 = vsel %vm824_vm2, %v866_v49, %v868_v62 }
 0x17c   :  { %1970 = vmatpush.msra.mxu1 %v8063_v40 }
 0x17d   :  { %v763_v53 = vpop.f32.mrf.mxu3 }
 0x17e   :  { %v650_v31 = vpop.f32.mrf.mxu2  ;;  %v10103_v26 = vadd.f32 %v763_v53, %v9879_v20  ;;  %v870_v20 = vrot.slane %v9526_v30, 2 }
 0x17f   :  { %v10106_v28 = vadd.f32 %v650_v31, %v9876_v57  ;;  %v10108_v48 = vpop.f32.mrf.mxu0  ;;  %v10122_v57 = vld [vmem:[%s15534_s0 + $0x38] sm:$0xff] }
 0x180   :  { %15791 = vst [vmem:[#allocation47_spill] sm:$0xff] %v10103_v26  ;;  %v10112_v2 = vpop.f32.mrf.mxu1  ;;  %v1283_v49 = vrot.slane %v10122_v57, 3 }
 0x181   :  { %15792 = vst [vmem:[#allocation48_spill] sm:$0xff] %v10106_v28 }
 0x182   :  { %7927 = vmatmul.msk.f32.gmra.mxu0 %vm218_vm1, %v869_v10  ;;  %8031 = vmatmul.msk.f32.gmra.mxu3 %vm218_vm1, %v1282_v29  ;;  %v1284_v26 = vsel %vm1269_vm3, %v1281_v41, %v1283_v49 }
 0x183   :  { %7959 = vmatmul.msk.f32.gmra.mxu1 %vm218_vm1, %v869_v10  ;;  %7999 = vmatmul.msk.f32.gmra.mxu2 %vm218_vm1, %v1282_v29  ;;  %v871_v10 = vsel %vm824_vm2, %v868_v62, %v870_v20  ;;  %v10153_v62 = vld [vmem:[%s15534_s0 + $0x40] sm:$0xff] }
 0x184   :  { %v1285_v41 = vrot.slane %v10153_v62, 3 }
 0x185   :  { %v766_v43 = vpop.f32.mrf.mxu3 }
 0x186   :  { %v653_v53 = vpop.f32.mrf.mxu2  ;;  %v10129_v31 = vadd.f32 %v766_v43, %v9912_v0 }
 0x187   :  { %v10132_v29 = vadd.f32 %v653_v53, %v9909_v46  ;;  %v10134_v30 = vpop.f32.mrf.mxu0  ;;  %v10147_v46 = vld [vmem:[%s15534_s0 + $0xc0] sm:$0xff] }
 0x188   :  { %15793 = vst [vmem:[#allocation49_spill] sm:$0xff] %v10129_v31  ;;  %v10138_v28 = vpop.f32.mrf.mxu1  ;;  %v872_v0 = vrot.slane %v10147_v46, 2 }
 0x189   :  { %15794 = vst [vmem:[#allocation50_spill] sm:$0xff] %v10132_v29  ;;  %v1286_v29 = vsel %vm1269_vm3, %v1283_v49, %v1285_v41 }
 0x18a   :  { %15795 = vst [vmem:[#allocation51_spill] sm:$0xff] %v10134_v30  ;;  %7928 = vmatmul.msk.f32.gmra.mxu0 %vm218_vm1, %v871_v10  ;;  %8032 = vmatmul.msk.f32.gmra.mxu3 %vm218_vm1, %v1284_v26  ;;  %v873_v31 = vsel %vm824_vm2, %v870_v20, %v872_v0  ;;  %v10184_v20 = vld [vmem:[%s15534_s0 + $0x48] sm:$0xff] }
 0x18b   :  { %15796 = vst [vmem:[#allocation52_spill] sm:$0xff] %v10138_v28  ;;  %7960 = vmatmul.msk.f32.gmra.mxu1 %vm218_vm1, %v871_v10  ;;  %8000 = vmatmul.msk.f32.gmra.mxu2 %vm218_vm1, %v1284_v26  ;;  %v1287_v49 = vrot.slane %v10184_v20, 3 }
 0x18d   :  { %v769_v40 = vpop.f32.mrf.mxu3  ;;  %v1288_v36 = vsel %vm1269_vm3, %v1285_v41, %v1287_v49  ;;  %v8061_v41 = vld [vmem:[%s15533_s1 + $0x318] sm:$0xff] }
 0x18e   :  { %v656_v43 = vpop.f32.mrf.mxu2  ;;  %v10157_v53 = vadd.f32 %v769_v40, %v9933_v56  ;;  %1971 = vmatpush.msra.mxu1 %v8061_v41  ;;  %v10235_v41 = vld [vmem:[%s15534_s0 + $0xd8] sm:$0xff] }
 0x18f   :  { %v10160_v26 = vadd.f32 %v656_v43, %v9930_v13  ;;  %v10162_v10 = vpop.f32.mrf.mxu0  ;;  %v10178_v13 = vld [vmem:[%s15534_s0 + $0xc8] sm:$0xff] }
 0x190   :  { %15797 = vst [vmem:[#allocation53_spill] sm:$0xff] %v10157_v53  ;;  %v10166_v44 = vpop.f32.mrf.mxu1  ;;  %v874_v56 = vrot.slane %v10178_v13, 2 }
 0x191   :  { %15798 = vst [vmem:[#allocation54_spill] sm:$0xff] %v10160_v26 }
 0x192   :  { %15799 = vst [vmem:[#allocation55_spill] sm:$0xff] %v10162_v10  ;;  %7929 = vmatmul.msk.f32.gmra.mxu0 %vm218_vm1, %v873_v31  ;;  %8033 = vmatmul.msk.f32.gmra.mxu3 %vm218_vm1, %v1286_v29  ;;  %v875_v26 = vsel %vm824_vm2, %v872_v0, %v874_v56 }
 0x193   :  { %15800 = vst [vmem:[#allocation56_spill] sm:$0xff] %v10166_v44  ;;  %7961 = vmatmul.msk.f32.gmra.mxu1 %vm218_vm1, %v873_v31  ;;  %8001 = vmatmul.msk.f32.gmra.mxu2 %vm218_vm1, %v1286_v29 }
 0x195   :  { %v772_v40 = vpop.f32.mrf.mxu3 }
 0x196   :  { %v659_v43 = vpop.f32.mrf.mxu2  ;;  %v10188_v31 = vadd.f32 %v772_v40, %v9951_v34  ;;  %v10212_v34 = vld [vmem:[%s15534_s0 + $0x50] sm:$0xff] }
 0x197   :  { %v10191_v29 = vadd.f32 %v659_v43, %v9948_v59  ;;  %v10193_v53 = vpop.f32.mrf.mxu0  ;;  %v876_v59 = vrot.slane %v10206_v45, 2  ;;  %v1289_v0 = vrot.slane %v10212_v34, 3 }
 0x198   :  { %15801 = vst [vmem:[#allocation57_spill] sm:$0xff] %v10188_v31  ;;  %v10197_v6 = vpop.f32.mrf.mxu1 }
 0x199   :  { %15802 = vst [vmem:[#allocation58_spill] sm:$0xff] %v10191_v29  ;;  %v877_v43 = vsel %vm824_vm2, %v874_v56, %v876_v59  ;;  %v1290_v31 = vsel %vm1269_vm3, %v1287_v49, %v1289_v0  ;;  %v10241_v56 = vld [vmem:[%s15534_s0 + $0x58] sm:$0xff] }
 0x19a   :  { %15803 = vst [vmem:[#allocation59_spill] sm:$0xff] %v10193_v53  ;;  %7930 = vmatmul.msk.f32.gmra.mxu0 %vm218_vm1, %v875_v26  ;;  %8034 = vmatmul.msk.f32.gmra.mxu3 %vm218_vm1, %v1288_v36  ;;  %v1291_v49 = vrot.slane %v10241_v56, 3 }
 0x19b   :  { %15804 = vst [vmem:[#allocation60_spill] sm:$0xff] %v10197_v6  ;;  %7962 = vmatmul.msk.f32.gmra.mxu1 %vm218_vm1, %v875_v26  ;;  %8002 = vmatmul.msk.f32.gmra.mxu2 %vm218_vm1, %v1288_v36 }
 0x19c   :  { %v1292_v21 = vsel %vm1269_vm3, %v1289_v0, %v1291_v49 }
 0x19d   :  { %v10218_v36 = vpop.f32.mrf.mxu3 }
 0x19e   :  { %15805 = vst [vmem:[#allocation61_spill] sm:$0xff] %v10218_v36  ;;  %v10220_v26 = vpop.f32.mrf.mxu2  ;;  %v878_v36 = vrot.slane %v10235_v41, 2 }
 0x19f   :  { %15806 = vst [vmem:[#allocation62_spill] sm:$0xff] %v10220_v26  ;;  %v10222_v40 = vpop.f32.mrf.mxu0 }
 0x1a0   :  { %15807 = vst [vmem:[#allocation63_spill] sm:$0xff] %v10222_v40  ;;  %v10226_v29 = vpop.f32.mrf.mxu1  ;;  %v8059_v40 = vld [vmem:[%s15533_s1 + $0x308] sm:$0xff] }
 0x1a1   :  { %15808 = vst [vmem:[#allocation64_spill] sm:$0xff] %v10226_v29  ;;  %1972 = vmatpush.msra.mxu1 %v8059_v40  ;;  %v10319_v40 = vld [vmem:[%s15534_s0 + $0xf0] sm:$0xff] }
 0x1a2   :  { %7931 = vmatmul.msk.f32.gmra.mxu0 %vm218_vm1, %v877_v43  ;;  %8035 = vmatmul.msk.f32.gmra.mxu3 %vm218_vm1, %v1290_v31 }
 0x1a3   :  { %7963 = vmatmul.msk.f32.gmra.mxu1 %vm218_vm1, %v877_v43  ;;  %8003 = vmatmul.msk.f32.gmra.mxu2 %vm218_vm1, %v1290_v31  ;;  %v879_v31 = vsel %vm824_vm2, %v876_v59, %v878_v36  ;;  %v10264_v59 = vld [vmem:[%s15534_s0 + $0xe0] sm:$0xff] }
 0x1a4   :  { %v880_v0 = vrot.slane %v10264_v59, 2 }
 0x1a5   :  { %v10244_v26 = vpop.f32.mrf.mxu3 }
 0x1a6   :  { %15809 = vst [vmem:[#allocation65_spill] sm:$0xff] %v10244_v26  ;;  %v10246_v16 = vpop.f32.mrf.mxu2  ;;  %v10270_v26 = vld [vmem:[%s15534_s0 + $0x60] sm:$0xff] }
 0x1a7   :  { %15810 = vst [vmem:[#allocation66_spill] sm:$0xff] %v10246_v16  ;;  %v10248_v43 = vpop.f32.mrf.mxu0  ;;  %v1293_v14 = vrot.slane %v10270_v26, 3 }
 0x1a8   :  { %15811 = vst [vmem:[#allocation67_spill] sm:$0xff] %v10248_v43  ;;  %v10255_v29 = vpop.f32.mrf.mxu1 }
 0x1a9   :  { %15812 = vst [vmem:[#allocation68_spill] sm:$0xff] %v10255_v29  ;;  %v1294_v43 = vsel %vm1269_vm3, %v1291_v49, %v1293_v14 }
 0x1aa   :  { %7932 = vmatmul.msk.f32.gmra.mxu0 %vm218_vm1, %v879_v31  ;;  %8036 = vmatmul.msk.f32.gmra.mxu3 %vm218_vm1, %v1292_v21 }
 0x1ab   :  { %7964 = vmatmul.msk.f32.gmra.mxu1 %vm218_vm1, %v879_v31  ;;  %8004 = vmatmul.msk.f32.gmra.mxu2 %vm218_vm1, %v1292_v21  ;;  %v881_v21 = vsel %vm824_vm2, %v878_v36, %v880_v0  ;;  %v10293_v36 = vld [vmem:[%s15534_s0 + $0xe8] sm:$0xff] }
 0x1ac   :  { %v882_v49 = vrot.slane %v10293_v36, 2 }
 0x1ad   :  { %v10273_v16 = vpop.f32.mrf.mxu3 }
 0x1ae   :  { %15813 = vst [vmem:[#allocation69_spill] sm:$0xff] %v10273_v16  ;;  %v10275_v29 = vpop.f32.mrf.mxu2  ;;  %v10299_v16 = vld [vmem:[%s15534_s0 + $0x68] sm:$0xff] }
 0x1af   :  { %15814 = vst [vmem:[#allocation70_spill] sm:$0xff] %v10275_v29  ;;  %v10277_v31 = vpop.f32.mrf.mxu0  ;;  %v1295_v29 = vrot.slane %v10299_v16, 3 }
 0x1b0   :  { %15815 = vst [vmem:[#allocation71_spill] sm:$0xff] %v10277_v31  ;;  %v10281_v52 = vpop.f32.mrf.mxu1  ;;  %v883_v31 = vsel %vm824_vm2, %v880_v0, %v882_v49  ;;  %v10325_v0 = vld [vmem:[%s15534_s0 + $0x70] sm:$0xff] }
 0x1b1   :  { %15816 = vst [vmem:[#allocation72_spill] sm:$0xff] %v10281_v52  ;;  %v1296_v39 = vsel %vm1269_vm3, %v1293_v14, %v1295_v29  ;;  %v1297_v14 = vrot.slane %v10325_v0, 3 }
 0x1b2   :  { %7933 = vmatmul.msk.f32.gmra.mxu0 %vm218_vm1, %v881_v21  ;;  %8037 = vmatmul.msk.f32.gmra.mxu3 %vm218_vm1, %v1294_v43 }
 0x1b3   :  { %7965 = vmatmul.msk.f32.gmra.mxu1 %vm218_vm1, %v881_v21  ;;  %8005 = vmatmul.msk.f32.gmra.mxu2 %vm218_vm1, %v1294_v43 }
 0x1b5   :  { %v10302_v52 = vpop.f32.mrf.mxu3 }
 0x1b6   :  { %15817 = vst [vmem:[#allocation73_spill] sm:$0xff] %v10302_v52  ;;  %v10304_v21 = vpop.f32.mrf.mxu2  ;;  %v884_v52 = vrot.slane %v10319_v40, 2 }
 0x1b7   :  { %15818 = vst [vmem:[#allocation74_spill] sm:$0xff] %v10304_v21  ;;  %v10306_v43 = vpop.f32.mrf.mxu0 }
 0x1b8   :  { %15819 = vst [vmem:[#allocation75_spill] sm:$0xff] %v10306_v43  ;;  %v10310_v6 = vpop.f32.mrf.mxu1  ;;  %v1298_v43 = vsel %vm1269_vm3, %v1295_v29, %v1297_v14  ;;  %v10351_v29 = vld [vmem:[%s15534_s0 + $0x78] sm:$0xff] }
 0x1b9   :  { %15820 = vst [vmem:[#allocation76_spill] sm:$0xff] %v10310_v6 }
 0x1ba   :  { %7934 = vmatmul.msk.f32.gmra.mxu0 %vm218_vm1, %v883_v31  ;;  %8038 = vmatmul.msk.f32.gmra.mxu3 %vm218_vm1, %v1296_v39 }
 0x1bb   :  { %7966 = vmatmul.msk.f32.gmra.mxu1 %vm218_vm1, %v883_v31  ;;  %8006 = vmatmul.msk.f32.gmra.mxu2 %vm218_vm1, %v1296_v39  ;;  %v885_v39 = vsel %vm824_vm2, %v882_v49, %v884_v52  ;;  %v1299_v49 = vrot.slane %v10351_v29, 3 }
 0x1bd   :  { %v10328_v21 = vpop.f32.mrf.mxu3  ;;  %v1300_v63 = vsel %vm1269_vm3, %v1297_v14, %v1299_v49 }
 0x1be   :  { %15821 = vst [vmem:[#allocation77_spill] sm:$0xff] %v10328_v21  ;;  %v10330_v6 = vpop.f32.mrf.mxu2  ;;  %v10345_v21 = vld [vmem:[%s15534_s0 + $0xf8] sm:$0xff] }
 0x1bf   :  { %15822 = vst [vmem:[#allocation78_spill] sm:$0xff] %v10330_v6  ;;  %v10332_v31 = vpop.f32.mrf.mxu0  ;;  %v886_v6 = vrot.slane %v10345_v21, 2 }
 0x1c0   :  { %15823 = vst [vmem:[#allocation79_spill] sm:$0xff] %v10332_v31  ;;  %v10336_v53 = vpop.f32.mrf.mxu1 }
 0x1c1   :  { %15824 = vst [vmem:[#allocation80_spill] sm:$0xff] %v10336_v53 }
 0x1c2   :  { %7935 = vmatmul.msk.f32.gmra.mxu0 %vm218_vm1, %v885_v39  ;;  %8039 = vmatmul.msk.f32.gmra.mxu3 %vm218_vm1, %v1298_v43 }
 0x1c3   :  { %7967 = vmatmul.msk.f32.gmra.mxu1 %vm218_vm1, %v885_v39  ;;  %8007 = vmatmul.msk.f32.gmra.mxu2 %vm218_vm1, %v1298_v43  ;;  %v887_v43 = vsel %vm824_vm2, %v884_v52, %v886_v6 }
 0x1c5   :  { %v10354_v53 = vpop.f32.mrf.mxu3 }
 0x1c6   :  { %15825 = vst [vmem:[#allocation81_spill] sm:$0xff] %v10354_v53  ;;  %v10356_v31 = vpop.f32.mrf.mxu2  ;;  %v888_v53 = vrot.slane %v15829_v22, 2 }
 0x1c7   :  { %15826 = vst [vmem:[#allocation82_spill] sm:$0xff] %v10356_v31  ;;  %v10358_v39 = vpop.f32.mrf.mxu0  ;;  %v10372_v31 = vld [vmem:[%s15534_s0 + $0x80] sm:$0xff] }
 0x1c8   :  { %15827 = vst [vmem:[#allocation83_spill] sm:$0xff] %v10358_v39  ;;  %v10362_v44 = vpop.f32.mrf.mxu1  ;;  %v1301_v52 = vrot.slane %v10372_v31, 3  ;;  %v889_v10 = vsel %vm824_vm2, %v886_v6, %v888_v53  ;;  %v1715_v6 = vrot.slane %v9966_v4, 4  ;;  %v1716_v53 = vrot.slane %v9972_v32, 4  ;;  %v8186_v4 = vld [vmem:[%s15535_s3 + $0x290] sm:$0x3] }
 0x1c9   :  { %15828 = vst [vmem:[#allocation84_spill] sm:$0xff] %v10362_v44  ;;  %8188 = vmatpush.msk.msrb.mxu3 %vm3325_vm5, %v8186_v4  ;;  %v1180_v4 = vadd.f32 %v9981_v1, %v9604_v5  ;;  %v1307_v5 = vrot.slane %v10446_v50, 3  ;;  %v1182_v1 = vadd.f32 %v10007_v47, %v9625_v51  ;;  %v8177_v51 = vld [vmem:[%s15535_s3 + $0x248] sm:$0xff]  ;;  %v10480_v47 = vld [vmem:[%s15534_s0 + $0xa0] sm:$0xff] }
 0x1ca   :  { %7936 = vmatmul.msk.f32.gmra.mxu0 %vm218_vm1, %v887_v43  ;;  %8040 = vmatmul.msk.f32.gmra.mxu3 %vm218_vm1, %v1300_v63 }
 0x1cb   :  { %7968 = vmatmul.msk.f32.gmra.mxu1 %vm218_vm1, %v887_v43  ;;  %8008 = vmatmul.msk.f32.gmra.mxu2 %vm218_vm1, %v1300_v63  ;;  %v1302_v43 = vsel %vm1269_vm3, %v1299_v49, %v1301_v52 }
 0x1cc   :  { %3558 = vmatpush.msrb.mxu0 %v8177_v51 }
 0x1cd   :  { %v10375_v14 = vpop.f32.mrf.mxu3 }
 0x1ce   :  { %15830 = vst [vmem:[#allocation85_spill] sm:$0xff] %v10375_v14  ;;  %v10377_v44 = vpop.f32.mrf.mxu2  ;;  %v10392_v14 = vld [vmem:[%s15534_s0 + $0x88] sm:$0xff] }
 0x1cf   :  { %15831 = vst [vmem:[#allocation86_spill] sm:$0xff] %v10377_v44  ;;  %v10379_v39 = vpop.f32.mrf.mxu0  ;;  %v1303_v44 = vrot.slane %v10392_v14, 3 }
 0x1d0   :  { %15832 = vst [vmem:[#allocation87_spill] sm:$0xff] %v10379_v39  ;;  %v10383_v63 = vpop.f32.mrf.mxu1 }
 0x1d1   :  { %15833 = vst [vmem:[#allocation88_spill] sm:$0xff] %v10383_v63 }
 0x1d2   :  { %7937 = vmatmul.msk.f32.gmra.mxu0 %vm218_vm1, %v889_v10  ;;  %8041 = vmatmul.msk.f32.gmra.mxu3 %vm218_vm1, %v1302_v43 }
 0x1d3   :  { %7969 = vmatmul.msk.f32.gmra.mxu1 %vm218_vm1, %v889_v10  ;;  %8009 = vmatmul.msk.f32.gmra.mxu2 %vm218_vm1, %v1302_v43  ;;  %v1304_v10 = vsel %vm1269_vm3, %v1301_v52, %v1303_v44  ;;  %v1717_v43 = vsel %vm1714_vm4, %v1715_v6, %v1716_v53  ;;  %v10421_v52 = vld [vmem:[%s15534_s0 + $0x90] sm:$0xff] }
 0x1d4   :  { %v1305_v6 = vrot.slane %v10421_v52, 3 }
 0x1d5   :  { %v10397_v49 = vpop.f32.mrf.mxu3 }
 0x1d6   :  { %15834 = vst [vmem:[#allocation89_spill] sm:$0xff] %v10397_v49  ;;  %v10399_v63 = vpop.f32.mrf.mxu2  ;;  %v1718_v49 = vrot.slane %v9995_v17, 4  ;;  %v1306_v28 = vsel %vm1269_vm3, %v1303_v44, %v1305_v6  ;;  %v1183_v44 = vadd.f32 %v10011_v8, %v9622_v19  ;;  %v8187_v8 = vld [vmem:[%s15535_s3 + $0x298] sm:$0x3] }
 0x1d7   :  { %15835 = vst [vmem:[#allocation90_spill] sm:$0xff] %v10399_v63  ;;  %v10401_v39 = vpop.f32.mrf.mxu0  ;;  %8221 = vmatpush.msk.msrb.mxu1 %vm3325_vm5, %v8187_v8  ;;  %v8175_v8 = vld [vmem:[%s15535_s3 + $0x238] sm:$0xff] }
 0x1d8   :  { %15836 = vst [vmem:[#allocation91_spill] sm:$0xff] %v10401_v39  ;;  %v10411_v32 = vpop.f32.mrf.mxu1  ;;  %v1719_v30 = vsel %vm1714_vm4, %v1716_v53, %v1718_v49  ;;  %3559 = vmatpush.msrb.mxu0 %v8175_v8 }
 0x1d9   :  { %15837 = vst [vmem:[#allocation92_spill] sm:$0xff] %v10411_v32 }
 0x1da   :  { %8042 = vmatmul.msk.f32.gmra.mxu3 %vm218_vm1, %v1304_v10  ;;  %8082 = vmatmul.msk.f32.vlgmr.msra.gmra.mxu0 %vm218_vm1, %v1717_v43 }
 0x1db   :  { %8010 = vmatmul.msk.f32.gmra.mxu2 %vm218_vm1, %v1304_v10  ;;  %8114 = vmatmul.msk.f32.vlgmr.msra.gmra.mxu1 %vm218_vm1, %v1717_v43 }
 0x1dd   :  { %v1529_v63 = vpop.f32.mrf.mxu3 }
 0x1de   :  { %v1416_v32 = vpop.f32.mrf.mxu2  ;;  %v10429_v10 = vadd.f32 %v1529_v63, %v1181_v7  ;;  %v1721_v7 = vsel %vm1714_vm4, %v1718_v49, %v1720_v35  ;;  %v1309_v49 = vrot.slane %v10480_v47, 3 }
 0x1df   :  { %v10431_v43 = vadd.f32 %v1416_v32, %v1180_v4  ;;  %v10433_v39 = vpop.f32.mrf.mxu0  ;;  %v1308_v32 = vsel %vm1269_vm3, %v1305_v6, %v1307_v5  ;;  %v1722_v6 = vrot.slane %v10047_v38, 4  ;;  %v10498_v38 = vld [vmem:[%s15534_s0 + $0xa8] sm:$0xff] }
 0x1e0   :  { %v10437_v58 = vpop.f32.mrf.mxu1 }
 0x1e2   :  { %8043 = vmatmul.msk.f32.gmra.mxu3 %vm218_vm1, %v1306_v28  ;;  %8083 = vmatmul.msk.f32.gmra.mxu0 %vm218_vm1, %v1719_v30 }
 0x1e3   :  { %8011 = vmatmul.msk.f32.gmra.mxu2 %vm218_vm1, %v1306_v28  ;;  %8115 = vmatmul.msk.f32.gmra.mxu1 %vm218_vm1, %v1719_v30 }
 0x1e5   :  { %v1532_v17 = vpop.f32.mrf.mxu3 }
 0x1e6   :  { %v1419_v63 = vpop.f32.mrf.mxu2  ;;  %v10454_v28 = vadd.f32 %v1532_v17, %v1183_v44  ;;  %v1310_v44 = vsel %vm1269_vm3, %v1307_v5, %v1309_v49  ;;  %v1724_v5 = vrot.slane %v10073_v11, 4  ;;  %v10521_v11 = vld [vmem:[%s15534_s0 + $0xb0] sm:$0xff] }
 0x1e7   :  { %v10456_v30 = vadd.f32 %v1419_v63, %v1182_v1  ;;  %v10458_v53 = vpop.f32.mrf.mxu0  ;;  %v1723_v1 = vsel %vm1714_vm4, %v1720_v35, %v1722_v6  ;;  %v1311_v63 = vrot.slane %v10498_v38, 3 }
 0x1e8   :  { %v10465_v19 = vpop.f32.mrf.mxu1 }
 0x1ea   :  { %8044 = vmatmul.msk.f32.gmra.mxu3 %vm218_vm1, %v1308_v32  ;;  %8084 = vmatmul.msk.f32.gmra.mxu0 %vm218_vm1, %v1721_v7 }
 0x1eb   :  { %8012 = vmatmul.msk.f32.gmra.mxu2 %vm218_vm1, %v1308_v32  ;;  %8116 = vmatmul.msk.f32.gmra.mxu1 %vm218_vm1, %v1721_v7  ;;  %v1312_v32 = vsel %vm1269_vm3, %v1309_v49, %v1311_v63  ;;  %v1725_v7 = vsel %vm1714_vm4, %v1722_v6, %v1724_v5  ;;  %v1313_v49 = vrot.slane %v10521_v11, 3  ;;  %v1726_v6 = vrot.slane %v10096_v27, 4  ;;  %v10538_v27 = vld [vmem:[%s15534_s0 + $0xb8] sm:$0xff] }
 0x1ed   :  { %v1727_v54 = vsel %vm1714_vm4, %v1724_v5, %v1726_v6 }
 0x1ef   :  { %v10485_v4 = vpop.f32.mrf.mxu0 }
 0x1f0   :  { %v10489_v17 = vpop.f32.mrf.mxu1 }
 0x1f2   :  { %8045 = vmatmul.msk.f32.gmra.mxu3 %vm218_vm1, %v1310_v44  ;;  %8085 = vmatmul.msk.f32.gmra.mxu0 %vm218_vm1, %v1723_v1 }
 0x1f3   :  { %8013 = vmatmul.msk.f32.gmra.mxu2 %vm218_vm1, %v1310_v44  ;;  %8117 = vmatmul.msk.f32.gmra.mxu1 %vm218_vm1, %v1723_v1  ;;  %v1314_v1 = vsel %vm1269_vm3, %v1311_v63, %v1313_v49  ;;  %v1728_v63 = vrot.slane %v10122_v57, 4  ;;  %v1317_v57 = vrot.slane %v10147_v46, 3  ;;  %v1319_v46 = vrot.slane %v10178_v13, 3 }
 0x1f4   :  { %v1321_v13 = vrot.slane %v10206_v45, 3  ;;  %v1323_v45 = vrot.slane %v10235_v41, 3 }
 0x1f5   :  { %v1729_v8 = vsel %vm1714_vm4, %v1726_v6, %v1728_v63  ;;  %v8184_v6 = vld [vmem:[%s15535_s3 + $0x280] sm:$0xff] }
 0x1f6   :  { %3457 = vmatpush.msrb.mxu3 %v8184_v6 }
 0x1f7   :  { %v10502_v35 = vpop.f32.mrf.mxu0 }
 0x1f8   :  { %v10509_v51 = vpop.f32.mrf.mxu1 }
 0x1f9   :  { %15838 = vst [vmem:[#allocation93_spill] sm:$0xff] %v10509_v51 }
 0x1fa   :  { %8046 = vmatmul.msk.f32.gmra.mxu3 %vm218_vm1, %v1312_v32  ;;  %8086 = vmatmul.msk.f32.gmra.mxu0 %vm218_vm1, %v1725_v7 }
 0x1fb   :  { %8014 = vmatmul.msk.f32.gmra.mxu2 %vm218_vm1, %v1312_v32  ;;  %8118 = vmatmul.msk.f32.gmra.mxu1 %vm218_vm1, %v1725_v7  ;;  %v1315_v32 = vrot.slane %v10538_v27, 3 }
 0x1fd   :  { %v1316_v7 = vsel %vm1269_vm3, %v1313_v49, %v1315_v32  ;;  %v1730_v49 = vrot.slane %v10153_v62, 4  ;;  %v1732_v62 = vrot.slane %v10184_v20, 4  ;;  %v1734_v20 = vrot.slane %v10212_v34, 4 }
 0x1fe   :  { %v1736_v34 = vrot.slane %v10241_v56, 4 }
 0x1ff   :  { %v10525_v44 = vpop.f32.mrf.mxu0  ;;  %v1735_v6 = vsel %vm1714_vm4, %v1732_v62, %v1734_v20 }
 0x200   :  { %15839 = vst [vmem:[#allocation94_spill] sm:$0xff] %v10525_v44  ;;  %v10529_v51 = vpop.f32.mrf.mxu1 }
 0x201   :  { %15840 = vst [vmem:[#allocation95_spill] sm:$0xff] %v10529_v51  ;;  %v8173_v51 = vld [vmem:[%s15535_s3 + $0x228] sm:$0xff] }
 0x202   :  { %8047 = vmatmul.msk.f32.gmra.mxu3 %vm218_vm1, %v1314_v1  ;;  %8087 = vmatmul.msk.f32.gmra.mxu0 %vm218_vm1, %v1727_v54 }
 0x203   :  { %8015 = vmatmul.msk.f32.gmra.mxu2 %vm218_vm1, %v1314_v1  ;;  %8119 = vmatmul.msk.f32.gmra.mxu1 %vm218_vm1, %v1727_v54  ;;  %v8170_v1 = vld [vmem:[%s15535_s3 + $0x210] sm:$0xff] }
 0x204   :  { %3335 = vmatpush.msrb.mxu2 %v8170_v1  ;;  %3560 = vmatpush.msrb.mxu0 %v8173_v51 }
 0x207   :  { %v10542_v5 = vpop.f32.mrf.mxu0 }
 0x208   :  { %15841 = vst [vmem:[#allocation96_spill] sm:$0xff] %v10542_v5  ;;  %v10549_v54 = vpop.f32.mrf.mxu1  ;;  %v1731_v5 = vsel %vm1714_vm4, %v1728_v63, %v1730_v49  ;;  %v1733_v63 = vsel %vm1714_vm4, %v1730_v49, %v1732_v62  ;;  %v1322_v49 = vsel %vm1269_vm3, %v1319_v46, %v1321_v13  ;;  %v1324_v62 = vsel %vm1269_vm3, %v1321_v13, %v1323_v45 }
 0x209   :  { %15842 = vst [vmem:[#allocation97_spill] sm:$0xff] %v10549_v54  ;;  %v1318_v54 = vsel %vm1269_vm3, %v1315_v32, %v1317_v57  ;;  %v1320_v32 = vsel %vm1269_vm3, %v1317_v57, %v1319_v46  ;;  %v1325_v13 = vrot.slane %v10264_v59, 3  ;;  %v1327_v59 = vrot.slane %v10293_v36, 3 }
 0x20a   :  { %8048 = vmatmul.msk.f32.gmra.mxu3 %vm218_vm1, %v1316_v7  ;;  %8088 = vmatmul.msk.f32.gmra.mxu0 %vm218_vm1, %v1729_v8  ;;  %v1742_v36 = vrot.slane %v10325_v0, 4  ;;  %v1331_v0 = vrot.slane %v10345_v21, 3  ;;  %v1333_v21 = vrot.slane %v15829_v22, 3 }
 0x20b   :  { %8016 = vmatmul.msk.f32.gmra.mxu2 %vm218_vm1, %v1316_v7  ;;  %8120 = vmatmul.msk.f32.gmra.mxu1 %vm218_vm1, %v1729_v8  ;;  %v8168_v7 = vld [vmem:[%s15535_s3 + $0x200] sm:$0xff] }
 0x20c   :  { %3336 = vmatpush.msrb.mxu2 %v8168_v7  ;;  %v10600_v7 = vpop.f32.mrf.mxu3 }
 0x20f   :  { %v10563_v1 = vpop.f32.mrf.mxu0 }
 0x210   :  { %v10567_v44 = vpop.f32.mrf.mxu1 }
 0x212   :  { %8049 = vmatmul.msk.f32.gmra.mxu3 %vm218_vm1, %v1318_v54  ;;  %8089 = vmatmul.msk.f32.gmra.mxu0 %vm218_vm1, %v1731_v5 }
 0x213   :  { %8017 = vmatmul.msk.f32.gmra.mxu2 %vm218_vm1, %v1318_v54  ;;  %8121 = vmatmul.msk.f32.gmra.mxu1 %vm218_vm1, %v1731_v5  ;;  %v8171_v5 = vld [vmem:[%s15535_s3 + $0x218] sm:$0xff]  ;;  %v8185_v54 = vld [vmem:[%s15535_s3 + $0x288] sm:$0xff] }
 0x214   :  { %3561 = vmatpush.msrb.mxu0 %v8171_v5  ;;  %3683 = vmatpush.msrb.mxu1 %v8185_v54  ;;  %v1737_v5 = vsel %vm1714_vm4, %v1734_v20, %v1736_v34  ;;  %v8166_v54 = vld [vmem:[%s15535_s3 + $0x1f0] sm:$0xff]  ;;  %v10624_v41 = vpop.f32.mrf.mxu3  ;;  %v1738_v20 = vrot.slane %v10270_v26, 4  ;;  %v1740_v26 = vrot.slane %v10299_v16, 4  ;;  %v1329_v16 = vrot.slane %v10319_v40, 3 }
 0x215   :  { %3337 = vmatpush.msrb.mxu2 %v8166_v54  ;;  %v1326_v54 = vsel %vm1269_vm3, %v1323_v45, %v1325_v13  ;;  %v8182_v40 = vld [vmem:[%s15535_s3 + $0x270] sm:$0xff] }
 0x216   :  { %3458 = vmatpush.msrb.mxu3 %v8182_v40 }
 0x217   :  { %v10575_v51 = vpop.f32.mrf.mxu0 }
 0x218   :  { %v10582_v8 = vpop.f32.mrf.mxu1 }
 0x219   :  { %15843 = vst [vmem:[#allocation98_spill] sm:$0xff] %v10582_v8 }
 0x21a   :  { %8050 = vmatmul.msk.f32.gmra.mxu3 %vm218_vm1, %v1320_v32  ;;  %8090 = vmatmul.msk.f32.gmra.mxu0 %vm218_vm1, %v1733_v63 }
 0x21b   :  { %8018 = vmatmul.msk.f32.gmra.mxu2 %vm218_vm1, %v1320_v32  ;;  %8122 = vmatmul.msk.f32.gmra.mxu1 %vm218_vm1, %v1733_v63  ;;  %v10604_v63 = vpop.f32.mrf.mxu2 }
 0x21f   :  { %v10596_v57 = vpop.f32.mrf.mxu0 }
 0x220   :  { %15844 = vst [vmem:[#allocation99_spill] sm:$0xff] %v10596_v57  ;;  %v10602_v32 = vpop.f32.mrf.mxu1 }
 0x221   :  { %15845 = vst [vmem:[#allocation100_spill] sm:$0xff] %v10602_v32 }
 0x222   :  { %8051 = vmatmul.msk.f32.gmra.mxu3 %vm218_vm1, %v1322_v49  ;;  %8091 = vmatmul.msk.f32.gmra.mxu0 %vm218_vm1, %v1735_v6 }
 0x223   :  { %8019 = vmatmul.msk.f32.gmra.mxu2 %vm218_vm1, %v1322_v49  ;;  %8123 = vmatmul.msk.f32.gmra.mxu1 %vm218_vm1, %v1735_v6  ;;  %v8169_v49 = vld [vmem:[%s15535_s3 + $0x208] sm:$0xff]  ;;  %v10628_v56 = vpop.f32.mrf.mxu2 }
 0x224   :  { %3562 = vmatpush.msrb.mxu0 %v8169_v49  ;;  %v1741_v49 = vsel %vm1714_vm4, %v1738_v20, %v1740_v26 }
 0x227   :  { %v10612_v46 = vpop.f32.mrf.mxu0 }
 0x228   :  { %15846 = vst [vmem:[#allocation101_spill] sm:$0xff] %v10612_v46  ;;  %v10619_v32 = vpop.f32.mrf.mxu1 }
 0x229   :  { %15847 = vst [vmem:[#allocation102_spill] sm:$0xff] %v10619_v32  ;;  %v1739_v32 = vsel %vm1714_vm4, %v1736_v34, %v1738_v20  ;;  %v1328_v34 = vsel %vm1269_vm3, %v1325_v13, %v1327_v59 }
 0x22a   :  { %8052 = vmatmul.msk.f32.gmra.mxu3 %vm218_vm1, %v1324_v62  ;;  %8092 = vmatmul.msk.f32.gmra.mxu0 %vm218_vm1, %v1737_v5 }
 0x22b   :  { %8020 = vmatmul.msk.f32.gmra.mxu2 %vm218_vm1, %v1324_v62  ;;  %8124 = vmatmul.msk.f32.gmra.mxu1 %vm218_vm1, %v1737_v5  ;;  %v10646_v62 = vpop.f32.mrf.mxu3  ;;  %v10648_v5 = vpop.f32.mrf.mxu2 }
 0x22f   :  { %v10634_v6 = vpop.f32.mrf.mxu0 }
 0x230   :  { %15848 = vst [vmem:[#allocation103_spill] sm:$0xff] %v10634_v6  ;;  %v10638_v46 = vpop.f32.mrf.mxu1 }
 0x231   :  { %15849 = vst [vmem:[#allocation104_spill] sm:$0xff] %v10638_v46 }
 0x232   :  { %8053 = vmatmul.msk.f32.gmra.mxu3 %vm218_vm1, %v1326_v54  ;;  %8093 = vmatmul.msk.f32.gmra.mxu0 %vm218_vm1, %v1739_v32 }
 0x233   :  { %8021 = vmatmul.msk.f32.gmra.mxu2 %vm218_vm1, %v1326_v54  ;;  %8125 = vmatmul.msk.f32.gmra.mxu1 %vm218_vm1, %v1739_v32  ;;  %v8164_v54 = vld [vmem:[%s15535_s3 + $0x1e0] sm:$0xff]  ;;  %v10665_v32 = vpop.f32.mrf.mxu3  ;;  %v10667_v13 = vpop.f32.mrf.mxu2 }
 0x234   :  { %3338 = vmatpush.msrb.mxu2 %v8164_v54  ;;  %v1330_v54 = vsel %vm1269_vm3, %v1327_v59, %v1329_v16  ;;  %v1744_v59 = vrot.slane %v10351_v29, 4  ;;  %v1746_v29 = vrot.slane %v10372_v31, 4 }
 0x237   :  { %v10650_v45 = vpop.f32.mrf.mxu0 }
 0x238   :  { %15850 = vst [vmem:[#allocation105_spill] sm:$0xff] %v10650_v45  ;;  %v10657_v46 = vpop.f32.mrf.mxu1 }
 0x239   :  { %15851 = vst [vmem:[#allocation106_spill] sm:$0xff] %v10657_v46  ;;  %v1743_v46 = vsel %vm1714_vm4, %v1740_v26, %v1742_v36 }
 0x23a   :  { %8054 = vmatmul.msk.f32.gmra.mxu3 %vm218_vm1, %v1328_v34  ;;  %8094 = vmatmul.msk.f32.gmra.mxu0 %vm218_vm1, %v1741_v49 }
 0x23b   :  { %8022 = vmatmul.msk.f32.gmra.mxu2 %vm218_vm1, %v1328_v34  ;;  %8126 = vmatmul.msk.f32.gmra.mxu1 %vm218_vm1, %v1741_v49  ;;  %v8167_v34 = vld [vmem:[%s15535_s3 + $0x1f8] sm:$0xff]  ;;  %v10694_v40 = vpop.f32.mrf.mxu3 }
 0x23c   :  { %3563 = vmatpush.msrb.mxu0 %v8167_v34  ;;  %v8162_v34 = vld [vmem:[%s15535_s3 + $0x1d0] sm:$0xff] }
 0x23d   :  { %3339 = vmatpush.msrb.mxu2 %v8162_v34  ;;  %v8165_v34 = vld [vmem:[%s15535_s3 + $0x1e8] sm:$0xff] }
 0x23e   :  { %3564 = vmatpush.msrb.mxu0 %v8165_v34 }
 0x23f   :  { %v10669_v20 = vpop.f32.mrf.mxu0 }
 0x240   :  { %15852 = vst [vmem:[#allocation107_spill] sm:$0xff] %v10669_v20  ;;  %v10679_v49 = vpop.f32.mrf.mxu1  ;;  %v1332_v20 = vsel %vm1269_vm3, %v1329_v16, %v1331_v0 }
 0x241   :  { %15853 = vst [vmem:[#allocation108_spill] sm:$0xff] %v10679_v49  ;;  %v1745_v49 = vsel %vm1714_vm4, %v1742_v36, %v1744_v59  ;;  %v1334_v36 = vsel %vm1269_vm3, %v1331_v0, %v1333_v21  ;;  %v1748_v0 = vrot.slane %v10392_v14, 4  ;;  %v2134_v21 = vld [vmem:[%s15536_s2] sm:$0x3]  ;;  %vm7724_vm3 = vcmask 80896  }
 0x242   :  { %8055 = vmatmul.msk.f32.gmra.mxu3 %vm218_vm1, %v1330_v54  ;;  %8095 = vmatmul.msk.f32.gmra.mxu0 %vm218_vm1, %v1743_v46 }
 0x243   :  { %8023 = vmatmul.msk.f32.gmra.mxu2 %vm218_vm1, %v1330_v54  ;;  %8127 = vmatmul.msk.f32.gmra.mxu1 %vm218_vm1, %v1743_v46  ;;  %v10698_v46 = vpop.f32.mrf.mxu2  ;;  %v1747_v54 = vsel %vm1714_vm4, %v1744_v59, %v1746_v29  ;;  %v1749_v34 = vsel %vm1714_vm4, %v1746_v29, %v1748_v0  ;;  %v1750_v29 = vrot.slane %v10421_v52, 4 }
 0x247   :  { %v10687_v26 = vpop.f32.mrf.mxu0 }
 0x248   :  { %15854 = vst [vmem:[#allocation109_spill] sm:$0xff] %v10687_v26  ;;  %v10696_v45 = vpop.f32.mrf.mxu1 }
 0x249   :  { %15855 = vst [vmem:[#allocation110_spill] sm:$0xff] %v10696_v45 }
 0x24a   :  { %8056 = vmatmul.msk.f32.gmra.mxu3 %vm218_vm1, %v1332_v20  ;;  %8096 = vmatmul.msk.f32.gmra.mxu0 %vm218_vm1, %v1745_v49 }
 0x24b   :  { %8024 = vmatmul.msk.f32.gmra.mxu2 %vm218_vm1, %v1332_v20  ;;  %8128 = vmatmul.msk.f32.gmra.mxu1 %vm218_vm1, %v1745_v49  ;;  %v8183_v20 = vld [vmem:[%s15535_s3 + $0x278] sm:$0xff]  ;;  %v10718_v49 = vpop.f32.mrf.mxu3  ;;  %v10722_v31 = vpop.f32.mrf.mxu2 }
 0x24c   :  { %3684 = vmatpush.msrb.mxu1 %v8183_v20  ;;  %v8160_v20 = vld [vmem:[%s15535_s3 + $0x1c0] sm:$0xff] }
 0x24d   :  { %3340 = vmatpush.msrb.mxu2 %v8160_v20  ;;  %v1751_v20 = vsel %vm1714_vm4, %v1748_v0, %v1750_v29  ;;  %v1752_v0 = vrot.slane %v10446_v50, 4 }
 0x24f   :  { %v10706_v16 = vpop.f32.mrf.mxu0  ;;  %v1753_v8 = vsel %vm1714_vm4, %v1750_v29, %v1752_v0 }
 0x250   :  { %15856 = vst [vmem:[#allocation111_spill] sm:$0xff] %v10706_v16  ;;  %v10716_v45 = vpop.f32.mrf.mxu1 }
 0x251   :  { %15857 = vst [vmem:[#allocation112_spill] sm:$0xff] %v10716_v45 }
 0x252   :  { %8057 = vmatmul.msk.f32.gmra.mxu3 %vm218_vm1, %v1334_v36  ;;  %8097 = vmatmul.msk.f32.gmra.mxu0 %vm218_vm1, %v1747_v54 }
 0x253   :  { %8025 = vmatmul.msk.f32.gmra.mxu2 %vm218_vm1, %v1334_v36  ;;  %8129 = vmatmul.msk.f32.gmra.mxu1 %vm218_vm1, %v1747_v54  ;;  %v10735_v36 = vperm.slane %v2134_v21, 0  ;;  %v10739_v54 = vperm.slane %v2134_v21, 1 }
 0x257   :  { %v1861_v59 = vpop.f32.mrf.mxu0 }
 0x258   :  { %v1974_v45 = vpop.f32.mrf.mxu1  ;;  %v2070_v16 = vadd.f32 %v1861_v59, %v10431_v43  ;;  %v8163_v43 = vld [vmem:[%s15535_s3 + $0x1d8] sm:$0xff] }
 0x259   :  { %v2071_v14 = vadd.f32 %v1974_v45, %v10429_v10  ;;  %3565 = vmatpush.msrb.mxu0 %v8163_v43 }
 0x25a   :  { %8098 = vmatmul.msk.f32.gmra.mxu0 %vm218_vm1, %v1749_v34  ;;  %v2140_v26 = vadd.f32 %v10735_v36, %v2070_v16 }
 0x25b   :  { %8130 = vmatmul.msk.f32.gmra.mxu1 %vm218_vm1, %v1749_v34  ;;  %v2141_v6 = vadd.f32 %v10739_v54, %v2071_v14  ;;  %v1184_v14 = vadd.f32 %v10030_v12, %v9649_v18  ;;  %v8158_v12 = vld [vmem:[%s15535_s3 + $0x1b0] sm:$0xff] }
 0x25c   :  { %v2204_v21 = vmax.f32 %v2140_v26, 0.0  ;;  %3341 = vmatpush.msrb.mxu2 %v8158_v12 }
 0x25d   :  { %v2205_v16 = vmax.f32 %v2141_v6, 0.0  ;;  %v1629_v43 = vadd.f32 %v10604_v63, %v1184_v14 }
 0x25e   :  { %v2332_v6 = vrot.slane %v2204_v21, 1 }
 0x25f   :  { %v1864_v57 = vpop.f32.mrf.mxu0 }
 0x260   :  { %v2072_v59 = vadd.f32 %v1864_v57, %v10456_v30  ;;  %v1977_v10 = vpop.f32.mrf.mxu1  ;;  %v10758_v30 = vpop.f32.mrf.mxu2 }
 0x261   :  { %v2073_v45 = vadd.f32 %v1977_v10, %v10454_v28  ;;  %v1185_v28 = vadd.f32 %v10037_v3, %v9646_v15 }
 0x262   :  { %v2142_v52 = vadd.f32 %v10735_v36, %v2072_v59  ;;  %8099 = vmatmul.msk.f32.gmra.mxu0 %vm218_vm1, %v1751_v20  ;;  %v10763_v59 = vpop.f32.mrf.mxu3 }
 0x263   :  { %v2143_v34 = vadd.f32 %v10739_v54, %v2073_v45  ;;  %8131 = vmatmul.msk.f32.gmra.mxu1 %vm218_vm1, %v1751_v20  ;;  %v1630_v20 = vadd.f32 %v10600_v7, %v1185_v28  ;;  %v2335_v45 = vrot.slane %v2205_v16, 1 }
 0x264   :  { %v2206_v57 = vmax.f32 %v2142_v52, 0.0 }
 0x265   :  { %v2207_v26 = vmax.f32 %v2143_v34, 0.0 }
 0x266   :  { %v2333_v10 = vrot.slane %v2206_v57, 1 }
 0x267   :  { %v1867_v50 = vpop.f32.mrf.mxu0  ;;  %v2336_v18 = vrot.slane %v2207_v26, 1 }
 0x268   :  { %v2074_v52 = vadd.f32 %v1867_v50, %v1629_v43  ;;  %v1980_v15 = vpop.f32.mrf.mxu1  ;;  %v2334_v3 = vsel %vm152_vm0, %v2332_v6, %v2333_v10  ;;  %v1754_v43 = vrot.slane %v10480_v47, 4  ;;  %v1186_v6 = vadd.f32 %v10056_v37, %v9673_v33  ;;  %v10786_v12 = vpop.f32.mrf.mxu2  ;;  %v8161_v33 = vld [vmem:[%s15535_s3 + $0x1c8] sm:$0xff] }
 0x269   :  { %v2075_v63 = vadd.f32 %v1980_v15, %v1630_v20  ;;  %v10771_v34 = vmax.f32 %v2204_v21, %v2334_v3  ;;  %v2337_v14 = vsel %vm152_vm0, %v2335_v45, %v2336_v18  ;;  %v1187_v21 = vadd.f32 %v10060_v24, %v9670_v60  ;;  %3566 = vmatpush.msrb.mxu0 %v8161_v33 }
 0x26a   :  { %v2144_v7 = vadd.f32 %v10735_v36, %v2074_v52  ;;  %8100 = vmatmul.msk.f32.gmra.mxu0 %vm218_vm1, %v1753_v8  ;;  %v10776_v29 = vmax.f32 %v2205_v16, %v2337_v14  ;;  %v1631_v50 = vadd.f32 %v10628_v56, %v1186_v6  ;;  %v10793_v37 = vpop.f32.mrf.mxu3 }
 0x26b   :  { %v2145_v28 = vadd.f32 %v10739_v54, %v2075_v63  ;;  %8132 = vmatmul.msk.f32.gmra.mxu1 %vm218_vm1, %v1753_v8  ;;  %v1632_v52 = vadd.f32 %v10624_v41, %v1187_v21  ;;  %v1755_v8 = vsel %vm1714_vm4, %v1752_v0, %v1754_v43 }
 0x26c   :  { %v2208_v20 = vmax.f32 %v2144_v7, 0.0 }
 0x26d   :  { %v2209_v45 = vmax.f32 %v2145_v28, 0.0 }
 0x26e   :  { %v2338_v16 = vrot.slane %v2208_v20, 1 }
 0x26f   :  { %v2340_v15 = vrot.slane %v2209_v45, 1  ;;  %v1870_v3 = vpop.f32.mrf.mxu0 }
 0x270   :  { %v2076_v47 = vadd.f32 %v1870_v3, %v1631_v50  ;;  %v1983_v60 = vpop.f32.mrf.mxu1  ;;  %v2339_v24 = vsel %vm152_vm0, %v2333_v10, %v2338_v16  ;;  %v1756_v10 = vrot.slane %v10498_v38, 4 }
 0x271   :  { %v2077_v56 = vadd.f32 %v1983_v60, %v1632_v52  ;;  %v2341_v63 = vsel %vm152_vm0, %v2336_v18, %v2340_v15  ;;  %v10797_v14 = vmax.f32 %v2206_v57, %v2339_v24  ;;  %v1188_v18 = vadd.f32 %v10082_v61, %v9697_v42  ;;  %v8180_v61 = vld [vmem:[%s15535_s3 + $0x260] sm:$0xff] }
 0x272   :  { %v2146_v41 = vadd.f32 %v10735_v36, %v2076_v47  ;;  %8101 = vmatmul.msk.f32.gmra.mxu0 %vm218_vm1, %v1755_v8  ;;  %v10801_v0 = vmax.f32 %v2207_v26, %v2341_v63  ;;  %v1189_v26 = vadd.f32 %v10086_v25, %v9694_v9  ;;  %v1757_v42 = vsel %vm1714_vm4, %v1754_v43, %v1756_v10  ;;  %v8156_v9 = vld [vmem:[%s15535_s3 + $0x1a0] sm:$0xff]  ;;  %v10824_v25 = vpop.f32.mrf.mxu2  ;;  %v10830_v60 = vpop.f32.mrf.mxu3 }
 0x273   :  { %v2147_v7 = vadd.f32 %v10739_v54, %v2077_v56  ;;  %8133 = vmatmul.msk.f32.gmra.mxu1 %vm218_vm1, %v1755_v8  ;;  %v8751_v28 = vpack.i.bf16 %v10797_v14, %v10771_v34  ;;  %v1633_v21 = vadd.f32 %v10648_v5, %v1188_v18  ;;  %3459 = vmatpush.msrb.mxu3 %v8180_v61 }
 0x274   :  { %v2210_v57 = vmax.f32 %v2146_v41, 0.0  ;;  %2662 = vrot.lane.b32.xlu1 %v10801_v0, %s8860_s14  ;;  %v1634_v52 = vadd.f32 %v10646_v62, %v1189_v26  ;;  %3342 = vmatpush.msrb.mxu2 %v8156_v9  ;;  %v1190_v41 = vadd.f32 %v10108_v48, %v9718_v55  ;;  %v8159_v26 = vld [vmem:[%s15535_s3 + $0x1b8] sm:$0xff]  ;;  %v15858_v9 = vld [vmem:[#allocation20_spill] sm:$0xff] }
 0x275   :  { %v2211_v6 = vmax.f32 %v2147_v7, 0.0  ;;  %8752 = vrot.lane.b32.xlu0 %v8751_v28, %s8860_s14  ;;  %3567 = vmatpush.msrb.mxu0 %v8159_v26 }
 0x276   :  { %v2342_v50 = vrot.slane %v2210_v57, 1  ;;  %v1635_v7 = vadd.f32 %v10667_v13, %v1190_v41 }
 0x277   :  { %v2344_v38 = vrot.slane %v2211_v6, 1  ;;  %v1873_v3 = vpop.f32.mrf.mxu0 }
 0x278   :  { %v2078_v8 = vadd.f32 %v1873_v3, %v1633_v21  ;;  %v1986_v33 = vpop.f32.mrf.mxu1  ;;  %v2343_v5 = vsel %vm152_vm0, %v2338_v16, %v2342_v50  ;;  %v1758_v16 = vrot.slane %v10521_v11, 4 }
 0x279   :  { %v2079_v62 = vadd.f32 %v1986_v33, %v1634_v52  ;;  %v2345_v47 = vsel %vm152_vm0, %v2340_v15, %v2344_v38  ;;  %v10828_v43 = vmax.f32 %v2208_v20, %v2343_v5  ;;  %v1191_v20 = vadd.f32 %v10112_v2, %v9715_v23  ;;  %v15860_v5 = vld [vmem:[#allocation19_spill] sm:$0xff] }
 0x27a   :  { %v2148_v24 = vadd.f32 %v10735_v36, %v2078_v8  ;;  %8102 = vmatmul.msk.f32.gmra.mxu0 %vm218_vm1, %v1757_v42  ;;  %v10834_v56 = vmax.f32 %v2209_v45, %v2345_v47  ;;  %v1759_v18 = vsel %vm1714_vm4, %v1756_v10, %v1758_v16  ;;  %v15859_v8 = vld [vmem:[#allocation51_spill] sm:$0xff]  ;;  %v10870_v33 = vpop.f32.mrf.mxu3 }
 0x27b   :  { %v2149_v63 = vadd.f32 %v10739_v54, %v2079_v62  ;;  %8134 = vmatmul.msk.f32.gmra.mxu1 %vm218_vm1, %v1757_v42  ;;  %v1636_v28 = vadd.f32 %v10665_v32, %v1191_v20  ;;  %v10859_v42 = vpop.f32.mrf.mxu2  ;;  %v15861_v62 = vld [vmem:[#allocation52_spill] sm:$0xff] }
 0x27c   :  { %v2212_v15 = vmax.f32 %v2148_v24, 0.0  ;;  %2666 = vrot.lane.b32.xlu2 %v10834_v56, %s8860_s14  ;;  %2664 = vrot.lane.b32.xlu1 %v10828_v43, %s8860_s14  ;;  %v1193_v47 = vadd.f32 %v15861_v62, %v15860_v5 }
 0x27d   :  { %v2213_v45 = vmax.f32 %v2149_v63, 0.0  ;;  %2658 = vrot.lane.b32.xlu0 %v10776_v29, %s8860_s14 }
 0x27e   :  { %v2346_v11 = vrot.slane %v2212_v15, 1 }
 0x27f   :  { %v2348_v55 = vrot.slane %v2213_v45, 1  ;;  %v1876_v48 = vpop.f32.mrf.mxu0 }
 0x280   :  { %v2080_v21 = vadd.f32 %v1876_v48, %v1635_v7  ;;  %v1989_v52 = vpop.f32.mrf.mxu1  ;;  %v2347_v23 = vsel %vm152_vm0, %v2342_v50, %v2346_v11  ;;  %v1760_v50 = vrot.slane %v10538_v27, 4  ;;  %v1638_v27 = vadd.f32 %v10694_v40, %v1193_v47  ;;  %v8154_v48 = vld [vmem:[%s15535_s3 + $0x190] sm:$0xff] }
 0x281   :  { %v2081_v2 = vadd.f32 %v1989_v52, %v1636_v28  ;;  %v10856_v3 = vmax.f32 %v2210_v57, %v2347_v23  ;;  %v2349_v13 = vsel %vm152_vm0, %v2344_v38, %v2348_v55  ;;  %v1192_v57 = vadd.f32 %v15859_v8, %v15858_v9  ;;  %v8181_v28 = vld [vmem:[%s15535_s3 + $0x268] sm:$0xff]  ;;  %3343 = vmatpush.msrb.mxu2 %v8154_v48  ;;  %v15865_v8 = vld [vmem:[#allocation56_spill] sm:$0xff] }
 0x282   :  { %v2150_v32 = vadd.f32 %v10735_v36, %v2080_v21  ;;  %8103 = vmatmul.msk.f32.gmra.mxu0 %vm218_vm1, %v1759_v18  ;;  %v10863_v10 = vmax.f32 %v2211_v6, %v2349_v13  ;;  %v1761_v7 = vsel %vm1714_vm4, %v1758_v16, %v1760_v50  ;;  %3685 = vmatpush.msrb.mxu1 %v8181_v28  ;;  %v15863_v13 = vld [vmem:[#allocation55_spill] sm:$0xff]  ;;  %v10911_v47 = vpop.f32.mrf.mxu3 }
 0x283   :  { %v2151_v61 = vadd.f32 %v10739_v54, %v2081_v2  ;;  %8135 = vmatmul.msk.f32.gmra.mxu1 %vm218_vm1, %v1759_v18  ;;  %v1637_v24 = vadd.f32 %v10698_v46, %v1192_v57  ;;  %v8157_v48 = vld [vmem:[%s15535_s3 + $0x1a8] sm:$0xff] }
 0x284   :  { %v2214_v38 = vmax.f32 %v2150_v32, 0.0  ;;  %2668 = vrot.lane.b32.xlu2 %v10856_v3, %s8860_s14  ;;  %3568 = vmatpush.msrb.mxu0 %v8157_v48 }
 0x285   :  { %v2215_v6 = vmax.f32 %v2151_v61, 0.0  ;;  %2670 = vrot.lane.b32.xlu0 %v10863_v10, %s8860_s14  ;;  %v10904_v61 = vpop.f32.mrf.mxu2 }
 0x286   :  { %v2350_v63 = vrot.slane %v2214_v38, 1 }
 0x287   :  { %v2352_v41 = vrot.slane %v2215_v6, 1  ;;  %v1879_v20 = vpop.f32.mrf.mxu0 }
 0x288   :  { %v2082_v18 = vadd.f32 %v1879_v20, %v1637_v24  ;;  %v1992_v26 = vpop.f32.mrf.mxu1  ;;  %v2351_v21 = vsel %vm152_vm0, %v2346_v11, %v2350_v63  ;;  %v8851_v11 = vld [vmem:[%s15534_s0 + $0xc0] sm:$0xff] }
 0x289   :  { %v2083_v46 = vadd.f32 %v1992_v26, %v1638_v27  ;;  %v2353_v40 = vsel %vm152_vm0, %v2348_v55, %v2352_v41  ;;  %v10889_v52 = vmax.f32 %v2212_v15, %v2351_v21  ;;  %v1762_v55 = vrot.slane %v8851_v11, 4  ;;  %v15862_v15 = vld [vmem:[#allocation22_spill] sm:$0xff] }
 0x28a   :  { %v2152_v16 = vadd.f32 %v10735_v36, %v2082_v18  ;;  %8104 = vmatmul.msk.f32.gmra.mxu0 %vm218_vm1, %v1761_v7  ;;  %v10893_v23 = vmax.f32 %v2213_v45, %v2353_v40  ;;  %v1194_v32 = vadd.f32 %v15863_v13, %v15862_v15  ;;  %v15864_v45 = vld [vmem:[#allocation21_spill] sm:$0xff]  ;;  %v15869_v13 = vld [vmem:[#allocation60_spill] sm:$0xff] }
 0x28b   :  { %v2153_v2 = vadd.f32 %v10739_v54, %v2083_v46  ;;  %8136 = vmatmul.msk.f32.gmra.mxu1 %vm218_vm1, %v1761_v7  ;;  %2672 = vrot.lane.b32.xlu1 %v10889_v52, %s8860_s14  ;;  %v1195_v57 = vadd.f32 %v15865_v8, %v15864_v45  ;;  %v1763_v28 = vsel %vm1714_vm4, %v1760_v50, %v1762_v55 }
 0x28c   :  { %v2216_v9 = vmax.f32 %v2152_v16, 0.0  ;;  %2674 = vrot.lane.b32.xlu2 %v10893_v23, %s8860_s14  ;;  %v1639_v62 = vadd.f32 %v10722_v31, %v1194_v32 }
 0x28d   :  { %v2217_v5 = vmax.f32 %v2153_v2, 0.0  ;;  %v1640_v27 = vadd.f32 %v10718_v49, %v1195_v57  ;;  %v15867_v2 = vld [vmem:[#allocation59_spill] sm:$0xff]  ;;  %v10940_v57 = vpop.f32.mrf.mxu2 }
 0x28e   :  { %v2354_v24 = vrot.slane %v2216_v9, 1 }
 0x28f   :  { %v2356_v20 = vrot.slane %v2217_v5, 1  ;;  %v1882_v7 = vpop.f32.mrf.mxu0 }
 0x290   :  { %v2084_v18 = vadd.f32 %v1882_v7, %v1639_v62  ;;  %v1995_v26 = vpop.f32.mrf.mxu1  ;;  %v2355_v21 = vsel %vm152_vm0, %v2350_v63, %v2354_v24  ;;  %v8852_v63 = vld [vmem:[%s15534_s0 + $0xc8] sm:$0xff] }
 0x291   :  { %v2085_v46 = vadd.f32 %v1995_v26, %v1640_v27  ;;  %v2357_v31 = vsel %vm152_vm0, %v2352_v41, %v2356_v20  ;;  %v10920_v40 = vmax.f32 %v2214_v38, %v2355_v21  ;;  %v1764_v41 = vrot.slane %v8852_v63, 4  ;;  %v15866_v38 = vld [vmem:[#allocation24_spill] sm:$0xff]  ;;  %v10947_v26 = vpop.f32.mrf.mxu3 }
 0x292   :  { %v2154_v49 = vadd.f32 %v10735_v36, %v2084_v18  ;;  %8105 = vmatmul.msk.f32.gmra.mxu0 %vm218_vm1, %v1763_v28  ;;  %v10924_v16 = vmax.f32 %v2215_v6, %v2357_v31  ;;  %v1196_v11 = vadd.f32 %v15867_v2, %v15866_v38  ;;  %v15868_v6 = vld [vmem:[#allocation23_spill] sm:$0xff]  ;;  %v8152_v18 = vld [vmem:[%s15535_s3 + $0x180] sm:$0xff] }
 0x293   :  { %v2155_v50 = vadd.f32 %v10739_v54, %v2085_v46  ;;  %8137 = vmatmul.msk.f32.gmra.mxu1 %vm218_vm1, %v1763_v28  ;;  %2676 = vrot.lane.b32.xlu0 %v10920_v40, %s8860_s14  ;;  %v1197_v32 = vadd.f32 %v15869_v13, %v15868_v6  ;;  %v1765_v48 = vsel %vm1714_vm4, %v1762_v55, %v1764_v41  ;;  %v15871_v38 = vld [vmem:[#allocation63_spill] sm:$0xff]  ;;  %v15873_v6 = vld [vmem:[#allocation64_spill] sm:$0xff] }
 0x294   :  { %v2218_v15 = vmax.f32 %v2154_v49, 0.0  ;;  %2678 = vrot.lane.b32.xlu1 %v10924_v16, %s8860_s14  ;;  %v1641_v8 = vadd.f32 %v10758_v30, %v1196_v11  ;;  %3344 = vmatpush.msrb.mxu2 %v8152_v18 }
 0x295   :  { %v2219_v45 = vmax.f32 %v2155_v50, 0.0  ;;  %v1642_v27 = vadd.f32 %v10763_v59, %v1197_v32 }
 0x296   :  { %v2358_v62 = vrot.slane %v2218_v15, 1 }
 0x297   :  { %v2360_v7 = vrot.slane %v2219_v45, 1  ;;  %v1885_v28 = vpop.f32.mrf.mxu0 }
 0x298   :  { %v2086_v21 = vadd.f32 %v1885_v28, %v1641_v8  ;;  %v1998_v46 = vpop.f32.mrf.mxu1  ;;  %v2359_v31 = vsel %vm152_vm0, %v2354_v24, %v2358_v62  ;;  %v8853_v24 = vld [vmem:[%s15534_s0 + $0xd0] sm:$0xff] }
 0x299   :  { %v2087_v30 = vadd.f32 %v1998_v46, %v1642_v27  ;;  %v2361_v49 = vsel %vm152_vm0, %v2356_v20, %v2360_v7  ;;  %v10951_v50 = vmax.f32 %v2216_v9, %v2359_v31  ;;  %v1766_v20 = vrot.slane %v8853_v24, 4  ;;  %v15870_v9 = vld [vmem:[#allocation26_spill] sm:$0xff]  ;;  %v8155_v46 = vld [vmem:[%s15535_s3 + $0x198] sm:$0xff]  ;;  %v10976_v31 = vpop.f32.mrf.mxu2 }
 0x29a   :  { %v2156_v59 = vadd.f32 %v10735_v36, %v2086_v21  ;;  %8106 = vmatmul.msk.f32.gmra.mxu0 %vm218_vm1, %v1765_v48  ;;  %v10955_v55 = vmax.f32 %v2217_v5, %v2361_v49  ;;  %v1198_v2 = vadd.f32 %v15871_v38, %v15870_v9  ;;  %v15872_v5 = vld [vmem:[#allocation25_spill] sm:$0xff] }
 0x29b   :  { %v2157_v63 = vadd.f32 %v10739_v54, %v2087_v30  ;;  %8138 = vmatmul.msk.f32.gmra.mxu1 %vm218_vm1, %v1765_v48  ;;  %2680 = vrot.lane.b32.xlu2 %v10951_v50, %s8860_s14  ;;  %v1199_v13 = vadd.f32 %v15873_v6, %v15872_v5  ;;  %v1767_v21 = vsel %vm1714_vm4, %v1764_v41, %v1766_v20 }
 0x29c   :  { %v2220_v11 = vmax.f32 %v2156_v59, 0.0  ;;  %2682 = vrot.lane.b32.xlu0 %v10955_v55, %s8860_s14  ;;  %v1643_v8 = vadd.f32 %v10786_v12, %v1198_v2  ;;  %3569 = vmatpush.msrb.mxu0 %v8155_v46  ;;  %v15875_v2 = vld [vmem:[#allocation67_spill] sm:$0xff] }
 0x29d   :  { %v2221_v32 = vmax.f32 %v2157_v63, 0.0  ;;  %v1644_v28 = vadd.f32 %v10793_v37, %v1199_v13  ;;  %v10982_v37 = vpop.f32.mrf.mxu3  ;;  %v15877_v13 = vld [vmem:[#allocation68_spill] sm:$0xff] }
 0x29e   :  { %v2362_v27 = vrot.slane %v2220_v11, 1 }
 0x29f   :  { %v2364_v48 = vrot.slane %v2221_v32, 1  ;;  %v1888_v18 = vpop.f32.mrf.mxu0 }
 0x2a0   :  { %v2088_v30 = vadd.f32 %v1888_v18, %v1643_v8  ;;  %v2001_v49 = vpop.f32.mrf.mxu1  ;;  %v2363_v59 = vsel %vm152_vm0, %v2358_v62, %v2362_v27 }
 0x2a1   :  { %v2089_v63 = vadd.f32 %v2001_v49, %v1644_v28  ;;  %v2365_v12 = vsel %vm152_vm0, %v2360_v7, %v2364_v48  ;;  %v10980_v24 = vmax.f32 %v2218_v15, %v2363_v59  ;;  %v8854_v15 = vld [vmem:[%s15534_s0 + $0xd8] sm:$0xff]  ;;  %v15874_v7 = vld [vmem:[#allocation28_spill] sm:$0xff] }
 0x2a2   :  { %v2158_v41 = vadd.f32 %v10735_v36, %v2088_v30  ;;  %8107 = vmatmul.msk.f32.gmra.mxu0 %vm218_vm1, %v1767_v21  ;;  %v10986_v9 = vmax.f32 %v2219_v45, %v2365_v12  ;;  %v1768_v62 = vrot.slane %v8854_v15, 4  ;;  %v1200_v5 = vadd.f32 %v15875_v2, %v15874_v7  ;;  %v15876_v45 = vld [vmem:[#allocation27_spill] sm:$0xff]  ;;  %v8150_v12 = vld [vmem:[%s15535_s3 + $0x170] sm:$0xff] }
 0x2a3   :  { %v2159_v38 = vadd.f32 %v10739_v54, %v2089_v63  ;;  %8139 = vmatmul.msk.f32.gmra.mxu1 %vm218_vm1, %v1767_v21  ;;  %2684 = vrot.lane.b32.xlu1 %v10980_v24, %s8860_s14  ;;  %v1201_v8 = vadd.f32 %v15877_v13, %v15876_v45  ;;  %v8178_v63 = vld [vmem:[%s15535_s3 + $0x250] sm:$0xff]  ;;  %v15879_v13 = vld [vmem:[#allocation71_spill] sm:$0xff] }
 0x2a4   :  { %v2222_v6 = vmax.f32 %v2158_v41, 0.0  ;;  %2686 = vrot.lane.b32.xlu2 %v10986_v9, %s8860_s14  ;;  %v1645_v18 = vadd.f32 %v10824_v25, %v1200_v5  ;;  %v1769_v59 = vsel %vm1714_vm4, %v1766_v20, %v1768_v62  ;;  %3460 = vmatpush.msrb.mxu3 %v8178_v63  ;;  %v11014_v20 = vpop.f32.mrf.mxu2 }
 0x2a5   :  { %v2223_v28 = vmax.f32 %v2159_v38, 0.0  ;;  %v1646_v46 = vadd.f32 %v10830_v60, %v1201_v8  ;;  %3345 = vmatpush.msrb.mxu2 %v8150_v12 }
 0x2a6   :  { %v2366_v21 = vrot.slane %v2222_v6, 1 }
 0x2a7   :  { %v2368_v30 = vrot.slane %v2223_v28, 1  ;;  %v1891_v49 = vpop.f32.mrf.mxu0 }
 0x2a8   :  { %v2090_v41 = vadd.f32 %v1891_v49, %v1645_v18  ;;  %v2004_v15 = vpop.f32.mrf.mxu1  ;;  %v2367_v38 = vsel %vm152_vm0, %v2362_v27, %v2366_v21  ;;  %v11029_v18 = vpop.f32.mrf.mxu3  ;;  %v15881_v49 = vld [vmem:[#allocation72_spill] sm:$0xff] }
 0x2a9   :  { %v2091_v25 = vadd.f32 %v2004_v15, %v1646_v46  ;;  %v2369_v60 = vsel %vm152_vm0, %v2364_v48, %v2368_v30  ;;  %v11012_v7 = vmax.f32 %v2220_v11, %v2367_v38  ;;  %v8855_v11 = vld [vmem:[%s15534_s0 + $0xe0] sm:$0xff] }
 0x2aa   :  { %v2160_v2 = vadd.f32 %v10735_v36, %v2090_v41  ;;  %8108 = vmatmul.msk.f32.gmra.mxu0 %vm218_vm1, %v1769_v59  ;;  %v11018_v5 = vmax.f32 %v2221_v32, %v2369_v60  ;;  %v1770_v27 = vrot.slane %v8855_v11, 4  ;;  %v15878_v48 = vld [vmem:[#allocation30_spill] sm:$0xff]  ;;  %v15880_v32 = vld [vmem:[#allocation29_spill] sm:$0xff] }
 0x2ab   :  { %v2161_v45 = vadd.f32 %v10739_v54, %v2091_v25  ;;  %8140 = vmatmul.msk.f32.gmra.mxu1 %vm218_vm1, %v1769_v59  ;;  %2688 = vrot.lane.b32.xlu0 %v11012_v7, %s8860_s14  ;;  %v1202_v8 = vadd.f32 %v15879_v13, %v15878_v48  ;;  %v1203_v59 = vadd.f32 %v15881_v49, %v15880_v32  ;;  %v15884_v49 = vld [vmem:[#allocation75_spill] sm:$0xff] }
 0x2ac   :  { %v2224_v46 = vmax.f32 %v2160_v2, 0.0  ;;  %2690 = vrot.lane.b32.xlu1 %v11018_v5, %s8860_s14  ;;  %v1771_v60 = vsel %vm1714_vm4, %v1768_v62, %v1770_v27  ;;  %v8153_v2 = vld [vmem:[%s15535_s3 + $0x188] sm:$0xff] }
 0x2ad   :  { %v2225_v63 = vmax.f32 %v2161_v45, 0.0  ;;  %v1647_v12 = vadd.f32 %v10859_v42, %v1202_v8  ;;  %v1648_v15 = vadd.f32 %v10870_v33, %v1203_v59  ;;  %3570 = vmatpush.msrb.mxu0 %v8153_v2 }
 0x2ae   :  { %v2370_v41 = vrot.slane %v2224_v46, 1 }
 0x2af   :  { %v2372_v38 = vrot.slane %v2225_v63, 1  ;;  %v1894_v25 = vpop.f32.mrf.mxu0 }
 0x2b0   :  { %v2092_v11 = vadd.f32 %v1894_v25, %v1647_v12  ;;  %v2007_v48 = vpop.f32.mrf.mxu1  ;;  %v2371_v13 = vsel %vm152_vm0, %v2366_v21, %v2370_v41  ;;  %v8856_v21 = vld [vmem:[%s15534_s0 + $0xe8] sm:$0xff]  ;;  %v11058_v12 = vpop.f32.mrf.mxu2  ;;  %v15886_v25 = vld [vmem:[#allocation76_spill] sm:$0xff] }
 0x2b1   :  { %v2093_v32 = vadd.f32 %v2007_v48, %v1648_v15  ;;  %v2373_v45 = vsel %vm152_vm0, %v2368_v30, %v2372_v38  ;;  %v11043_v42 = vmax.f32 %v2222_v6, %v2371_v13  ;;  %v1772_v30 = vrot.slane %v8856_v21, 4  ;;  %v15883_v6 = vld [vmem:[#allocation32_spill] sm:$0xff]  ;;  %v11065_v48 = vpop.f32.mrf.mxu3 }
 0x2b2   :  { %v2162_v33 = vadd.f32 %v10735_v36, %v2092_v11  ;;  %8109 = vmatmul.msk.f32.gmra.mxu0 %vm218_vm1, %v1771_v60  ;;  %v11047_v8 = vmax.f32 %v2223_v28, %v2373_v45  ;;  %v1204_v59 = vadd.f32 %v15884_v49, %v15883_v6  ;;  %v15885_v28 = vld [vmem:[#allocation31_spill] sm:$0xff]  ;;  %v8148_v49 = vld [vmem:[%s15535_s3 + $0x160] sm:$0xff] }
 0x2b3   :  { %15882 = vst [vmem:[#allocation20_spill] sm:$0xff] %v11043_v42  ;;  %v2163_v62 = vadd.f32 %v10739_v54, %v2093_v32  ;;  %8141 = vmatmul.msk.f32.gmra.mxu1 %vm218_vm1, %v1771_v60  ;;  %2692 = vrot.lane.b32.xlu2 %v11043_v42, %s8860_s14  ;;  %v1205_v60 = vadd.f32 %v15886_v25, %v15885_v28 }
 0x2b4   :  { %v2226_v15 = vmax.f32 %v2162_v33, 0.0  ;;  %2694 = vrot.lane.b32.xlu0 %v11047_v8, %s8860_s14  ;;  %v1649_v11 = vadd.f32 %v10904_v61, %v1204_v59  ;;  %v1773_v6 = vsel %vm1714_vm4, %v1770_v27, %v1772_v30  ;;  %v8179_v33 = vld [vmem:[%s15535_s3 + $0x258] sm:$0xff]  ;;  %3346 = vmatpush.msrb.mxu2 %v8148_v49 }
 0x2b5   :  { %v2227_v2 = vmax.f32 %v2163_v62, 0.0  ;;  %v1650_v32 = vadd.f32 %v10911_v47, %v1205_v60  ;;  %3686 = vmatpush.msrb.mxu1 %v8179_v33  ;;  %v15891_v33 = vld [vmem:[#allocation80_spill] sm:$0xff] }
 0x2b6   :  { %v2374_v13 = vrot.slane %v2226_v15, 1 }
 0x2b7   :  { %v2376_v45 = vrot.slane %v2227_v2, 1  ;;  %v1897_v21 = vpop.f32.mrf.mxu0 }
 0x2b8   :  { %v2094_v62 = vadd.f32 %v1897_v21, %v1649_v11  ;;  %v2010_v28 = vpop.f32.mrf.mxu1  ;;  %v2375_v61 = vsel %vm152_vm0, %v2370_v41, %v2374_v13  ;;  %v8857_v41 = vld [vmem:[%s15534_s0 + $0xf0] sm:$0xff]  ;;  %v15889_v11 = vld [vmem:[#allocation79_spill] sm:$0xff] }
 0x2b9   :  { %v2095_v59 = vadd.f32 %v2010_v28, %v1650_v32  ;;  %v2377_v47 = vsel %vm152_vm0, %v2372_v38, %v2376_v45  ;;  %v11077_v25 = vmax.f32 %v2224_v46, %v2375_v61  ;;  %v1774_v38 = vrot.slane %v8857_v41, 4  ;;  %v15888_v46 = vld [vmem:[#allocation34_spill] sm:$0xff]  ;;  %v11097_v28 = vpop.f32.mrf.mxu2 }
 0x2ba   :  { %v2164_v27 = vadd.f32 %v10735_v36, %v2094_v62  ;;  %8110 = vmatmul.msk.f32.gmra.mxu0 %vm218_vm1, %v1773_v6  ;;  %v11081_v60 = vmax.f32 %v2225_v63, %v2377_v47  ;;  %v1206_v32 = vadd.f32 %v15889_v11, %v15888_v46  ;;  %v15890_v63 = vld [vmem:[#allocation33_spill] sm:$0xff]  ;;  %v11104_v46 = vpop.f32.mrf.mxu3 }
 0x2bb   :  { %15887 = vst [vmem:[#allocation51_spill] sm:$0xff] %v11077_v25  ;;  %v2165_v42 = vadd.f32 %v10739_v54, %v2095_v59  ;;  %8142 = vmatmul.msk.f32.gmra.mxu1 %vm218_vm1, %v1773_v6  ;;  %2696 = vrot.lane.b32.xlu1 %v11077_v25, %s8860_s14  ;;  %v1207_v49 = vadd.f32 %v15891_v33, %v15890_v63 }
 0x2bc   :  { %v2228_v21 = vmax.f32 %v2164_v27, 0.0  ;;  %2698 = vrot.lane.b32.xlu2 %v11081_v60, %s8860_s14  ;;  %v1651_v6 = vadd.f32 %v10940_v57, %v1206_v32  ;;  %v1775_v25 = vsel %vm1714_vm4, %v1772_v30, %v1774_v38  ;;  %v8151_v27 = vld [vmem:[%s15535_s3 + $0x178] sm:$0xff] }
 0x2bd   :  { %v2229_v62 = vmax.f32 %v2165_v42, 0.0  ;;  %v1652_v59 = vadd.f32 %v10947_v26, %v1207_v49  ;;  %3571 = vmatpush.msrb.mxu0 %v8151_v27  ;;  %v15897_v27 = vld [vmem:[#allocation84_spill] sm:$0xff] }
 0x2be   :  { %v2378_v61 = vrot.slane %v2228_v21, 1 }
 0x2bf   :  { %v2380_v47 = vrot.slane %v2229_v62, 1  ;;  %v1900_v41 = vpop.f32.mrf.mxu0 }
 0x2c0   :  { %v2096_v11 = vadd.f32 %v1900_v41, %v1651_v6  ;;  %v2013_v63 = vpop.f32.mrf.mxu1  ;;  %v2379_v42 = vsel %vm152_vm0, %v2374_v13, %v2378_v61  ;;  %v8858_v13 = vld [vmem:[%s15534_s0 + $0xf8] sm:$0xff]  ;;  %v15895_v6 = vld [vmem:[#allocation83_spill] sm:$0xff] }
 0x2c1   :  { %v2097_v57 = vadd.f32 %v2013_v63, %v1652_v59  ;;  %v2381_v32 = vsel %vm152_vm0, %v2376_v45, %v2380_v47  ;;  %v11108_v33 = vmax.f32 %v2226_v15, %v2379_v42  ;;  %v1776_v45 = vrot.slane %v8858_v13, 4  ;;  %v15894_v15 = vld [vmem:[#allocation36_spill] sm:$0xff] }
 0x2c2   :  { %v2166_v26 = vadd.f32 %v10735_v36, %v2096_v11  ;;  %8111 = vmatmul.msk.f32.gmra.mxu0 %vm218_vm1, %v1775_v25  ;;  %v11112_v30 = vmax.f32 %v2227_v2, %v2381_v32  ;;  %v1208_v59 = vadd.f32 %v15895_v6, %v15894_v15  ;;  %v15896_v2 = vld [vmem:[#allocation35_spill] sm:$0xff]  ;;  %v11133_v15 = vpop.f32.mrf.mxu2 }
 0x2c3   :  { %15892 = vst [vmem:[#allocation19_spill] sm:$0xff] %v11108_v33  ;;  %v2167_v49 = vadd.f32 %v10739_v54, %v2097_v57  ;;  %8143 = vmatmul.msk.f32.gmra.mxu1 %vm218_vm1, %v1775_v25  ;;  %2700 = vrot.lane.b32.xlu0 %v11108_v33, %s8860_s14  ;;  %v1209_v11 = vadd.f32 %v15897_v27, %v15896_v2 }
 0x2c4   :  { %15893 = vst [vmem:[#allocation52_spill] sm:$0xff] %v11112_v30  ;;  %v2230_v41 = vmax.f32 %v2166_v26, 0.0  ;;  %2702 = vrot.lane.b32.xlu1 %v11112_v30, %s8860_s14  ;;  %v1653_v25 = vadd.f32 %v10976_v31, %v1208_v59  ;;  %v1777_v13 = vsel %vm1714_vm4, %v1774_v38, %v1776_v45  ;;  %v8146_v26 = vld [vmem:[%s15535_s3 + $0x150] sm:$0xff] }
 0x2c5   :  { %v2231_v63 = vmax.f32 %v2167_v49, 0.0  ;;  %v1654_v57 = vadd.f32 %v10982_v37, %v1209_v11  ;;  %3347 = vmatpush.msrb.mxu2 %v8146_v26  ;;  %v11139_v37 = vpop.f32.mrf.mxu3 }
 0x2c6   :  { %v2382_v42 = vrot.slane %v2230_v41, 1 }
 0x2c7   :  { %v2384_v32 = vrot.slane %v2231_v63, 1  ;;  %v1903_v33 = vpop.f32.mrf.mxu0 }
 0x2c8   :  { %v2098_v6 = vadd.f32 %v1903_v33, %v1653_v25  ;;  %v2016_v30 = vpop.f32.mrf.mxu1  ;;  %v2383_v2 = vsel %vm152_vm0, %v2378_v61, %v2382_v42  ;;  %v1778_v61 = vrot.slane %v15829_v22, 4  ;;  %v15901_v25 = vld [vmem:[#allocation37_spill] sm:$0xff] }
 0x2c9   :  { %v2099_v49 = vadd.f32 %v2016_v30, %v1654_v57  ;;  %v2385_v31 = vsel %vm152_vm0, %v2380_v47, %v2384_v32  ;;  %v11137_v59 = vmax.f32 %v2228_v21, %v2383_v2  ;;  %v15899_v47 = vld [vmem:[#allocation38_spill] sm:$0xff]  ;;  %v15900_v21 = vld [vmem:[#allocation87_spill] sm:$0xff]  ;;  %v15902_v57 = vld [vmem:[#allocation88_spill] sm:$0xff] }
 0x2ca   :  { %v2168_v38 = vadd.f32 %v10735_v36, %v2098_v6  ;;  %8112 = vmatmul.msk.f32.gmra.mxu0 %vm218_vm1, %v1777_v13  ;;  %v11143_v27 = vmax.f32 %v2229_v62, %v2385_v31  ;;  %v1210_v33 = vadd.f32 %v15900_v21, %v15899_v47  ;;  %v1211_v62 = vadd.f32 %v15902_v57, %v15901_v25  ;;  %v15904_v57 = vld [vmem:[#allocation91_spill] sm:$0xff] }
 0x2cb   :  { %15898 = vst [vmem:[#allocation22_spill] sm:$0xff] %v11137_v59  ;;  %v2169_v11 = vadd.f32 %v10739_v54, %v2099_v49  ;;  %8144 = vmatmul.msk.f32.gmra.mxu1 %vm218_vm1, %v1777_v13  ;;  %2704 = vrot.lane.b32.xlu2 %v11137_v59, %s8860_s14  ;;  %v1779_v22 = vsel %vm1714_vm4, %v1776_v45, %v1778_v61 }
 0x2cc   :  { %v2232_v30 = vmax.f32 %v2168_v38, 0.0  ;;  %2706 = vrot.lane.b32.xlu0 %v11143_v27, %s8860_s14  ;;  %v1655_v6 = vadd.f32 %v11014_v20, %v1210_v33  ;;  %v1656_v13 = vadd.f32 %v11029_v18, %v1211_v62  ;;  %v8149_v38 = vld [vmem:[%s15535_s3 + $0x168] sm:$0xff]  ;;  %v11166_v33 = vpop.f32.mrf.mxu2 }
 0x2cd   :  { %v2233_v26 = vmax.f32 %v2169_v11, 0.0  ;;  %3572 = vmatpush.msrb.mxu0 %v8149_v38  ;;  %v15905_v62 = vld [vmem:[#allocation39_spill] sm:$0xff] }
 0x2ce   :  { %v2386_v2 = vrot.slane %v2232_v30, 1 }
 0x2cf   :  { %v2388_v49 = vrot.slane %v2233_v26, 1  ;;  %v1906_v31 = vpop.f32.mrf.mxu0 }
 0x2d0   :  { %v2100_v47 = vadd.f32 %v1906_v31, %v1655_v6  ;;  %v2019_v21 = vpop.f32.mrf.mxu1  ;;  %v2387_v59 = vsel %vm152_vm0, %v2382_v42, %v2386_v2  ;;  %v15903_v42 = vld [vmem:[#allocation40_spill] sm:$0xff]  ;;  %v8147_v31 = vld [vmem:[%s15535_s3 + $0x158] sm:$0xff] }
 0x2d1   :  { %v2101_v25 = vadd.f32 %v2019_v21, %v1656_v13  ;;  %v2389_v11 = vsel %vm152_vm0, %v2384_v32, %v2388_v49  ;;  %v11164_v20 = vmax.f32 %v2230_v41, %v2387_v59  ;;  %v1212_v32 = vadd.f32 %v15904_v57, %v15903_v42  ;;  %v11178_v41 = vpop.f32.mrf.mxu3  ;;  %v15906_v6 = vld [vmem:[#allocation92_spill] sm:$0xff]  ;;  %3573 = vmatpush.msrb.mxu0 %v8147_v31  ;;  %v15908_v31 = vld [vmem:[#allocation42_spill] sm:$0xff] }
 0x2d2   :  { %v2170_v18 = vadd.f32 %v10735_v36, %v2100_v47  ;;  %8113 = vmatmul.msk.f32.gmra.mxu0 %vm218_vm1, %v1779_v22  ;;  %v11170_v45 = vmax.f32 %v2231_v63, %v2389_v11  ;;  %v1213_v63 = vadd.f32 %v15906_v6, %v15905_v62  ;;  %v2979_v11 = vld [vmem:[%s15535_s3 + $0xf0] sm:$0xff] }
 0x2d3   :  { %v2171_v61 = vadd.f32 %v10739_v54, %v2101_v25  ;;  %8145 = vmatmul.msk.f32.gmra.mxu1 %vm218_vm1, %v1779_v22  ;;  %2708 = vrot.lane.b32.xlu1 %v11164_v20, %s8860_s14  ;;  %v1657_v22 = vadd.f32 %v11058_v12, %v1212_v32  ;;  %vm7657_vm1 = vcmask 982016  }
 0x2d4   :  { %v2234_v59 = vmax.f32 %v2170_v18, 0.0  ;;  %2710 = vrot.lane.b32.xlu2 %v11170_v45, %s8860_s14  ;;  %v1658_v47 = vadd.f32 %v11065_v48, %v1213_v63  ;;  %v2989_v18 = vld [vmem:[%s15535_s3 + $0x140] sm:$0x3]  ;;  %3854 = vmatpush.msra.mxu2 %v2979_v11 }
 0x2d5   :  { %v2235_v13 = vmax.f32 %v2171_v61, 0.0  ;;  %8254 = vmatpush.msk.msra.mxu3 %vm3325_vm5, %v2989_v18 }
 0x2d6   :  { %v2390_v38 = vrot.slane %v2234_v59, 1 }
 0x2d7   :  { %v2392_v21 = vrot.slane %v2235_v13, 1  ;;  %v1909_v25 = vpop.f32.mrf.mxu0 }
 0x2d8   :  { %v2102_v61 = vadd.f32 %v1909_v25, %v1657_v22  ;;  %v2022_v42 = vpop.f32.mrf.mxu1  ;;  %v2391_v57 = vsel %vm152_vm0, %v2386_v2, %v2390_v38  ;;  %v1214_v2 = vadd.f32 %v10433_v39, %v15908_v31  ;;  %v11208_v22 = vpop.f32.mrf.mxu2 }
 0x2d9   :  { %v2103_v12 = vadd.f32 %v2022_v42, %v1658_v47  ;;  %v2393_v48 = vsel %vm152_vm0, %v2388_v49, %v2392_v21  ;;  %v11198_v32 = vmax.f32 %v2232_v30, %v2391_v57  ;;  %v15909_v30 = vld [vmem:[#allocation41_spill] sm:$0xff]  ;;  %v11215_v11 = vpop.f32.mrf.mxu3 }
 0x2da   :  { %v2172_v62 = vadd.f32 %v10735_v36, %v2102_v61  ;;  %v11201_v6 = vmax.f32 %v2233_v26, %v2393_v48  ;;  %v1215_v49 = vadd.f32 %v10437_v58, %v15909_v30  ;;  %v1659_v26 = vadd.f32 %v11097_v28, %v1214_v2 }
 0x2db   :  { %15907 = vst [vmem:[#allocation55_spill] sm:$0xff] %v11198_v32  ;;  %v2173_v63 = vadd.f32 %v10739_v54, %v2103_v12  ;;  %2712 = vrot.lane.b32.xlu0 %v11198_v32, %s8860_s14 }
 0x2dc   :  { %v2236_v25 = vmax.f32 %v2172_v62, 0.0  ;;  %2714 = vrot.lane.b32.xlu1 %v11201_v6, %s8860_s14  ;;  %v1660_v61 = vadd.f32 %v11104_v46, %v1215_v49  ;;  %v15910_v46 = vld [vmem:[#allocation44_spill] sm:$0xff] }
 0x2dd   :  { %v2237_v47 = vmax.f32 %v2173_v63, 0.0  ;;  %v1216_v2 = vadd.f32 %v10458_v53, %v15910_v46 }
 0x2de   :  { %v2394_v18 = vrot.slane %v2236_v25, 1 }
 0x2df   :  { %v2396_v42 = vrot.slane %v2237_v47, 1  ;;  %v1912_v57 = vpop.f32.mrf.mxu0  ;;  %v1661_v30 = vadd.f32 %v11133_v15, %v1216_v2  ;;  %v2977_v15 = vld [vmem:[%s15535_s3 + $0xe0] sm:$0xff] }
 0x2e0   :  { %v2104_v39 = vadd.f32 %v1912_v57, %v1659_v26  ;;  %v2025_v12 = vpop.f32.mrf.mxu1  ;;  %v2395_v48 = vsel %vm152_vm0, %v2390_v38, %v2394_v18  ;;  %v11241_v49 = vpop.f32.mrf.mxu2  ;;  %3855 = vmatpush.msra.mxu2 %v2977_v15 }
 0x2e1   :  { %v2105_v62 = vadd.f32 %v2025_v12, %v1660_v61  ;;  %v2397_v31 = vsel %vm152_vm0, %v2392_v21, %v2396_v42  ;;  %v11220_v32 = vmax.f32 %v2234_v59, %v2395_v48  ;;  %v15911_v59 = vld [vmem:[#allocation43_spill] sm:$0xff]  ;;  %v11246_v48 = vpop.f32.mrf.mxu3 }
 0x2e2   :  { %v11223_v58 = vadd.f32 %v10735_v36, %v2104_v39  ;;  %v11225_v28 = vmax.f32 %v2235_v13, %v2397_v31  ;;  %v1217_v21 = vadd.f32 %v10465_v19, %v15911_v59 }
 0x2e3   :  { %v11228_v63 = vadd.f32 %v10739_v54, %v2105_v62  ;;  %2716 = vrot.lane.b32.xlu2 %v11220_v32, %s8860_s14 }
 0x2e4   :  { %v15558_v38 = vmax.f32 %v11223_v58, 0.0  ;;  %2718 = vrot.lane.b32.xlu0 %v11225_v28, %s8860_s14  ;;  %v1662_v53 = vadd.f32 %v11139_v37, %v1217_v21 }
 0x2e5   :  { %v2239_v13 = vmax.f32 %v11228_v63, 0.0 }
 0x2e6   :  { %v2398_v26 = vrot.slane %v15558_v38, 1  ;;  %v2663_v61 = vpop.permute.xlu1 %2662 }
 0x2e7   :  { %v2400_v57 = vrot.slane %v2239_v13, 1  ;;  %v8753_v39 = vpop.permute.xlu0 %8752  ;;  %v1915_v12 = vpop.f32.mrf.mxu0 }
 0x2e8   :  { %v2028_v62 = vpop.f32.mrf.mxu1  ;;  %v8755_v31 = vunpack.i.h.bf16 %v8753_v39  ;;  %v2106_v19 = vadd.f32 %v1915_v12, %v1661_v30  ;;  %v2399_v63 = vsel %vm152_vm0, %v2394_v18, %v2398_v26  ;;  %v11261_v30 = vmax.f32 %v10801_v0, %v2663_v61 }
 0x2e9   :  { %v2107_v46 = vadd.f32 %v2028_v62, %v1662_v53  ;;  %v2401_v2 = vsel %vm152_vm0, %v2396_v42, %v2400_v57  ;;  %v11253_v59 = vmax.f32 %v2236_v25, %v2399_v63  ;;  %v15915_v53 = vld [vmem:[#allocation46_spill] sm:$0xff]  ;;  %v15916_v25 = vld [vmem:[#allocation45_spill] sm:$0xff]  ;;  %v2667_v62 = vpop.permute.xlu2 %2666 }
 0x2ea   :  { %v11256_v37 = vadd.f32 %v10735_v36, %v2106_v19  ;;  %v11258_v21 = vmax.f32 %v2237_v47, %v2401_v2  ;;  %15914 = vst [vmem:[#allocation24_spill] sm:$0xff] %v11261_v30  ;;  %v1218_v42 = vadd.f32 %v10485_v4, %v15915_v53  ;;  %v1219_v12 = vadd.f32 %v10489_v17, %v15916_v25 }
 0x2eb   :  { %15912 = vst [vmem:[#allocation21_spill] sm:$0xff] %v11253_v59  ;;  %v11264_v18 = vadd.f32 %v10739_v54, %v2107_v46  ;;  %2720 = vrot.lane.b32.xlu1 %v11253_v59, %s8860_s14  ;;  %v2788_v19 = vsel %vm2786_vm6, %v8755_v31, %v2663_v61  ;;  %v8754_v46 = vunpack.i.l.bf16 %v8753_v39  ;;  %v11293_v39 = vpop.f32.mrf.mxu2  ;;  %v11306_v59 = vpop.f32.mrf.mxu3 }
 0x2ec   :  { %15913 = vst [vmem:[#allocation56_spill] sm:$0xff] %v11258_v21  ;;  %v15557_v47 = vmax.f32 %v11256_v37, 0.0  ;;  %2722 = vrot.lane.b32.xlu2 %v11258_v21, %s8860_s14  ;;  %v1663_v63 = vadd.f32 %v11166_v33, %v1218_v42  ;;  %v1664_v15 = vadd.f32 %v11178_v41, %v1219_v12  ;;  %v11284_v61 = vmax.f32 %v10797_v14, %v2788_v19  ;;  %v2980_v33 = vld [vmem:[%s15535_s3 + $0xf8] sm:$0xff]  ;;  %v2990_v41 = vld [vmem:[%s15535_s3 + $0x148] sm:$0x3] }
 0x2ed   :  { %v15556_v0 = vmax.f32 %v11264_v18, 0.0  ;;  %4080 = vmatpush.msra.mxu0 %v2980_v33  ;;  %8287 = vmatpush.msk.msra.mxu1 %vm3325_vm5, %v2990_v41 }
 0x2ee   :  { %v2402_v4 = vrot.slane %v15557_v47, 1  ;;  %v2665_v2 = vpop.permute.xlu1 %2664  ;;  %15917 = vst [vmem:[#allocation59_spill] sm:$0xff] %v11284_v61 }
 0x2ef   :  { %v2404_v17 = vrot.slane %v15556_v0, 1  ;;  %v2659_v31 = vpop.permute.xlu0 %2658  ;;  %v1918_v53 = vpop.f32.mrf.mxu0  ;;  %v2789_v42 = vsel %vm2786_vm6, %v2665_v2, %v2667_v62 }
 0x2f0   :  { %v2031_v12 = vpop.f32.mrf.mxu1  ;;  %v2787_v14 = vsel %vm2786_vm6, %v8754_v46, %v2659_v31  ;;  %v11298_v19 = vmax.f32 %v10776_v29, %v2659_v31  ;;  %v2108_v0 = vadd.f32 %v1918_v53, %v1663_v63  ;;  %v2403_v21 = vsel %vm152_vm0, %v2398_v26, %v2402_v4  ;;  %v15920_v31 = vld [vmem:[#allocation48_spill] sm:$0xff] }
 0x2f1   :  { %v2109_v47 = vadd.f32 %v2031_v12, %v1664_v15  ;;  %v11301_v25 = vmax.f32 %v10771_v34, %v2787_v14  ;;  %v2405_v38 = vsel %vm152_vm0, %v2400_v57, %v2404_v17  ;;  %v15919_v29 = vmax.f32 %v11223_v58, 0.0 }
 0x2f2   :  { %v11309_v2 = vadd.f32 %v10735_v36, %v2108_v0  ;;  %v11311_v46 = vmax.f32 %v2239_v13, %v2405_v38  ;;  %v3102_v34 = vrot.slane %v11298_v19, 2  ;;  %v3100_v57 = vrot.slane %v11284_v61, 2  ;;  %v15922_v13 = vld [vmem:[#allocation47_spill] sm:$0xff] }
 0x2f3   :  { %15918 = vst [vmem:[#allocation23_spill] sm:$0xff] %v11301_v25  ;;  %v11315_v63 = vmax.f32 %v15919_v29, %v2403_v21  ;;  %v11319_v15 = vadd.f32 %v10739_v54, %v2109_v47  ;;  %v3099_v26 = vrot.slane %v11301_v25, 2  ;;  %v1220_v53 = vadd.f32 %v10502_v35, %v15920_v31  ;;  %v15923_v21 = vld [vmem:[#allocation93_spill] sm:$0xff]  ;;  %v2669_v29 = vpop.permute.xlu2 %2668 }
 0x2f4   :  { %v15562_v0 = vmax.f32 %v11309_v2, 0.0  ;;  %2726 = vrot.lane.b32.xlu1 %v11311_v46, %s8860_s14  ;;  %v15921_v58 = vrot.slane %v11261_v30, 2  ;;  %v1221_v47 = vadd.f32 %v15923_v21, %v15922_v13  ;;  %v11336_v33 = vmax.f32 %v10828_v43, %v2789_v42 }
 0x2f5   :  { %2724 = vrot.lane.b32.xlu0 %v11315_v63, %s8860_s14  ;;  %v15561_v35 = vmax.f32 %v11319_v15, 0.0  ;;  %v3101_v41 = vsel %vm824_vm2, %v3099_v26, %v3100_v57  ;;  %v1665_v12 = vadd.f32 %v11208_v22, %v1220_v53  ;;  %v11344_v14 = vmax.f32 %v10834_v56, %v2667_v62  ;;  %v2975_v22 = vld [vmem:[%s15535_s3 + $0xd0] sm:$0xff] }
 0x2f6   :  { %v3104_v38 = vsel %vm824_vm2, %v3102_v34, %v15921_v58  ;;  %15924 = vst [vmem:[#allocation60_spill] sm:$0xff] %v11336_v33  ;;  %v2406_v34 = vrot.slane %v15562_v0, 1  ;;  %3348 = vmatmul.f32.vlgmr.msrb.gmra.mxu2 %v3101_v41  ;;  %3574 = vmatmul.f32.vlgmr.msrb.gmra.mxu0 %v3101_v41  ;;  %v1666_v43 = vadd.f32 %v11215_v11, %v1221_v47  ;;  %v15926_v13 = vmax.f32 %v11256_v37, 0.0  ;;  %v11361_v47 = vpop.f32.mrf.mxu2  ;;  %v15928_v37 = vld [vmem:[#allocation50_spill] sm:$0xff] }
 0x2f7   :  { %8189 = vmatmul.msk.f32.vlgmr.msrb.gmra.mxu3 %vm3260_vm7, %v3104_v38  ;;  %8222 = vmatmul.msk.f32.vlgmr.msrb.gmra.mxu1 %vm3260_vm7, %v3104_v38  ;;  %15925 = vst [vmem:[#allocation26_spill] sm:$0xff] %v11344_v14  ;;  %v2408_v42 = vrot.slane %v15561_v35, 1  ;;  %v2671_v31 = vpop.permute.xlu0 %2670  ;;  %v1921_v58 = vpop.f32.mrf.mxu0  ;;  %v3105_v21 = vrot.slane %v11336_v33, 2 }
 0x2f8   :  { %v2034_v26 = vpop.f32.mrf.mxu1  ;;  %v2110_v56 = vadd.f32 %v1921_v58, %v1665_v12  ;;  %v2407_v62 = vsel %vm152_vm0, %v2402_v4, %v2406_v34  ;;  %3856 = vmatpush.msra.mxu2 %v2975_v22  ;;  %v2790_v41 = vsel %vm2786_vm6, %v2669_v29, %v2671_v31  ;;  %v15927_v12 = vmax.f32 %v11264_v18, 0.0  ;;  %v15929_v58 = vld [vmem:[#allocation94_spill] sm:$0xff] }
 0x2f9   :  { %v2111_v53 = vadd.f32 %v2034_v26, %v1666_v43  ;;  %v2409_v38 = vsel %vm152_vm0, %v2404_v17, %v2408_v42  ;;  %v11358_v11 = vmax.f32 %v15926_v13, %v2407_v62  ;;  %v3107_v43 = vrot.slane %v11344_v14, 2  ;;  %v11379_v26 = vpop.f32.mrf.mxu3 }
 0x2fa   :  { %v11365_v35 = vadd.f32 %v10735_v36, %v2110_v56  ;;  %v11369_v4 = vmax.f32 %v15927_v12, %v2409_v38  ;;  %v1222_v22 = vadd.f32 %v15929_v58, %v15928_v37  ;;  %v11382_v29 = vmax.f32 %v10863_v10, %v2671_v31  ;;  %v15933_v38 = vld [vmem:[#allocation95_spill] sm:$0xff] }
 0x2fb   :  { %v11373_v17 = vadd.f32 %v10739_v54, %v2111_v53  ;;  %2728 = vrot.lane.b32.xlu2 %v11358_v11, %s8860_s14  ;;  %v15931_v56 = vrot.slane %v11261_v30, 2  ;;  %v15932_v53 = vld [vmem:[#allocation49_spill] sm:$0xff]  ;;  %v11394_v37 = vmax.f32 %v10856_v3, %v2790_v41  ;;  %v2978_v3 = vld [vmem:[%s15535_s3 + $0xe8] sm:$0xff] }
 0x2fc   :  { %15930 = vst [vmem:[#allocation63_spill] sm:$0xff] %v11382_v29  ;;  %v2244_v18 = vmax.f32 %v11365_v35, 0.0  ;;  %v1223_v13 = vadd.f32 %v15933_v38, %v15932_v53  ;;  %v3106_v35 = vsel %vm824_vm2, %v3100_v57, %v3105_v21  ;;  %v1667_v31 = vadd.f32 %v11241_v49, %v1222_v22  ;;  %4081 = vmatpush.msra.mxu0 %v2978_v3  ;;  %v2675_v57 = vpop.permute.xlu2 %2674 }
 0x2fd   :  { %2730 = vrot.lane.b32.xlu0 %v11369_v4, %s8860_s14  ;;  %v3108_v62 = vsel %vm824_vm2, %v15931_v56, %v3107_v43  ;;  %v2245_v12 = vmax.f32 %v11373_v17, 0.0  ;;  %15934 = vst [vmem:[#allocation25_spill] sm:$0xff] %v11394_v37  ;;  %v2673_v10 = vpop.permute.xlu1 %2672  ;;  %v3111_v0 = vrot.slane %v11382_v29, 2 }
 0x2fe   :  { %v2410_v58 = vrot.slane %v2244_v18, 1  ;;  %3351 = vmatmul.f32.gmra.mxu2 %v3106_v35  ;;  %3577 = vmatmul.f32.gmra.mxu0 %v3106_v35  ;;  %v1668_v56 = vadd.f32 %v11246_v48, %v1223_v13  ;;  %v15935_v35 = vmax.f32 %v11309_v2, 0.0  ;;  %v3109_v13 = vrot.slane %v11394_v37, 2  ;;  %v15937_v2 = vld [vmem:[#allocation54_spill] sm:$0xff] }
 0x2ff   :  { %8190 = vmatmul.msk.f32.gmra.mxu3 %vm3260_vm7, %v3108_v62  ;;  %8223 = vmatmul.msk.f32.gmra.mxu1 %vm3260_vm7, %v3108_v62  ;;  %v2412_v53 = vrot.slane %v2245_v12, 1  ;;  %v1924_v38 = vpop.f32.mrf.mxu0  ;;  %v2791_v33 = vsel %vm2786_vm6, %v2673_v10, %v2675_v57 }
 0x300   :  { %v2112_v41 = vadd.f32 %v1924_v38, %v1667_v31  ;;  %v2037_v17 = vpop.f32.mrf.mxu1  ;;  %v2411_v62 = vsel %vm152_vm0, %v2406_v34, %v2410_v58  ;;  %v15936_v34 = vmax.f32 %v11319_v15, 0.0  ;;  %v3112_v15 = vsel %vm824_vm2, %v3107_v43, %v3111_v0 }
 0x301   :  { %v2113_v49 = vadd.f32 %v2037_v17, %v1668_v56  ;;  %v2413_v22 = vsel %vm152_vm0, %v2408_v42, %v2412_v53  ;;  %v11409_v48 = vmax.f32 %v15935_v35, %v2411_v62  ;;  %v15938_v42 = vld [vmem:[#allocation96_spill] sm:$0xff]  ;;  %v11427_v17 = vpop.f32.mrf.mxu2  ;;  %v15940_v62 = vld [vmem:[#allocation97_spill] sm:$0xff]  ;;  %v11443_v10 = vpop.f32.mrf.mxu3  ;;  %v11446_v43 = vmax.f32 %v10893_v23, %v2675_v57  ;;  %v2973_v23 = vld [vmem:[%s15535_s3 + $0xc0] sm:$0xff] }
 0x302   :  { %v11414_v31 = vadd.f32 %v10735_v36, %v2112_v41  ;;  %v11418_v38 = vmax.f32 %v15936_v34, %v2413_v22  ;;  %v1224_v56 = vadd.f32 %v15938_v42, %v15937_v2  ;;  %v15939_v41 = vld [vmem:[#allocation53_spill] sm:$0xff]  ;;  %v3110_v2 = vsel %vm824_vm2, %v3105_v21, %v3109_v13  ;;  %3857 = vmatpush.msra.mxu2 %v2973_v23 }
 0x303   :  { %v11421_v3 = vadd.f32 %v10739_v54, %v2113_v49  ;;  %2732 = vrot.lane.b32.xlu1 %v11409_v48, %s8860_s14  ;;  %v1225_v22 = vadd.f32 %v15940_v62, %v15939_v41  ;;  %v11436_v49 = vmax.f32 %v10889_v52, %v2791_v33  ;;  %15942 = vst [vmem:[#allocation28_spill] sm:$0xff] %v11446_v43 }
 0x304   :  { %2734 = vrot.lane.b32.xlu2 %v11418_v38, %s8860_s14  ;;  %v1669_v42 = vadd.f32 %v11293_v39, %v1224_v56  ;;  %v15943_v41 = vmax.f32 %v11414_v31, 0.0 }
 0x305   :  { %15941 = vst [vmem:[#allocation64_spill] sm:$0xff] %v11436_v49  ;;  %v15571_v35 = vmax.f32 %v11421_v3, 0.0  ;;  %v2677_v34 = vpop.permute.xlu0 %2676  ;;  %v1670_v33 = vadd.f32 %v11306_v59, %v1225_v22  ;;  %v3113_v59 = vrot.slane %v11436_v49, 2  ;;  %v15949_v49 = vld [vmem:[#allocation3_spill] sm:$0xff] }
 0x306   :  { %v2414_v52 = vrot.slane %v15943_v41, 1  ;;  %3354 = vmatmul.f32.gmra.mxu2 %v3110_v2  ;;  %3580 = vmatmul.f32.gmra.mxu0 %v3110_v2  ;;  %v2679_v62 = vpop.permute.xlu1 %2678 }
 0x307   :  { %8191 = vmatmul.msk.f32.gmra.mxu3 %vm3260_vm7, %v3112_v15  ;;  %8224 = vmatmul.msk.f32.gmra.mxu1 %vm3260_vm7, %v3112_v15  ;;  %v2416_v15 = vrot.slane %v15571_v35, 1  ;;  %v1927_v37 = vpop.f32.mrf.mxu0  ;;  %v2792_v22 = vsel %vm2786_vm6, %v2677_v34, %v2679_v62 }
 0x308   :  { %v2114_v21 = vadd.f32 %v1927_v37, %v1669_v42  ;;  %v2040_v29 = vpop.f32.mrf.mxu1  ;;  %v2415_v39 = vsel %vm152_vm0, %v2410_v58, %v2414_v52  ;;  %v3115_v58 = vrot.slane %v11446_v43, 2  ;;  %v15950_v43 = vld [vmem:[#allocation62_spill] sm:$0xff] }
 0x309   :  { %v2115_v57 = vadd.f32 %v2040_v29, %v1670_v33  ;;  %v2417_v56 = vsel %vm152_vm0, %v2412_v53, %v2416_v15  ;;  %v11458_v41 = vmax.f32 %v2244_v18, %v2415_v39  ;;  %v15944_v29 = vld [vmem:[#allocation58_spill] sm:$0xff]  ;;  %v11476_v53 = vmax.f32 %v10924_v16, %v2679_v62  ;;  %v15946_v33 = vld [vmem:[#allocation57_spill] sm:$0xff]  ;;  %v11492_v62 = vpop.f32.mrf.mxu2 }
 0x30a   :  { %v11463_v2 = vadd.f32 %v10735_v36, %v2114_v21  ;;  %v11465_v37 = vmax.f32 %v2245_v12, %v2417_v56  ;;  %v1226_v18 = vadd.f32 %v10563_v1, %v15944_v29  ;;  %v3116_v12 = vsel %vm824_vm2, %v3111_v0, %v3115_v58  ;;  %v11505_v29 = vpop.f32.mrf.mxu3 }
 0x30b   :  { %v11469_v42 = vadd.f32 %v10739_v54, %v2115_v57  ;;  %2736 = vrot.lane.b32.xlu0 %v11458_v41, %s8860_s14  ;;  %15945 = vst [vmem:[#allocation67_spill] sm:$0xff] %v11476_v53  ;;  %v1227_v21 = vadd.f32 %v10567_v44, %v15946_v33  ;;  %v11485_v39 = vmax.f32 %v10920_v40, %v2792_v22  ;;  %v2681_v57 = vpop.permute.xlu2 %2680 }
 0x30c   :  { %v15570_v34 = vmax.f32 %v11463_v2, 0.0  ;;  %2738 = vrot.lane.b32.xlu1 %v11465_v37, %s8860_s14  ;;  %v3114_v1 = vsel %vm824_vm2, %v3109_v13, %v3113_v59  ;;  %v1671_v16 = vadd.f32 %v11361_v47, %v1226_v18  ;;  %v2976_v13 = vld [vmem:[%s15535_s3 + $0xd8] sm:$0xff]  ;;  %v2987_v47 = vld [vmem:[%s15535_s3 + $0x130] sm:$0xff]  ;;  %v663_v14 = vadd.f32 %v15950_v43, %v15949_v49 }
 0x30d   :  { %15947 = vst [vmem:[#allocation27_spill] sm:$0xff] %v11485_v39  ;;  %v15569_v23 = vmax.f32 %v11469_v42, 0.0  ;;  %v1672_v44 = vadd.f32 %v11379_v26, %v1227_v21  ;;  %v3119_v26 = vrot.slane %v11476_v53, 2  ;;  %4082 = vmatpush.msra.mxu0 %v2976_v13  ;;  %3979 = vmatpush.msra.mxu3 %v2987_v47  ;;  %v3117_v35 = vrot.slane %v11485_v39, 2 }
 0x30e   :  { %v2418_v0 = vrot.slane %v15570_v34, 1  ;;  %3357 = vmatmul.f32.gmra.mxu2 %v3114_v1  ;;  %3583 = vmatmul.f32.gmra.mxu0 %v3114_v1  ;;  %v2683_v56 = vpop.permute.xlu0 %2682  ;;  %v1228_v49 = vadd.f32 %v10575_v51, %v663_v14 }
 0x30f   :  { %8192 = vmatmul.msk.f32.gmra.mxu3 %vm3260_vm7, %v3116_v12  ;;  %8225 = vmatmul.msk.f32.gmra.mxu1 %vm3260_vm7, %v3116_v12  ;;  %v2420_v40 = vrot.slane %v15569_v23, 1  ;;  %v1930_v22 = vpop.f32.mrf.mxu0  ;;  %v15948_v23 = vmax.f32 %v11414_v31, 0.0  ;;  %v11534_v43 = vmax.f32 %v10955_v55, %v2683_v56  ;;  %v3118_v55 = vsel %vm824_vm2, %v3113_v59, %v3117_v35 }
 0x310   :  { %v2116_v18 = vadd.f32 %v1930_v22, %v1671_v16  ;;  %v2043_v12 = vpop.f32.mrf.mxu1  ;;  %v2419_v33 = vsel %vm152_vm0, %v2414_v52, %v2418_v0  ;;  %v2793_v16 = vsel %vm2786_vm6, %v2681_v57, %v2683_v56  ;;  %v15951_v22 = vmax.f32 %v11421_v3, 0.0  ;;  %v15955_v57 = vld [vmem:[#allocation98_spill] sm:$0xff] }
 0x311   :  { %v2117_v21 = vadd.f32 %v2043_v12, %v1672_v44  ;;  %v2421_v1 = vsel %vm152_vm0, %v2416_v15, %v2420_v40  ;;  %v11512_v34 = vmax.f32 %v15948_v23, %v2419_v33  ;;  %v15952_v44 = vld [vmem:[#allocation4_spill] sm:$0xff]  ;;  %v15953_v15 = vld [vmem:[#allocation61_spill] sm:$0xff]  ;;  %15954 = vst [vmem:[#allocation68_spill] sm:$0xff] %v11534_v43  ;;  %v3120_v3 = vsel %vm824_vm2, %v3115_v58, %v3119_v26 }
 0x312   :  { %v11519_v52 = vadd.f32 %v10735_v36, %v2116_v18  ;;  %v11523_v13 = vmax.f32 %v15951_v22, %v2421_v1  ;;  %v776_v47 = vadd.f32 %v15953_v15, %v15952_v44  ;;  %v11542_v12 = vmax.f32 %v10951_v50, %v2793_v16  ;;  %v11554_v1 = vpop.f32.mrf.mxu2 }
 0x313   :  { %v11528_v31 = vadd.f32 %v10739_v54, %v2117_v21  ;;  %2740 = vrot.lane.b32.xlu2 %v11512_v34, %s8860_s14  ;;  %v1673_v14 = vadd.f32 %v11427_v17, %v1228_v49  ;;  %v3123_v59 = vrot.slane %v11534_v43, 2  ;;  %v2971_v17 = vld [vmem:[%s15535_s3 + $0xb0] sm:$0xff]  ;;  %v2687_v15 = vpop.permute.xlu2 %2686  ;;  %v15957_v49 = vmax.f32 %v11463_v2, 0.0  ;;  %v15961_v2 = vld [vmem:[#allocation6_spill] sm:$0xff] }
 0x314   :  { %v2250_v23 = vmax.f32 %v11519_v52, 0.0  ;;  %2742 = vrot.lane.b32.xlu0 %v11523_v13, %s8860_s14  ;;  %v1229_v18 = vadd.f32 %v15955_v57, %v776_v47  ;;  %15956 = vst [vmem:[#allocation30_spill] sm:$0xff] %v11542_v12  ;;  %v3121_v57 = vrot.slane %v11542_v12, 2  ;;  %3858 = vmatpush.msra.mxu2 %v2971_v17  ;;  %v15963_v17 = vld [vmem:[#allocation99_spill] sm:$0xff]  ;;  %v15971_v52 = vld [vmem:[#allocation69_spill] sm:$0xff] }
 0x315   :  { %v15578_v33 = vmax.f32 %v11528_v31, 0.0  ;;  %v2685_v51 = vpop.permute.xlu1 %2684 }
 0x316   :  { %v2422_v56 = vrot.slane %v2250_v23, 1  ;;  %3360 = vmatmul.f32.gmra.mxu2 %v3118_v55  ;;  %3586 = vmatmul.f32.gmra.mxu0 %v3118_v55  ;;  %v1674_v58 = vadd.f32 %v11443_v10, %v1229_v18  ;;  %v15958_v18 = vld [vmem:[#allocation5_spill] sm:$0xff]  ;;  %v15959_v55 = vld [vmem:[#allocation66_spill] sm:$0xff] }
 0x317   :  { %8193 = vmatmul.msk.f32.gmra.mxu3 %vm3260_vm7, %v3120_v3  ;;  %8226 = vmatmul.msk.f32.gmra.mxu1 %vm3260_vm7, %v3120_v3  ;;  %v2424_v50 = vrot.slane %v15578_v33, 1  ;;  %v1933_v21 = vpop.f32.mrf.mxu0 }
 0x318   :  { %v2118_v16 = vadd.f32 %v1933_v21, %v1673_v14  ;;  %v2046_v22 = vpop.f32.mrf.mxu1  ;;  %v2423_v44 = vsel %vm152_vm0, %v2418_v0, %v2422_v56  ;;  %v666_v0 = vadd.f32 %v15959_v55, %v15958_v18  ;;  %v11569_v14 = vpop.f32.mrf.mxu3  ;;  %v2794_v21 = vsel %vm2786_vm6, %v2685_v51, %v2687_v15 }
 0x319   :  { %v2119_v47 = vadd.f32 %v2046_v22, %v1674_v58  ;;  %v2425_v10 = vsel %vm152_vm0, %v2420_v40, %v2424_v50  ;;  %v11564_v3 = vmax.f32 %v15957_v49, %v2423_v44  ;;  %v15960_v58 = vmax.f32 %v11469_v42, 0.0  ;;  %v15962_v22 = vld [vmem:[#allocation65_spill] sm:$0xff] }
 0x31a   :  { %v11573_v33 = vadd.f32 %v10735_v36, %v2118_v16  ;;  %v779_v44 = vadd.f32 %v15962_v22, %v15961_v2  ;;  %v1230_v18 = vadd.f32 %v15963_v17, %v666_v0  ;;  %v3124_v42 = vsel %vm824_vm2, %v3119_v26, %v3123_v59  ;;  %v15964_v16 = vld [vmem:[#allocation100_spill] sm:$0xff]  ;;  %v1497_v12 = vpop.f32.mrf.mxu2 }
 0x31b   :  { %v11577_v40 = vmax.f32 %v15960_v58, %v2425_v10  ;;  %v11582_v49 = vadd.f32 %v10739_v54, %v2119_v47  ;;  %2744 = vrot.lane.b32.xlu1 %v11564_v3, %s8860_s14  ;;  %v11593_v55 = vmax.f32 %v10980_v24, %v2794_v21  ;;  %v3122_v0 = vsel %vm824_vm2, %v3117_v35, %v3121_v57  ;;  %v2974_v35 = vld [vmem:[%s15535_s3 + $0xc8] sm:$0xff] }
 0x31c   :  { %v15580_v51 = vmax.f32 %v11573_v33, 0.0  ;;  %v1231_v10 = vadd.f32 %v15964_v16, %v779_v44  ;;  %v1675_v2 = vadd.f32 %v11492_v62, %v1230_v18  ;;  %v11601_v22 = vmax.f32 %v10986_v9, %v2687_v15  ;;  %v2988_v9 = vld [vmem:[%s15535_s3 + $0x138] sm:$0xff]  ;;  %v15967_v62 = vld [vmem:[#allocation7_spill] sm:$0xff]  ;;  %v15968_v15 = vld [vmem:[#allocation70_spill] sm:$0xff]  ;;  %4083 = vmatpush.msra.mxu0 %v2974_v35 }
 0x31d   :  { %2746 = vrot.lane.b32.xlu2 %v11577_v40, %s8860_s14  ;;  %15965 = vst [vmem:[#allocation71_spill] sm:$0xff] %v11593_v55  ;;  %v15579_v47 = vmax.f32 %v11582_v49, 0.0  ;;  %v2689_v58 = vpop.permute.xlu0 %2688  ;;  %v669_v18 = vadd.f32 %v15968_v15, %v15967_v62  ;;  %4205 = vmatpush.msra.mxu1 %v2988_v9 }
 0x31e   :  { %15966 = vst [vmem:[#allocation29_spill] sm:$0xff] %v11601_v22  ;;  %v2426_v26 = vrot.slane %v15580_v51, 1  ;;  %3363 = vmatmul.f32.gmra.mxu2 %v3122_v0  ;;  %3589 = vmatmul.f32.gmra.mxu0 %v3122_v0  ;;  %v1676_v24 = vadd.f32 %v11505_v29, %v1231_v10  ;;  %v2691_v44 = vpop.permute.xlu1 %2690  ;;  %v3125_v51 = vrot.slane %v11593_v55, 2 }
 0x31f   :  { %8194 = vmatmul.msk.f32.gmra.mxu3 %vm3260_vm7, %v3124_v42  ;;  %8227 = vmatmul.msk.f32.gmra.mxu1 %vm3260_vm7, %v3124_v42  ;;  %v2428_v21 = vrot.slane %v15579_v47, 1  ;;  %v1936_v17 = vpop.f32.mrf.mxu0  ;;  %v2795_v43 = vsel %vm2786_vm6, %v2689_v58, %v2691_v44  ;;  %v11641_v15 = vmax.f32 %v11018_v5, %v2691_v44 }
 0x320   :  { %v2120_v42 = vadd.f32 %v1936_v17, %v1675_v2  ;;  %v2049_v16 = vpop.f32.mrf.mxu1  ;;  %v2427_v29 = vsel %vm152_vm0, %v2422_v56, %v2426_v26  ;;  %v15969_v2 = vmax.f32 %v11528_v31, 0.0  ;;  %v15970_v17 = vld [vmem:[#allocation8_spill] sm:$0xff]  ;;  %v1610_v9 = vpop.f32.mrf.mxu3  ;;  %v3126_v5 = vsel %vm824_vm2, %v3121_v57, %v3125_v51 }
 0x321   :  { %v2121_v10 = vadd.f32 %v2049_v16, %v1676_v24  ;;  %v11619_v0 = vmax.f32 %v2250_v23, %v2427_v29  ;;  %v2429_v47 = vsel %vm152_vm0, %v2424_v50, %v2428_v21  ;;  %v3127_v24 = vrot.slane %v11601_v22, 2  ;;  %v15972_v50 = vld [vmem:[#allocation101_spill] sm:$0xff]  ;;  %15973 = vst [vmem:[#allocation72_spill] sm:$0xff] %v11641_v15 }
 0x322   :  { %v11625_v62 = vadd.f32 %v10735_v36, %v2120_v42  ;;  %v11629_v56 = vmax.f32 %v15969_v2, %v2429_v47  ;;  %v782_v23 = vadd.f32 %v15971_v52, %v15970_v17  ;;  %v1232_v58 = vadd.f32 %v15972_v50, %v669_v18  ;;  %v15974_v42 = vld [vmem:[#allocation102_spill] sm:$0xff]  ;;  %v2693_v18 = vpop.permute.xlu2 %2692 }
 0x323   :  { %v11635_v35 = vadd.f32 %v10739_v54, %v2121_v10  ;;  %2748 = vrot.lane.b32.xlu0 %v11619_v0, %s8860_s14  ;;  %v3128_v47 = vsel %vm824_vm2, %v3123_v59, %v3127_v24  ;;  %v11649_v29 = vmax.f32 %v11012_v7, %v2795_v43  ;;  %v2969_v52 = vld [vmem:[%s15535_s3 + $0xa0] sm:$0xff]  ;;  %v3131_v50 = vrot.slane %v11641_v15, 2 }
 0x324   :  { %v15586_v31 = vmax.f32 %v11625_v62, 0.0  ;;  %2750 = vrot.lane.b32.xlu1 %v11629_v56, %s8860_s14  ;;  %v1233_v16 = vadd.f32 %v15974_v42, %v782_v23  ;;  %v1677_v44 = vadd.f32 %v11554_v1, %v1232_v58  ;;  %3859 = vmatpush.msra.mxu2 %v2969_v52  ;;  %v15989_v15 = vld [vmem:[#allocation78_spill] sm:$0xff] }
 0x325   :  { %15975 = vst [vmem:[#allocation32_spill] sm:$0xff] %v11649_v29  ;;  %v15585_v10 = vmax.f32 %v11635_v35, 0.0 }
 0x326   :  { %v2430_v2 = vrot.slane %v15586_v31, 1  ;;  %3366 = vmatmul.f32.gmra.mxu2 %v3126_v5  ;;  %3592 = vmatmul.f32.gmra.mxu0 %v3126_v5  ;;  %v1678_v59 = vadd.f32 %v11569_v14, %v1233_v16  ;;  %v2695_v43 = vpop.permute.xlu0 %2694  ;;  %v3129_v16 = vrot.slane %v11649_v29, 2  ;;  %v15977_v5 = vld [vmem:[#allocation9_spill] sm:$0xff]  ;;  %v15988_v29 = vld [vmem:[#allocation11_spill] sm:$0xff] }
 0x327   :  { %8195 = vmatmul.msk.f32.gmra.mxu3 %vm3260_vm7, %v3128_v47  ;;  %8228 = vmatmul.msk.f32.gmra.mxu1 %vm3260_vm7, %v3128_v47  ;;  %v2432_v7 = vrot.slane %v15585_v10, 1  ;;  %v1939_v17 = vpop.f32.mrf.mxu0  ;;  %v15976_v47 = vmax.f32 %v11573_v33, 0.0  ;;  %v15978_v10 = vld [vmem:[#allocation74_spill] sm:$0xff]  ;;  %v15981_v33 = vld [vmem:[#allocation73_spill] sm:$0xff]  ;;  %v675_v55 = vadd.f32 %v15989_v15, %v15988_v29 }
 0x328   :  { %v2122_v57 = vadd.f32 %v1939_v17, %v1677_v44  ;;  %v2052_v23 = vpop.f32.mrf.mxu1  ;;  %v2431_v1 = vsel %vm152_vm0, %v2426_v26, %v2430_v2  ;;  %v672_v31 = vadd.f32 %v15978_v10, %v15977_v5  ;;  %v2796_v44 = vsel %vm2786_vm6, %v2693_v18, %v2695_v43 }
 0x329   :  { %v2123_v58 = vadd.f32 %v2052_v23, %v1678_v59  ;;  %v11668_v14 = vmax.f32 %v15976_v47, %v2431_v1  ;;  %v2433_v42 = vsel %vm152_vm0, %v2428_v21, %v2432_v7  ;;  %v15979_v26 = vmax.f32 %v11582_v49, 0.0  ;;  %v15980_v59 = vld [vmem:[#allocation10_spill] sm:$0xff]  ;;  %v15982_v21 = vld [vmem:[#allocation103_spill] sm:$0xff]  ;;  %v1500_v47 = vpop.f32.mrf.mxu2 }
 0x32a   :  { %v11676_v17 = vadd.f32 %v10735_v36, %v2122_v57  ;;  %v785_v23 = vadd.f32 %v15981_v33, %v15980_v59  ;;  %v1234_v10 = vadd.f32 %v15982_v21, %v672_v31  ;;  %v11691_v18 = vmax.f32 %v11047_v8, %v2695_v43  ;;  %v1613_v33 = vpop.f32.mrf.mxu3 }
 0x32b   :  { %v11680_v52 = vmax.f32 %v15979_v26, %v2433_v42  ;;  %v11685_v1 = vadd.f32 %v10739_v54, %v2123_v58  ;;  %2752 = vrot.lane.b32.xlu2 %v11668_v14, %s8860_s14  ;;  %v3132_v49 = vsel %vm824_vm2, %v3127_v24, %v3131_v50  ;;  %v15984_v42 = vld [vmem:[#allocation104_spill] sm:$0xff]  ;;  %v3130_v31 = vsel %vm824_vm2, %v3125_v51, %v3129_v16 }
 0x32c   :  { %15983 = vst [vmem:[#allocation75_spill] sm:$0xff] %v11691_v18  ;;  %v15587_v57 = vmax.f32 %v11676_v17, 0.0  ;;  %v1235_v5 = vadd.f32 %v15984_v42, %v785_v23  ;;  %v15985_v58 = vld [vmem:[#allocation20_spill] sm:$0xff]  ;;  %v1679_v43 = vadd.f32 %v1497_v12, %v1234_v10  ;;  %v2972_v42 = vld [vmem:[%s15535_s3 + $0xb8] sm:$0xff]  ;;  %v3135_v12 = vrot.slane %v11691_v18, 2  ;;  %v2699_v10 = vpop.permute.xlu2 %2698 }
 0x32d   :  { %2754 = vrot.lane.b32.xlu0 %v11680_v52, %s8860_s14  ;;  %v11699_v26 = vmax.f32 %v15985_v58, %v2796_v44  ;;  %v15588_v59 = vmax.f32 %v11685_v1, 0.0  ;;  %v2697_v8 = vpop.permute.xlu1 %2696  ;;  %4084 = vmatpush.msra.mxu0 %v2972_v42 }
 0x32e   :  { %v2434_v21 = vrot.slane %v15587_v57, 1  ;;  %3369 = vmatmul.f32.gmra.mxu2 %v3130_v31  ;;  %3595 = vmatmul.f32.gmra.mxu0 %v3130_v31  ;;  %v1680_v24 = vadd.f32 %v1610_v9, %v1235_v5  ;;  %v15987_v9 = vmax.f32 %v11625_v62, 0.0 }
 0x32f   :  { %15986 = vst [vmem:[#allocation31_spill] sm:$0xff] %v11699_v26  ;;  %8196 = vmatmul.msk.f32.gmra.mxu3 %vm3260_vm7, %v3132_v49  ;;  %8229 = vmatmul.msk.f32.gmra.mxu1 %vm3260_vm7, %v3132_v49  ;;  %v2436_v44 = vrot.slane %v15588_v59, 1  ;;  %v1942_v23 = vpop.f32.mrf.mxu0  ;;  %v3133_v59 = vrot.slane %v11699_v26, 2  ;;  %v15999_v26 = vld [vmem:[#allocation82_spill] sm:$0xff] }
 0x330   :  { %v2124_v49 = vadd.f32 %v1942_v23, %v1679_v43  ;;  %v2055_v58 = vpop.f32.mrf.mxu1  ;;  %v2435_v51 = vsel %vm152_vm0, %v2430_v2, %v2434_v21  ;;  %v2797_v43 = vsel %vm2786_vm6, %v2697_v8, %v2699_v10  ;;  %v15990_v23 = vmax.f32 %v11635_v35, 0.0  ;;  %v15994_v8 = vld [vmem:[#allocation106_spill] sm:$0xff] }
 0x331   :  { %v2125_v57 = vadd.f32 %v2055_v58, %v1680_v24  ;;  %v2437_v31 = vsel %vm152_vm0, %v2432_v7, %v2436_v44  ;;  %v11717_v5 = vmax.f32 %v15987_v9, %v2435_v51  ;;  %v15991_v24 = vld [vmem:[#allocation12_spill] sm:$0xff]  ;;  %v15992_v7 = vld [vmem:[#allocation77_spill] sm:$0xff]  ;;  %v3136_v35 = vsel %vm824_vm2, %v3131_v50, %v3135_v12 }
 0x332   :  { %v11724_v2 = vadd.f32 %v10735_v36, %v2124_v49  ;;  %v11728_v42 = vmax.f32 %v15990_v23, %v2437_v31  ;;  %v788_v58 = vadd.f32 %v15992_v7, %v15991_v24  ;;  %v15993_v51 = vld [vmem:[#allocation105_spill] sm:$0xff]  ;;  %v15995_v31 = vld [vmem:[#allocation51_spill] sm:$0xff]  ;;  %v1503_v7 = vpop.f32.mrf.mxu2 }
 0x333   :  { %v11733_v62 = vadd.f32 %v10739_v54, %v2125_v57  ;;  %2756 = vrot.lane.b32.xlu1 %v11717_v5, %s8860_s14  ;;  %v1236_v15 = vadd.f32 %v15993_v51, %v675_v55  ;;  %v11744_v9 = vmax.f32 %v15995_v31, %v2797_v43  ;;  %v3134_v55 = vsel %vm824_vm2, %v3129_v16, %v3133_v59  ;;  %v1616_v16 = vpop.f32.mrf.mxu3 }
 0x334   :  { %v15600_v29 = vmax.f32 %v11724_v2, 0.0  ;;  %2758 = vrot.lane.b32.xlu2 %v11728_v42, %s8860_s14  ;;  %v1237_v49 = vadd.f32 %v15994_v8, %v788_v58  ;;  %v11751_v51 = vmax.f32 %v11081_v60, %v2699_v10  ;;  %v2967_v10 = vld [vmem:[%s15535_s3 + $0x90] sm:$0xff]  ;;  %v16010_v22 = vmax.f32 %v11724_v2, 0.0 }
 0x335   :  { %15996 = vst [vmem:[#allocation76_spill] sm:$0xff] %v11744_v9  ;;  %v15599_v57 = vmax.f32 %v11733_v62, 0.0  ;;  %v2701_v23 = vpop.permute.xlu0 %2700  ;;  %v1681_v24 = vadd.f32 %v1500_v47, %v1236_v15  ;;  %3860 = vmatpush.msra.mxu2 %v2967_v10  ;;  %v16004_v10 = vld [vmem:[#allocation107_spill] sm:$0xff]  ;;  %v16014_v2 = vld [vmem:[#allocation16_spill] sm:$0xff] }
 0x336   :  { %15997 = vst [vmem:[#allocation34_spill] sm:$0xff] %v11751_v51  ;;  %v2438_v50 = vrot.slane %v15600_v29, 1  ;;  %3372 = vmatmul.f32.gmra.mxu2 %v3134_v55  ;;  %3598 = vmatmul.f32.gmra.mxu0 %v3134_v55  ;;  %v1682_v43 = vadd.f32 %v1613_v33, %v1237_v49  ;;  %v2703_v8 = vpop.permute.xlu1 %2702  ;;  %v2970_v33 = vld [vmem:[%s15535_s3 + $0xa8] sm:$0xff]  ;;  %v16000_v55 = vmax.f32 %v11676_v17, 0.0  ;;  %v16002_v17 = vld [vmem:[#allocation14_spill] sm:$0xff] }
 0x337   :  { %8197 = vmatmul.msk.f32.gmra.mxu3 %vm3260_vm7, %v3136_v35  ;;  %8230 = vmatmul.msk.f32.gmra.mxu1 %vm3260_vm7, %v3136_v35  ;;  %v2440_v58 = vrot.slane %v15599_v57, 1  ;;  %v1945_v31 = vpop.f32.mrf.mxu0  ;;  %v15998_v35 = vld [vmem:[#allocation13_spill] sm:$0xff] }
 0x338   :  { %v678_v18 = vadd.f32 %v15999_v26, %v15998_v35  ;;  %v2126_v47 = vadd.f32 %v1945_v31, %v1681_v24  ;;  %v2058_v15 = vpop.f32.mrf.mxu1  ;;  %v2439_v60 = vsel %vm152_vm0, %v2434_v21, %v2438_v50  ;;  %v3137_v24 = vrot.slane %v11744_v9, 2  ;;  %4085 = vmatpush.msra.mxu0 %v2970_v33  ;;  %v16005_v33 = vld [vmem:[#allocation52_spill] sm:$0xff] }
 0x339   :  { %v2127_v49 = vadd.f32 %v2058_v15, %v1682_v43  ;;  %v11768_v57 = vmax.f32 %v16000_v55, %v2439_v60  ;;  %v2441_v26 = vsel %vm152_vm0, %v2436_v44, %v2440_v58  ;;  %v2798_v21 = vsel %vm2786_vm6, %v2701_v23, %v2703_v8  ;;  %v16003_v15 = vld [vmem:[#allocation81_spill] sm:$0xff] }
 0x33a   :  { %v11774_v31 = vadd.f32 %v10735_v36, %v2126_v47  ;;  %v16001_v35 = vmax.f32 %v11685_v1, 0.0  ;;  %v3139_v43 = vrot.slane %v11751_v51, 2  ;;  %v791_v60 = vadd.f32 %v16003_v15, %v16002_v17  ;;  %v16008_v17 = vld [vmem:[#allocation19_spill] sm:$0xff] }
 0x33b   :  { %v11784_v44 = vadd.f32 %v10739_v54, %v2127_v49  ;;  %2760 = vrot.lane.b32.xlu0 %v11768_v57, %s8860_s14  ;;  %v1238_v23 = vadd.f32 %v16004_v10, %v678_v18  ;;  %v11790_v47 = vmax.f32 %v16005_v33, %v2703_v8  ;;  %v11798_v49 = vmax.f32 %v16008_v17, %v2798_v21  ;;  %v2985_v8 = vld [vmem:[%s15535_s3 + $0x120] sm:$0xff]  ;;  %v2705_v33 = vpop.permute.xlu2 %2704 }
 0x33c   :  { %v11778_v29 = vmax.f32 %v16001_v35, %v2441_v26  ;;  %v15607_v1 = vmax.f32 %v11774_v31, 0.0  ;;  %v3140_v55 = vsel %vm824_vm2, %v3135_v12, %v3139_v43  ;;  %v16007_v26 = vld [vmem:[#allocation108_spill] sm:$0xff]  ;;  %v3138_v18 = vsel %vm824_vm2, %v3133_v59, %v3137_v24  ;;  %3980 = vmatpush.msra.mxu3 %v2985_v8  ;;  %v1619_v8 = vpop.f32.mrf.mxu3 }
 0x33d   :  { %16006 = vst [vmem:[#allocation79_spill] sm:$0xff] %v11790_v47  ;;  %v1239_v35 = vadd.f32 %v16007_v26, %v791_v60  ;;  %v15608_v15 = vmax.f32 %v11784_v44, 0.0  ;;  %v1683_v10 = vadd.f32 %v1503_v7, %v1238_v23  ;;  %v3143_v51 = vrot.slane %v11790_v47, 2  ;;  %v1506_v7 = vpop.f32.mrf.mxu2 }
 0x33e   :  { %2762 = vrot.lane.b32.xlu1 %v11778_v29, %s8860_s14  ;;  %16009 = vst [vmem:[#allocation33_spill] sm:$0xff] %v11798_v49  ;;  %v2442_v12 = vrot.slane %v15607_v1, 1  ;;  %3375 = vmatmul.f32.gmra.mxu2 %v3138_v18  ;;  %v2707_v26 = vpop.permute.xlu0 %2706 }
 0x33f   :  { %8198 = vmatmul.msk.f32.gmra.mxu3 %vm3260_vm7, %v3140_v55  ;;  %8231 = vmatmul.msk.f32.gmra.mxu1 %vm3260_vm7, %v3140_v55  ;;  %v1684_v21 = vadd.f32 %v1616_v16, %v1239_v35  ;;  %v2444_v60 = vrot.slane %v15608_v15, 1  ;;  %v1948_v17 = vpop.f32.mrf.mxu0  ;;  %v3141_v35 = vrot.slane %v11798_v49, 2  ;;  %v16012_v15 = vld [vmem:[#allocation86_spill] sm:$0xff] }
 0x340   :  { %3601 = vmatmul.f32.gmra.mxu0 %v3138_v18  ;;  %v2128_v55 = vadd.f32 %v1948_v17, %v1683_v10  ;;  %v2061_v59 = vpop.f32.mrf.mxu1  ;;  %v2443_v9 = vsel %vm152_vm0, %v2438_v50, %v2442_v12  ;;  %v16011_v18 = vld [vmem:[#allocation15_spill] sm:$0xff]  ;;  %v2799_v10 = vsel %vm2786_vm6, %v2705_v33, %v2707_v26  ;;  %v16013_v17 = vmax.f32 %v11733_v62, 0.0 }
 0x341   :  { %v2129_v23 = vadd.f32 %v2061_v59, %v1684_v21  ;;  %v11815_v1 = vmax.f32 %v16010_v22, %v2443_v9  ;;  %v2445_v16 = vsel %vm152_vm0, %v2440_v58, %v2444_v60  ;;  %v681_v39 = vadd.f32 %v16012_v15, %v16011_v18  ;;  %v16015_v22 = vld [vmem:[#allocation85_spill] sm:$0xff] }
 0x342   :  { %v11823_v50 = vadd.f32 %v10735_v36, %v2128_v55  ;;  %v11827_v21 = vmax.f32 %v16013_v17, %v2445_v16  ;;  %v794_v9 = vadd.f32 %v16015_v22, %v16014_v2  ;;  %v16016_v15 = vld [vmem:[#allocation109_spill] sm:$0xff]  ;;  %v11838_v33 = vmax.f32 %v11143_v27, %v2707_v26  ;;  %v16018_v16 = vld [vmem:[#allocation110_spill] sm:$0xff] }
 0x343   :  { %v11832_v58 = vadd.f32 %v10739_v54, %v2129_v23  ;;  %2764 = vrot.lane.b32.xlu2 %v11815_v1, %s8860_s14  ;;  %v1240_v59 = vadd.f32 %v16016_v15, %v681_v39  ;;  %v3144_v62 = vsel %vm824_vm2, %v3139_v43, %v3143_v51  ;;  %v16019_v17 = vld [vmem:[#allocation22_spill] sm:$0xff]  ;;  %v3142_v39 = vsel %vm824_vm2, %v3137_v24, %v3141_v35 }
 0x344   :  { %16017 = vst [vmem:[#allocation80_spill] sm:$0xff] %v11838_v33  ;;  %v15612_v55 = vmax.f32 %v11823_v50, 0.0  ;;  %2766 = vrot.lane.b32.xlu0 %v11827_v21, %s8860_s14  ;;  %v1241_v18 = vadd.f32 %v16018_v16, %v794_v9  ;;  %v11846_v23 = vmax.f32 %v16019_v17, %v2799_v10  ;;  %v2965_v24 = vld [vmem:[%s15535_s3 + $0x80] sm:$0xff] }
 0x345   :  { %v15611_v2 = vmax.f32 %v11832_v58, 0.0  ;;  %v2709_v27 = vpop.permute.xlu1 %2708  ;;  %v1685_v26 = vadd.f32 %v1506_v7, %v1240_v59  ;;  %v2968_v7 = vld [vmem:[%s15535_s3 + $0x98] sm:$0xff]  ;;  %v2711_v59 = vpop.permute.xlu2 %2710  ;;  %3861 = vmatpush.msra.mxu2 %v2965_v24 }
 0x346   :  { %16020 = vst [vmem:[#allocation36_spill] sm:$0xff] %v11846_v23  ;;  %v2446_v22 = vrot.slane %v15612_v55, 1  ;;  %3378 = vmatmul.f32.gmra.mxu2 %v3142_v39  ;;  %v1686_v43 = vadd.f32 %v1619_v8, %v1241_v18  ;;  %4086 = vmatpush.msra.mxu0 %v2968_v7  ;;  %v16028_v7 = vld [vmem:[#allocation112_spill] sm:$0xff] }
 0x347   :  { %8199 = vmatmul.msk.f32.gmra.mxu3 %vm3260_vm7, %v3144_v62  ;;  %8232 = vmatmul.msk.f32.gmra.mxu1 %vm3260_vm7, %v3144_v62  ;;  %v2448_v10 = vrot.slane %v15611_v2, 1  ;;  %v1951_v9 = vpop.f32.mrf.mxu0  ;;  %v3147_v62 = vrot.slane %v11838_v33, 2  ;;  %v16023_v2 = vld [vmem:[#allocation90_spill] sm:$0xff]  ;;  %v2800_v33 = vsel %vm2786_vm6, %v2709_v27, %v2711_v59  ;;  %v1622_v27 = vpop.f32.mrf.mxu3 }
 0x348   :  { %3604 = vmatmul.f32.gmra.mxu0 %v3142_v39  ;;  %v2130_v15 = vadd.f32 %v1951_v9, %v1685_v26  ;;  %v2064_v16 = vpop.f32.mrf.mxu1  ;;  %v2447_v17 = vsel %vm152_vm0, %v2442_v12, %v2446_v22  ;;  %v16021_v39 = vmax.f32 %v11774_v31, 0.0  ;;  %v3145_v12 = vrot.slane %v11846_v23, 2  ;;  %v16022_v9 = vld [vmem:[#allocation17_spill] sm:$0xff] }
 0x349   :  { %v2131_v8 = vadd.f32 %v2064_v16, %v1686_v43  ;;  %v2449_v18 = vsel %vm152_vm0, %v2444_v60, %v2448_v10  ;;  %v684_v55 = vadd.f32 %v16023_v2, %v16022_v9  ;;  %v16024_v43 = vmax.f32 %v11784_v44, 0.0  ;;  %v16025_v60 = vld [vmem:[#allocation18_spill] sm:$0xff]  ;;  %v16026_v31 = vld [vmem:[#allocation89_spill] sm:$0xff]  ;;  %v16027_v2 = vld [vmem:[#allocation111_spill] sm:$0xff] }
 0x34a   :  { %v11867_v26 = vmax.f32 %v16021_v39, %v2447_v17  ;;  %v11874_v49 = vadd.f32 %v10735_v36, %v2130_v15  ;;  %v797_v17 = vadd.f32 %v16026_v31, %v16025_v60  ;;  %v1509_v39 = vpop.f32.mrf.mxu2  ;;  %v3148_v44 = vsel %vm824_vm2, %v3143_v51, %v3147_v62 }
 0x34b   :  { %v11878_v16 = vmax.f32 %v16024_v43, %v2449_v18  ;;  %v11883_v23 = vadd.f32 %v10739_v54, %v2131_v8  ;;  %v1242_v24 = vadd.f32 %v16027_v2, %v684_v55  ;;  %v11894_v9 = vmax.f32 %v11164_v20, %v2800_v33 }
 0x34c   :  { %2768 = vrot.lane.b32.xlu1 %v11867_v26, %s8860_s14  ;;  %v2264_v15 = vmax.f32 %v11874_v49, 0.0  ;;  %v1243_v18 = vadd.f32 %v16028_v7, %v797_v17  ;;  %v3146_v43 = vsel %vm824_vm2, %v3141_v35, %v3145_v12  ;;  %v11901_v60 = vmax.f32 %v11170_v45, %v2711_v59 }
 0x34d   :  { %2770 = vrot.lane.b32.xlu2 %v11878_v16, %s8860_s14  ;;  %16029 = vst [vmem:[#allocation83_spill] sm:$0xff] %v11894_v9  ;;  %v2265_v8 = vmax.f32 %v11883_v23, 0.0  ;;  %v2713_v55 = vpop.permute.xlu0 %2712  ;;  %v1687_v49 = vadd.f32 %v1509_v39, %v1242_v24  ;;  %v16031_v39 = vmax.f32 %v11823_v50, 0.0  ;;  %v3149_v24 = vrot.slane %v11894_v9, 2 }
 0x34e   :  { %16030 = vst [vmem:[#allocation35_spill] sm:$0xff] %v11901_v60  ;;  %v2450_v31 = vrot.slane %v2264_v15, 1  ;;  %3381 = vmatmul.f32.gmra.mxu2 %v3146_v43  ;;  %v1688_v51 = vadd.f32 %v1622_v27, %v1243_v18  ;;  %v2715_v20 = vpop.permute.xlu1 %2714 }
 0x34f   :  { %8200 = vmatmul.msk.f32.gmra.mxu3 %vm3260_vm7, %v3148_v44  ;;  %8233 = vmatmul.msk.f32.gmra.mxu1 %vm3260_vm7, %v3148_v44  ;;  %v2452_v17 = vrot.slane %v2265_v8, 1  ;;  %v1954_v33 = vpop.f32.mrf.mxu0  ;;  %v2986_v44 = vld [vmem:[%s15535_s3 + $0x128] sm:$0xff]  ;;  %v2801_v27 = vsel %vm2786_vm6, %v2713_v55, %v2715_v20  ;;  %v11924_v50 = vmax.f32 %v11201_v6, %v2715_v20  ;;  %v2717_v6 = vpop.permute.xlu2 %2716 }
 0x350   :  { %3607 = vmatmul.f32.gmra.mxu0 %v3146_v43  ;;  %v2132_v2 = vadd.f32 %v1954_v33, %v1687_v49  ;;  %v2067_v23 = vpop.f32.mrf.mxu1  ;;  %v2451_v7 = vsel %vm152_vm0, %v2446_v22, %v2450_v31  ;;  %4206 = vmatpush.msra.mxu1 %v2986_v44  ;;  %v16032_v22 = vmax.f32 %v11832_v58, 0.0  ;;  %v3151_v49 = vrot.slane %v11901_v60, 2  ;;  %v16034_v55 = vld [vmem:[#allocation55_spill] sm:$0xff] }
 0x351   :  { %v2133_v35 = vadd.f32 %v2067_v23, %v1688_v51  ;;  %v11909_v45 = vmax.f32 %v16031_v39, %v2451_v7  ;;  %v2453_v59 = vsel %vm152_vm0, %v2448_v10, %v2452_v17  ;;  %16033 = vst [vmem:[#allocation84_spill] sm:$0xff] %v11924_v50  ;;  %v11930_v58 = vmax.f32 %v16034_v55, %v2801_v27  ;;  %v2966_v7 = vld [vmem:[%s15535_s3 + $0x88] sm:$0xff] }
 0x352   :  { %v2202_v18 = vadd.f32 %v10735_v36, %v2132_v2  ;;  %v11917_v43 = vmax.f32 %v16032_v22, %v2453_v59  ;;  %v3152_v36 = vsel %vm824_vm2, %v3147_v62, %v3151_v49  ;;  %v2963_v62 = vld [vmem:[%s15535_s3 + $0x70] sm:$0xff]  ;;  %4087 = vmatpush.msra.mxu0 %v2966_v7 }
 0x353   :  { %v2203_v51 = vadd.f32 %v10739_v54, %v2133_v35  ;;  %2772 = vrot.lane.b32.xlu0 %v11909_v45, %s8860_s14  ;;  %16035 = vst [vmem:[#allocation38_spill] sm:$0xff] %v11930_v58  ;;  %v3150_v54 = vsel %vm824_vm2, %v3145_v12, %v3149_v24  ;;  %v16036_v35 = vld [vmem:[#allocation2_spill] sm:$0xff]  ;;  %v3155_v12 = vrot.slane %v11924_v50, 2  ;;  %3862 = vmatpush.msra.mxu2 %v2963_v62  ;;  %v3153_v22 = vrot.slane %v11930_v58, 2  ;;  %v16040_v62 = vld [vmem:[#allocation56_spill] sm:$0xff] }
 0x354   :  { %v2266_v10 = vmax.f32 %v2202_v18, 0.0  ;;  %2774 = vrot.lane.b32.xlu1 %v11917_v43, %s8860_s14  ;;  %v15619_v55 = vmax.f32 %v16036_v35, 0.0 }
 0x355   :  { %v2267_v33 = vmax.f32 %v2203_v51, 0.0 }
 0x356   :  { %v2454_v2 = vrot.slane %v2266_v10, 1  ;;  %3384 = vmatmul.f32.gmra.mxu2 %v3150_v54  ;;  %v2719_v23 = vpop.permute.xlu0 %2718 }
 0x357   :  { %8201 = vmatmul.msk.f32.gmra.mxu3 %vm3260_vm7, %v3152_v36  ;;  %8234 = vmatmul.msk.f32.gmra.mxu1 %vm3260_vm7, %v3152_v36  ;;  %v2456_v20 = vrot.slane %v2267_v33, 1  ;;  %v2802_v51 = vsel %vm2786_vm6, %v2717_v6, %v2719_v23 }
 0x358   :  { %3610 = vmatmul.f32.gmra.mxu0 %v3150_v54  ;;  %v2455_v44 = vsel %vm152_vm0, %v2450_v31, %v2454_v2  ;;  %v2458_v39 = vsel %vm152_vm0, %v2454_v2, %v16036_v35  ;;  %v11957_v31 = vmax.f32 %v11225_v28, %v2719_v23 }
 0x359   :  { %v11945_v59 = vmax.f32 %v2264_v15, %v2455_v44  ;;  %v2457_v27 = vsel %vm152_vm0, %v2452_v17, %v2456_v20  ;;  %v11948_v18 = vmax.f32 %v2266_v10, %v2458_v39  ;;  %v3156_v15 = vsel %vm824_vm2, %v3151_v49, %v3155_v12  ;;  %v2723_v49 = vpop.permute.xlu2 %2722 }
 0x35a   :  { %v11952_v36 = vmax.f32 %v2265_v8, %v2457_v27  ;;  %v11965_v17 = vmax.f32 %v11220_v32, %v2802_v51  ;;  %v3154_v10 = vsel %vm824_vm2, %v3149_v24, %v3153_v22  ;;  %v2459_v28 = vsel %vm152_vm0, %v2456_v20, %v16036_v35  ;;  %v16038_v20 = vld [vmem:[#allocation21_spill] sm:$0xff] }
 0x35b   :  { %2776 = vrot.lane.b32.xlu2 %v11945_v59, %s8860_s14  ;;  %v3159_v54 = vrot.slane %v11957_v31, 2  ;;  %v11974_v2 = vmax.f32 %v2267_v33, %v2459_v28  ;;  %v11991_v7 = vmax.f32 %v16040_v62, %v2723_v49  ;;  %v2964_v27 = vld [vmem:[%s15535_s3 + $0x78] sm:$0xff]  ;;  %vm7003_vm0 = vcmask 916480  }
 0x35c   :  { %2778 = vrot.lane.b32.xlu0 %v11952_v36, %s8860_s14  ;;  %2780 = vrot.lane.b32.xlu1 %v11948_v18, %s8860_s14  ;;  %16037 = vst [vmem:[#allocation87_spill] sm:$0xff] %v11965_v17  ;;  %v3157_v32 = vrot.slane %v11965_v17, 2 }
 0x35d   :  { %v2721_v8 = vpop.permute.xlu1 %2720  ;;  %v3160_v24 = vsel %vm824_vm2, %v3155_v12, %v3159_v54  ;;  %16041 = vst [vmem:[#allocation88_spill] sm:$0xff] %v11991_v7  ;;  %v2961_v12 = vld [vmem:[%s15535_s3 + $0x60] sm:$0xff]  ;;  %4088 = vmatpush.msra.mxu0 %v2964_v27 }
 0x35e   :  { %3387 = vmatmul.f32.gmra.mxu2 %v3154_v10  ;;  %v2803_v6 = vsel %vm2786_vm6, %v2721_v8, %v2723_v49  ;;  %v3158_v33 = vsel %vm824_vm2, %v3153_v22, %v3157_v32 }
 0x35f   :  { %8202 = vmatmul.msk.f32.gmra.mxu3 %vm3260_vm7, %v3156_v15  ;;  %8235 = vmatmul.msk.f32.gmra.mxu1 %vm3260_vm7, %v3156_v15  ;;  %v11985_v23 = vmax.f32 %v16038_v20, %v2803_v6  ;;  %v3163_v15 = vrot.slane %v11991_v7, 2 }
 0x360   :  { %3613 = vmatmul.f32.gmra.mxu0 %v3154_v10  ;;  %3863 = vmatpush.msra.mxu2 %v2961_v12 }
 0x361   :  { %16039 = vst [vmem:[#allocation37_spill] sm:$0xff] %v11985_v23  ;;  %v3161_v51 = vrot.slane %v11985_v23, 2  ;;  %v3164_v10 = vsel %vm824_vm2, %v3159_v54, %v3163_v15  ;;  %v2729_v6 = vpop.permute.xlu2 %2728 }
 0x363   :  { %2782 = vrot.lane.b32.xlu2 %v11974_v2, %s8860_s14  ;;  %v3162_v49 = vsel %vm824_vm2, %v3157_v32, %v3161_v51 }
 0x364   :  { %2784 = vrot.lane.b32.xlu0 %v15619_v55, %s8860_s14 }
 0x366   :  { %3390 = vmatmul.f32.gmra.mxu2 %v3158_v33  ;;  %v2727_v39 = vpop.permute.xlu1 %2726 }
 0x367   :  { %8203 = vmatmul.msk.f32.gmra.mxu3 %vm3260_vm7, %v3160_v24  ;;  %8236 = vmatmul.msk.f32.gmra.mxu1 %vm3260_vm7, %v3160_v24  ;;  %v2725_v44 = vpop.permute.xlu0 %2724  ;;  %v12003_v8 = vmax.f32 %v11311_v46, %v2727_v39  ;;  %v2983_v46 = vld [vmem:[%s15535_s3 + $0x110] sm:$0xff] }
 0x368   :  { %3616 = vmatmul.f32.gmra.mxu0 %v3158_v33  ;;  %v2804_v22 = vsel %vm2786_vm6, %v2725_v44, %v2727_v39  ;;  %3981 = vmatpush.msra.mxu3 %v2983_v46 }
 0x369   :  { %16042 = vst [vmem:[#allocation40_spill] sm:$0xff] %v12003_v8  ;;  %v12007_v28 = vmax.f32 %v11315_v63, %v2804_v22  ;;  %v3167_v20 = vrot.slane %v12003_v8, 2 }
 0x36b   :  { %16043 = vst [vmem:[#allocation91_spill] sm:$0xff] %v12007_v28  ;;  %v3165_v54 = vrot.slane %v12007_v28, 2  ;;  %v3168_v44 = vsel %vm824_vm2, %v3163_v15, %v3167_v20  ;;  %v2735_v15 = vpop.permute.xlu2 %2734 }
 0x36d   :  { %v3166_v27 = vsel %vm824_vm2, %v3161_v51, %v3165_v54 }
 0x36e   :  { %3393 = vmatmul.f32.gmra.mxu2 %v3162_v49 }
 0x36f   :  { %8204 = vmatmul.msk.f32.gmra.mxu3 %vm3260_vm7, %v3164_v10  ;;  %8237 = vmatmul.msk.f32.gmra.mxu1 %vm3260_vm7, %v3164_v10  ;;  %v2731_v24 = vpop.permute.xlu0 %2730 }
 0x370   :  { %3619 = vmatmul.f32.gmra.mxu0 %v3162_v49  ;;  %v2805_v63 = vsel %vm2786_vm6, %v2729_v6, %v2731_v24  ;;  %v12023_v32 = vmax.f32 %v11369_v4, %v2731_v24  ;;  %v2959_v4 = vld [vmem:[%s15535_s3 + $0x50] sm:$0xff] }
 0x371   :  { %v12027_v39 = vmax.f32 %v11358_v11, %v2805_v63  ;;  %v2962_v11 = vld [vmem:[%s15535_s3 + $0x68] sm:$0xff]  ;;  %3864 = vmatpush.msra.mxu2 %v2959_v4 }
 0x372   :  { %16046 = vst [vmem:[#allocation42_spill] sm:$0xff] %v12023_v32  ;;  %v3171_v10 = vrot.slane %v12023_v32, 2  ;;  %4089 = vmatpush.msra.mxu0 %v2962_v11 }
 0x373   :  { %v12020_v62 = vpop.f32.mrf.mxu0  ;;  %16047 = vst [vmem:[#allocation41_spill] sm:$0xff] %v12027_v39  ;;  %v3169_v6 = vrot.slane %v12027_v39, 2 }
 0x374   :  { %v12018_v33 = vpop.f32.mrf.mxu1  ;;  %16045 = vst [vmem:[#allocation92_spill] sm:$0xff] %v12020_v62 }
 0x375   :  { %16044 = vst [vmem:[#allocation39_spill] sm:$0xff] %v12018_v33  ;;  %v2733_v12 = vpop.permute.xlu1 %2732  ;;  %v3170_v4 = vsel %vm824_vm2, %v3165_v54, %v3169_v6 }
 0x376   :  { %3396 = vmatmul.f32.gmra.mxu2 %v3166_v27  ;;  %v2806_v51 = vsel %vm2786_vm6, %v2733_v12, %v2735_v15  ;;  %v12055_v12 = vmax.f32 %v11418_v38, %v2735_v15  ;;  %v2984_v38 = vld [vmem:[%s15535_s3 + $0x118] sm:$0xff] }
 0x377   :  { %8205 = vmatmul.msk.f32.gmra.mxu3 %vm3260_vm7, %v3168_v44  ;;  %8238 = vmatmul.msk.f32.gmra.mxu1 %vm3260_vm7, %v3168_v44  ;;  %v3172_v44 = vsel %vm824_vm2, %v3167_v20, %v3171_v10 }
 0x378   :  { %3622 = vmatmul.f32.gmra.mxu0 %v3166_v27  ;;  %v12049_v27 = vmax.f32 %v11409_v48, %v2806_v51  ;;  %16051 = vst [vmem:[#allocation45_spill] sm:$0xff] %v12055_v12  ;;  %4207 = vmatpush.msra.mxu1 %v2984_v38 }
 0x379   :  { %v3349_v49 = vpop.f32.mrf.mxu2 }
 0x37a   :  { %v3462_v22 = vpop.f32.mrf.mxu3  ;;  %16050 = vst [vmem:[#allocation46_spill] sm:$0xff] %v12049_v27  ;;  %v3173_v20 = vrot.slane %v12049_v27, 2 }
 0x37b   :  { %v12041_v24 = vadd.f32 %v3462_v22, %v3349_v49  ;;  %v12045_v63 = vpop.f32.mrf.mxu0 }
 0x37c   :  { %v12043_v46 = vpop.f32.mrf.mxu1  ;;  %16049 = vst [vmem:[#allocation43_spill] sm:$0xff] %v12045_v63 }
 0x37d   :  { %16048 = vst [vmem:[#allocation44_spill] sm:$0xff] %v12043_v46  ;;  %v2737_v55 = vpop.permute.xlu0 %2736 }
 0x37e   :  { %3399 = vmatmul.f32.gmra.mxu2 %v3170_v4  ;;  %v2739_v22 = vpop.permute.xlu1 %2738 }
 0x37f   :  { %8206 = vmatmul.msk.f32.gmra.mxu3 %vm3260_vm7, %v3172_v44  ;;  %8239 = vmatmul.msk.f32.gmra.mxu1 %vm3260_vm7, %v3172_v44  ;;  %v2807_v48 = vsel %vm2786_vm6, %v2737_v55, %v2739_v22  ;;  %v3175_v44 = vrot.slane %v12055_v12, 2  ;;  %v12070_v15 = vmax.f32 %v11465_v37, %v2739_v22  ;;  %v2957_v37 = vld [vmem:[%s15535_s3 + $0x40] sm:$0xff] }
 0x380   :  { %3625 = vmatmul.f32.gmra.mxu0 %v3170_v4  ;;  %v12074_v55 = vmax.f32 %v11458_v41, %v2807_v48  ;;  %3865 = vmatpush.msra.mxu2 %v2957_v37 }
 0x381   :  { %v3352_v49 = vpop.f32.mrf.mxu2  ;;  %16054 = vst [vmem:[#allocation93_spill] sm:$0xff] %v12070_v15  ;;  %v3176_v4 = vsel %vm824_vm2, %v3171_v10, %v3175_v44  ;;  %v2960_v10 = vld [vmem:[%s15535_s3 + $0x58] sm:$0xff]  ;;  %v3179_v22 = vrot.slane %v12070_v15, 2 }
 0x382   :  { %v3465_v11 = vpop.f32.mrf.mxu3  ;;  %16055 = vst [vmem:[#allocation50_spill] sm:$0xff] %v12074_v55  ;;  %4090 = vmatpush.msra.mxu0 %v2960_v10 }
 0x383   :  { %v12059_v51 = vadd.f32 %v3465_v11, %v3352_v49  ;;  %v12067_v54 = vpop.f32.mrf.mxu0  ;;  %v3174_v11 = vsel %vm824_vm2, %v3169_v6, %v3173_v20  ;;  %v2741_v49 = vpop.permute.xlu2 %2740  ;;  %v3177_v6 = vrot.slane %v12074_v55, 2  ;;  %v3180_v33 = vsel %vm824_vm2, %v3175_v44, %v3179_v22 }
 0x384   :  { %v12061_v46 = vpop.f32.mrf.mxu1  ;;  %16053 = vst [vmem:[#allocation47_spill] sm:$0xff] %v12067_v54 }
 0x385   :  { %16052 = vst [vmem:[#allocation48_spill] sm:$0xff] %v12061_v46 }
 0x386   :  { %3402 = vmatmul.f32.gmra.mxu2 %v3174_v11  ;;  %v2743_v46 = vpop.permute.xlu0 %2742 }
 0x387   :  { %8207 = vmatmul.msk.f32.gmra.mxu3 %vm3260_vm7, %v3176_v4  ;;  %8240 = vmatmul.msk.f32.gmra.mxu1 %vm3260_vm7, %v3176_v4  ;;  %v2808_v38 = vsel %vm2786_vm6, %v2741_v49, %v2743_v46  ;;  %v12095_v63 = vmax.f32 %v11523_v13, %v2743_v46  ;;  %v3178_v49 = vsel %vm824_vm2, %v3173_v20, %v3177_v6 }
 0x388   :  { %3628 = vmatmul.f32.gmra.mxu0 %v3174_v11  ;;  %v12099_v62 = vmax.f32 %v11512_v34, %v2808_v38 }
 0x389   :  { %v3355_v48 = vpop.f32.mrf.mxu2  ;;  %16058 = vst [vmem:[#allocation95_spill] sm:$0xff] %v12095_v63 }
 0x38a   :  { %v3468_v41 = vpop.f32.mrf.mxu3  ;;  %16059 = vst [vmem:[#allocation54_spill] sm:$0xff] %v12099_v62  ;;  %v3181_v46 = vrot.slane %v12099_v62, 2 }
 0x38b   :  { %v12088_v4 = vadd.f32 %v3468_v41, %v3355_v48  ;;  %v12092_v54 = vpop.f32.mrf.mxu0  ;;  %v3183_v41 = vrot.slane %v12095_v63, 2  ;;  %v2747_v48 = vpop.permute.xlu2 %2746 }
 0x38c   :  { %v12090_v11 = vpop.f32.mrf.mxu1  ;;  %16057 = vst [vmem:[#allocation49_spill] sm:$0xff] %v12092_v54  ;;  %v3182_v54 = vsel %vm824_vm2, %v3177_v6, %v3181_v46 }
 0x38d   :  { %16056 = vst [vmem:[#allocation94_spill] sm:$0xff] %v12090_v11  ;;  %v2745_v37 = vpop.permute.xlu1 %2744 }
 0x38e   :  { %3405 = vmatmul.f32.gmra.mxu2 %v3178_v49  ;;  %v2809_v44 = vsel %vm2786_vm6, %v2745_v37, %v2747_v48  ;;  %v12121_v37 = vmax.f32 %v11577_v40, %v2747_v48 }
 0x38f   :  { %8208 = vmatmul.msk.f32.gmra.mxu3 %vm3260_vm7, %v3180_v33  ;;  %8241 = vmatmul.msk.f32.gmra.mxu1 %vm3260_vm7, %v3180_v33  ;;  %v3184_v33 = vsel %vm824_vm2, %v3179_v22, %v3183_v41  ;;  %v12115_v20 = vmax.f32 %v11564_v3, %v2809_v44  ;;  %v2955_v22 = vld [vmem:[%s15535_s3 + $0x30] sm:$0xff]  ;;  %v2958_v3 = vld [vmem:[%s15535_s3 + $0x48] sm:$0xff] }
 0x390   :  { %3631 = vmatmul.f32.gmra.mxu0 %v3178_v49  ;;  %16063 = vst [vmem:[#allocation58_spill] sm:$0xff] %v12121_v37  ;;  %3866 = vmatpush.msra.mxu2 %v2955_v22  ;;  %v3187_v48 = vrot.slane %v12121_v37, 2 }
 0x391   :  { %v3358_v13 = vpop.f32.mrf.mxu2  ;;  %16062 = vst [vmem:[#allocation97_spill] sm:$0xff] %v12115_v20  ;;  %4091 = vmatpush.msra.mxu0 %v2958_v3 }
 0x392   :  { %v3471_v10 = vpop.f32.mrf.mxu3  ;;  %v3188_v62 = vsel %vm824_vm2, %v3183_v41, %v3187_v48 }
 0x393   :  { %v12107_v34 = vadd.f32 %v3471_v10, %v3358_v13  ;;  %v12111_v11 = vpop.f32.mrf.mxu0 }
 0x394   :  { %v12109_v38 = vpop.f32.mrf.mxu1  ;;  %16061 = vst [vmem:[#allocation53_spill] sm:$0xff] %v12111_v11 }
 0x395   :  { %16060 = vst [vmem:[#allocation96_spill] sm:$0xff] %v12109_v38  ;;  %v2749_v49 = vpop.permute.xlu0 %2748 }
 0x396   :  { %3408 = vmatmul.f32.gmra.mxu2 %v3182_v54  ;;  %v2751_v10 = vpop.permute.xlu1 %2750 }
 0x397   :  { %8209 = vmatmul.msk.f32.gmra.mxu3 %vm3260_vm7, %v3184_v33  ;;  %8242 = vmatmul.msk.f32.gmra.mxu1 %vm3260_vm7, %v3184_v33  ;;  %v3185_v33 = vrot.slane %v12115_v20, 2  ;;  %v2810_v40 = vsel %vm2786_vm6, %v2749_v49, %v2751_v10  ;;  %v12139_v11 = vmax.f32 %v11629_v56, %v2751_v10 }
 0x398   :  { %3634 = vmatmul.f32.gmra.mxu0 %v3182_v54  ;;  %v12143_v63 = vmax.f32 %v11619_v0, %v2810_v40 }
 0x399   :  { %v3361_v44 = vpop.f32.mrf.mxu2  ;;  %16066 = vst [vmem:[#allocation62_spill] sm:$0xff] %v12139_v11  ;;  %v3186_v49 = vsel %vm824_vm2, %v3181_v46, %v3185_v33 }
 0x39a   :  { %v3474_v13 = vpop.f32.mrf.mxu3  ;;  %16067 = vst [vmem:[#allocation4_spill] sm:$0xff] %v12143_v63  ;;  %v3189_v10 = vrot.slane %v12143_v63, 2 }
 0x39b   :  { %v12131_v6 = vadd.f32 %v3474_v13, %v3361_v44  ;;  %v12136_v38 = vpop.f32.mrf.mxu0  ;;  %v2753_v13 = vpop.permute.xlu2 %2752  ;;  %v3191_v44 = vrot.slane %v12139_v11, 2 }
 0x39c   :  { %v12133_v54 = vpop.f32.mrf.mxu1  ;;  %16065 = vst [vmem:[#allocation3_spill] sm:$0xff] %v12136_v38 }
 0x39d   :  { %16064 = vst [vmem:[#allocation57_spill] sm:$0xff] %v12133_v54  ;;  %v3192_v46 = vsel %vm824_vm2, %v3187_v48, %v3191_v44 }
 0x39e   :  { %3411 = vmatmul.f32.gmra.mxu2 %v3186_v49 }
 0x39f   :  { %8210 = vmatmul.msk.f32.gmra.mxu3 %vm3260_vm7, %v3188_v62  ;;  %8243 = vmatmul.msk.f32.gmra.mxu1 %vm3260_vm7, %v3188_v62  ;;  %v2755_v22 = vpop.permute.xlu0 %2754 }
 0x3a0   :  { %3637 = vmatmul.f32.gmra.mxu0 %v3186_v49  ;;  %v2811_v41 = vsel %vm2786_vm6, %v2753_v13, %v2755_v22  ;;  %v12158_v62 = vmax.f32 %v11680_v52, %v2755_v22  ;;  %v2981_v49 = vld [vmem:[%s15535_s3 + $0x100] sm:$0xff] }
 0x3a1   :  { %v3364_v56 = vpop.f32.mrf.mxu2  ;;  %v12165_v38 = vmax.f32 %v11668_v14, %v2811_v41  ;;  %3982 = vmatpush.msra.mxu3 %v2981_v49  ;;  %v2953_v22 = vld [vmem:[%s15535_s3 + $0x20] sm:$0xff]  ;;  %v2956_v14 = vld [vmem:[%s15535_s3 + $0x38] sm:$0xff] }
 0x3a2   :  { %v3477_v3 = vpop.f32.mrf.mxu3  ;;  %16070 = vst [vmem:[#allocation5_spill] sm:$0xff] %v12158_v62  ;;  %v3195_v48 = vrot.slane %v12158_v62, 2  ;;  %3867 = vmatpush.msra.mxu2 %v2953_v22  ;;  %4092 = vmatpush.msra.mxu0 %v2956_v14 }
 0x3a3   :  { %v12151_v0 = vadd.f32 %v3477_v3, %v3364_v56  ;;  %v12155_v54 = vpop.f32.mrf.mxu0  ;;  %16071 = vst [vmem:[#allocation66_spill] sm:$0xff] %v12165_v38  ;;  %v3190_v3 = vsel %vm824_vm2, %v3185_v33, %v3189_v10  ;;  %v2759_v56 = vpop.permute.xlu2 %2758 }
 0x3a4   :  { %v12153_v40 = vpop.f32.mrf.mxu1  ;;  %16069 = vst [vmem:[#allocation98_spill] sm:$0xff] %v12155_v54  ;;  %v3196_v54 = vsel %vm824_vm2, %v3191_v44, %v3195_v48 }
 0x3a5   :  { %16068 = vst [vmem:[#allocation61_spill] sm:$0xff] %v12153_v40  ;;  %v2757_v13 = vpop.permute.xlu1 %2756 }
 0x3a6   :  { %3414 = vmatmul.f32.gmra.mxu2 %v3190_v3  ;;  %v2812_v33 = vsel %vm2786_vm6, %v2757_v13, %v2759_v56  ;;  %v12193_v13 = vmax.f32 %v11728_v42, %v2759_v56  ;;  %v2982_v56 = vld [vmem:[%s15535_s3 + $0x108] sm:$0xff] }
 0x3a7   :  { %8211 = vmatmul.msk.f32.gmra.mxu3 %vm3260_vm7, %v3192_v46  ;;  %8244 = vmatmul.msk.f32.gmra.mxu1 %vm3260_vm7, %v3192_v46  ;;  %v3193_v46 = vrot.slane %v12165_v38, 2  ;;  %v12187_v62 = vmax.f32 %v11717_v5, %v2812_v33 }
 0x3a8   :  { %3640 = vmatmul.f32.gmra.mxu0 %v3190_v3  ;;  %16075 = vst [vmem:[#allocation100_spill] sm:$0xff] %v12193_v13  ;;  %4208 = vmatpush.msra.mxu1 %v2982_v56 }
 0x3a9   :  { %v3367_v41 = vpop.f32.mrf.mxu2  ;;  %16074 = vst [vmem:[#allocation99_spill] sm:$0xff] %v12187_v62  ;;  %v3194_v22 = vsel %vm824_vm2, %v3189_v10, %v3193_v46  ;;  %v3197_v44 = vrot.slane %v12187_v62, 2 }
 0x3aa   :  { %v3480_v52 = vpop.f32.mrf.mxu3 }
 0x3ab   :  { %v12179_v49 = vadd.f32 %v3480_v52, %v3367_v41  ;;  %v12183_v40 = vpop.f32.mrf.mxu0 }
 0x3ac   :  { %v12181_v3 = vpop.f32.mrf.mxu1  ;;  %16073 = vst [vmem:[#allocation65_spill] sm:$0xff] %v12183_v40 }
 0x3ad   :  { %16072 = vst [vmem:[#allocation6_spill] sm:$0xff] %v12181_v3  ;;  %v2761_v63 = vpop.permute.xlu0 %2760 }
 0x3ae   :  { %3417 = vmatmul.f32.gmra.mxu2 %v3194_v22 }
 0x3af   :  { %8212 = vmatmul.msk.f32.gmra.mxu3 %vm3260_vm7, %v3196_v54  ;;  %8245 = vmatmul.msk.f32.gmra.mxu1 %vm3260_vm7, %v3196_v54  ;;  %v3199_v54 = vrot.slane %v12193_v13, 2 }
 0x3b0   :  { %3643 = vmatmul.f32.gmra.mxu0 %v3194_v22  ;;  %v2763_v52 = vpop.permute.xlu1 %2762 }
 0x3b1   :  { %v3370_v41 = vpop.f32.mrf.mxu2  ;;  %v2813_v5 = vsel %vm2786_vm6, %v2761_v63, %v2763_v52  ;;  %v12205_v42 = vmax.f32 %v11778_v29, %v2763_v52  ;;  %v3200_v10 = vsel %vm824_vm2, %v3195_v48, %v3199_v54  ;;  %v3198_v63 = vsel %vm824_vm2, %v3193_v46, %v3197_v44  ;;  %v2951_v48 = vld [vmem:[%s15535_s3 + $0x10] sm:$0xff] }
 0x3b2   :  { %v3483_v14 = vpop.f32.mrf.mxu3  ;;  %v12212_v22 = vmax.f32 %v11768_v57, %v2813_v5  ;;  %v2954_v57 = vld [vmem:[%s15535_s3 + $0x28] sm:$0xff]  ;;  %3868 = vmatpush.msra.mxu2 %v2951_v48 }
 0x3b3   :  { %v12197_v33 = vadd.f32 %v3483_v14, %v3370_v41  ;;  %v12202_v40 = vpop.f32.mrf.mxu0  ;;  %16078 = vst [vmem:[#allocation8_spill] sm:$0xff] %v12205_v42  ;;  %v2765_v14 = vpop.permute.xlu2 %2764  ;;  %v3203_v41 = vrot.slane %v12205_v42, 2  ;;  %4093 = vmatpush.msra.mxu0 %v2954_v57 }
 0x3b4   :  { %v12199_v3 = vpop.f32.mrf.mxu1  ;;  %16077 = vst [vmem:[#allocation70_spill] sm:$0xff] %v12202_v40  ;;  %v3201_v46 = vrot.slane %v12212_v22, 2 }
 0x3b5   :  { %16076 = vst [vmem:[#allocation7_spill] sm:$0xff] %v12199_v3  ;;  %v3204_v62 = vsel %vm824_vm2, %v3199_v54, %v3203_v41 }
 0x3b6   :  { %16079 = vst [vmem:[#allocation69_spill] sm:$0xff] %v12212_v22  ;;  %3420 = vmatmul.f32.gmra.mxu2 %v3198_v63  ;;  %v2767_v29 = vpop.permute.xlu0 %2766 }
 0x3b7   :  { %8213 = vmatmul.msk.f32.gmra.mxu3 %vm3260_vm7, %v3200_v10  ;;  %8246 = vmatmul.msk.f32.gmra.mxu1 %vm3260_vm7, %v3200_v10  ;;  %v2814_v10 = vsel %vm2786_vm6, %v2765_v14, %v2767_v29  ;;  %v12233_v40 = vmax.f32 %v11827_v21, %v2767_v29  ;;  %v3202_v14 = vsel %vm824_vm2, %v3197_v44, %v3201_v46 }
 0x3b8   :  { %3646 = vmatmul.f32.gmra.mxu0 %v3198_v63  ;;  %v12237_v42 = vmax.f32 %v11815_v1, %v2814_v10 }
 0x3b9   :  { %v3373_v5 = vpop.f32.mrf.mxu2  ;;  %16082 = vst [vmem:[#allocation9_spill] sm:$0xff] %v12233_v40 }
 0x3ba   :  { %v3486_v52 = vpop.f32.mrf.mxu3  ;;  %16083 = vst [vmem:[#allocation74_spill] sm:$0xff] %v12237_v42  ;;  %v3205_v29 = vrot.slane %v12237_v42, 2 }
 0x3bb   :  { %v12226_v63 = vadd.f32 %v3486_v52, %v3373_v5  ;;  %v3207_v52 = vrot.slane %v12233_v40, 2  ;;  %v2771_v5 = vpop.permute.xlu2 %2770 }
 0x3bc   :  { %v12228_v56 = vpop.f32.mrf.mxu1 }
 0x3bd   :  { %16080 = vst [vmem:[#allocation101_spill] sm:$0xff] %v12228_v56  ;;  %v12230_v3 = vpop.f32.mrf.mxu0 }
 0x3be   :  { %16081 = vst [vmem:[#allocation102_spill] sm:$0xff] %v12230_v3  ;;  %v2769_v48 = vpop.permute.xlu1 %2768  ;;  %3423 = vmatmul.f32.gmra.mxu2 %v3202_v14  ;;  %v3206_v3 = vsel %vm824_vm2, %v3201_v46, %v3205_v29 }
 0x3bf   :  { %8214 = vmatmul.msk.f32.gmra.mxu3 %vm3260_vm7, %v3204_v62  ;;  %8247 = vmatmul.msk.f32.gmra.mxu1 %vm3260_vm7, %v3204_v62  ;;  %v2815_v54 = vsel %vm2786_vm6, %v2769_v48, %v2771_v5  ;;  %v3208_v62 = vsel %vm824_vm2, %v3203_v41, %v3207_v52  ;;  %v12259_v48 = vmax.f32 %v11878_v16, %v2771_v5 }
 0x3c0   :  { %3649 = vmatmul.f32.gmra.mxu0 %v3202_v14  ;;  %v12253_v44 = vmax.f32 %v11867_v26, %v2815_v54  ;;  %v2952_v26 = vld [vmem:[%s15535_s3 + $0x18] sm:$0xff] }
 0x3c1   :  { %v3376_v21 = vpop.f32.mrf.mxu2  ;;  %16087 = vst [vmem:[#allocation104_spill] sm:$0xff] %v12259_v48  ;;  %4094 = vmatpush.msra.mxu0 %v2952_v26 }
 0x3c2   :  { %v3489_v57 = vpop.f32.mrf.mxu3  ;;  %16086 = vst [vmem:[#allocation103_spill] sm:$0xff] %v12253_v44  ;;  %v3209_v46 = vrot.slane %v12253_v44, 2 }
 0x3c3   :  { %v12245_v1 = vadd.f32 %v3489_v57, %v3376_v21  ;;  %v2949_v57 = vld [vmem:[%s15535_s3] sm:$0xff] }
 0x3c4   :  { %v12247_v10 = vpop.f32.mrf.mxu1  ;;  %3869 = vmatpush.msra.mxu2 %v2949_v57 }
 0x3c5   :  { %16084 = vst [vmem:[#allocation10_spill] sm:$0xff] %v12247_v10  ;;  %v12249_v56 = vpop.f32.mrf.mxu0  ;;  %v2773_v14 = vpop.permute.xlu0 %2772 }
 0x3c6   :  { %16085 = vst [vmem:[#allocation73_spill] sm:$0xff] %v12249_v56  ;;  %3426 = vmatmul.f32.gmra.mxu2 %v3206_v3  ;;  %v2775_v41 = vpop.permute.xlu1 %2774 }
 0x3c7   :  { %8215 = vmatmul.msk.f32.gmra.mxu3 %vm3260_vm7, %v3208_v62  ;;  %8248 = vmatmul.msk.f32.gmra.mxu1 %vm3260_vm7, %v3208_v62  ;;  %v2816_v16 = vsel %vm2786_vm6, %v2773_v14, %v2775_v41  ;;  %v3211_v62 = vrot.slane %v12259_v48, 2  ;;  %v12277_v56 = vmax.f32 %v11917_v43, %v2775_v41  ;;  %v3210_v14 = vsel %vm824_vm2, %v3205_v29, %v3209_v46 }
 0x3c8   :  { %3652 = vmatmul.f32.gmra.mxu0 %v3206_v3  ;;  %v12281_v26 = vmax.f32 %v11909_v45, %v2816_v16 }
 0x3c9   :  { %v3379_v54 = vpop.f32.mrf.mxu2  ;;  %16090 = vst [vmem:[#allocation78_spill] sm:$0xff] %v12277_v56  ;;  %v3212_v57 = vsel %vm824_vm2, %v3207_v52, %v3211_v62 }
 0x3ca   :  { %v3492_v21 = vpop.f32.mrf.mxu3  ;;  %16091 = vst [vmem:[#allocation12_spill] sm:$0xff] %v12281_v26  ;;  %v3213_v41 = vrot.slane %v12281_v26, 2 }
 0x3cb   :  { %v12269_v5 = vadd.f32 %v3492_v21, %v3379_v54  ;;  %v2777_v21 = vpop.permute.xlu2 %2776 }
 0x3cc   :  { %v12271_v3 = vpop.f32.mrf.mxu1 }
 0x3cd   :  { %16088 = vst [vmem:[#allocation20_spill] sm:$0xff] %v12271_v3  ;;  %v12274_v10 = vpop.f32.mrf.mxu0 }
 0x3ce   :  { %16089 = vst [vmem:[#allocation11_spill] sm:$0xff] %v12274_v10  ;;  %3429 = vmatmul.f32.gmra.mxu2 %v3210_v14  ;;  %v2779_v54 = vpop.permute.xlu0 %2778  ;;  %v3215_v10 = vrot.slane %v12277_v56, 2 }
 0x3cf   :  { %8216 = vmatmul.msk.f32.gmra.mxu3 %vm3260_vm7, %v3212_v57  ;;  %8249 = vmatmul.msk.f32.gmra.mxu1 %vm3260_vm7, %v3212_v57  ;;  %v2817_v52 = vsel %vm2786_vm6, %v2777_v21, %v2779_v54  ;;  %v12296_v29 = vmax.f32 %v11952_v36, %v2779_v54  ;;  %v3214_v21 = vsel %vm824_vm2, %v3209_v46, %v3213_v41  ;;  %v8350_v36 = vld [vmem:[%s15535_s3 + $0x390] sm:$0xff] }
 0x3d0   :  { %3655 = vmatmul.f32.gmra.mxu0 %v3210_v14  ;;  %v3216_v57 = vsel %vm824_vm2, %v3211_v62, %v3215_v10  ;;  %v12300_v14 = vmax.f32 %v11945_v59, %v2817_v52  ;;  %v8360_v59 = vld [vmem:[%s15535_s3 + $0x3e0] sm:$0x3]  ;;  %v2781_v62 = vpop.permute.xlu1 %2780  ;;  %4580 = vmatpush.msrb.mxu2 %v8350_v36 }
 0x3d1   :  { %v3382_v43 = vpop.f32.mrf.mxu2  ;;  %16094 = vst [vmem:[#allocation106_spill] sm:$0xff] %v12296_v29  ;;  %v3219_v46 = vrot.slane %v12296_v29, 2  ;;  %8362 = vmatpush.msk.msrb.mxu3 %vm3325_vm5, %v8360_v59 }
 0x3d2   :  { %v3495_v3 = vpop.f32.mrf.mxu3  ;;  %16095 = vst [vmem:[#allocation51_spill] sm:$0xff] %v12300_v14 }
 0x3d3   :  { %v12289_v45 = vadd.f32 %v3495_v3, %v3382_v43  ;;  %v2950_v3 = vld [vmem:[%s15535_s3 + $0x8] sm:$0xff]  ;;  %v2783_v43 = vpop.permute.xlu2 %2782 }
 0x3d4   :  { %v12291_v16 = vpop.f32.mrf.mxu1  ;;  %4095 = vmatpush.msra.mxu0 %v2950_v3  ;;  %v3220_v3 = vsel %vm824_vm2, %v3215_v10, %v3219_v46 }
 0x3d5   :  { %16092 = vst [vmem:[#allocation77_spill] sm:$0xff] %v12291_v16  ;;  %v12293_v44 = vpop.f32.mrf.mxu0 }
 0x3d6   :  { %16093 = vst [vmem:[#allocation105_spill] sm:$0xff] %v12293_v44  ;;  %3432 = vmatmul.f32.gmra.mxu2 %v3214_v21 }
 0x3d7   :  { %8217 = vmatmul.msk.f32.gmra.mxu3 %vm3260_vm7, %v3216_v57  ;;  %8250 = vmatmul.msk.f32.gmra.mxu1 %vm3260_vm7, %v3216_v57  ;;  %v3217_v57 = vrot.slane %v12300_v14, 2  ;;  %v12332_v14 = vmax.f32 %v11974_v2, %v2783_v43 }
 0x3d8   :  { %3658 = vmatmul.f32.gmra.mxu0 %v3214_v21  ;;  %v2818_v21 = vsel %vm2786_vm6, %v2781_v62, %v2783_v43 }
 0x3d9   :  { %v3385_v52 = vpop.f32.mrf.mxu2  ;;  %v12326_v36 = vmax.f32 %v11948_v18, %v2818_v21  ;;  %v3218_v59 = vsel %vm824_vm2, %v3213_v41, %v3217_v57  ;;  %16099 = vst [vmem:[#allocation81_spill] sm:$0xff] %v12332_v14  ;;  %v3223_v21 = vrot.slane %v12332_v14, 2  ;;  %v16102_v41 = vmax.f32 %v16036_v35, 0.0  ;;  %v8351_v35 = vld [vmem:[%s15535_s3 + $0x398] sm:$0xff] }
 0x3da   :  { %v3498_v54 = vpop.f32.mrf.mxu3  ;;  %4806 = vmatpush.msrb.mxu0 %v8351_v35 }
 0x3db   :  { %v12318_v16 = vadd.f32 %v3498_v54, %v3385_v52  ;;  %16098 = vst [vmem:[#allocation14_spill] sm:$0xff] %v12326_v36  ;;  %v2785_v54 = vpop.permute.xlu0 %2784  ;;  %v3224_v2 = vsel %vm824_vm2, %v3219_v46, %v3223_v21  ;;  %v8361_v46 = vld [vmem:[%s15535_s3 + $0x3e8] sm:$0x3] }
 0x3dc   :  { %v12320_v44 = vpop.f32.mrf.mxu1  ;;  %8395 = vmatpush.msk.msrb.mxu1 %vm3325_vm5, %v8361_v46 }
 0x3dd   :  { %16096 = vst [vmem:[#allocation13_spill] sm:$0xff] %v12320_v44  ;;  %v12322_v26 = vpop.f32.mrf.mxu0  ;;  %v3221_v44 = vrot.slane %v12326_v36, 2 }
 0x3de   :  { %16097 = vst [vmem:[#allocation82_spill] sm:$0xff] %v12322_v26  ;;  %3435 = vmatmul.f32.gmra.mxu2 %v3218_v59 }
 0x3df   :  { %8218 = vmatmul.msk.f32.gmra.mxu3 %vm3260_vm7, %v3220_v3  ;;  %8251 = vmatmul.msk.f32.gmra.mxu1 %vm3260_vm7, %v3220_v3  ;;  %v12344_v3 = vmax.f32 %v16102_v41, %v2785_v54  ;;  %v3222_v43 = vsel %vm824_vm2, %v3217_v57, %v3221_v44 }
 0x3e0   :  { %3661 = vmatmul.f32.gmra.mxu0 %v3218_v59  ;;  %v8348_v59 = vld [vmem:[%s15535_s3 + $0x380] sm:$0xff] }
 0x3e1   :  { %v3388_v52 = vpop.f32.mrf.mxu2  ;;  %16103 = vst [vmem:[#allocation108_spill] sm:$0xff] %v12344_v3  ;;  %4581 = vmatpush.msrb.mxu2 %v8348_v59  ;;  %v3225_v54 = vrot.slane %v12344_v3, 2  ;;  %v16118_v3 = vld [vmem:[#allocation63_spill] sm:$0xff] }
 0x3e2   :  { %v3501_v62 = vpop.f32.mrf.mxu3 }
 0x3e3   :  { %v12335_v10 = vadd.f32 %v3501_v62, %v3388_v52  ;;  %v3226_v59 = vsel %vm824_vm2, %v3221_v44, %v3225_v54  ;;  %v8346_v44 = vld [vmem:[%s15535_s3 + $0x370] sm:$0xff] }
 0x3e4   :  { %v12337_v18 = vpop.f32.mrf.mxu1  ;;  %4582 = vmatpush.msrb.mxu2 %v8346_v44 }
 0x3e5   :  { %16100 = vst [vmem:[#allocation107_spill] sm:$0xff] %v12337_v18  ;;  %v12340_v26 = vpop.f32.mrf.mxu0 }
 0x3e6   :  { %16101 = vst [vmem:[#allocation52_spill] sm:$0xff] %v12340_v26  ;;  %3438 = vmatmul.f32.gmra.mxu2 %v3222_v43 }
 0x3e7   :  { %8219 = vmatmul.msk.f32.gmra.mxu3 %vm3260_vm7, %v3224_v2  ;;  %8252 = vmatmul.msk.f32.gmra.mxu1 %vm3260_vm7, %v3224_v2 }
 0x3e8   :  { %3664 = vmatmul.f32.gmra.mxu0 %v3222_v43  ;;  %v3227_v43 = vsel %vm824_vm2, %v3223_v21, %v3225_v54 }
 0x3e9   :  { %v3391_v57 = vpop.f32.mrf.mxu2 }
 0x3ea   :  { %v3504_v62 = vpop.f32.mrf.mxu3 }
 0x3eb   :  { %v12361_v52 = vadd.f32 %v3504_v62, %v3391_v57 }
 0x3ec   :  { %v12363_v41 = vpop.f32.mrf.mxu1 }
 0x3ed   :  { %16104 = vst [vmem:[#allocation19_spill] sm:$0xff] %v12363_v41  ;;  %v12365_v2 = vpop.f32.mrf.mxu0 }
 0x3ee   :  { %16105 = vst [vmem:[#allocation15_spill] sm:$0xff] %v12365_v2  ;;  %3441 = vmatmul.f32.gmra.mxu2 %v3226_v59  ;;  %v8358_v2 = vld [vmem:[%s15535_s3 + $0x3d0] sm:$0xff] }
 0x3ef   :  { %8220 = vmatmul.msk.f32.gmra.mxu3 %vm3260_vm7, %v3227_v43  ;;  %8253 = vmatmul.msk.f32.gmra.mxu1 %vm3260_vm7, %v3227_v43 }
 0x3f0   :  { %3667 = vmatmul.f32.gmra.mxu0 %v3226_v59  ;;  %4705 = vmatpush.msrb.mxu3 %v8358_v2  ;;  %v16124_v2 = vld [vmem:[#allocation64_spill] sm:$0xff] }
 0x3f1   :  { %v3394_v18 = vpop.f32.mrf.mxu2 }
 0x3f2   :  { %v3507_v35 = vpop.f32.mrf.mxu3 }
 0x3f3   :  { %v12371_v46 = vadd.f32 %v3507_v35, %v3394_v18  ;;  %v8349_v18 = vld [vmem:[%s15535_s3 + $0x388] sm:$0xff] }
 0x3f4   :  { %v12373_v62 = vpop.f32.mrf.mxu1  ;;  %4807 = vmatpush.msrb.mxu0 %v8349_v18 }
 0x3f5   :  { %16106 = vst [vmem:[#allocation86_spill] sm:$0xff] %v12373_v62  ;;  %v12375_v57 = vpop.f32.mrf.mxu0 }
 0x3f6   :  { %16107 = vst [vmem:[#allocation16_spill] sm:$0xff] %v12375_v57  ;;  %3870 = vmatmul.f32.vlgmr.msra.gmra.mxu2 %v11301_v25  ;;  %v8344_v57 = vld [vmem:[%s15535_s3 + $0x360] sm:$0xff] }
 0x3f7   :  { %8255 = vmatmul.msk.f32.vlgmr.msra.gmra.mxu3 %vm3260_vm7, %v11298_v19  ;;  %8288 = vmatmul.msk.f32.vlgmr.msra.gmra.mxu1 %vm3260_vm7, %v11298_v19 }
 0x3f8   :  { %4096 = vmatmul.f32.vlgmr.msra.gmra.mxu0 %v11301_v25  ;;  %4583 = vmatpush.msrb.mxu2 %v8344_v57  ;;  %v16119_v57 = vld [vmem:[#allocation25_spill] sm:$0xff] }
 0x3f9   :  { %v3397_v54 = vpop.f32.mrf.mxu2 }
 0x3fa   :  { %v3510_v21 = vpop.f32.mrf.mxu3 }
 0x3fb   :  { %v12389_v43 = vadd.f32 %v3510_v21, %v3397_v54 }
 0x3fc   :  { %v12391_v59 = vpop.f32.mrf.mxu1 }
 0x3fd   :  { %16108 = vst [vmem:[#allocation85_spill] sm:$0xff] %v12391_v59  ;;  %v12393_v35 = vpop.f32.mrf.mxu0  ;;  %v16113_v59 = vld [vmem:[#allocation26_spill] sm:$0xff] }
 0x3fe   :  { %16109 = vst [vmem:[#allocation109_spill] sm:$0xff] %v12393_v35  ;;  %3873 = vmatmul.f32.gmra.mxu2 %v11284_v61  ;;  %v16114_v35 = vld [vmem:[#allocation60_spill] sm:$0xff] }
 0x3ff   :  { %8256 = vmatmul.msk.f32.gmra.mxu3 %vm3260_vm7, %v11261_v30  ;;  %8289 = vmatmul.msk.f32.gmra.mxu1 %vm3260_vm7, %v11261_v30 }
 0x400   :  { %4099 = vmatmul.f32.gmra.mxu0 %v11284_v61 }
 0x401   :  { %v3400_v18 = vpop.f32.mrf.mxu2 }
 0x402   :  { %v3513_v44 = vpop.f32.mrf.mxu3 }
 0x403   :  { %v12401_v62 = vadd.f32 %v3513_v44, %v3400_v18  ;;  %v8347_v44 = vld [vmem:[%s15535_s3 + $0x378] sm:$0xff] }
 0x404   :  { %v12403_v21 = vpop.f32.mrf.mxu1  ;;  %4808 = vmatpush.msrb.mxu0 %v8347_v44 }
 0x405   :  { %16110 = vst [vmem:[#allocation110_spill] sm:$0xff] %v12401_v62  ;;  %v12405_v54 = vpop.f32.mrf.mxu0  ;;  %v8342_v62 = vld [vmem:[%s15535_s3 + $0x350] sm:$0xff] }
 0x406   :  { %16111 = vst [vmem:[#allocation22_spill] sm:$0xff] %v12403_v21  ;;  %3876 = vmatmul.f32.gmra.mxu2 %v16114_v35 }
 0x407   :  { %16112 = vst [vmem:[#allocation17_spill] sm:$0xff] %v12405_v54  ;;  %8257 = vmatmul.msk.f32.gmra.mxu3 %vm3260_vm7, %v16113_v59  ;;  %8290 = vmatmul.msk.f32.gmra.mxu1 %vm3260_vm7, %v16113_v59 }
 0x408   :  { %4102 = vmatmul.f32.gmra.mxu0 %v16114_v35  ;;  %4584 = vmatpush.msrb.mxu2 %v8342_v62  ;;  %v16128_v62 = vld [vmem:[#allocation27_spill] sm:$0xff] }
 0x409   :  { %v3403_v21 = vpop.f32.mrf.mxu2 }
 0x40a   :  { %v3516_v18 = vpop.f32.mrf.mxu3 }
 0x40b   :  { %v12419_v54 = vadd.f32 %v3516_v18, %v3403_v21 }
 0x40c   :  { %v12421_v41 = vpop.f32.mrf.mxu1 }
 0x40d   :  { %16115 = vst [vmem:[#allocation90_spill] sm:$0xff] %v12419_v54  ;;  %v12426_v26 = vpop.f32.mrf.mxu0 }
 0x40e   :  { %16116 = vst [vmem:[#allocation18_spill] sm:$0xff] %v12421_v41  ;;  %3879 = vmatmul.f32.gmra.mxu2 %v16119_v57 }
 0x40f   :  { %16117 = vst [vmem:[#allocation89_spill] sm:$0xff] %v12426_v26  ;;  %8258 = vmatmul.msk.f32.gmra.mxu3 %vm3260_vm7, %v16118_v3  ;;  %8291 = vmatmul.msk.f32.gmra.mxu1 %vm3260_vm7, %v16118_v3  ;;  %v16123_v26 = vld [vmem:[#allocation28_spill] sm:$0xff] }
 0x410   :  { %4105 = vmatmul.f32.gmra.mxu0 %v16119_v57 }
 0x411   :  { %v3406_v44 = vpop.f32.mrf.mxu2 }
 0x412   :  { %v3519_v21 = vpop.f32.mrf.mxu3 }
 0x413   :  { %v12434_v18 = vadd.f32 %v3519_v21, %v3406_v44  ;;  %v8345_v21 = vld [vmem:[%s15535_s3 + $0x368] sm:$0xff] }
 0x414   :  { %v12436_v41 = vpop.f32.mrf.mxu1  ;;  %4809 = vmatpush.msrb.mxu0 %v8345_v21 }
 0x415   :  { %16120 = vst [vmem:[#allocation111_spill] sm:$0xff] %v12434_v18  ;;  %v12438_v54 = vpop.f32.mrf.mxu0 }
 0x416   :  { %16121 = vst [vmem:[#allocation112_spill] sm:$0xff] %v12436_v41  ;;  %3882 = vmatmul.f32.gmra.mxu2 %v16124_v2 }
 0x417   :  { %16122 = vst [vmem:[#allocation55_spill] sm:$0xff] %v12438_v54  ;;  %8259 = vmatmul.msk.f32.gmra.mxu3 %vm3260_vm7, %v16123_v26  ;;  %8292 = vmatmul.msk.f32.gmra.mxu1 %vm3260_vm7, %v16123_v26 }
 0x418   :  { %4108 = vmatmul.f32.gmra.mxu0 %v16124_v2  ;;  %v8359_v2 = vld [vmem:[%s15535_s3 + $0x3d8] sm:$0xff] }
 0x419   :  { %v3409_v41 = vpop.f32.mrf.mxu2  ;;  %4931 = vmatpush.msrb.mxu1 %v8359_v2  ;;  %v8340_v2 = vld [vmem:[%s15535_s3 + $0x340] sm:$0xff] }
 0x41a   :  { %v3522_v44 = vpop.f32.mrf.mxu3  ;;  %4585 = vmatpush.msrb.mxu2 %v8340_v2 }
 0x41b   :  { %v12452_v54 = vadd.f32 %v3522_v44, %v3409_v41 }
 0x41c   :  { %v12454_v18 = vpop.f32.mrf.mxu1 }
 0x41d   :  { %16125 = vst [vmem:[#allocation2_spill] sm:$0xff] %v12452_v54  ;;  %v12456_v26 = vpop.f32.mrf.mxu0  ;;  %v16132_v54 = vld [vmem:[#allocation68_spill] sm:$0xff] }
 0x41e   :  { %16126 = vst [vmem:[#allocation21_spill] sm:$0xff] %v12454_v18  ;;  %3885 = vmatmul.f32.gmra.mxu2 %v16128_v62 }
 0x41f   :  { %16127 = vst [vmem:[#allocation56_spill] sm:$0xff] %v12456_v26  ;;  %8260 = vmatmul.msk.f32.gmra.mxu3 %vm3260_vm7, %v11476_v53  ;;  %8293 = vmatmul.msk.f32.gmra.mxu1 %vm3260_vm7, %v11476_v53  ;;  %v16133_v53 = vld [vmem:[#allocation30_spill] sm:$0xff] }
 0x420   :  { %4111 = vmatmul.f32.gmra.mxu0 %v16128_v62  ;;  %v16137_v62 = vld [vmem:[#allocation29_spill] sm:$0xff] }
 0x421   :  { %v3412_v21 = vpop.f32.mrf.mxu2 }
 0x422   :  { %v3525_v41 = vpop.f32.mrf.mxu3 }
 0x423   :  { %v12467_v44 = vadd.f32 %v3525_v41, %v3412_v21  ;;  %v8343_v41 = vld [vmem:[%s15535_s3 + $0x358] sm:$0xff] }
 0x424   :  { %v12469_v18 = vpop.f32.mrf.mxu1  ;;  %4810 = vmatpush.msrb.mxu0 %v8343_v41 }
 0x425   :  { %16129 = vst [vmem:[#allocation113_spill] sm:$0xff] %v12467_v44  ;;  %v12471_v26 = vpop.f32.mrf.mxu0 }
 0x426   :  { %16130 = vst [vmem:[#allocation114_spill] sm:$0xff] %v12469_v18  ;;  %3888 = vmatmul.f32.gmra.mxu2 %v16133_v53 }
 0x427   :  { %16131 = vst [vmem:[#allocation115_spill] sm:$0xff] %v12471_v26  ;;  %8261 = vmatmul.msk.f32.gmra.mxu3 %vm3260_vm7, %v16132_v54  ;;  %8294 = vmatmul.msk.f32.gmra.mxu1 %vm3260_vm7, %v16132_v54 }
 0x428   :  { %4114 = vmatmul.f32.gmra.mxu0 %v16133_v53  ;;  %v16138_v53 = vld [vmem:[#allocation71_spill] sm:$0xff] }
 0x429   :  { %v3415_v18 = vpop.f32.mrf.mxu2 }
 0x42a   :  { %v3528_v21 = vpop.f32.mrf.mxu3 }
 0x42b   :  { %v12485_v26 = vadd.f32 %v3528_v21, %v3415_v18 }
 0x42c   :  { %v12487_v44 = vpop.f32.mrf.mxu1 }
 0x42d   :  { %16134 = vst [vmem:[#allocation116_spill] sm:$0xff] %v12485_v26  ;;  %v12489_v54 = vpop.f32.mrf.mxu0  ;;  %v8338_v26 = vld [vmem:[%s15535_s3 + $0x330] sm:$0xff] }
 0x42e   :  { %16135 = vst [vmem:[#allocation117_spill] sm:$0xff] %v12487_v44  ;;  %3891 = vmatmul.f32.gmra.mxu2 %v16138_v53  ;;  %v16142_v44 = vld [vmem:[#allocation72_spill] sm:$0xff] }
 0x42f   :  { %16136 = vst [vmem:[#allocation118_spill] sm:$0xff] %v12489_v54  ;;  %8262 = vmatmul.msk.f32.gmra.mxu3 %vm3260_vm7, %v16137_v62  ;;  %8295 = vmatmul.msk.f32.gmra.mxu1 %vm3260_vm7, %v16137_v62  ;;  %v16143_v54 = vld [vmem:[#allocation32_spill] sm:$0xff]  ;;  %v16147_v62 = vld [vmem:[#allocation75_spill] sm:$0xff] }
 0x430   :  { %4117 = vmatmul.f32.gmra.mxu0 %v16138_v53  ;;  %4586 = vmatpush.msrb.mxu2 %v8338_v26  ;;  %v16148_v26 = vld [vmem:[#allocation31_spill] sm:$0xff] }
 0x431   :  { %v3418_v41 = vpop.f32.mrf.mxu2 }
 0x432   :  { %v3531_v2 = vpop.f32.mrf.mxu3 }
 0x433   :  { %v12497_v57 = vadd.f32 %v3531_v2, %v3418_v41  ;;  %v8341_v2 = vld [vmem:[%s15535_s3 + $0x348] sm:$0xff] }
 0x434   :  { %v12499_v18 = vpop.f32.mrf.mxu1  ;;  %4811 = vmatpush.msrb.mxu0 %v8341_v2 }
 0x435   :  { %16139 = vst [vmem:[#allocation119_spill] sm:$0xff] %v12497_v57  ;;  %v12501_v21 = vpop.f32.mrf.mxu0 }
 0x436   :  { %16140 = vst [vmem:[#allocation120_spill] sm:$0xff] %v12499_v18  ;;  %3894 = vmatmul.f32.gmra.mxu2 %v16143_v54 }
 0x437   :  { %16141 = vst [vmem:[#allocation121_spill] sm:$0xff] %v12501_v21  ;;  %8263 = vmatmul.msk.f32.gmra.mxu3 %vm3260_vm7, %v16142_v44  ;;  %8296 = vmatmul.msk.f32.gmra.mxu1 %vm3260_vm7, %v16142_v44 }
 0x438   :  { %4120 = vmatmul.f32.gmra.mxu0 %v16143_v54  ;;  %v8356_v54 = vld [vmem:[%s15535_s3 + $0x3c0] sm:$0xff] }
 0x439   :  { %v3421_v18 = vpop.f32.mrf.mxu2  ;;  %4706 = vmatpush.msrb.mxu3 %v8356_v54  ;;  %v8336_v54 = vld [vmem:[%s15535_s3 + $0x320] sm:$0xff] }
 0x43a   :  { %v3534_v41 = vpop.f32.mrf.mxu3  ;;  %4587 = vmatpush.msrb.mxu2 %v8336_v54  ;;  %v8357_v54 = vld [vmem:[%s15535_s3 + $0x3c8] sm:$0xff] }
 0x43b   :  { %v12515_v21 = vadd.f32 %v3534_v41, %v3421_v18  ;;  %4932 = vmatpush.msrb.mxu1 %v8357_v54  ;;  %v8334_v54 = vld [vmem:[%s15535_s3 + $0x310] sm:$0xff] }
 0x43c   :  { %v12517_v57 = vpop.f32.mrf.mxu1  ;;  %4588 = vmatpush.msrb.mxu2 %v8334_v54 }
 0x43d   :  { %16144 = vst [vmem:[#allocation122_spill] sm:$0xff] %v12515_v21  ;;  %v12519_v44 = vpop.f32.mrf.mxu0  ;;  %v16152_v21 = vld [vmem:[#allocation34_spill] sm:$0xff] }
 0x43e   :  { %16145 = vst [vmem:[#allocation123_spill] sm:$0xff] %v12517_v57  ;;  %3897 = vmatmul.f32.gmra.mxu2 %v16148_v26 }
 0x43f   :  { %16146 = vst [vmem:[#allocation124_spill] sm:$0xff] %v12519_v44  ;;  %8264 = vmatmul.msk.f32.gmra.mxu3 %vm3260_vm7, %v16147_v62  ;;  %8297 = vmatmul.msk.f32.gmra.mxu1 %vm3260_vm7, %v16147_v62  ;;  %v16153_v62 = vld [vmem:[#allocation76_spill] sm:$0xff] }
 0x440   :  { %4123 = vmatmul.f32.gmra.mxu0 %v16148_v26 }
 0x441   :  { %v3424_v2 = vpop.f32.mrf.mxu2 }
 0x442   :  { %v3537_v18 = vpop.f32.mrf.mxu3 }
 0x443   :  { %v12530_v41 = vadd.f32 %v3537_v18, %v3424_v2  ;;  %v8339_v18 = vld [vmem:[%s15535_s3 + $0x338] sm:$0xff] }
 0x444   :  { %v12532_v57 = vpop.f32.mrf.mxu1  ;;  %4812 = vmatpush.msrb.mxu0 %v8339_v18 }
 0x445   :  { %16149 = vst [vmem:[#allocation125_spill] sm:$0xff] %v12530_v41  ;;  %v12534_v44 = vpop.f32.mrf.mxu0 }
 0x446   :  { %16150 = vst [vmem:[#allocation126_spill] sm:$0xff] %v12532_v57  ;;  %3900 = vmatmul.f32.gmra.mxu2 %v16153_v62 }
 0x447   :  { %16151 = vst [vmem:[#allocation127_spill] sm:$0xff] %v12534_v44  ;;  %8265 = vmatmul.msk.f32.gmra.mxu3 %vm3260_vm7, %v16152_v21  ;;  %8298 = vmatmul.msk.f32.gmra.mxu1 %vm3260_vm7, %v16152_v21 }
 0x448   :  { %4126 = vmatmul.f32.gmra.mxu0 %v16153_v62  ;;  %v16157_v62 = vld [vmem:[#allocation33_spill] sm:$0xff] }
 0x449   :  { %v3427_v57 = vpop.f32.mrf.mxu2 }
 0x44a   :  { %v3540_v2 = vpop.f32.mrf.mxu3 }
 0x44b   :  { %v12548_v44 = vadd.f32 %v3540_v2, %v3427_v57 }
 0x44c   :  { %v12550_v41 = vpop.f32.mrf.mxu1 }
 0x44d   :  { %16154 = vst [vmem:[#allocation128_spill] sm:$0xff] %v12548_v44  ;;  %v12552_v21 = vpop.f32.mrf.mxu0  ;;  %v16161_v44 = vld [vmem:[#allocation80_spill] sm:$0xff] }
 0x44e   :  { %16155 = vst [vmem:[#allocation129_spill] sm:$0xff] %v12550_v41  ;;  %3903 = vmatmul.f32.gmra.mxu2 %v16157_v62 }
 0x44f   :  { %16156 = vst [vmem:[#allocation130_spill] sm:$0xff] %v12552_v21  ;;  %8266 = vmatmul.msk.f32.gmra.mxu3 %vm3260_vm7, %v11790_v47  ;;  %8299 = vmatmul.msk.f32.gmra.mxu1 %vm3260_vm7, %v11790_v47 }
 0x450   :  { %4129 = vmatmul.f32.gmra.mxu0 %v16157_v62  ;;  %v16162_v62 = vld [vmem:[#allocation36_spill] sm:$0xff] }
 0x451   :  { %v3430_v18 = vpop.f32.mrf.mxu2 }
 0x452   :  { %v3543_v57 = vpop.f32.mrf.mxu3 }
 0x453   :  { %v12563_v2 = vadd.f32 %v3543_v57, %v3430_v18  ;;  %v8337_v57 = vld [vmem:[%s15535_s3 + $0x328] sm:$0xff] }
 0x454   :  { %v12565_v41 = vpop.f32.mrf.mxu1  ;;  %4813 = vmatpush.msrb.mxu0 %v8337_v57 }
 0x455   :  { %16158 = vst [vmem:[#allocation131_spill] sm:$0xff] %v12563_v2  ;;  %v12567_v21 = vpop.f32.mrf.mxu0 }
 0x456   :  { %16159 = vst [vmem:[#allocation132_spill] sm:$0xff] %v12565_v41  ;;  %3906 = vmatmul.f32.gmra.mxu2 %v16162_v62 }
 0x457   :  { %16160 = vst [vmem:[#allocation133_spill] sm:$0xff] %v12567_v21  ;;  %8267 = vmatmul.msk.f32.gmra.mxu3 %vm3260_vm7, %v16161_v44  ;;  %8300 = vmatmul.msk.f32.gmra.mxu1 %vm3260_vm7, %v16161_v44 }
 0x458   :  { %4132 = vmatmul.f32.gmra.mxu0 %v16162_v62 }
 0x459   :  { %v3433_v41 = vpop.f32.mrf.mxu2 }
 0x45a   :  { %v3546_v18 = vpop.f32.mrf.mxu3 }
 0x45b   :  { %v12581_v21 = vadd.f32 %v3546_v18, %v3433_v41 }
 0x45c   :  { %v12583_v2 = vpop.f32.mrf.mxu1 }
 0x45d   :  { %16163 = vst [vmem:[#allocation134_spill] sm:$0xff] %v12583_v2  ;;  %v12585_v44 = vpop.f32.mrf.mxu0  ;;  %v8332_v2 = vld [vmem:[%s15535_s3 + $0x300] sm:$0xff] }
 0x45e   :  { %16164 = vst [vmem:[#allocation135_spill] sm:$0xff] %v12585_v44  ;;  %3909 = vmatmul.f32.gmra.mxu2 %v11894_v9 }
 0x45f   :  { %8268 = vmatmul.msk.f32.gmra.mxu3 %vm3260_vm7, %v11901_v60  ;;  %8301 = vmatmul.msk.f32.gmra.mxu1 %vm3260_vm7, %v11901_v60 }
 0x460   :  { %4135 = vmatmul.f32.gmra.mxu0 %v11894_v9  ;;  %4589 = vmatpush.msrb.mxu2 %v8332_v2 }
 0x461   :  { %v3436_v57 = vpop.f32.mrf.mxu2 }
 0x462   :  { %v3549_v54 = vpop.f32.mrf.mxu3 }
 0x463   :  { %v12593_v62 = vadd.f32 %v3549_v54, %v3436_v57  ;;  %v8335_v54 = vld [vmem:[%s15535_s3 + $0x318] sm:$0xff] }
 0x464   :  { %v12595_v41 = vpop.f32.mrf.mxu1  ;;  %4814 = vmatpush.msrb.mxu0 %v8335_v54 }
 0x465   :  { %16165 = vst [vmem:[#allocation136_spill] sm:$0xff] %v12593_v62  ;;  %v12597_v18 = vpop.f32.mrf.mxu0 }
 0x466   :  { %16166 = vst [vmem:[#allocation137_spill] sm:$0xff] %v12595_v41  ;;  %3912 = vmatmul.f32.gmra.mxu2 %v11930_v58 }
 0x467   :  { %16167 = vst [vmem:[#allocation138_spill] sm:$0xff] %v12597_v18  ;;  %8269 = vmatmul.msk.f32.gmra.mxu3 %vm3260_vm7, %v11924_v50  ;;  %8302 = vmatmul.msk.f32.gmra.mxu1 %vm3260_vm7, %v11924_v50 }
 0x468   :  { %4138 = vmatmul.f32.gmra.mxu0 %v11930_v58 }
 0x469   :  { %v3439_v41 = vpop.f32.mrf.mxu2 }
 0x46a   :  { %v3552_v57 = vpop.f32.mrf.mxu3 }
 0x46b   :  { %v12611_v18 = vadd.f32 %v3552_v57, %v3439_v41  ;;  %v8354_v41 = vld [vmem:[%s15535_s3 + $0x3b0] sm:$0xff] }
 0x46c   :  { %v12613_v44 = vpop.f32.mrf.mxu1  ;;  %4707 = vmatpush.msrb.mxu3 %v8354_v41  ;;  %v8330_v41 = vld [vmem:[%s15535_s3 + $0x2f0] sm:$0xff] }
 0x46d   :  { %16168 = vst [vmem:[#allocation139_spill] sm:$0xff] %v12611_v18  ;;  %v12615_v62 = vpop.f32.mrf.mxu0  ;;  %4590 = vmatpush.msrb.mxu2 %v8330_v41 }
 0x46e   :  { %16169 = vst [vmem:[#allocation140_spill] sm:$0xff] %v12613_v44  ;;  %3915 = vmatmul.f32.gmra.mxu2 %v11965_v17 }
 0x46f   :  { %16170 = vst [vmem:[#allocation141_spill] sm:$0xff] %v12615_v62  ;;  %8270 = vmatmul.msk.f32.gmra.mxu3 %vm3260_vm7, %v11957_v31  ;;  %8303 = vmatmul.msk.f32.gmra.mxu1 %vm3260_vm7, %v11957_v31 }
 0x470   :  { %4141 = vmatmul.f32.gmra.mxu0 %v11965_v17 }
 0x471   :  { %v3442_v54 = vpop.f32.mrf.mxu2 }
 0x472   :  { %v3555_v2 = vpop.f32.mrf.mxu3 }
 0x473   :  { %v12626_v57 = vadd.f32 %v3555_v2, %v3442_v54  ;;  %v8333_v2 = vld [vmem:[%s15535_s3 + $0x308] sm:$0xff] }
 0x474   :  { %v12628_v44 = vpop.f32.mrf.mxu1  ;;  %4815 = vmatpush.msrb.mxu0 %v8333_v2 }
 0x475   :  { %16171 = vst [vmem:[#allocation142_spill] sm:$0xff] %v12626_v57  ;;  %v12630_v62 = vpop.f32.mrf.mxu0 }
 0x476   :  { %16172 = vst [vmem:[#allocation143_spill] sm:$0xff] %v12628_v44  ;;  %3918 = vmatmul.f32.gmra.mxu2 %v11985_v23 }
 0x477   :  { %16173 = vst [vmem:[#allocation144_spill] sm:$0xff] %v12630_v62  ;;  %8271 = vmatmul.msk.f32.gmra.mxu3 %vm3260_vm7, %v11991_v7  ;;  %8304 = vmatmul.msk.f32.gmra.mxu1 %vm3260_vm7, %v11991_v7 }
 0x478   :  { %4144 = vmatmul.f32.gmra.mxu0 %v11985_v23 }
 0x479   :  { %v3871_v44 = vpop.f32.mrf.mxu2 }
 0x47a   :  { %v3984_v54 = vpop.f32.mrf.mxu3  ;;  %v3872_v62 = vadd.f32 %v3871_v44, %v12041_v24 }
 0x47c   :  { %v12645_v57 = vpop.f32.mrf.mxu1  ;;  %v12649_v18 = vadd.f32 %v3984_v54, %v3872_v62  ;;  %v8355_v54 = vld [vmem:[%s15535_s3 + $0x3b8] sm:$0xff] }
 0x47d   :  { %16174 = vst [vmem:[#allocation145_spill] sm:$0xff] %v12645_v57  ;;  %v12647_v7 = vpop.f32.mrf.mxu0  ;;  %4933 = vmatpush.msrb.mxu1 %v8355_v54 }
 0x47e   :  { %16175 = vst [vmem:[#allocation146_spill] sm:$0xff] %v12647_v7  ;;  %3921 = vmatmul.f32.gmra.mxu2 %v12007_v28 }
 0x47f   :  { %8272 = vmatmul.msk.f32.gmra.mxu3 %vm3260_vm7, %v12003_v8  ;;  %8305 = vmatmul.msk.f32.gmra.mxu1 %vm3260_vm7, %v12003_v8 }
 0x480   :  { %4147 = vmatmul.f32.gmra.mxu0 %v12007_v28 }
 0x481   :  { %v3874_v2 = vpop.f32.mrf.mxu2 }
 0x482   :  { %v3987_v41 = vpop.f32.mrf.mxu3  ;;  %v3875_v24 = vadd.f32 %v3874_v2, %v12059_v51  ;;  %v8328_v51 = vld [vmem:[%s15535_s3 + $0x2e0] sm:$0xff] }
 0x483   :  { %4591 = vmatpush.msrb.mxu2 %v8328_v51 }
 0x484   :  { %v12658_v44 = vpop.f32.mrf.mxu1  ;;  %v12662_v62 = vadd.f32 %v3987_v41, %v3875_v24  ;;  %v8331_v41 = vld [vmem:[%s15535_s3 + $0x2f8] sm:$0xff] }
 0x485   :  { %16176 = vst [vmem:[#allocation147_spill] sm:$0xff] %v12658_v44  ;;  %v12660_v57 = vpop.f32.mrf.mxu0  ;;  %4816 = vmatpush.msrb.mxu0 %v8331_v41 }
 0x486   :  { %16177 = vst [vmem:[#allocation148_spill] sm:$0xff] %v12660_v57  ;;  %3924 = vmatmul.f32.gmra.mxu2 %v12027_v39 }
 0x487   :  { %16178 = vst [vmem:[#allocation149_spill] sm:$0xff] %v12662_v62  ;;  %8273 = vmatmul.msk.f32.gmra.mxu3 %vm3260_vm7, %v12023_v32  ;;  %8306 = vmatmul.msk.f32.gmra.mxu1 %vm3260_vm7, %v12023_v32 }
 0x488   :  { %4150 = vmatmul.f32.gmra.mxu0 %v12027_v39 }
 0x489   :  { %v3877_v24 = vpop.f32.mrf.mxu2 }
 0x48a   :  { %v3990_v2 = vpop.f32.mrf.mxu3  ;;  %v3878_v44 = vadd.f32 %v3877_v24, %v12088_v4 }
 0x48c   :  { %v12680_v57 = vpop.f32.mrf.mxu1  ;;  %v12684_v62 = vadd.f32 %v3990_v2, %v3878_v44  ;;  %v8329_v2 = vld [vmem:[%s15535_s3 + $0x2e8] sm:$0xff] }
 0x48d   :  { %16179 = vst [vmem:[#allocation150_spill] sm:$0xff] %v12680_v57  ;;  %v12682_v7 = vpop.f32.mrf.mxu0  ;;  %4817 = vmatpush.msrb.mxu0 %v8329_v2 }
 0x48e   :  { %16180 = vst [vmem:[#allocation151_spill] sm:$0xff] %v12682_v7  ;;  %3927 = vmatmul.f32.gmra.mxu2 %v12049_v27  ;;  %v16187_v7 = vld [vmem:[#allocation95_spill] sm:$0xff] }
 0x48f   :  { %8274 = vmatmul.msk.f32.gmra.mxu3 %vm3260_vm7, %v12055_v12  ;;  %8307 = vmatmul.msk.f32.gmra.mxu1 %vm3260_vm7, %v12055_v12 }
 0x490   :  { %4153 = vmatmul.f32.gmra.mxu0 %v12049_v27 }
 0x491   :  { %v3880_v51 = vpop.f32.mrf.mxu2 }
 0x492   :  { %v3993_v54 = vpop.f32.mrf.mxu3  ;;  %v3881_v4 = vadd.f32 %v3880_v51, %v12107_v34  ;;  %v8326_v34 = vld [vmem:[%s15535_s3 + $0x2d0] sm:$0xff] }
 0x493   :  { %4592 = vmatpush.msrb.mxu2 %v8326_v34 }
 0x494   :  { %v12693_v41 = vpop.f32.mrf.mxu1  ;;  %v12697_v44 = vadd.f32 %v3993_v54, %v3881_v4 }
 0x495   :  { %16181 = vst [vmem:[#allocation152_spill] sm:$0xff] %v12693_v41  ;;  %v12695_v24 = vpop.f32.mrf.mxu0 }
 0x496   :  { %16182 = vst [vmem:[#allocation153_spill] sm:$0xff] %v12695_v24  ;;  %3930 = vmatmul.f32.gmra.mxu2 %v12074_v55 }
 0x497   :  { %16183 = vst [vmem:[#allocation154_spill] sm:$0xff] %v12697_v44  ;;  %8275 = vmatmul.msk.f32.gmra.mxu3 %vm3260_vm7, %v12070_v15  ;;  %8308 = vmatmul.msk.f32.gmra.mxu1 %vm3260_vm7, %v12070_v15  ;;  %v16188_v44 = vld [vmem:[#allocation54_spill] sm:$0xff] }
 0x498   :  { %4156 = vmatmul.f32.gmra.mxu0 %v12074_v55 }
 0x499   :  { %v3883_v51 = vpop.f32.mrf.mxu2 }
 0x49a   :  { %v3996_v54 = vpop.f32.mrf.mxu3  ;;  %v3884_v4 = vadd.f32 %v3883_v51, %v12131_v6 }
 0x49c   :  { %v12712_v41 = vpop.f32.mrf.mxu1  ;;  %v12716_v57 = vadd.f32 %v3996_v54, %v3884_v4  ;;  %v8324_v4 = vld [vmem:[%s15535_s3 + $0x2c0] sm:$0xff] }
 0x49d   :  { %16184 = vst [vmem:[#allocation155_spill] sm:$0xff] %v12712_v41  ;;  %v12714_v24 = vpop.f32.mrf.mxu0  ;;  %4593 = vmatpush.msrb.mxu2 %v8324_v4 }
 0x49e   :  { %16185 = vst [vmem:[#allocation156_spill] sm:$0xff] %v12714_v24  ;;  %3933 = vmatmul.f32.gmra.mxu2 %v16188_v44 }
 0x49f   :  { %16186 = vst [vmem:[#allocation157_spill] sm:$0xff] %v12716_v57  ;;  %8276 = vmatmul.msk.f32.gmra.mxu3 %vm3260_vm7, %v16187_v7  ;;  %8309 = vmatmul.msk.f32.gmra.mxu1 %vm3260_vm7, %v16187_v7  ;;  %v16195_v57 = vld [vmem:[#allocation4_spill] sm:$0xff] }
 0x4a0   :  { %4159 = vmatmul.f32.gmra.mxu0 %v16188_v44 }
 0x4a1   :  { %v3886_v2 = vpop.f32.mrf.mxu2 }
 0x4a2   :  { %v3999_v34 = vpop.f32.mrf.mxu3  ;;  %v3887_v6 = vadd.f32 %v3886_v2, %v12151_v0  ;;  %v8352_v0 = vld [vmem:[%s15535_s3 + $0x3a0] sm:$0xff] }
 0x4a3   :  { %4708 = vmatpush.msrb.mxu3 %v8352_v0 }
 0x4a4   :  { %v12725_v51 = vpop.f32.mrf.mxu1  ;;  %v12729_v54 = vadd.f32 %v3999_v34, %v3887_v6  ;;  %v8327_v34 = vld [vmem:[%s15535_s3 + $0x2d8] sm:$0xff] }
 0x4a5   :  { %16189 = vst [vmem:[#allocation158_spill] sm:$0xff] %v12725_v51  ;;  %v12727_v41 = vpop.f32.mrf.mxu0  ;;  %4818 = vmatpush.msrb.mxu0 %v8327_v34 }
 0x4a6   :  { %16190 = vst [vmem:[#allocation159_spill] sm:$0xff] %v12727_v41  ;;  %3936 = vmatmul.f32.gmra.mxu2 %v12115_v20 }
 0x4a7   :  { %16191 = vst [vmem:[#allocation160_spill] sm:$0xff] %v12729_v54  ;;  %8277 = vmatmul.msk.f32.gmra.mxu3 %vm3260_vm7, %v12121_v37  ;;  %8310 = vmatmul.msk.f32.gmra.mxu1 %vm3260_vm7, %v12121_v37 }
 0x4a8   :  { %4162 = vmatmul.f32.gmra.mxu0 %v12115_v20 }
 0x4a9   :  { %v3889_v6 = vpop.f32.mrf.mxu2 }
 0x4aa   :  { %v4002_v2 = vpop.f32.mrf.mxu3  ;;  %v3890_v51 = vadd.f32 %v3889_v6, %v12179_v49 }
 0x4ac   :  { %v12747_v41 = vpop.f32.mrf.mxu1  ;;  %v12751_v54 = vadd.f32 %v4002_v2, %v3890_v51  ;;  %v16199_v2 = vld [vmem:[#allocation5_spill] sm:$0xff] }
 0x4ad   :  { %16192 = vst [vmem:[#allocation161_spill] sm:$0xff] %v12747_v41  ;;  %v12749_v24 = vpop.f32.mrf.mxu0 }
 0x4ae   :  { %16193 = vst [vmem:[#allocation162_spill] sm:$0xff] %v12749_v24  ;;  %3939 = vmatmul.f32.gmra.mxu2 %v16195_v57 }
 0x4af   :  { %16194 = vst [vmem:[#allocation163_spill] sm:$0xff] %v12751_v54  ;;  %8278 = vmatmul.msk.f32.gmra.mxu3 %vm3260_vm7, %v12139_v11  ;;  %8311 = vmatmul.msk.f32.gmra.mxu1 %vm3260_vm7, %v12139_v11  ;;  %v16202_v54 = vld [vmem:[#allocation99_spill] sm:$0xff] }
 0x4b0   :  { %4165 = vmatmul.f32.gmra.mxu0 %v16195_v57 }
 0x4b1   :  { %v3892_v4 = vpop.f32.mrf.mxu2 }
 0x4b2   :  { %v4005_v0 = vpop.f32.mrf.mxu3  ;;  %v3893_v49 = vadd.f32 %v3892_v4, %v12197_v33  ;;  %v8353_v33 = vld [vmem:[%s15535_s3 + $0x3a8] sm:$0xff]  ;;  %v8322_v4 = vld [vmem:[%s15535_s3 + $0x2b0] sm:$0xff] }
 0x4b3   :  { %4934 = vmatpush.msrb.mxu1 %v8353_v33  ;;  %4594 = vmatpush.msrb.mxu2 %v8322_v4 }
 0x4b4   :  { %v12760_v34 = vpop.f32.mrf.mxu1  ;;  %v12764_v51 = vadd.f32 %v4005_v0, %v3893_v49  ;;  %v8325_v0 = vld [vmem:[%s15535_s3 + $0x2c8] sm:$0xff] }
 0x4b5   :  { %16196 = vst [vmem:[#allocation164_spill] sm:$0xff] %v12760_v34  ;;  %v12762_v6 = vpop.f32.mrf.mxu0  ;;  %4819 = vmatpush.msrb.mxu0 %v8325_v0 }
 0x4b6   :  { %16197 = vst [vmem:[#allocation165_spill] sm:$0xff] %v12762_v6  ;;  %3942 = vmatmul.f32.gmra.mxu2 %v12165_v38 }
 0x4b7   :  { %16198 = vst [vmem:[#allocation166_spill] sm:$0xff] %v12764_v51  ;;  %8279 = vmatmul.msk.f32.gmra.mxu3 %vm3260_vm7, %v16199_v2  ;;  %8312 = vmatmul.msk.f32.gmra.mxu1 %vm3260_vm7, %v16199_v2 }
 0x4b8   :  { %4168 = vmatmul.f32.gmra.mxu0 %v12165_v38 }
 0x4b9   :  { %v3895_v34 = vpop.f32.mrf.mxu2 }
 0x4ba   :  { %v4008_v49 = vpop.f32.mrf.mxu3  ;;  %v3896_v6 = vadd.f32 %v3895_v34, %v12226_v63 }
 0x4bc   :  { %v12782_v41 = vpop.f32.mrf.mxu1  ;;  %v12786_v51 = vadd.f32 %v4008_v49, %v3896_v6  ;;  %v16205_v49 = vld [vmem:[#allocation8_spill] sm:$0xff] }
 0x4bd   :  { %16200 = vst [vmem:[#allocation167_spill] sm:$0xff] %v12782_v41  ;;  %v12784_v24 = vpop.f32.mrf.mxu0 }
 0x4be   :  { %16201 = vst [vmem:[#allocation168_spill] sm:$0xff] %v12784_v24  ;;  %3945 = vmatmul.f32.gmra.mxu2 %v16202_v54 }
 0x4bf   :  { %8280 = vmatmul.msk.f32.gmra.mxu3 %vm3260_vm7, %v12193_v13  ;;  %8313 = vmatmul.msk.f32.gmra.mxu1 %vm3260_vm7, %v12193_v13 }
 0x4c0   :  { %4171 = vmatmul.f32.gmra.mxu0 %v16202_v54 }
 0x4c1   :  { %v3898_v4 = vpop.f32.mrf.mxu2 }
 0x4c2   :  { %v4011_v33 = vpop.f32.mrf.mxu3  ;;  %v3899_v63 = vadd.f32 %v3898_v4, %v12245_v1  ;;  %v8320_v1 = vld [vmem:[%s15535_s3 + $0x2a0] sm:$0xff]  ;;  %v8323_v4 = vld [vmem:[%s15535_s3 + $0x2b8] sm:$0xff] }
 0x4c3   :  { %4595 = vmatpush.msrb.mxu2 %v8320_v1  ;;  %4820 = vmatpush.msrb.mxu0 %v8323_v4 }
 0x4c4   :  { %v12795_v34 = vpop.f32.mrf.mxu1  ;;  %v12799_v6 = vadd.f32 %v4011_v33, %v3899_v63 }
 0x4c5   :  { %16203 = vst [vmem:[#allocation169_spill] sm:$0xff] %v12795_v34  ;;  %v12797_v0 = vpop.f32.mrf.mxu0 }
 0x4c6   :  { %16204 = vst [vmem:[#allocation170_spill] sm:$0xff] %v12797_v0  ;;  %3948 = vmatmul.f32.gmra.mxu2 %v12212_v22 }
 0x4c7   :  { %8281 = vmatmul.msk.f32.gmra.mxu3 %vm3260_vm7, %v16205_v49  ;;  %8314 = vmatmul.msk.f32.gmra.mxu1 %vm3260_vm7, %v16205_v49 }
 0x4c8   :  { %4174 = vmatmul.f32.gmra.mxu0 %v12212_v22 }
 0x4c9   :  { %v3901_v63 = vpop.f32.mrf.mxu2 }
 0x4ca   :  { %v4014_v33 = vpop.f32.mrf.mxu3  ;;  %v3902_v34 = vadd.f32 %v3901_v63, %v12269_v5 }
 0x4cc   :  { %v12814_v0 = vpop.f32.mrf.mxu1  ;;  %v12818_v24 = vadd.f32 %v4014_v33, %v3902_v34  ;;  %v16212_v33 = vld [vmem:[#allocation103_spill] sm:$0xff] }
 0x4cd   :  { %16206 = vst [vmem:[#allocation171_spill] sm:$0xff] %v12814_v0  ;;  %v12816_v41 = vpop.f32.mrf.mxu0 }
 0x4ce   :  { %16207 = vst [vmem:[#allocation172_spill] sm:$0xff] %v12816_v41  ;;  %3951 = vmatmul.f32.gmra.mxu2 %v12237_v42 }
 0x4cf   :  { %16208 = vst [vmem:[#allocation173_spill] sm:$0xff] %v12818_v24  ;;  %8282 = vmatmul.msk.f32.gmra.mxu3 %vm3260_vm7, %v12233_v40  ;;  %8315 = vmatmul.msk.f32.gmra.mxu1 %vm3260_vm7, %v12233_v40 }
 0x4d0   :  { %4177 = vmatmul.f32.gmra.mxu0 %v12237_v42 }
 0x4d1   :  { %v3904_v4 = vpop.f32.mrf.mxu2 }
 0x4d2   :  { %v4017_v1 = vpop.f32.mrf.mxu3  ;;  %v3905_v5 = vadd.f32 %v3904_v4, %v12289_v45  ;;  %v8321_v45 = vld [vmem:[%s15535_s3 + $0x2a8] sm:$0xff]  ;;  %v8458_v4 = vld [vmem:[%s15535_s3 + $0x4e0] sm:$0xff] }
 0x4d3   :  { %4821 = vmatpush.msrb.mxu0 %v8321_v45  ;;  %5370 = vmatpush.msra.mxu2 %v8458_v4  ;;  %v16216_v45 = vld [vmem:[#allocation12_spill] sm:$0xff] }
 0x4d4   :  { %v12827_v63 = vpop.f32.mrf.mxu1  ;;  %v12831_v34 = vadd.f32 %v4017_v1, %v3905_v5  ;;  %v8468_v1 = vld [vmem:[%s15535_s3 + $0x530] sm:$0x3] }
 0x4d5   :  { %16209 = vst [vmem:[#allocation174_spill] sm:$0xff] %v12827_v63  ;;  %v12829_v0 = vpop.f32.mrf.mxu0  ;;  %8470 = vmatpush.msk.msra.mxu3 %vm3325_vm5, %v8468_v1 }
 0x4d6   :  { %16210 = vst [vmem:[#allocation175_spill] sm:$0xff] %v12829_v0  ;;  %3954 = vmatmul.f32.gmra.mxu2 %v16212_v33 }
 0x4d7   :  { %16211 = vst [vmem:[#allocation176_spill] sm:$0xff] %v12831_v34  ;;  %8283 = vmatmul.msk.f32.gmra.mxu3 %vm3260_vm7, %v12259_v48  ;;  %8316 = vmatmul.msk.f32.gmra.mxu1 %vm3260_vm7, %v12259_v48 }
 0x4d8   :  { %4180 = vmatmul.f32.gmra.mxu0 %v16212_v33 }
 0x4d9   :  { %v3907_v63 = vpop.f32.mrf.mxu2 }
 0x4da   :  { %v4020_v5 = vpop.f32.mrf.mxu3  ;;  %v3908_v0 = vadd.f32 %v3907_v63, %v12318_v16 }
 0x4dc   :  { %v12850_v41 = vpop.f32.mrf.mxu1  ;;  %v12854_v24 = vadd.f32 %v4020_v5, %v3908_v0  ;;  %v16220_v5 = vld [vmem:[#allocation51_spill] sm:$0xff] }
 0x4dd   :  { %16213 = vst [vmem:[#allocation177_spill] sm:$0xff] %v12850_v41  ;;  %v12852_v34 = vpop.f32.mrf.mxu0 }
 0x4de   :  { %16214 = vst [vmem:[#allocation178_spill] sm:$0xff] %v12852_v34  ;;  %3957 = vmatmul.f32.gmra.mxu2 %v16216_v45 }
 0x4df   :  { %16215 = vst [vmem:[#allocation179_spill] sm:$0xff] %v12854_v24  ;;  %8284 = vmatmul.msk.f32.gmra.mxu3 %vm3260_vm7, %v12277_v56  ;;  %8317 = vmatmul.msk.f32.gmra.mxu1 %vm3260_vm7, %v12277_v56 }
 0x4e0   :  { %4183 = vmatmul.f32.gmra.mxu0 %v16216_v45 }
 0x4e1   :  { %v3910_v1 = vpop.f32.mrf.mxu2 }
 0x4e2   :  { %v4023_v4 = vpop.f32.mrf.mxu3  ;;  %v3911_v16 = vadd.f32 %v3910_v1, %v12335_v10  ;;  %v8456_v10 = vld [vmem:[%s15535_s3 + $0x4d0] sm:$0xff]  ;;  %v8459_v1 = vld [vmem:[%s15535_s3 + $0x4e8] sm:$0xff] }
 0x4e3   :  { %5371 = vmatpush.msra.mxu2 %v8456_v10  ;;  %5596 = vmatpush.msra.mxu0 %v8459_v1  ;;  %v4352_v1 = vrot.slane %v11298_v19, 4 }
 0x4e4   :  { %v12863_v63 = vpop.f32.mrf.mxu1  ;;  %v12867_v0 = vadd.f32 %v4023_v4, %v3911_v16  ;;  %v8469_v4 = vld [vmem:[%s15535_s3 + $0x538] sm:$0x3] }
 0x4e5   :  { %16217 = vst [vmem:[#allocation180_spill] sm:$0xff] %v12863_v63  ;;  %v12865_v41 = vpop.f32.mrf.mxu0  ;;  %8503 = vmatpush.msk.msra.mxu1 %vm3325_vm5, %v8469_v4 }
 0x4e6   :  { %16218 = vst [vmem:[#allocation181_spill] sm:$0xff] %v12865_v41  ;;  %3960 = vmatmul.f32.gmra.mxu2 %v16220_v5 }
 0x4e7   :  { %16219 = vst [vmem:[#allocation182_spill] sm:$0xff] %v12867_v0  ;;  %8285 = vmatmul.msk.f32.gmra.mxu3 %vm3260_vm7, %v12296_v29  ;;  %8318 = vmatmul.msk.f32.gmra.mxu1 %vm3260_vm7, %v12296_v29 }
 0x4e8   :  { %4186 = vmatmul.f32.gmra.mxu0 %v16220_v5 }
 0x4e9   :  { %v3913_v63 = vpop.f32.mrf.mxu2 }
 0x4ea   :  { %v4026_v16 = vpop.f32.mrf.mxu3  ;;  %v3914_v41 = vadd.f32 %v3913_v63, %v12361_v52  ;;  %v4349_v63 = vrot.slane %v11301_v25, 4 }
 0x4ec   :  { %v12886_v34 = vpop.f32.mrf.mxu1  ;;  %v12890_v24 = vadd.f32 %v4026_v16, %v3914_v41  ;;  %v4353_v16 = vrot.slane %v11261_v30, 4 }
 0x4ed   :  { %16221 = vst [vmem:[#allocation183_spill] sm:$0xff] %v12886_v34  ;;  %v12888_v0 = vpop.f32.mrf.mxu0 }
 0x4ee   :  { %16222 = vst [vmem:[#allocation184_spill] sm:$0xff] %v12888_v0  ;;  %3963 = vmatmul.f32.gmra.mxu2 %v12326_v36  ;;  %v4350_v0 = vrot.slane %v11284_v61, 4 }
 0x4ef   :  { %16223 = vst [vmem:[#allocation185_spill] sm:$0xff] %v12890_v24  ;;  %8286 = vmatmul.msk.f32.gmra.mxu3 %vm3260_vm7, %v12332_v14  ;;  %8319 = vmatmul.msk.f32.gmra.mxu1 %vm3260_vm7, %v12332_v14  ;;  %v4354_v14 = vsel %vm1714_vm4, %v4352_v1, %v4353_v16 }
 0x4f0   :  { %4189 = vmatmul.f32.gmra.mxu0 %v12326_v36  ;;  %v4351_v25 = vsel %vm1714_vm4, %v4349_v63, %v4350_v0 }
 0x4f1   :  { %v3916_v52 = vpop.f32.mrf.mxu2 }
 0x4f2   :  { %v4029_v10 = vpop.f32.mrf.mxu3  ;;  %v3917_v4 = vadd.f32 %v3916_v52, %v12371_v46  ;;  %v8454_v46 = vld [vmem:[%s15535_s3 + $0x4c0] sm:$0xff]  ;;  %v8457_v52 = vld [vmem:[%s15535_s3 + $0x4d8] sm:$0xff] }
 0x4f3   :  { %5372 = vmatpush.msra.mxu2 %v8454_v46  ;;  %5597 = vmatpush.msra.mxu0 %v8457_v52 }
 0x4f4   :  { %v12901_v41 = vpop.f32.mrf.mxu1  ;;  %v12907_v24 = vadd.f32 %v4029_v10, %v3917_v4  ;;  %v4355_v4 = vrot.slane %v16114_v35, 4  ;;  %v16231_v35 = vld [vmem:[#allocation110_spill] sm:$0xff] }
 0x4f5   :  { %16224 = vst [vmem:[#allocation186_spill] sm:$0xff] %v12901_v41  ;;  %v12904_v34 = vpop.f32.mrf.mxu0 }
 0x4f6   :  { %16225 = vst [vmem:[#allocation187_spill] sm:$0xff] %v12904_v34  ;;  %4596 = vmatmul.f32.vlgmr.msrb.gmra.mxu2 %v4351_v25  ;;  %v4356_v46 = vsel %vm1714_vm4, %v4350_v0, %v4355_v4 }
 0x4f7   :  { %16226 = vst [vmem:[#allocation188_spill] sm:$0xff] %v12907_v24  ;;  %8363 = vmatmul.msk.f32.vlgmr.msrb.gmra.mxu3 %vm3260_vm7, %v4354_v14  ;;  %8396 = vmatmul.msk.f32.vlgmr.msrb.gmra.mxu1 %vm3260_vm7, %v4354_v14 }
 0x4f8   :  { %4822 = vmatmul.f32.vlgmr.msrb.gmra.mxu0 %v4351_v25  ;;  %v4357_v25 = vrot.slane %v16113_v59, 4 }
 0x4f9   :  { %v3919_v1 = vpop.f32.mrf.mxu2 }
 0x4fa   :  { %v4032_v10 = vpop.f32.mrf.mxu3  ;;  %v3920_v14 = vadd.f32 %v3919_v1, %v12389_v43  ;;  %v4358_v24 = vsel %vm1714_vm4, %v4353_v16, %v4357_v25  ;;  %v4361_v43 = vrot.slane %v16118_v3, 4 }
 0x4fc   :  { %v12921_v41 = vpop.f32.mrf.mxu1  ;;  %v12926_v34 = vadd.f32 %v4032_v10, %v3920_v14 }
 0x4fd   :  { %16227 = vst [vmem:[#allocation189_spill] sm:$0xff] %v12921_v41  ;;  %v12924_v63 = vpop.f32.mrf.mxu0  ;;  %v16230_v41 = vld [vmem:[#allocation25_spill] sm:$0xff] }
 0x4fe   :  { %16228 = vst [vmem:[#allocation190_spill] sm:$0xff] %v12924_v63  ;;  %4599 = vmatmul.f32.gmra.mxu2 %v4356_v46  ;;  %v4359_v59 = vrot.slane %v16230_v41, 4 }
 0x4ff   :  { %16229 = vst [vmem:[#allocation191_spill] sm:$0xff] %v12926_v34  ;;  %8364 = vmatmul.msk.f32.gmra.mxu3 %vm3260_vm7, %v4358_v24  ;;  %8397 = vmatmul.msk.f32.gmra.mxu1 %vm3260_vm7, %v4358_v24  ;;  %v4362_v24 = vsel %vm1714_vm4, %v4357_v25, %v4361_v43 }
 0x500   :  { %4825 = vmatmul.f32.gmra.mxu0 %v4356_v46  ;;  %v4360_v0 = vsel %vm1714_vm4, %v4355_v4, %v4359_v59  ;;  %v8455_v46 = vld [vmem:[%s15535_s3 + $0x4c8] sm:$0xff]  ;;  %v16238_v4 = vld [vmem:[#allocation28_spill] sm:$0xff] }
 0x501   :  { %v3922_v1 = vpop.f32.mrf.mxu2  ;;  %5598 = vmatpush.msra.mxu0 %v8455_v46 }
 0x502   :  { %v4035_v52 = vpop.f32.mrf.mxu3  ;;  %v3923_v63 = vadd.f32 %v3922_v1, %v16231_v35  ;;  %v8452_v35 = vld [vmem:[%s15535_s3 + $0x4b0] sm:$0xff] }
 0x503   :  { %5373 = vmatpush.msra.mxu2 %v8452_v35  ;;  %v8466_v35 = vld [vmem:[%s15535_s3 + $0x520] sm:$0xff] }
 0x504   :  { %v12935_v10 = vpop.f32.mrf.mxu1  ;;  %v12939_v16 = vadd.f32 %v4035_v52, %v3923_v63  ;;  %v16235_v52 = vld [vmem:[#allocation64_spill] sm:$0xff]  ;;  %5495 = vmatpush.msra.mxu3 %v8466_v35  ;;  %v8450_v35 = vld [vmem:[%s15535_s3 + $0x4a0] sm:$0xff] }
 0x505   :  { %16232 = vst [vmem:[#allocation110_spill] sm:$0xff] %v12935_v10  ;;  %v12937_v14 = vpop.f32.mrf.mxu0  ;;  %v4363_v1 = vrot.slane %v16235_v52, 4  ;;  %v16236_v10 = vld [vmem:[#allocation90_spill] sm:$0xff]  ;;  %5374 = vmatpush.msra.mxu2 %v8450_v35 }
 0x506   :  { %16233 = vst [vmem:[#allocation192_spill] sm:$0xff] %v12937_v14  ;;  %4602 = vmatmul.f32.gmra.mxu2 %v4360_v0 }
 0x507   :  { %16234 = vst [vmem:[#allocation193_spill] sm:$0xff] %v12939_v16  ;;  %8365 = vmatmul.msk.f32.gmra.mxu3 %vm3260_vm7, %v4362_v24  ;;  %8398 = vmatmul.msk.f32.gmra.mxu1 %vm3260_vm7, %v4362_v24 }
 0x508   :  { %4828 = vmatmul.f32.gmra.mxu0 %v4360_v0  ;;  %v4365_v0 = vrot.slane %v16238_v4, 4 }
 0x509   :  { %v3925_v25 = vpop.f32.mrf.mxu2 }
 0x50a   :  { %v4038_v63 = vpop.f32.mrf.mxu3  ;;  %v3926_v24 = vadd.f32 %v3925_v25, %v16236_v10  ;;  %v4366_v3 = vsel %vm1714_vm4, %v4361_v43, %v4365_v0  ;;  %v4364_v10 = vsel %vm1714_vm4, %v4359_v59, %v4363_v1  ;;  %v16241_v25 = vld [vmem:[#allocation67_spill] sm:$0xff] }
 0x50b   :  { %v16243_v43 = vld [vmem:[#allocation111_spill] sm:$0xff] }
 0x50c   :  { %v12953_v14 = vpop.f32.mrf.mxu1  ;;  %v12958_v41 = vadd.f32 %v4038_v63, %v3926_v24  ;;  %v16242_v24 = vld [vmem:[#allocation27_spill] sm:$0xff] }
 0x50d   :  { %16237 = vst [vmem:[#allocation90_spill] sm:$0xff] %v12953_v14  ;;  %v12956_v16 = vpop.f32.mrf.mxu0  ;;  %v4369_v14 = vrot.slane %v16241_v25, 4 }
 0x50e   :  { %16239 = vst [vmem:[#allocation194_spill] sm:$0xff] %v12956_v16  ;;  %4605 = vmatmul.f32.gmra.mxu2 %v4364_v10  ;;  %v4367_v16 = vrot.slane %v16242_v24, 4 }
 0x50f   :  { %16240 = vst [vmem:[#allocation195_spill] sm:$0xff] %v12958_v41  ;;  %8366 = vmatmul.msk.f32.gmra.mxu3 %vm3260_vm7, %v4366_v3  ;;  %8399 = vmatmul.msk.f32.gmra.mxu1 %vm3260_vm7, %v4366_v3  ;;  %v4370_v3 = vsel %vm1714_vm4, %v4365_v0, %v4369_v14  ;;  %v16247_v0 = vld [vmem:[#allocation68_spill] sm:$0xff] }
 0x510   :  { %4831 = vmatmul.f32.gmra.mxu0 %v4364_v10  ;;  %v4368_v59 = vsel %vm1714_vm4, %v4363_v1, %v4367_v16  ;;  %v8453_v10 = vld [vmem:[%s15535_s3 + $0x4b8] sm:$0xff] }
 0x511   :  { %v3928_v63 = vpop.f32.mrf.mxu2  ;;  %5599 = vmatpush.msra.mxu0 %v8453_v10 }
 0x512   :  { %v4041_v46 = vpop.f32.mrf.mxu3  ;;  %v3929_v41 = vadd.f32 %v3928_v63, %v16243_v43  ;;  %v16248_v43 = vld [vmem:[#allocation30_spill] sm:$0xff] }
 0x514   :  { %v12970_v4 = vpop.f32.mrf.mxu1  ;;  %v12974_v34 = vadd.f32 %v4041_v46, %v3929_v41  ;;  %v4373_v46 = vrot.slane %v16247_v0, 4 }
 0x515   :  { %16244 = vst [vmem:[#allocation67_spill] sm:$0xff] %v12970_v4  ;;  %v12972_v52 = vpop.f32.mrf.mxu0  ;;  %v16249_v4 = vld [vmem:[#allocation2_spill] sm:$0xff] }
 0x516   :  { %16245 = vst [vmem:[#allocation111_spill] sm:$0xff] %v12972_v52  ;;  %4608 = vmatmul.f32.gmra.mxu2 %v4368_v59  ;;  %v4374_v24 = vsel %vm1714_vm4, %v4369_v14, %v4373_v46 }
 0x517   :  { %16246 = vst [vmem:[#allocation196_spill] sm:$0xff] %v12974_v34  ;;  %8367 = vmatmul.msk.f32.gmra.mxu3 %vm3260_vm7, %v4370_v3  ;;  %8400 = vmatmul.msk.f32.gmra.mxu1 %vm3260_vm7, %v4370_v3  ;;  %v4371_v3 = vrot.slane %v16248_v43, 4 }
 0x518   :  { %4834 = vmatmul.f32.gmra.mxu0 %v4368_v59 }
 0x519   :  { %v3931_v63 = vpop.f32.mrf.mxu2  ;;  %v4372_v35 = vsel %vm1714_vm4, %v4367_v16, %v4371_v3 }
 0x51a   :  { %v4044_v41 = vpop.f32.mrf.mxu3  ;;  %v3932_v1 = vadd.f32 %v3931_v63, %v16249_v4  ;;  %v8467_v4 = vld [vmem:[%s15535_s3 + $0x528] sm:$0xff] }
 0x51b   :  { %5721 = vmatpush.msra.mxu1 %v8467_v4 }
 0x51c   :  { %v12989_v52 = vpop.f32.mrf.mxu1  ;;  %v12993_v34 = vadd.f32 %v4044_v41, %v3932_v1  ;;  %v4375_v41 = vrot.slane %v16138_v53, 4  ;;  %v16253_v1 = vld [vmem:[#allocation113_spill] sm:$0xff] }
 0x51d   :  { %16250 = vst [vmem:[#allocation2_spill] sm:$0xff] %v12989_v52  ;;  %v12991_v59 = vpop.f32.mrf.mxu0 }
 0x51e   :  { %16251 = vst [vmem:[#allocation197_spill] sm:$0xff] %v12991_v59  ;;  %4611 = vmatmul.f32.gmra.mxu2 %v4372_v35  ;;  %v16255_v59 = vld [vmem:[#allocation29_spill] sm:$0xff]  ;;  %v4376_v4 = vsel %vm1714_vm4, %v4371_v3, %v4375_v41 }
 0x51f   :  { %16252 = vst [vmem:[#allocation198_spill] sm:$0xff] %v12993_v34  ;;  %8368 = vmatmul.msk.f32.gmra.mxu3 %vm3260_vm7, %v4374_v24  ;;  %8401 = vmatmul.msk.f32.gmra.mxu1 %vm3260_vm7, %v4374_v24  ;;  %v4377_v34 = vrot.slane %v16255_v59, 4 }
 0x520   :  { %4837 = vmatmul.f32.gmra.mxu0 %v4372_v35 }
 0x521   :  { %v3934_v63 = vpop.f32.mrf.mxu2  ;;  %v4378_v35 = vsel %vm1714_vm4, %v4373_v46, %v4377_v34  ;;  %v16258_v46 = vld [vmem:[#allocation72_spill] sm:$0xff] }
 0x522   :  { %v4047_v10 = vpop.f32.mrf.mxu3  ;;  %v3935_v52 = vadd.f32 %v3934_v63, %v16253_v1  ;;  %v8448_v63 = vld [vmem:[%s15535_s3 + $0x490] sm:$0xff]  ;;  %v8451_v1 = vld [vmem:[%s15535_s3 + $0x4a8] sm:$0xff] }
 0x523   :  { %5375 = vmatpush.msra.mxu2 %v8448_v63  ;;  %5600 = vmatpush.msra.mxu0 %v8451_v1 }
 0x524   :  { %v13004_v14 = vpop.f32.mrf.mxu1  ;;  %v13009_v16 = vadd.f32 %v4047_v10, %v3935_v52  ;;  %v4381_v10 = vrot.slane %v16258_v46, 4 }
 0x525   :  { %16254 = vst [vmem:[#allocation113_spill] sm:$0xff] %v13004_v14  ;;  %v13007_v24 = vpop.f32.mrf.mxu0 }
 0x526   :  { %16256 = vst [vmem:[#allocation199_spill] sm:$0xff] %v13007_v24  ;;  %4614 = vmatmul.f32.gmra.mxu2 %v4376_v4  ;;  %v16259_v24 = vld [vmem:[#allocation32_spill] sm:$0xff]  ;;  %v4382_v43 = vsel %vm1714_vm4, %v4377_v34, %v4381_v10 }
 0x527   :  { %16257 = vst [vmem:[#allocation200_spill] sm:$0xff] %v13009_v16  ;;  %8369 = vmatmul.msk.f32.gmra.mxu3 %vm3260_vm7, %v4378_v35  ;;  %8402 = vmatmul.msk.f32.gmra.mxu1 %vm3260_vm7, %v4378_v35  ;;  %v4379_v35 = vrot.slane %v16259_v24, 4  ;;  %v16260_v16 = vld [vmem:[#allocation116_spill] sm:$0xff]  ;;  %v16263_v24 = vld [vmem:[#allocation75_spill] sm:$0xff] }
 0x528   :  { %4840 = vmatmul.f32.gmra.mxu0 %v4376_v4  ;;  %v4385_v46 = vrot.slane %v16263_v24, 4 }
 0x529   :  { %v3937_v14 = vpop.f32.mrf.mxu2  ;;  %v4380_v63 = vsel %vm1714_vm4, %v4375_v41, %v4379_v35 }
 0x52a   :  { %v4050_v52 = vpop.f32.mrf.mxu3  ;;  %v3938_v3 = vadd.f32 %v3937_v14, %v16260_v16  ;;  %v4383_v16 = vrot.slane %v16148_v26, 4 }
 0x52c   :  { %v13024_v59 = vpop.f32.mrf.mxu1  ;;  %v13028_v53 = vadd.f32 %v4050_v52, %v3938_v3  ;;  %v4384_v41 = vsel %vm1714_vm4, %v4379_v35, %v4383_v16  ;;  %v16271_v35 = vld [vmem:[#allocation34_spill] sm:$0xff] }
 0x52d   :  { %16261 = vst [vmem:[#allocation116_spill] sm:$0xff] %v13024_v59  ;;  %v13026_v4 = vpop.f32.mrf.mxu0  ;;  %v16264_v59 = vld [vmem:[#allocation119_spill] sm:$0xff] }
 0x52e   :  { %16262 = vst [vmem:[#allocation201_spill] sm:$0xff] %v13026_v4  ;;  %4617 = vmatmul.f32.gmra.mxu2 %v4380_v63 }
 0x52f   :  { %8370 = vmatmul.msk.f32.gmra.mxu3 %vm3260_vm7, %v4382_v43  ;;  %8403 = vmatmul.msk.f32.gmra.mxu1 %vm3260_vm7, %v4382_v43  ;;  %v4386_v43 = vsel %vm1714_vm4, %v4381_v10, %v4385_v46 }
 0x530   :  { %4843 = vmatmul.f32.gmra.mxu0 %v4380_v63  ;;  %v8449_v63 = vld [vmem:[%s15535_s3 + $0x498] sm:$0xff] }
 0x531   :  { %v3940_v14 = vpop.f32.mrf.mxu2  ;;  %5601 = vmatpush.msra.mxu0 %v8449_v63 }
 0x532   :  { %v4053_v1 = vpop.f32.mrf.mxu3  ;;  %v3941_v4 = vadd.f32 %v3940_v14, %v16264_v59  ;;  %v8446_v59 = vld [vmem:[%s15535_s3 + $0x480] sm:$0xff] }
 0x533   :  { %5376 = vmatpush.msra.mxu2 %v8446_v59 }
 0x534   :  { %v13037_v52 = vpop.f32.mrf.mxu1  ;;  %v13041_v34 = vadd.f32 %v4053_v1, %v3941_v4  ;;  %v16268_v1 = vld [vmem:[#allocation76_spill] sm:$0xff] }
 0x535   :  { %16265 = vst [vmem:[#allocation119_spill] sm:$0xff] %v13037_v52  ;;  %v13039_v3 = vpop.f32.mrf.mxu0  ;;  %v4387_v14 = vrot.slane %v16268_v1, 4  ;;  %v16269_v52 = vld [vmem:[#allocation122_spill] sm:$0xff] }
 0x536   :  { %16266 = vst [vmem:[#allocation202_spill] sm:$0xff] %v13039_v3  ;;  %4620 = vmatmul.f32.gmra.mxu2 %v4384_v41 }
 0x537   :  { %16267 = vst [vmem:[#allocation203_spill] sm:$0xff] %v13041_v34  ;;  %8371 = vmatmul.msk.f32.gmra.mxu3 %vm3260_vm7, %v4386_v43  ;;  %8404 = vmatmul.msk.f32.gmra.mxu1 %vm3260_vm7, %v4386_v43  ;;  %v4388_v59 = vsel %vm1714_vm4, %v4383_v16, %v4387_v14 }
 0x538   :  { %4846 = vmatmul.f32.gmra.mxu0 %v4384_v41  ;;  %v4389_v41 = vrot.slane %v16271_v35, 4 }
 0x539   :  { %v3943_v10 = vpop.f32.mrf.mxu2 }
 0x53a   :  { %v4056_v4 = vpop.f32.mrf.mxu3  ;;  %v3944_v43 = vadd.f32 %v3943_v10, %v16269_v52  ;;  %v4390_v24 = vsel %vm1714_vm4, %v4385_v46, %v4389_v41  ;;  %v8464_v52 = vld [vmem:[%s15535_s3 + $0x510] sm:$0xff]  ;;  %v4393_v10 = vrot.slane %v11790_v47, 4  ;;  %v16275_v46 = vld [vmem:[#allocation125_spill] sm:$0xff] }
 0x53b   :  { %5496 = vmatpush.msra.mxu3 %v8464_v52 }
 0x53c   :  { %v13055_v3 = vpop.f32.mrf.mxu1  ;;  %v13060_v26 = vadd.f32 %v4056_v4, %v3944_v43  ;;  %v16274_v43 = vld [vmem:[#allocation33_spill] sm:$0xff] }
 0x53d   :  { %16270 = vst [vmem:[#allocation122_spill] sm:$0xff] %v13055_v3  ;;  %v13058_v34 = vpop.f32.mrf.mxu0  ;;  %v4391_v3 = vrot.slane %v16274_v43, 4 }
 0x53e   :  { %16272 = vst [vmem:[#allocation204_spill] sm:$0xff] %v13058_v34  ;;  %4623 = vmatmul.f32.gmra.mxu2 %v4388_v59 }
 0x53f   :  { %16273 = vst [vmem:[#allocation205_spill] sm:$0xff] %v13060_v26  ;;  %8372 = vmatmul.msk.f32.gmra.mxu3 %vm3260_vm7, %v4390_v24  ;;  %8405 = vmatmul.msk.f32.gmra.mxu1 %vm3260_vm7, %v4390_v24  ;;  %v4392_v52 = vsel %vm1714_vm4, %v4387_v14, %v4391_v3 }
 0x540   :  { %4849 = vmatmul.f32.gmra.mxu0 %v4388_v59  ;;  %v4394_v59 = vsel %vm1714_vm4, %v4389_v41, %v4393_v10  ;;  %v16279_v41 = vld [vmem:[#allocation80_spill] sm:$0xff] }
 0x541   :  { %v3946_v4 = vpop.f32.mrf.mxu2 }
 0x542   :  { %v4059_v63 = vpop.f32.mrf.mxu3  ;;  %v3947_v34 = vadd.f32 %v3946_v4, %v16275_v46  ;;  %v8444_v4 = vld [vmem:[%s15535_s3 + $0x470] sm:$0xff]  ;;  %v8447_v46 = vld [vmem:[%s15535_s3 + $0x488] sm:$0xff] }
 0x543   :  { %5377 = vmatpush.msra.mxu2 %v8444_v4  ;;  %5602 = vmatpush.msra.mxu0 %v8447_v46 }
 0x544   :  { %v13072_v26 = vpop.f32.mrf.mxu1  ;;  %v13076_v16 = vadd.f32 %v4059_v63, %v3947_v34  ;;  %v4397_v63 = vrot.slane %v16279_v41, 4 }
 0x545   :  { %16276 = vst [vmem:[#allocation125_spill] sm:$0xff] %v13072_v26  ;;  %v13074_v24 = vpop.f32.mrf.mxu0 }
 0x546   :  { %16277 = vst [vmem:[#allocation206_spill] sm:$0xff] %v13074_v24  ;;  %4626 = vmatmul.f32.gmra.mxu2 %v4392_v52  ;;  %v16280_v24 = vld [vmem:[#allocation36_spill] sm:$0xff]  ;;  %v4398_v35 = vsel %vm1714_vm4, %v4393_v10, %v4397_v63 }
 0x547   :  { %16278 = vst [vmem:[#allocation207_spill] sm:$0xff] %v13076_v16  ;;  %8373 = vmatmul.msk.f32.gmra.mxu3 %vm3260_vm7, %v4394_v59  ;;  %8406 = vmatmul.msk.f32.gmra.mxu1 %vm3260_vm7, %v4394_v59  ;;  %v4395_v59 = vrot.slane %v16280_v24, 4  ;;  %v16281_v16 = vld [vmem:[#allocation128_spill] sm:$0xff] }
 0x548   :  { %4852 = vmatmul.f32.gmra.mxu0 %v4392_v52 }
 0x549   :  { %v3949_v26 = vpop.f32.mrf.mxu2  ;;  %v4396_v4 = vsel %vm1714_vm4, %v4391_v3, %v4395_v59 }
 0x54a   :  { %v4062_v34 = vpop.f32.mrf.mxu3  ;;  %v3950_v14 = vadd.f32 %v3949_v26, %v16281_v16  ;;  %v8465_v26 = vld [vmem:[%s15535_s3 + $0x518] sm:$0xff] }
 0x54b   :  { %5722 = vmatpush.msra.mxu1 %v8465_v26 }
 0x54c   :  { %v13091_v43 = vpop.f32.mrf.mxu1  ;;  %v13095_v47 = vadd.f32 %v4062_v34, %v3950_v14  ;;  %v4399_v34 = vrot.slane %v11894_v9, 4  ;;  %v16284_v14 = vld [vmem:[#allocation131_spill] sm:$0xff] }
 0x54d   :  { %16282 = vst [vmem:[#allocation80_spill] sm:$0xff] %v13091_v43  ;;  %v13093_v52 = vpop.f32.mrf.mxu0 }
 0x54e   :  { %16283 = vst [vmem:[#allocation36_spill] sm:$0xff] %v13093_v52  ;;  %4629 = vmatmul.f32.gmra.mxu2 %v4396_v4  ;;  %v4401_v52 = vrot.slane %v11901_v60, 4  ;;  %v4400_v26 = vsel %vm1714_vm4, %v4395_v59, %v4399_v34 }
 0x54f   :  { %8374 = vmatmul.msk.f32.gmra.mxu3 %vm3260_vm7, %v4398_v35  ;;  %8407 = vmatmul.msk.f32.gmra.mxu1 %vm3260_vm7, %v4398_v35 }
 0x550   :  { %4855 = vmatmul.f32.gmra.mxu0 %v4396_v4  ;;  %v4402_v4 = vsel %vm1714_vm4, %v4397_v63, %v4401_v52  ;;  %v4405_v63 = vrot.slane %v11924_v50, 4 }
 0x551   :  { %v3952_v46 = vpop.f32.mrf.mxu2 }
 0x552   :  { %v4065_v16 = vpop.f32.mrf.mxu3  ;;  %v3953_v43 = vadd.f32 %v3952_v46, %v16284_v14  ;;  %v8442_v46 = vld [vmem:[%s15535_s3 + $0x460] sm:$0xff]  ;;  %v8445_v14 = vld [vmem:[%s15535_s3 + $0x478] sm:$0xff] }
 0x553   :  { %5378 = vmatpush.msra.mxu2 %v8442_v46  ;;  %5603 = vmatpush.msra.mxu0 %v8445_v14 }
 0x554   :  { %v13106_v10 = vpop.f32.mrf.mxu1  ;;  %v13111_v3 = vadd.f32 %v4065_v16, %v3953_v43 }
 0x555   :  { %16285 = vst [vmem:[#allocation128_spill] sm:$0xff] %v13106_v10  ;;  %v13109_v35 = vpop.f32.mrf.mxu0 }
 0x556   :  { %16286 = vst [vmem:[#allocation131_spill] sm:$0xff] %v13109_v35  ;;  %4632 = vmatmul.f32.gmra.mxu2 %v4400_v26 }
 0x557   :  { %16287 = vst [vmem:[#allocation208_spill] sm:$0xff] %v13111_v3  ;;  %8375 = vmatmul.msk.f32.gmra.mxu3 %vm3260_vm7, %v4402_v4  ;;  %8408 = vmatmul.msk.f32.gmra.mxu1 %vm3260_vm7, %v4402_v4  ;;  %v4403_v4 = vrot.slane %v11930_v58, 4  ;;  %v4406_v3 = vsel %vm1714_vm4, %v4401_v52, %v4405_v63  ;;  %v4409_v58 = vrot.slane %v11957_v31, 4 }
 0x558   :  { %4858 = vmatmul.f32.gmra.mxu0 %v4400_v26 }
 0x559   :  { %v3955_v16 = vpop.f32.mrf.mxu2  ;;  %v4404_v46 = vsel %vm1714_vm4, %v4399_v34, %v4403_v4 }
 0x55a   :  { %v4068_v43 = vpop.f32.mrf.mxu3  ;;  %v3956_v59 = vadd.f32 %v3955_v16, %v12581_v21  ;;  %v4407_v16 = vrot.slane %v11965_v17, 4 }
 0x55c   :  { %v13126_v10 = vpop.f32.mrf.mxu1  ;;  %v13130_v35 = vadd.f32 %v4068_v43, %v3956_v59  ;;  %v4408_v34 = vsel %vm1714_vm4, %v4403_v4, %v4407_v16  ;;  %v16296_v4 = vld [vmem:[#allocation88_spill] sm:$0xff] }
 0x55d   :  { %16288 = vst [vmem:[#allocation209_spill] sm:$0xff] %v13126_v10  ;;  %v13128_v26 = vpop.f32.mrf.mxu0  ;;  %v16290_v10 = vld [vmem:[#allocation136_spill] sm:$0xff] }
 0x55e   :  { %16289 = vst [vmem:[#allocation210_spill] sm:$0xff] %v13128_v26  ;;  %4635 = vmatmul.f32.gmra.mxu2 %v4404_v46 }
 0x55f   :  { %8376 = vmatmul.msk.f32.gmra.mxu3 %vm3260_vm7, %v4406_v3  ;;  %8409 = vmatmul.msk.f32.gmra.mxu1 %vm3260_vm7, %v4406_v3  ;;  %v4410_v3 = vsel %vm1714_vm4, %v4405_v63, %v4409_v58 }
 0x560   :  { %4861 = vmatmul.f32.gmra.mxu0 %v4404_v46  ;;  %v8443_v46 = vld [vmem:[%s15535_s3 + $0x468] sm:$0xff] }
 0x561   :  { %v3958_v21 = vpop.f32.mrf.mxu2  ;;  %5604 = vmatpush.msra.mxu0 %v8443_v46 }
 0x562   :  { %v4071_v14 = vpop.f32.mrf.mxu3  ;;  %v3959_v26 = vadd.f32 %v3958_v21, %v16290_v10  ;;  %v8440_v10 = vld [vmem:[%s15535_s3 + $0x450] sm:$0xff]  ;;  %v16294_v21 = vld [vmem:[#allocation139_spill] sm:$0xff] }
 0x563   :  { %5379 = vmatpush.msra.mxu2 %v8440_v10 }
 0x564   :  { %v13139_v43 = vpop.f32.mrf.mxu1  ;;  %v13143_v52 = vadd.f32 %v4071_v14, %v3959_v26  ;;  %v4411_v14 = vrot.slane %v11985_v23, 4 }
 0x565   :  { %16291 = vst [vmem:[#allocation136_spill] sm:$0xff] %v13139_v43  ;;  %v13141_v59 = vpop.f32.mrf.mxu0 }
 0x566   :  { %16292 = vst [vmem:[#allocation211_spill] sm:$0xff] %v13141_v59  ;;  %4638 = vmatmul.f32.gmra.mxu2 %v4408_v34  ;;  %v4412_v10 = vsel %vm1714_vm4, %v4407_v16, %v4411_v14 }
 0x567   :  { %16293 = vst [vmem:[#allocation212_spill] sm:$0xff] %v13143_v52  ;;  %8377 = vmatmul.msk.f32.gmra.mxu3 %vm3260_vm7, %v4410_v3  ;;  %8410 = vmatmul.msk.f32.gmra.mxu1 %vm3260_vm7, %v4410_v3 }
 0x568   :  { %4864 = vmatmul.f32.gmra.mxu0 %v4408_v34  ;;  %v4413_v34 = vrot.slane %v16296_v4, 4 }
 0x569   :  { %v3961_v63 = vpop.f32.mrf.mxu2 }
 0x56a   :  { %v4074_v26 = vpop.f32.mrf.mxu3  ;;  %v3962_v3 = vadd.f32 %v3961_v63, %v16294_v21  ;;  %v4414_v17 = vsel %vm1714_vm4, %v4409_v58, %v4413_v34  ;;  %v4417_v63 = vrot.slane %v12003_v8, 4  ;;  %v8462_v21 = vld [vmem:[%s15535_s3 + $0x500] sm:$0xff] }
 0x56b   :  { %5497 = vmatpush.msra.mxu3 %v8462_v21  ;;  %v16298_v58 = vld [vmem:[#allocation142_spill] sm:$0xff]  ;;  %v8441_v21 = vld [vmem:[%s15535_s3 + $0x458] sm:$0xff] }
 0x56c   :  { %v13157_v43 = vpop.f32.mrf.mxu1  ;;  %v13162_v52 = vadd.f32 %v4074_v26, %v3962_v3  ;;  %v4415_v26 = vrot.slane %v12007_v28, 4  ;;  %5605 = vmatpush.msra.mxu0 %v8441_v21 }
 0x56d   :  { %16295 = vst [vmem:[#allocation139_spill] sm:$0xff] %v13157_v43  ;;  %v13160_v59 = vpop.f32.mrf.mxu0 }
 0x56e   :  { %16297 = vst [vmem:[#allocation88_spill] sm:$0xff] %v13160_v59  ;;  %4641 = vmatmul.f32.gmra.mxu2 %v4412_v10  ;;  %v4416_v8 = vsel %vm1714_vm4, %v4411_v14, %v4415_v26 }
 0x56f   :  { %8378 = vmatmul.msk.f32.gmra.mxu3 %vm3260_vm7, %v4414_v17  ;;  %8411 = vmatmul.msk.f32.gmra.mxu1 %vm3260_vm7, %v4414_v17 }
 0x570   :  { %4867 = vmatmul.f32.gmra.mxu0 %v4412_v10  ;;  %v4418_v10 = vsel %vm1714_vm4, %v4413_v34, %v4417_v63  ;;  %v4421_v34 = vrot.slane %v12023_v32, 4 }
 0x571   :  { %v3964_v43 = vpop.f32.mrf.mxu2 }
 0x572   :  { %v4077_v46 = vpop.f32.mrf.mxu3  ;;  %v3965_v3 = vadd.f32 %v3964_v43, %v16298_v58  ;;  %v8438_v43 = vld [vmem:[%s15535_s3 + $0x440] sm:$0xff] }
 0x573   :  { %5380 = vmatpush.msra.mxu2 %v8438_v43 }
 0x574   :  { %v13174_v59 = vpop.f32.mrf.mxu1  ;;  %v13178_v16 = vadd.f32 %v4077_v46, %v3965_v3  ;;  %v4419_v3 = vrot.slane %v12027_v39, 4 }
 0x575   :  { %16299 = vst [vmem:[#allocation142_spill] sm:$0xff] %v13174_v59  ;;  %v13176_v17 = vpop.f32.mrf.mxu0 }
 0x576   :  { %16300 = vst [vmem:[#allocation213_spill] sm:$0xff] %v13176_v17  ;;  %4644 = vmatmul.f32.gmra.mxu2 %v4416_v8  ;;  %v4422_v17 = vsel %vm1714_vm4, %v4417_v63, %v4421_v34  ;;  %v4420_v43 = vsel %vm1714_vm4, %v4415_v26, %v4419_v3  ;;  %v16305_v63 = vld [vmem:[#allocation149_spill] sm:$0xff]  ;;  %v8463_v26 = vld [vmem:[%s15535_s3 + $0x508] sm:$0xff] }
 0x577   :  { %8379 = vmatmul.msk.f32.gmra.mxu3 %vm3260_vm7, %v4418_v10  ;;  %8412 = vmatmul.msk.f32.gmra.mxu1 %vm3260_vm7, %v4418_v10 }
 0x578   :  { %4870 = vmatmul.f32.gmra.mxu0 %v4416_v8  ;;  %5723 = vmatpush.msra.mxu1 %v8463_v26 }
 0x579   :  { %v4597_v58 = vpop.f32.mrf.mxu2 }
 0x57a   :  { %v4710_v46 = vpop.f32.mrf.mxu3 }
 0x57b   :  { %v4711_v10 = vadd.f32 %v4710_v46, %v4597_v58  ;;  %v4423_v46 = vrot.slane %v12049_v27, 4 }
 0x57c   :  { %v13192_v14 = vpop.f32.mrf.mxu1 }
 0x57d   :  { %16301 = vst [vmem:[#allocation214_spill] sm:$0xff] %v13192_v14  ;;  %v13194_v8 = vpop.f32.mrf.mxu0  ;;  %v13197_v59 = vadd.f32 %v4711_v10, %v12649_v18  ;;  %v4425_v18 = vrot.slane %v12055_v12, 4 }
 0x57e   :  { %16302 = vst [vmem:[#allocation215_spill] sm:$0xff] %v13194_v8  ;;  %4647 = vmatmul.f32.gmra.mxu2 %v4420_v43 }
 0x57f   :  { %8380 = vmatmul.msk.f32.gmra.mxu3 %vm3260_vm7, %v4422_v17  ;;  %8413 = vmatmul.msk.f32.gmra.mxu1 %vm3260_vm7, %v4422_v17  ;;  %v4426_v17 = vsel %vm1714_vm4, %v4421_v34, %v4425_v18  ;;  %v8439_v34 = vld [vmem:[%s15535_s3 + $0x448] sm:$0xff] }
 0x580   :  { %4873 = vmatmul.f32.gmra.mxu0 %v4420_v43  ;;  %v8436_v43 = vld [vmem:[%s15535_s3 + $0x430] sm:$0xff] }
 0x581   :  { %v4600_v39 = vpop.f32.mrf.mxu2  ;;  %5381 = vmatpush.msra.mxu2 %v8436_v43  ;;  %5606 = vmatpush.msra.mxu0 %v8439_v34  ;;  %v4433_v34 = vrot.slane %v16187_v7, 4 }
 0x582   :  { %v4713_v21 = vpop.f32.mrf.mxu3 }
 0x583   :  { %v4714_v58 = vadd.f32 %v4713_v21, %v4600_v39  ;;  %v4424_v39 = vsel %vm1714_vm4, %v4419_v3, %v4423_v46 }
 0x584   :  { %v13204_v14 = vpop.f32.mrf.mxu1 }
 0x585   :  { %16303 = vst [vmem:[#allocation216_spill] sm:$0xff] %v13204_v14  ;;  %v13207_v10 = vpop.f32.mrf.mxu0  ;;  %v13210_v8 = vadd.f32 %v4714_v58, %v16305_v63  ;;  %v4429_v58 = vrot.slane %v12070_v15, 4 }
 0x586   :  { %16304 = vst [vmem:[#allocation217_spill] sm:$0xff] %v13207_v10  ;;  %4650 = vmatmul.f32.gmra.mxu2 %v4424_v39 }
 0x587   :  { %16306 = vst [vmem:[#allocation149_spill] sm:$0xff] %v13210_v8  ;;  %8381 = vmatmul.msk.f32.gmra.mxu3 %vm3260_vm7, %v4426_v17  ;;  %8414 = vmatmul.msk.f32.gmra.mxu1 %vm3260_vm7, %v4426_v17  ;;  %v4427_v17 = vrot.slane %v12074_v55, 4  ;;  %v4430_v8 = vsel %vm1714_vm4, %v4425_v18, %v4429_v58  ;;  %v16311_v18 = vld [vmem:[#allocation154_spill] sm:$0xff] }
 0x588   :  { %4876 = vmatmul.f32.gmra.mxu0 %v4424_v39 }
 0x589   :  { %v4603_v63 = vpop.f32.mrf.mxu2  ;;  %v4428_v26 = vsel %vm1714_vm4, %v4423_v46, %v4427_v17 }
 0x58a   :  { %v4716_v21 = vpop.f32.mrf.mxu3 }
 0x58b   :  { %v4717_v3 = vadd.f32 %v4716_v21, %v4603_v63  ;;  %v4431_v63 = vrot.slane %v16188_v44, 4 }
 0x58c   :  { %v13227_v14 = vpop.f32.mrf.mxu1 }
 0x58d   :  { %16307 = vst [vmem:[#allocation218_spill] sm:$0xff] %v13227_v14  ;;  %v13229_v39 = vpop.f32.mrf.mxu0  ;;  %v13232_v10 = vadd.f32 %v4717_v3, %v12684_v62  ;;  %v4432_v46 = vsel %vm1714_vm4, %v4427_v17, %v4431_v63  ;;  %v4437_v17 = vrot.slane %v12121_v37, 4 }
 0x58e   :  { %16308 = vst [vmem:[#allocation219_spill] sm:$0xff] %v13229_v39  ;;  %4653 = vmatmul.f32.gmra.mxu2 %v4428_v26 }
 0x58f   :  { %8382 = vmatmul.msk.f32.gmra.mxu3 %vm3260_vm7, %v4430_v8  ;;  %8415 = vmatmul.msk.f32.gmra.mxu1 %vm3260_vm7, %v4430_v8  ;;  %v4434_v8 = vsel %vm1714_vm4, %v4429_v58, %v4433_v34 }
 0x590   :  { %4879 = vmatmul.f32.gmra.mxu0 %v4428_v26  ;;  %v8434_v26 = vld [vmem:[%s15535_s3 + $0x420] sm:$0xff] }
 0x591   :  { %v4606_v21 = vpop.f32.mrf.mxu2  ;;  %5382 = vmatpush.msra.mxu2 %v8434_v26 }
 0x592   :  { %v4719_v43 = vpop.f32.mrf.mxu3 }
 0x593   :  { %v4720_v14 = vadd.f32 %v4719_v43, %v4606_v21  ;;  %v8437_v43 = vld [vmem:[%s15535_s3 + $0x438] sm:$0xff]  ;;  %v4435_v21 = vrot.slane %v12115_v20, 4 }
 0x594   :  { %v13240_v39 = vpop.f32.mrf.mxu1  ;;  %5607 = vmatpush.msra.mxu0 %v8437_v43 }
 0x595   :  { %16309 = vst [vmem:[#allocation220_spill] sm:$0xff] %v13240_v39  ;;  %v13242_v62 = vpop.f32.mrf.mxu0  ;;  %v13245_v3 = vadd.f32 %v4720_v14, %v16311_v18  ;;  %v16315_v39 = vld [vmem:[#allocation157_spill] sm:$0xff]  ;;  %v4436_v26 = vsel %vm1714_vm4, %v4431_v63, %v4435_v21 }
 0x596   :  { %16310 = vst [vmem:[#allocation221_spill] sm:$0xff] %v13242_v62  ;;  %4656 = vmatmul.f32.gmra.mxu2 %v4432_v46 }
 0x597   :  { %16312 = vst [vmem:[#allocation154_spill] sm:$0xff] %v13245_v3  ;;  %8383 = vmatmul.msk.f32.gmra.mxu3 %vm3260_vm7, %v4434_v8  ;;  %8416 = vmatmul.msk.f32.gmra.mxu1 %vm3260_vm7, %v4434_v8  ;;  %v4438_v3 = vsel %vm1714_vm4, %v4433_v34, %v4437_v17  ;;  %v16318_v34 = vld [vmem:[#allocation160_spill] sm:$0xff] }
 0x598   :  { %4882 = vmatmul.f32.gmra.mxu0 %v4432_v46 }
 0x599   :  { %v4609_v58 = vpop.f32.mrf.mxu2 }
 0x59a   :  { %v4722_v14 = vpop.f32.mrf.mxu3 }
 0x59b   :  { %v4723_v18 = vadd.f32 %v4722_v14, %v4609_v58  ;;  %v4441_v14 = vrot.slane %v12139_v11, 4 }
 0x59c   :  { %v13258_v8 = vpop.f32.mrf.mxu1 }
 0x59d   :  { %16313 = vst [vmem:[#allocation222_spill] sm:$0xff] %v13258_v8  ;;  %v13261_v46 = vpop.f32.mrf.mxu0  ;;  %v13264_v62 = vadd.f32 %v4723_v18, %v16315_v39  ;;  %v4439_v8 = vrot.slane %v16195_v57, 4 }
 0x59e   :  { %16314 = vst [vmem:[#allocation223_spill] sm:$0xff] %v13261_v46  ;;  %4659 = vmatmul.f32.gmra.mxu2 %v4436_v26 }
 0x59f   :  { %8384 = vmatmul.msk.f32.gmra.mxu3 %vm3260_vm7, %v4438_v3  ;;  %8417 = vmatmul.msk.f32.gmra.mxu1 %vm3260_vm7, %v4438_v3  ;;  %v4442_v3 = vsel %vm1714_vm4, %v4437_v17, %v4441_v14  ;;  %v4440_v63 = vsel %vm1714_vm4, %v4435_v21, %v4439_v8  ;;  %v8435_v17 = vld [vmem:[%s15535_s3 + $0x428] sm:$0xff] }
 0x5a0   :  { %4885 = vmatmul.f32.gmra.mxu0 %v4436_v26  ;;  %v8460_v26 = vld [vmem:[%s15535_s3 + $0x4f0] sm:$0xff] }
 0x5a1   :  { %v4612_v58 = vpop.f32.mrf.mxu2  ;;  %5498 = vmatpush.msra.mxu3 %v8460_v26  ;;  %5608 = vmatpush.msra.mxu0 %v8435_v17 }
 0x5a2   :  { %v4725_v43 = vpop.f32.mrf.mxu3 }
 0x5a3   :  { %v4726_v46 = vadd.f32 %v4725_v43, %v4612_v58  ;;  %v8432_v43 = vld [vmem:[%s15535_s3 + $0x410] sm:$0xff]  ;;  %v4445_v58 = vrot.slane %v16199_v2, 4 }
 0x5a4   :  { %v13272_v37 = vpop.f32.mrf.mxu1  ;;  %5383 = vmatpush.msra.mxu2 %v8432_v43 }
 0x5a5   :  { %16316 = vst [vmem:[#allocation157_spill] sm:$0xff] %v13272_v37  ;;  %v13274_v39 = vpop.f32.mrf.mxu0  ;;  %v13277_v18 = vadd.f32 %v4726_v46, %v16318_v34  ;;  %v4443_v34 = vrot.slane %v12165_v38, 4  ;;  %v4446_v57 = vsel %vm1714_vm4, %v4441_v14, %v4445_v58  ;;  %v16325_v14 = vld [vmem:[#allocation166_spill] sm:$0xff] }
 0x5a6   :  { %16317 = vst [vmem:[#allocation224_spill] sm:$0xff] %v13274_v39  ;;  %4662 = vmatmul.f32.gmra.mxu2 %v4440_v63  ;;  %v16322_v39 = vld [vmem:[#allocation163_spill] sm:$0xff] }
 0x5a7   :  { %16319 = vst [vmem:[#allocation160_spill] sm:$0xff] %v13277_v18  ;;  %8385 = vmatmul.msk.f32.gmra.mxu3 %vm3260_vm7, %v4442_v3  ;;  %8418 = vmatmul.msk.f32.gmra.mxu1 %vm3260_vm7, %v4442_v3  ;;  %v4444_v26 = vsel %vm1714_vm4, %v4439_v8, %v4443_v34 }
 0x5a8   :  { %4888 = vmatmul.f32.gmra.mxu0 %v4440_v63 }
 0x5a9   :  { %v4615_v21 = vpop.f32.mrf.mxu2 }
 0x5aa   :  { %v4728_v46 = vpop.f32.mrf.mxu3 }
 0x5ab   :  { %v4729_v3 = vadd.f32 %v4728_v46, %v4615_v21  ;;  %v4447_v46 = vrot.slane %v16202_v54, 4 }
 0x5ac   :  { %v13294_v63 = vpop.f32.mrf.mxu1 }
 0x5ad   :  { %16320 = vst [vmem:[#allocation225_spill] sm:$0xff] %v13294_v63  ;;  %v13296_v37 = vpop.f32.mrf.mxu0  ;;  %v13299_v18 = vadd.f32 %v4729_v3, %v16322_v39  ;;  %v4449_v39 = vrot.slane %v12193_v13, 4  ;;  %v4448_v8 = vsel %vm1714_vm4, %v4443_v34, %v4447_v46 }
 0x5ae   :  { %16321 = vst [vmem:[#allocation226_spill] sm:$0xff] %v13296_v37  ;;  %4665 = vmatmul.f32.gmra.mxu2 %v4444_v26 }
 0x5af   :  { %8386 = vmatmul.msk.f32.gmra.mxu3 %vm3260_vm7, %v4446_v57  ;;  %8419 = vmatmul.msk.f32.gmra.mxu1 %vm3260_vm7, %v4446_v57  ;;  %v4450_v57 = vsel %vm1714_vm4, %v4445_v58, %v4449_v39  ;;  %v8433_v58 = vld [vmem:[%s15535_s3 + $0x418] sm:$0xff] }
 0x5b0   :  { %4891 = vmatmul.f32.gmra.mxu0 %v4444_v26  ;;  %v8461_v26 = vld [vmem:[%s15535_s3 + $0x4f8] sm:$0xff] }
 0x5b1   :  { %v4618_v17 = vpop.f32.mrf.mxu2  ;;  %5724 = vmatpush.msra.mxu1 %v8461_v26  ;;  %5609 = vmatpush.msra.mxu0 %v8433_v58  ;;  %v4457_v58 = vrot.slane %v12233_v40, 4 }
 0x5b2   :  { %v4731_v43 = vpop.f32.mrf.mxu3 }
 0x5b3   :  { %v4732_v21 = vadd.f32 %v4731_v43, %v4618_v17  ;;  %v8430_v43 = vld [vmem:[%s15535_s3 + $0x400] sm:$0xff] }
 0x5b4   :  { %v13306_v63 = vpop.f32.mrf.mxu1  ;;  %5384 = vmatpush.msra.mxu2 %v8430_v43 }
 0x5b5   :  { %16323 = vst [vmem:[#allocation163_spill] sm:$0xff] %v13306_v63  ;;  %v13309_v3 = vpop.f32.mrf.mxu0  ;;  %v13312_v37 = vadd.f32 %v4732_v21, %v16325_v14  ;;  %v4453_v21 = vrot.slane %v16205_v49, 4  ;;  %v4451_v14 = vrot.slane %v12212_v22, 4 }
 0x5b6   :  { %16324 = vst [vmem:[#allocation227_spill] sm:$0xff] %v13309_v3  ;;  %4668 = vmatmul.f32.gmra.mxu2 %v4448_v8 }
 0x5b7   :  { %16326 = vst [vmem:[#allocation166_spill] sm:$0xff] %v13312_v37  ;;  %8387 = vmatmul.msk.f32.gmra.mxu3 %vm3260_vm7, %v4450_v57  ;;  %8420 = vmatmul.msk.f32.gmra.mxu1 %vm3260_vm7, %v4450_v57  ;;  %v4454_v37 = vsel %vm1714_vm4, %v4449_v39, %v4453_v21  ;;  %v4452_v26 = vsel %vm1714_vm4, %v4447_v46, %v4451_v14 }
 0x5b8   :  { %4894 = vmatmul.f32.gmra.mxu0 %v4448_v8 }
 0x5b9   :  { %v4621_v34 = vpop.f32.mrf.mxu2 }
 0x5ba   :  { %v4734_v17 = vpop.f32.mrf.mxu3 }
 0x5bb   :  { %v4735_v57 = vadd.f32 %v4734_v17, %v4621_v34  ;;  %v4455_v34 = vrot.slane %v12237_v42, 4 }
 0x5bc   :  { %v13329_v8 = vpop.f32.mrf.mxu1 }
 0x5bd   :  { %16327 = vst [vmem:[#allocation228_spill] sm:$0xff] %v13329_v8  ;;  %v13331_v63 = vpop.f32.mrf.mxu0  ;;  %v13334_v3 = vadd.f32 %v4735_v57, %v12786_v51  ;;  %v4456_v46 = vsel %vm1714_vm4, %v4451_v14, %v4455_v34  ;;  %v8428_v57 = vld [vmem:[%s15535_s3 + $0x3f0] sm:$0xff]  ;;  %v4461_v14 = vrot.slane %v12259_v48, 4 }
 0x5be   :  { %16328 = vst [vmem:[#allocation229_spill] sm:$0xff] %v13331_v63  ;;  %4671 = vmatmul.f32.gmra.mxu2 %v4452_v26 }
 0x5bf   :  { %8388 = vmatmul.msk.f32.gmra.mxu3 %vm3260_vm7, %v4454_v37  ;;  %8421 = vmatmul.msk.f32.gmra.mxu1 %vm3260_vm7, %v4454_v37  ;;  %v4458_v37 = vsel %vm1714_vm4, %v4453_v21, %v4457_v58 }
 0x5c0   :  { %4897 = vmatmul.f32.gmra.mxu0 %v4452_v26  ;;  %v8431_v26 = vld [vmem:[%s15535_s3 + $0x408] sm:$0xff]  ;;  %5385 = vmatpush.msra.mxu2 %v8428_v57 }
 0x5c1   :  { %v4624_v17 = vpop.f32.mrf.mxu2  ;;  %5610 = vmatpush.msra.mxu0 %v8431_v26 }
 0x5c2   :  { %v4737_v43 = vpop.f32.mrf.mxu3 }
 0x5c3   :  { %v4738_v8 = vadd.f32 %v4737_v43, %v4624_v17 }
 0x5c4   :  { %v13342_v63 = vpop.f32.mrf.mxu1 }
 0x5c5   :  { %16329 = vst [vmem:[#allocation230_spill] sm:$0xff] %v13342_v63  ;;  %v13344_v51 = vpop.f32.mrf.mxu0  ;;  %v13347_v39 = vadd.f32 %v4738_v8, %v12799_v6  ;;  %v4459_v8 = vrot.slane %v16212_v33, 4 }
 0x5c6   :  { %16330 = vst [vmem:[#allocation231_spill] sm:$0xff] %v13344_v51  ;;  %4674 = vmatmul.f32.gmra.mxu2 %v4456_v46  ;;  %v4462_v51 = vsel %vm1714_vm4, %v4457_v58, %v4461_v14  ;;  %v16336_v58 = vld [vmem:[#allocation176_spill] sm:$0xff] }
 0x5c7   :  { %8389 = vmatmul.msk.f32.gmra.mxu3 %vm3260_vm7, %v4458_v37  ;;  %8422 = vmatmul.msk.f32.gmra.mxu1 %vm3260_vm7, %v4458_v37  ;;  %v4460_v57 = vsel %vm1714_vm4, %v4455_v34, %v4459_v8 }
 0x5c8   :  { %4900 = vmatmul.f32.gmra.mxu0 %v4456_v46  ;;  %v16333_v46 = vld [vmem:[#allocation173_spill] sm:$0xff] }
 0x5c9   :  { %v4627_v21 = vpop.f32.mrf.mxu2 }
 0x5ca   :  { %v4740_v6 = vpop.f32.mrf.mxu3 }
 0x5cb   :  { %v4741_v43 = vadd.f32 %v4740_v6, %v4627_v21  ;;  %v4465_v6 = vrot.slane %v12277_v56, 4 }
 0x5cc   :  { %v13360_v17 = vpop.f32.mrf.mxu1 }
 0x5cd   :  { %16331 = vst [vmem:[#allocation232_spill] sm:$0xff] %v13360_v17  ;;  %v13363_v37 = vpop.f32.mrf.mxu0  ;;  %v13366_v63 = vadd.f32 %v4741_v43, %v16333_v46  ;;  %v4463_v17 = vrot.slane %v16216_v45, 4 }
 0x5ce   :  { %16332 = vst [vmem:[#allocation233_spill] sm:$0xff] %v13363_v37  ;;  %4677 = vmatmul.f32.gmra.mxu2 %v4460_v57 }
 0x5cf   :  { %8390 = vmatmul.msk.f32.gmra.mxu3 %vm3260_vm7, %v4462_v51  ;;  %8423 = vmatmul.msk.f32.gmra.mxu1 %vm3260_vm7, %v4462_v51  ;;  %v4466_v51 = vsel %vm1714_vm4, %v4461_v14, %v4465_v6  ;;  %v4464_v34 = vsel %vm1714_vm4, %v4459_v8, %v4463_v17  ;;  %v8576_v14 = vld [vmem:[%s15535_s3 + $0x680] sm:$0x3] }
 0x5d0   :  { %4903 = vmatmul.f32.gmra.mxu0 %v4460_v57  ;;  %v8429_v57 = vld [vmem:[%s15535_s3 + $0x3f8] sm:$0xff]  ;;  %8578 = vmatpush.msk.msrb.mxu3 %vm3325_vm5, %v8576_v14 }
 0x5d1   :  { %v4630_v21 = vpop.f32.mrf.mxu2  ;;  %5611 = vmatpush.msra.mxu0 %v8429_v57 }
 0x5d2   :  { %v4743_v26 = vpop.f32.mrf.mxu3 }
 0x5d3   :  { %v4744_v37 = vadd.f32 %v4743_v26, %v4630_v21  ;;  %v8566_v26 = vld [vmem:[%s15535_s3 + $0x630] sm:$0xff]  ;;  %v4469_v21 = vrot.slane %v12296_v29, 4 }
 0x5d4   :  { %v13374_v48 = vpop.f32.mrf.mxu1  ;;  %5937 = vmatpush.msrb.mxu2 %v8566_v26 }
 0x5d5   :  { %16334 = vst [vmem:[#allocation173_spill] sm:$0xff] %v13374_v48  ;;  %v13376_v43 = vpop.f32.mrf.mxu0  ;;  %v13379_v46 = vadd.f32 %v4744_v37, %v16336_v58  ;;  %v4467_v58 = vrot.slane %v16220_v5, 4  ;;  %v4470_v45 = vsel %vm1714_vm4, %v4465_v6, %v4469_v21  ;;  %v16345_v6 = vld [vmem:[#allocation182_spill] sm:$0xff] }
 0x5d6   :  { %16335 = vst [vmem:[#allocation234_spill] sm:$0xff] %v13376_v43  ;;  %4680 = vmatmul.f32.gmra.mxu2 %v4464_v34  ;;  %v16340_v43 = vld [vmem:[#allocation179_spill] sm:$0xff] }
 0x5d7   :  { %16337 = vst [vmem:[#allocation176_spill] sm:$0xff] %v13379_v46  ;;  %8391 = vmatmul.msk.f32.gmra.mxu3 %vm3260_vm7, %v4466_v51  ;;  %8424 = vmatmul.msk.f32.gmra.mxu1 %vm3260_vm7, %v4466_v51  ;;  %v4468_v57 = vsel %vm1714_vm4, %v4463_v17, %v4467_v58 }
 0x5d8   :  { %4906 = vmatmul.f32.gmra.mxu0 %v4464_v34 }
 0x5d9   :  { %v4633_v8 = vpop.f32.mrf.mxu2 }
 0x5da   :  { %v4746_v37 = vpop.f32.mrf.mxu3 }
 0x5db   :  { %v4747_v51 = vadd.f32 %v4746_v37, %v4633_v8  ;;  %v4471_v37 = vrot.slane %v12326_v36, 4 }
 0x5dc   :  { %v13397_v34 = vpop.f32.mrf.mxu1 }
 0x5dd   :  { %16338 = vst [vmem:[#allocation235_spill] sm:$0xff] %v13397_v34  ;;  %v13399_v48 = vpop.f32.mrf.mxu0  ;;  %v13402_v46 = vadd.f32 %v4747_v51, %v16340_v43  ;;  %v4472_v17 = vsel %vm1714_vm4, %v4467_v58, %v4471_v37 }
 0x5de   :  { %16339 = vst [vmem:[#allocation236_spill] sm:$0xff] %v13399_v48  ;;  %4683 = vmatmul.f32.gmra.mxu2 %v4468_v57  ;;  %v16343_v48 = vld [vmem:[#allocation81_spill] sm:$0xff] }
 0x5df   :  { %16341 = vst [vmem:[#allocation179_spill] sm:$0xff] %v13402_v46  ;;  %8392 = vmatmul.msk.f32.gmra.mxu3 %vm3260_vm7, %v4470_v45  ;;  %8425 = vmatmul.msk.f32.gmra.mxu1 %vm3260_vm7, %v4470_v45  ;;  %v4473_v43 = vrot.slane %v16343_v48, 4 }
 0x5e0   :  { %4909 = vmatmul.f32.gmra.mxu0 %v4468_v57  ;;  %v8564_v57 = vld [vmem:[%s15535_s3 + $0x620] sm:$0xff] }
 0x5e1   :  { %v4636_v14 = vpop.f32.mrf.mxu2  ;;  %v4474_v45 = vsel %vm1714_vm4, %v4469_v21, %v4473_v43  ;;  %v8577_v21 = vld [vmem:[%s15535_s3 + $0x688] sm:$0x3]  ;;  %5938 = vmatpush.msrb.mxu2 %v8564_v57 }
 0x5e2   :  { %v4749_v26 = vpop.f32.mrf.mxu3  ;;  %8611 = vmatpush.msk.msrb.mxu1 %vm3325_vm5, %v8577_v21  ;;  %v5142_v21 = vrot.slane %v11298_v19, 6 }
 0x5e3   :  { %v4750_v8 = vadd.f32 %v4749_v26, %v4636_v14  ;;  %v8567_v26 = vld [vmem:[%s15535_s3 + $0x638] sm:$0xff] }
 0x5e4   :  { %v13409_v34 = vpop.f32.mrf.mxu1  ;;  %6163 = vmatpush.msrb.mxu0 %v8567_v26 }
 0x5e5   :  { %16342 = vst [vmem:[#allocation237_spill] sm:$0xff] %v13409_v34  ;;  %v13412_v51 = vpop.f32.mrf.mxu0  ;;  %v13415_v46 = vadd.f32 %v4750_v8, %v16345_v6  ;;  %v16347_v8 = vld [vmem:[#allocation108_spill] sm:$0xff] }
 0x5e6   :  { %16344 = vst [vmem:[#allocation238_spill] sm:$0xff] %v13412_v51  ;;  %4686 = vmatmul.f32.gmra.mxu2 %v4472_v17  ;;  %v4475_v6 = vrot.slane %v16347_v8, 4  ;;  %v16350_v51 = vld [vmem:[#allocation185_spill] sm:$0xff] }
 0x5e7   :  { %16346 = vst [vmem:[#allocation182_spill] sm:$0xff] %v13415_v46  ;;  %8393 = vmatmul.msk.f32.gmra.mxu3 %vm3260_vm7, %v4474_v45  ;;  %8426 = vmatmul.msk.f32.gmra.mxu1 %vm3260_vm7, %v4474_v45 }
 0x5e8   :  { %4912 = vmatmul.f32.gmra.mxu0 %v4472_v17  ;;  %v4477_v48 = vsel %vm1714_vm4, %v4473_v43, %v4475_v6  ;;  %v4476_v57 = vsel %vm1714_vm4, %v4471_v37, %v4475_v6  ;;  %v8562_v6 = vld [vmem:[%s15535_s3 + $0x610] sm:$0xff] }
 0x5e9   :  { %v4639_v58 = vpop.f32.mrf.mxu2  ;;  %5939 = vmatpush.msrb.mxu2 %v8562_v6 }
 0x5ea   :  { %v4752_v14 = vpop.f32.mrf.mxu3 }
 0x5eb   :  { %v4753_v45 = vadd.f32 %v4752_v14, %v4639_v58  ;;  %v16352_v58 = vld [vmem:[#allocation23_spill] sm:$0xff] }
 0x5ec   :  { %v13432_v17 = vpop.f32.mrf.mxu1 }
 0x5ed   :  { %16348 = vst [vmem:[#allocation239_spill] sm:$0xff] %v13432_v17  ;;  %v13434_v34 = vpop.f32.mrf.mxu0  ;;  %v13437_v46 = vadd.f32 %v4753_v45, %v16350_v51  ;;  %v5139_v17 = vrot.slane %v16352_v58, 6  ;;  %v5143_v51 = vrot.slane %v11261_v30, 6  ;;  %v5140_v45 = vrot.slane %v11284_v61, 6 }
 0x5ee   :  { %16349 = vst [vmem:[#allocation240_spill] sm:$0xff] %v13434_v34  ;;  %4689 = vmatmul.f32.gmra.mxu2 %v4476_v57 }
 0x5ef   :  { %16351 = vst [vmem:[#allocation185_spill] sm:$0xff] %v13437_v46  ;;  %8394 = vmatmul.msk.f32.gmra.mxu3 %vm3260_vm7, %v4477_v48  ;;  %8427 = vmatmul.msk.f32.gmra.mxu1 %vm3260_vm7, %v4477_v48  ;;  %v16355_v48 = vld [vmem:[#allocation188_spill] sm:$0xff]  ;;  %v5144_v37 = vsel %vm3325_vm5, %v5142_v21, %v5143_v51  ;;  %v5141_v19 = vsel %vm3325_vm5, %v5139_v17, %v5140_v45  ;;  %v16358_v17 = vld [vmem:[#allocation26_spill] sm:$0xff] }
 0x5f0   :  { %4915 = vmatmul.f32.gmra.mxu0 %v4476_v57  ;;  %v8565_v57 = vld [vmem:[%s15535_s3 + $0x628] sm:$0xff]  ;;  %v16356_v21 = vld [vmem:[#allocation60_spill] sm:$0xff] }
 0x5f1   :  { %v4642_v14 = vpop.f32.mrf.mxu2  ;;  %6164 = vmatpush.msrb.mxu0 %v8565_v57 }
 0x5f2   :  { %v4755_v26 = vpop.f32.mrf.mxu3 }
 0x5f3   :  { %v4756_v34 = vadd.f32 %v4755_v26, %v4642_v14  ;;  %v5145_v14 = vrot.slane %v16356_v21, 6  ;;  %v16362_v21 = vld [vmem:[#allocation25_spill] sm:$0xff] }
 0x5f4   :  { %v13445_v8 = vpop.f32.mrf.mxu1 }
 0x5f5   :  { %16353 = vst [vmem:[#allocation23_spill] sm:$0xff] %v13445_v8  ;;  %v13448_v43 = vpop.f32.mrf.mxu0  ;;  %v13452_v46 = vadd.f32 %v4756_v34, %v16355_v48  ;;  %v16360_v8 = vld [vmem:[#allocation191_spill] sm:$0xff]  ;;  %v5146_v6 = vsel %vm3325_vm5, %v5140_v45, %v5145_v14 }
 0x5f6   :  { %16354 = vst [vmem:[#allocation241_spill] sm:$0xff] %v13448_v43  ;;  %5386 = vmatmul.f32.vlgmr.msra.gmra.mxu2 %v5141_v19 }
 0x5f7   :  { %8471 = vmatmul.msk.f32.vlgmr.msra.gmra.mxu3 %vm3260_vm7, %v5144_v37  ;;  %8504 = vmatmul.msk.f32.vlgmr.msra.gmra.mxu1 %vm3260_vm7, %v5144_v37  ;;  %v5147_v37 = vrot.slane %v16358_v17, 6  ;;  %v5149_v17 = vrot.slane %v16362_v21, 6  ;;  %v16371_v21 = vld [vmem:[#allocation195_spill] sm:$0xff] }
 0x5f8   :  { %5612 = vmatmul.f32.vlgmr.msra.gmra.mxu0 %v5141_v19 }
 0x5f9   :  { %v4645_v26 = vpop.f32.mrf.mxu2  ;;  %v5148_v61 = vsel %vm3325_vm5, %v5143_v51, %v5147_v37  ;;  %v16365_v51 = vld [vmem:[#allocation193_spill] sm:$0xff]  ;;  %v5150_v45 = vsel %vm3325_vm5, %v5145_v14, %v5149_v17  ;;  %v16369_v14 = vld [vmem:[#allocation28_spill] sm:$0xff] }
 0x5fa   :  { %v4758_v34 = vpop.f32.mrf.mxu3 }
 0x5fb   :  { %v4759_v58 = vadd.f32 %v4758_v34, %v4645_v26  ;;  %v16361_v34 = vld [vmem:[#allocation63_spill] sm:$0xff] }
 0x5fc   :  { %v13465_v48 = vpop.f32.mrf.mxu1  ;;  %v5151_v26 = vrot.slane %v16361_v34, 6 }
 0x5fd   :  { %16357 = vst [vmem:[#allocation188_spill] sm:$0xff] %v13465_v48  ;;  %v13468_v19 = vpop.f32.mrf.mxu0  ;;  %v13471_v43 = vadd.f32 %v4759_v58, %v16360_v8 }
 0x5fe   :  { %16359 = vst [vmem:[#allocation242_spill] sm:$0xff] %v13468_v19  ;;  %5389 = vmatmul.f32.gmra.mxu2 %v5146_v6 }
 0x5ff   :  { %8472 = vmatmul.msk.f32.gmra.mxu3 %vm3260_vm7, %v5148_v61  ;;  %8505 = vmatmul.msk.f32.gmra.mxu1 %vm3260_vm7, %v5148_v61  ;;  %v5152_v61 = vsel %vm3325_vm5, %v5147_v37, %v5151_v26 }
 0x600   :  { %5615 = vmatmul.f32.gmra.mxu0 %v5146_v6  ;;  %v8563_v6 = vld [vmem:[%s15535_s3 + $0x618] sm:$0xff] }
 0x601   :  { %v4648_v48 = vpop.f32.mrf.mxu2  ;;  %6165 = vmatpush.msrb.mxu0 %v8563_v6 }
 0x602   :  { %v4761_v57 = vpop.f32.mrf.mxu3 }
 0x603   :  { %v4762_v19 = vadd.f32 %v4761_v57, %v4648_v48  ;;  %v8560_v48 = vld [vmem:[%s15535_s3 + $0x600] sm:$0xff]  ;;  %v16367_v57 = vld [vmem:[#allocation64_spill] sm:$0xff] }
 0x604   :  { %v13479_v30 = vpop.f32.mrf.mxu1  ;;  %5940 = vmatpush.msrb.mxu2 %v8560_v48  ;;  %v8574_v48 = vld [vmem:[%s15535_s3 + $0x670] sm:$0xff] }
 0x605   :  { %16363 = vst [vmem:[#allocation191_spill] sm:$0xff] %v13479_v30  ;;  %v13481_v8 = vpop.f32.mrf.mxu0  ;;  %v13484_v58 = vadd.f32 %v4762_v19, %v16365_v51  ;;  %v5153_v51 = vrot.slane %v16367_v57, 6  ;;  %6062 = vmatpush.msrb.mxu3 %v8574_v48  ;;  %v8558_v48 = vld [vmem:[%s15535_s3 + $0x5f0] sm:$0xff] }
 0x606   :  { %16364 = vst [vmem:[#allocation243_spill] sm:$0xff] %v13481_v8  ;;  %5392 = vmatmul.f32.gmra.mxu2 %v5150_v45  ;;  %v5155_v8 = vrot.slane %v16369_v14, 6  ;;  %v16376_v14 = vld [vmem:[#allocation196_spill] sm:$0xff] }
 0x607   :  { %16366 = vst [vmem:[#allocation193_spill] sm:$0xff] %v13484_v58  ;;  %8473 = vmatmul.msk.f32.gmra.mxu3 %vm3260_vm7, %v5152_v61  ;;  %8506 = vmatmul.msk.f32.gmra.mxu1 %vm3260_vm7, %v5152_v61  ;;  %v5154_v6 = vsel %vm3325_vm5, %v5149_v17, %v5153_v51 }
 0x608   :  { %5618 = vmatmul.f32.gmra.mxu0 %v5150_v45  ;;  %v5156_v58 = vsel %vm3325_vm5, %v5151_v26, %v5155_v8  ;;  %5941 = vmatpush.msrb.mxu2 %v8558_v48 }
 0x609   :  { %v4651_v37 = vpop.f32.mrf.mxu2 }
 0x60a   :  { %v4764_v19 = vpop.f32.mrf.mxu3 }
 0x60b   :  { %v4765_v30 = vadd.f32 %v4764_v19, %v4651_v37  ;;  %v5159_v37 = vrot.slane %v16241_v25, 6 }
 0x60c   :  { %v13497_v61 = vpop.f32.mrf.mxu1 }
 0x60d   :  { %16368 = vst [vmem:[#allocation244_spill] sm:$0xff] %v13497_v61  ;;  %v13500_v45 = vpop.f32.mrf.mxu0  ;;  %v13503_v34 = vadd.f32 %v4765_v30, %v16371_v21  ;;  %v16373_v21 = vld [vmem:[#allocation27_spill] sm:$0xff] }
 0x60e   :  { %16370 = vst [vmem:[#allocation245_spill] sm:$0xff] %v13500_v45  ;;  %5395 = vmatmul.f32.gmra.mxu2 %v5154_v6  ;;  %v5157_v61 = vrot.slane %v16373_v21, 6 }
 0x60f   :  { %16372 = vst [vmem:[#allocation195_spill] sm:$0xff] %v13503_v34  ;;  %8474 = vmatmul.msk.f32.gmra.mxu3 %vm3260_vm7, %v5156_v58  ;;  %8507 = vmatmul.msk.f32.gmra.mxu1 %vm3260_vm7, %v5156_v58  ;;  %v5160_v58 = vsel %vm3325_vm5, %v5155_v8, %v5159_v37  ;;  %v5163_v8 = vrot.slane %v16247_v0, 6 }
 0x610   :  { %5621 = vmatmul.f32.gmra.mxu0 %v5154_v6  ;;  %v5158_v17 = vsel %vm3325_vm5, %v5153_v51, %v5157_v61  ;;  %v8561_v6 = vld [vmem:[%s15535_s3 + $0x608] sm:$0xff] }
 0x611   :  { %v4654_v30 = vpop.f32.mrf.mxu2  ;;  %6166 = vmatpush.msrb.mxu0 %v8561_v6  ;;  %v5164_v21 = vsel %vm3325_vm5, %v5159_v37, %v5163_v8  ;;  %v8575_v6 = vld [vmem:[%s15535_s3 + $0x678] sm:$0xff] }
 0x612   :  { %v4767_v19 = vpop.f32.mrf.mxu3  ;;  %6288 = vmatpush.msrb.mxu1 %v8575_v6  ;;  %v16384_v37 = vld [vmem:[#allocation29_spill] sm:$0xff] }
 0x613   :  { %v4768_v26 = vadd.f32 %v4767_v19, %v4654_v30  ;;  %v16377_v30 = vld [vmem:[#allocation30_spill] sm:$0xff] }
 0x614   :  { %v13514_v45 = vpop.f32.mrf.mxu1 }
 0x615   :  { %16374 = vst [vmem:[#allocation246_spill] sm:$0xff] %v13514_v45  ;;  %v13516_v57 = vpop.f32.mrf.mxu0  ;;  %v13519_v34 = vadd.f32 %v4768_v26, %v16376_v14  ;;  %v5161_v26 = vrot.slane %v16377_v30, 6  ;;  %v16380_v45 = vld [vmem:[#allocation198_spill] sm:$0xff]  ;;  %v5167_v30 = vrot.slane %v16384_v37, 6 }
 0x616   :  { %16375 = vst [vmem:[#allocation247_spill] sm:$0xff] %v13516_v57  ;;  %5398 = vmatmul.f32.gmra.mxu2 %v5158_v17 }
 0x617   :  { %8475 = vmatmul.msk.f32.gmra.mxu3 %vm3260_vm7, %v5160_v58  ;;  %8508 = vmatmul.msk.f32.gmra.mxu1 %vm3260_vm7, %v5160_v58  ;;  %v5162_v48 = vsel %vm3325_vm5, %v5157_v61, %v5161_v26 }
 0x618   :  { %5624 = vmatmul.f32.gmra.mxu0 %v5158_v17 }
 0x619   :  { %v4657_v19 = vpop.f32.mrf.mxu2 }
 0x61a   :  { %v4770_v14 = vpop.f32.mrf.mxu3 }
 0x61b   :  { %v4771_v58 = vadd.f32 %v4770_v14, %v4657_v19 }
 0x61c   :  { %v13533_v51 = vpop.f32.mrf.mxu1 }
 0x61d   :  { %16378 = vst [vmem:[#allocation196_spill] sm:$0xff] %v13533_v51  ;;  %v13535_v17 = vpop.f32.mrf.mxu0  ;;  %v13538_v57 = vadd.f32 %v4771_v58, %v16380_v45  ;;  %v16382_v51 = vld [vmem:[#allocation71_spill] sm:$0xff] }
 0x61e   :  { %16379 = vst [vmem:[#allocation248_spill] sm:$0xff] %v13535_v17  ;;  %5401 = vmatmul.f32.gmra.mxu2 %v5162_v48  ;;  %v5165_v45 = vrot.slane %v16382_v51, 6 }
 0x61f   :  { %16381 = vst [vmem:[#allocation198_spill] sm:$0xff] %v13538_v57  ;;  %8476 = vmatmul.msk.f32.gmra.mxu3 %vm3260_vm7, %v5164_v21  ;;  %8509 = vmatmul.msk.f32.gmra.mxu1 %vm3260_vm7, %v5164_v21  ;;  %v16386_v21 = vld [vmem:[#allocation200_spill] sm:$0xff] }
 0x620   :  { %5627 = vmatmul.f32.gmra.mxu0 %v5162_v48  ;;  %v5168_v48 = vsel %vm3325_vm5, %v5163_v8, %v5167_v30  ;;  %v5166_v6 = vsel %vm3325_vm5, %v5161_v26, %v5165_v45  ;;  %v16388_v8 = vld [vmem:[#allocation72_spill] sm:$0xff] }
 0x621   :  { %v4660_v19 = vpop.f32.mrf.mxu2 }
 0x622   :  { %v4773_v14 = vpop.f32.mrf.mxu3 }
 0x623   :  { %v4774_v58 = vadd.f32 %v4773_v14, %v4660_v19  ;;  %v8556_v14 = vld [vmem:[%s15535_s3 + $0x5e0] sm:$0xff]  ;;  %v8559_v19 = vld [vmem:[%s15535_s3 + $0x5f8] sm:$0xff] }
 0x624   :  { %v13548_v17 = vpop.f32.mrf.mxu1  ;;  %5942 = vmatpush.msrb.mxu2 %v8556_v14  ;;  %6167 = vmatpush.msrb.mxu0 %v8559_v19 }
 0x625   :  { %16383 = vst [vmem:[#allocation249_spill] sm:$0xff] %v13548_v17  ;;  %v13551_v0 = vpop.f32.mrf.mxu0  ;;  %v13554_v61 = vadd.f32 %v4774_v58, %v16386_v21  ;;  %v5171_v21 = vrot.slane %v16388_v8, 6 }
 0x626   :  { %16385 = vst [vmem:[#allocation250_spill] sm:$0xff] %v13551_v0  ;;  %5404 = vmatmul.f32.gmra.mxu2 %v5166_v6  ;;  %v16389_v0 = vld [vmem:[#allocation32_spill] sm:$0xff] }
 0x627   :  { %16387 = vst [vmem:[#allocation200_spill] sm:$0xff] %v13554_v61  ;;  %8477 = vmatmul.msk.f32.gmra.mxu3 %vm3260_vm7, %v5168_v48  ;;  %8510 = vmatmul.msk.f32.gmra.mxu1 %vm3260_vm7, %v5168_v48  ;;  %v5169_v48 = vrot.slane %v16389_v0, 6  ;;  %v5172_v61 = vsel %vm3325_vm5, %v5167_v30, %v5171_v21  ;;  %v16392_v0 = vld [vmem:[#allocation75_spill] sm:$0xff] }
 0x628   :  { %5630 = vmatmul.f32.gmra.mxu0 %v5166_v6  ;;  %v16396_v30 = vld [vmem:[#allocation203_spill] sm:$0xff] }
 0x629   :  { %v4663_v17 = vpop.f32.mrf.mxu2  ;;  %v5170_v14 = vsel %vm3325_vm5, %v5165_v45, %v5169_v48 }
 0x62a   :  { %v4776_v58 = vpop.f32.mrf.mxu3 }
 0x62b   :  { %v4777_v51 = vadd.f32 %v4776_v58, %v4663_v17  ;;  %v5175_v17 = vrot.slane %v16392_v0, 6 }
 0x62c   :  { %v13568_v26 = vpop.f32.mrf.mxu1 }
 0x62d   :  { %16390 = vst [vmem:[#allocation251_spill] sm:$0xff] %v13568_v26  ;;  %v13570_v6 = vpop.f32.mrf.mxu0  ;;  %v13573_v37 = vadd.f32 %v4777_v51, %v13028_v53  ;;  %v16393_v26 = vld [vmem:[#allocation31_spill] sm:$0xff] }
 0x62e   :  { %16391 = vst [vmem:[#allocation252_spill] sm:$0xff] %v13570_v6  ;;  %5407 = vmatmul.f32.gmra.mxu2 %v5170_v14  ;;  %v5173_v8 = vrot.slane %v16393_v26, 6 }
 0x62f   :  { %8478 = vmatmul.msk.f32.gmra.mxu3 %vm3260_vm7, %v5172_v61  ;;  %8511 = vmatmul.msk.f32.gmra.mxu1 %vm3260_vm7, %v5172_v61  ;;  %v5176_v61 = vsel %vm3325_vm5, %v5171_v21, %v5175_v17 }
 0x630   :  { %5633 = vmatmul.f32.gmra.mxu0 %v5170_v14  ;;  %v5174_v45 = vsel %vm3325_vm5, %v5169_v48, %v5173_v8  ;;  %v8554_v14 = vld [vmem:[%s15535_s3 + $0x5d0] sm:$0xff]  ;;  %v16398_v48 = vld [vmem:[#allocation34_spill] sm:$0xff] }
 0x631   :  { %v4666_v58 = vpop.f32.mrf.mxu2  ;;  %5943 = vmatpush.msrb.mxu2 %v8554_v14 }
 0x632   :  { %v4779_v19 = vpop.f32.mrf.mxu3 }
 0x633   :  { %v4780_v6 = vadd.f32 %v4779_v19, %v4666_v58  ;;  %v8557_v19 = vld [vmem:[%s15535_s3 + $0x5e8] sm:$0xff]  ;;  %v5177_v58 = vrot.slane %v16268_v1, 6 }
 0x634   :  { %v13581_v57 = vpop.f32.mrf.mxu1  ;;  %6168 = vmatpush.msrb.mxu0 %v8557_v19  ;;  %v8572_v19 = vld [vmem:[%s15535_s3 + $0x660] sm:$0xff] }
 0x635   :  { %16394 = vst [vmem:[#allocation253_spill] sm:$0xff] %v13581_v57  ;;  %v13583_v53 = vpop.f32.mrf.mxu0  ;;  %v13586_v51 = vadd.f32 %v4780_v6, %v16396_v30  ;;  %v5179_v57 = vrot.slane %v16398_v48, 6  ;;  %v5178_v14 = vsel %vm3325_vm5, %v5173_v8, %v5177_v58  ;;  %6063 = vmatpush.msrb.mxu3 %v8572_v19 }
 0x636   :  { %16395 = vst [vmem:[#allocation254_spill] sm:$0xff] %v13583_v53  ;;  %5410 = vmatmul.f32.gmra.mxu2 %v5174_v45  ;;  %v16400_v53 = vld [vmem:[#allocation205_spill] sm:$0xff] }
 0x637   :  { %8479 = vmatmul.msk.f32.gmra.mxu3 %vm3260_vm7, %v5176_v61  ;;  %8512 = vmatmul.msk.f32.gmra.mxu1 %vm3260_vm7, %v5176_v61  ;;  %v5180_v0 = vsel %vm3325_vm5, %v5175_v17, %v5179_v57 }
 0x638   :  { %5636 = vmatmul.f32.gmra.mxu0 %v5174_v45 }
 0x639   :  { %v4669_v21 = vpop.f32.mrf.mxu2 }
 0x63a   :  { %v4782_v6 = vpop.f32.mrf.mxu3 }
 0x63b   :  { %v4783_v30 = vadd.f32 %v4782_v6, %v4669_v21  ;;  %v16401_v21 = vld [vmem:[#allocation79_spill] sm:$0xff] }
 0x63c   :  { %v13599_v61 = vpop.f32.mrf.mxu1 }
 0x63d   :  { %16397 = vst [vmem:[#allocation203_spill] sm:$0xff] %v13599_v61  ;;  %v13602_v45 = vpop.f32.mrf.mxu0  ;;  %v13605_v26 = vadd.f32 %v4783_v30, %v16400_v53  ;;  %v5183_v61 = vrot.slane %v16401_v21, 6  ;;  %v16402_v30 = vld [vmem:[#allocation33_spill] sm:$0xff] }
 0x63e   :  { %16399 = vst [vmem:[#allocation255_spill] sm:$0xff] %v13602_v45  ;;  %5413 = vmatmul.f32.gmra.mxu2 %v5178_v14  ;;  %v5181_v45 = vrot.slane %v16402_v30, 6 }
 0x63f   :  { %8480 = vmatmul.msk.f32.gmra.mxu3 %vm3260_vm7, %v5180_v0  ;;  %8513 = vmatmul.msk.f32.gmra.mxu1 %vm3260_vm7, %v5180_v0  ;;  %v16405_v0 = vld [vmem:[#allocation207_spill] sm:$0xff] }
 0x640   :  { %5639 = vmatmul.f32.gmra.mxu0 %v5178_v14  ;;  %v5184_v14 = vsel %vm3325_vm5, %v5179_v57, %v5183_v61  ;;  %v5182_v19 = vsel %vm3325_vm5, %v5177_v58, %v5181_v45  ;;  %v5187_v57 = vrot.slane %v16279_v41, 6 }
 0x641   :  { %v4672_v53 = vpop.f32.mrf.mxu2 }
 0x642   :  { %v4785_v6 = vpop.f32.mrf.mxu3  ;;  %v5188_v30 = vsel %vm3325_vm5, %v5183_v61, %v5187_v57  ;;  %v5191_v61 = vrot.slane %v11901_v60, 6 }
 0x643   :  { %v4786_v17 = vadd.f32 %v4785_v6, %v4672_v53  ;;  %v8552_v6 = vld [vmem:[%s15535_s3 + $0x5c0] sm:$0xff]  ;;  %v8555_v53 = vld [vmem:[%s15535_s3 + $0x5d8] sm:$0xff] }
 0x644   :  { %v13616_v1 = vpop.f32.mrf.mxu1  ;;  %5944 = vmatpush.msrb.mxu2 %v8552_v6  ;;  %6169 = vmatpush.msrb.mxu0 %v8555_v53  ;;  %v8573_v53 = vld [vmem:[%s15535_s3 + $0x668] sm:$0xff] }
 0x645   :  { %16403 = vst [vmem:[#allocation205_spill] sm:$0xff] %v13616_v1  ;;  %v13618_v48 = vpop.f32.mrf.mxu0  ;;  %v13621_v8 = vadd.f32 %v4786_v17, %v16405_v0  ;;  %6289 = vmatpush.msrb.mxu1 %v8573_v53 }
 0x646   :  { %16404 = vst [vmem:[#allocation79_spill] sm:$0xff] %v13618_v48  ;;  %5416 = vmatmul.f32.gmra.mxu2 %v5182_v19 }
 0x647   :  { %8481 = vmatmul.msk.f32.gmra.mxu3 %vm3260_vm7, %v5184_v14  ;;  %8514 = vmatmul.msk.f32.gmra.mxu1 %vm3260_vm7, %v5184_v14  ;;  %v5185_v14 = vrot.slane %v16280_v24, 6 }
 0x648   :  { %5642 = vmatmul.f32.gmra.mxu0 %v5182_v19 }
 0x649   :  { %v4675_v0 = vpop.f32.mrf.mxu2  ;;  %v5186_v6 = vsel %vm3325_vm5, %v5181_v45, %v5185_v14 }
 0x64a   :  { %v4788_v17 = vpop.f32.mrf.mxu3 }
 0x64b   :  { %v4789_v1 = vadd.f32 %v4788_v17, %v4675_v0 }
 0x64c   :  { %v13635_v58 = vpop.f32.mrf.mxu1 }
 0x64d   :  { %16406 = vst [vmem:[#allocation207_spill] sm:$0xff] %v13635_v58  ;;  %v13637_v19 = vpop.f32.mrf.mxu0  ;;  %v13640_v48 = vadd.f32 %v4789_v1, %v13095_v47  ;;  %v5189_v47 = vrot.slane %v11894_v9, 6 }
 0x64e   :  { %16407 = vst [vmem:[#allocation256_spill] sm:$0xff] %v13637_v19  ;;  %5419 = vmatmul.f32.gmra.mxu2 %v5186_v6 }
 0x64f   :  { %8482 = vmatmul.msk.f32.gmra.mxu3 %vm3260_vm7, %v5188_v30  ;;  %8515 = vmatmul.msk.f32.gmra.mxu1 %vm3260_vm7, %v5188_v30  ;;  %v16410_v30 = vld [vmem:[#allocation208_spill] sm:$0xff]  ;;  %v5190_v53 = vsel %vm3325_vm5, %v5185_v14, %v5189_v47 }
 0x650   :  { %5645 = vmatmul.f32.gmra.mxu0 %v5186_v6  ;;  %v5192_v6 = vsel %vm3325_vm5, %v5187_v57, %v5191_v61  ;;  %v5195_v57 = vrot.slane %v11924_v50, 6 }
 0x651   :  { %v4678_v0 = vpop.f32.mrf.mxu2 }
 0x652   :  { %v4791_v17 = vpop.f32.mrf.mxu3  ;;  %v5196_v60 = vsel %vm3325_vm5, %v5191_v61, %v5195_v57 }
 0x653   :  { %v4792_v1 = vadd.f32 %v4791_v17, %v4678_v0  ;;  %v8550_v17 = vld [vmem:[%s15535_s3 + $0x5b0] sm:$0xff]  ;;  %v8553_v0 = vld [vmem:[%s15535_s3 + $0x5c8] sm:$0xff] }
 0x654   :  { %v13650_v58 = vpop.f32.mrf.mxu1  ;;  %5945 = vmatpush.msrb.mxu2 %v8550_v17  ;;  %6170 = vmatpush.msrb.mxu0 %v8553_v0 }
 0x655   :  { %16408 = vst [vmem:[#allocation257_spill] sm:$0xff] %v13650_v58  ;;  %v13653_v19 = vpop.f32.mrf.mxu0  ;;  %v13656_v45 = vadd.f32 %v4792_v1, %v16410_v30  ;;  %v16411_v58 = vld [vmem:[#allocation38_spill] sm:$0xff] }
 0x656   :  { %16409 = vst [vmem:[#allocation258_spill] sm:$0xff] %v13653_v19  ;;  %5422 = vmatmul.f32.gmra.mxu2 %v5190_v53 }
 0x657   :  { %8483 = vmatmul.msk.f32.gmra.mxu3 %vm3260_vm7, %v5192_v6  ;;  %8516 = vmatmul.msk.f32.gmra.mxu1 %vm3260_vm7, %v5192_v6  ;;  %v5193_v6 = vrot.slane %v16411_v58, 6 }
 0x658   :  { %5648 = vmatmul.f32.gmra.mxu0 %v5190_v53 }
 0x659   :  { %v4681_v30 = vpop.f32.mrf.mxu2  ;;  %v5194_v17 = vsel %vm3325_vm5, %v5189_v47, %v5193_v6 }
 0x65a   :  { %v4794_v1 = vpop.f32.mrf.mxu3 }
 0x65b   :  { %v4795_v19 = vadd.f32 %v4794_v1, %v4681_v30  ;;  %v5199_v1 = vrot.slane %v11957_v31, 6 }
 0x65c   :  { %v13670_v14 = vpop.f32.mrf.mxu1 }
 0x65d   :  { %16412 = vst [vmem:[#allocation208_spill] sm:$0xff] %v13670_v14  ;;  %v13672_v53 = vpop.f32.mrf.mxu0  ;;  %v13675_v9 = vadd.f32 %v4795_v19, %v13130_v35  ;;  %v16414_v14 = vld [vmem:[#allocation87_spill] sm:$0xff]  ;;  %v16417_v19 = vld [vmem:[#allocation212_spill] sm:$0xff] }
 0x65e   :  { %16413 = vst [vmem:[#allocation259_spill] sm:$0xff] %v13672_v53  ;;  %5425 = vmatmul.f32.gmra.mxu2 %v5194_v17  ;;  %v5197_v58 = vrot.slane %v16414_v14, 6 }
 0x65f   :  { %8484 = vmatmul.msk.f32.gmra.mxu3 %vm3260_vm7, %v5196_v60  ;;  %8517 = vmatmul.msk.f32.gmra.mxu1 %vm3260_vm7, %v5196_v60  ;;  %v5200_v60 = vsel %vm3325_vm5, %v5195_v57, %v5199_v1 }
 0x660   :  { %5651 = vmatmul.f32.gmra.mxu0 %v5194_v17  ;;  %v5198_v47 = vsel %vm3325_vm5, %v5193_v6, %v5197_v58  ;;  %v8548_v17 = vld [vmem:[%s15535_s3 + $0x5a0] sm:$0xff]  ;;  %v5203_v6 = vrot.slane %v16296_v4, 6 }
 0x661   :  { %v4684_v30 = vpop.f32.mrf.mxu2  ;;  %5946 = vmatpush.msrb.mxu2 %v8548_v17 }
 0x662   :  { %v4797_v0 = vpop.f32.mrf.mxu3 }
 0x663   :  { %v4798_v53 = vadd.f32 %v4797_v0, %v4684_v30  ;;  %v8551_v0 = vld [vmem:[%s15535_s3 + $0x5b8] sm:$0xff]  ;;  %v5201_v30 = vrot.slane %v11985_v23, 6 }
 0x664   :  { %v13683_v50 = vpop.f32.mrf.mxu1  ;;  %6171 = vmatpush.msrb.mxu0 %v8551_v0 }
 0x665   :  { %16415 = vst [vmem:[#allocation87_spill] sm:$0xff] %v13683_v50  ;;  %v13685_v35 = vpop.f32.mrf.mxu0  ;;  %v13688_v61 = vadd.f32 %v4798_v53, %v16417_v19  ;;  %v5202_v17 = vsel %vm3325_vm5, %v5197_v58, %v5201_v30 }
 0x666   :  { %16416 = vst [vmem:[#allocation260_spill] sm:$0xff] %v13685_v35  ;;  %5428 = vmatmul.f32.gmra.mxu2 %v5198_v47  ;;  %v5204_v35 = vsel %vm3325_vm5, %v5199_v1, %v5203_v6 }
 0x667   :  { %8485 = vmatmul.msk.f32.gmra.mxu3 %vm3260_vm7, %v5200_v60  ;;  %8518 = vmatmul.msk.f32.gmra.mxu1 %vm3260_vm7, %v5200_v60 }
 0x668   :  { %5654 = vmatmul.f32.gmra.mxu0 %v5198_v47 }
 0x669   :  { %v4687_v57 = vpop.f32.mrf.mxu2 }
 0x66a   :  { %v4800_v53 = vpop.f32.mrf.mxu3 }
 0x66b   :  { %v4801_v19 = vadd.f32 %v4800_v53, %v4687_v57  ;;  %v16420_v53 = vld [vmem:[#allocation40_spill] sm:$0xff] }
 0x66c   :  { %v13701_v60 = vpop.f32.mrf.mxu1  ;;  %v5207_v57 = vrot.slane %v16420_v53, 6 }
 0x66d   :  { %16418 = vst [vmem:[#allocation212_spill] sm:$0xff] %v13701_v60  ;;  %v13704_v47 = vpop.f32.mrf.mxu0  ;;  %v13707_v50 = vadd.f32 %v4801_v19, %v13162_v52  ;;  %v8570_v60 = vld [vmem:[%s15535_s3 + $0x650] sm:$0xff]  ;;  %v5205_v52 = vrot.slane %v12007_v28, 6 }
 0x66e   :  { %16419 = vst [vmem:[#allocation261_spill] sm:$0xff] %v13704_v47  ;;  %5431 = vmatmul.f32.gmra.mxu2 %v5202_v17  ;;  %6064 = vmatpush.msrb.mxu3 %v8570_v60  ;;  %v8546_v60 = vld [vmem:[%s15535_s3 + $0x590] sm:$0xff] }
 0x66f   :  { %8486 = vmatmul.msk.f32.gmra.mxu3 %vm3260_vm7, %v5204_v35  ;;  %8519 = vmatmul.msk.f32.gmra.mxu1 %vm3260_vm7, %v5204_v35  ;;  %v5208_v35 = vsel %vm3325_vm5, %v5203_v6, %v5207_v57  ;;  %v5211_v6 = vrot.slane %v12023_v32, 6 }
 0x670   :  { %5657 = vmatmul.f32.gmra.mxu0 %v5202_v17  ;;  %v5206_v17 = vsel %vm3325_vm5, %v5201_v30, %v5205_v52  ;;  %5947 = vmatpush.msrb.mxu2 %v8546_v60 }
 0x671   :  { %v4690_v47 = vpop.f32.mrf.mxu2 }
 0x672   :  { %v4803_v0 = vpop.f32.mrf.mxu3 }
 0x673   :  { %v4804_v1 = vadd.f32 %v4803_v0, %v4690_v47  ;;  %v8549_v47 = vld [vmem:[%s15535_s3 + $0x5a8] sm:$0xff] }
 0x674   :  { %v13718_v19 = vpop.f32.mrf.mxu1  ;;  %6172 = vmatpush.msrb.mxu0 %v8549_v47 }
 0x675   :  { %v13720_v23 = vpop.f32.mrf.mxu0  ;;  %v13723_v58 = vadd.f32 %v4804_v1, %v13178_v16  ;;  %v16422_v1 = vld [vmem:[#allocation41_spill] sm:$0xff] }
 0x676   :  { %5434 = vmatmul.f32.gmra.mxu2 %v5206_v17 }
 0x677   :  { %16421 = vst [vmem:[#allocation262_spill] sm:$0xff] %v13723_v58  ;;  %8487 = vmatmul.msk.f32.gmra.mxu3 %vm3260_vm7, %v5208_v35  ;;  %8520 = vmatmul.msk.f32.gmra.mxu1 %vm3260_vm7, %v5208_v35  ;;  %v5209_v35 = vrot.slane %v16422_v1, 6  ;;  %v5212_v58 = vsel %vm3325_vm5, %v5207_v57, %v5211_v6  ;;  %v16424_v57 = vld [vmem:[#allocation149_spill] sm:$0xff] }
 0x678   :  { %5660 = vmatmul.f32.gmra.mxu0 %v5206_v17 }
 0x679   :  { %v5387_v0 = vpop.f32.mrf.mxu2  ;;  %v5210_v60 = vsel %vm3325_vm5, %v5205_v52, %v5209_v35  ;;  %v8571_v52 = vld [vmem:[%s15535_s3 + $0x658] sm:$0xff] }
 0x67a   :  { %v5500_v16 = vpop.f32.mrf.mxu3  ;;  %6290 = vmatpush.msrb.mxu1 %v8571_v52 }
 0x67b   :  { %v5501_v28 = vadd.f32 %v5500_v16, %v5387_v0  ;;  %v5213_v16 = vrot.slane %v12049_v27, 6 }
 0x67c   :  { %v13737_v30 = vpop.f32.mrf.mxu1 }
 0x67d   :  { %v13739_v17 = vpop.f32.mrf.mxu0  ;;  %v13742_v53 = vadd.f32 %v5501_v28, %v13197_v59  ;;  %v5215_v28 = vrot.slane %v12055_v12, 6 }
 0x67e   :  { %5437 = vmatmul.f32.gmra.mxu2 %v5210_v60 }
 0x67f   :  { %16423 = vst [vmem:[#allocation263_spill] sm:$0xff] %v13742_v53  ;;  %8488 = vmatmul.msk.f32.gmra.mxu3 %vm3260_vm7, %v5212_v58  ;;  %8521 = vmatmul.msk.f32.gmra.mxu1 %vm3260_vm7, %v5212_v58  ;;  %v5216_v58 = vsel %vm3325_vm5, %v5211_v6, %v5215_v28  ;;  %v8547_v6 = vld [vmem:[%s15535_s3 + $0x598] sm:$0xff] }
 0x680   :  { %5663 = vmatmul.f32.gmra.mxu0 %v5210_v60  ;;  %v8544_v60 = vld [vmem:[%s15535_s3 + $0x580] sm:$0xff] }
 0x681   :  { %v5390_v1 = vpop.f32.mrf.mxu2  ;;  %5948 = vmatpush.msrb.mxu2 %v8544_v60  ;;  %6173 = vmatpush.msrb.mxu0 %v8547_v6  ;;  %v5223_v6 = vrot.slane %v16187_v7, 6 }
 0x682   :  { %v5503_v47 = vpop.f32.mrf.mxu3 }
 0x683   :  { %v5504_v0 = vadd.f32 %v5503_v47, %v5390_v1  ;;  %v5214_v1 = vsel %vm3325_vm5, %v5209_v35, %v5213_v16 }
 0x684   :  { %v13749_v32 = vpop.f32.mrf.mxu1 }
 0x685   :  { %v13752_v59 = vpop.f32.mrf.mxu0  ;;  %v13755_v53 = vadd.f32 %v5504_v0, %v16424_v57  ;;  %v5219_v0 = vrot.slane %v12070_v15, 6 }
 0x686   :  { %5440 = vmatmul.f32.gmra.mxu2 %v5214_v1 }
 0x687   :  { %16425 = vst [vmem:[#allocation149_spill] sm:$0xff] %v13755_v53  ;;  %8489 = vmatmul.msk.f32.gmra.mxu3 %vm3260_vm7, %v5216_v58  ;;  %8522 = vmatmul.msk.f32.gmra.mxu1 %vm3260_vm7, %v5216_v58  ;;  %v5217_v58 = vrot.slane %v12074_v55, 6  ;;  %v5220_v53 = vsel %vm3325_vm5, %v5215_v28, %v5219_v0  ;;  %v16426_v28 = vld [vmem:[#allocation154_spill] sm:$0xff] }
 0x688   :  { %5666 = vmatmul.f32.gmra.mxu0 %v5214_v1 }
 0x689   :  { %v5393_v57 = vpop.f32.mrf.mxu2  ;;  %v5218_v52 = vsel %vm3325_vm5, %v5213_v16, %v5217_v58 }
 0x68a   :  { %v5506_v47 = vpop.f32.mrf.mxu3 }
 0x68b   :  { %v5507_v35 = vadd.f32 %v5506_v47, %v5393_v57  ;;  %v5221_v57 = vrot.slane %v16188_v44, 6 }
 0x68c   :  { %v13772_v27 = vpop.f32.mrf.mxu1 }
 0x68d   :  { %v13774_v1 = vpop.f32.mrf.mxu0  ;;  %v13777_v12 = vadd.f32 %v5507_v35, %v13232_v10  ;;  %v5222_v16 = vsel %vm3325_vm5, %v5217_v58, %v5221_v57  ;;  %v16429_v58 = vld [vmem:[#allocation58_spill] sm:$0xff] }
 0x68e   :  { %5443 = vmatmul.f32.gmra.mxu2 %v5218_v52  ;;  %v5227_v44 = vrot.slane %v16429_v58, 6 }
 0x68f   :  { %8490 = vmatmul.msk.f32.gmra.mxu3 %vm3260_vm7, %v5220_v53  ;;  %8523 = vmatmul.msk.f32.gmra.mxu1 %vm3260_vm7, %v5220_v53  ;;  %v5224_v53 = vsel %vm3325_vm5, %v5219_v0, %v5223_v6 }
 0x690   :  { %5669 = vmatmul.f32.gmra.mxu0 %v5218_v52  ;;  %v8542_v52 = vld [vmem:[%s15535_s3 + $0x570] sm:$0xff] }
 0x691   :  { %v5396_v47 = vpop.f32.mrf.mxu2  ;;  %5949 = vmatpush.msrb.mxu2 %v8542_v52 }
 0x692   :  { %v5509_v60 = vpop.f32.mrf.mxu3 }
 0x693   :  { %v5510_v55 = vadd.f32 %v5509_v60, %v5396_v47  ;;  %v8545_v60 = vld [vmem:[%s15535_s3 + $0x588] sm:$0xff]  ;;  %v5225_v47 = vrot.slane %v12115_v20, 6  ;;  %v16431_v20 = vld [vmem:[#allocation4_spill] sm:$0xff] }
 0x694   :  { %v13785_v15 = vpop.f32.mrf.mxu1  ;;  %6174 = vmatpush.msrb.mxu0 %v8545_v60  ;;  %v5229_v58 = vrot.slane %v16431_v20, 6 }
 0x695   :  { %v13787_v10 = vpop.f32.mrf.mxu0  ;;  %v13790_v35 = vadd.f32 %v5510_v55, %v16426_v28  ;;  %v5226_v52 = vsel %vm3325_vm5, %v5221_v57, %v5225_v47 }
 0x696   :  { %5446 = vmatmul.f32.gmra.mxu2 %v5222_v16  ;;  %v5230_v57 = vsel %vm3325_vm5, %v5225_v47, %v5229_v58 }
 0x697   :  { %16427 = vst [vmem:[#allocation154_spill] sm:$0xff] %v13790_v35  ;;  %8491 = vmatmul.msk.f32.gmra.mxu3 %vm3260_vm7, %v5224_v53  ;;  %8524 = vmatmul.msk.f32.gmra.mxu1 %vm3260_vm7, %v5224_v53  ;;  %v5228_v35 = vsel %vm3325_vm5, %v5223_v6, %v5227_v44  ;;  %v16432_v6 = vld [vmem:[#allocation160_spill] sm:$0xff] }
 0x698   :  { %5672 = vmatmul.f32.gmra.mxu0 %v5222_v16 }
 0x699   :  { %v5399_v0 = vpop.f32.mrf.mxu2 }
 0x69a   :  { %v5512_v55 = vpop.f32.mrf.mxu3 }
 0x69b   :  { %v5513_v28 = vadd.f32 %v5512_v55, %v5399_v0  ;;  %v5231_v55 = vrot.slane %v12139_v11, 6 }
 0x69c   :  { %v13803_v53 = vpop.f32.mrf.mxu1 }
 0x69d   :  { %16428 = vst [vmem:[#allocation264_spill] sm:$0xff] %v13803_v53  ;;  %v13806_v16 = vpop.f32.mrf.mxu0  ;;  %v13809_v7 = vadd.f32 %v5513_v28, %v13264_v62 }
 0x69e   :  { %16430 = vst [vmem:[#allocation265_spill] sm:$0xff] %v13806_v16  ;;  %5449 = vmatmul.f32.gmra.mxu2 %v5226_v52 }
 0x69f   :  { %8492 = vmatmul.msk.f32.gmra.mxu3 %vm3260_vm7, %v5228_v35  ;;  %8525 = vmatmul.msk.f32.gmra.mxu1 %vm3260_vm7, %v5228_v35  ;;  %v5232_v35 = vsel %vm3325_vm5, %v5227_v44, %v5231_v55  ;;  %v8543_v44 = vld [vmem:[%s15535_s3 + $0x578] sm:$0xff] }
 0x6a0   :  { %5675 = vmatmul.f32.gmra.mxu0 %v5226_v52  ;;  %v8568_v52 = vld [vmem:[%s15535_s3 + $0x640] sm:$0xff] }
 0x6a1   :  { %v5402_v0 = vpop.f32.mrf.mxu2  ;;  %6065 = vmatpush.msrb.mxu3 %v8568_v52  ;;  %6175 = vmatpush.msrb.mxu0 %v8543_v44 }
 0x6a2   :  { %v5515_v60 = vpop.f32.mrf.mxu3 }
 0x6a3   :  { %v5516_v53 = vadd.f32 %v5515_v60, %v5402_v0  ;;  %v8540_v60 = vld [vmem:[%s15535_s3 + $0x560] sm:$0xff]  ;;  %v5235_v0 = vrot.slane %v16199_v2, 6 }
 0x6a4   :  { %v13817_v16 = vpop.f32.mrf.mxu1  ;;  %5950 = vmatpush.msrb.mxu2 %v8540_v60 }
 0x6a5   :  { %v13819_v62 = vpop.f32.mrf.mxu0  ;;  %v13822_v28 = vadd.f32 %v5516_v53, %v16432_v6  ;;  %v5233_v6 = vrot.slane %v12165_v38, 6 }
 0x6a6   :  { %5452 = vmatmul.f32.gmra.mxu2 %v5230_v57 }
 0x6a7   :  { %16433 = vst [vmem:[#allocation160_spill] sm:$0xff] %v13822_v28  ;;  %8493 = vmatmul.msk.f32.gmra.mxu3 %vm3260_vm7, %v5232_v35  ;;  %8526 = vmatmul.msk.f32.gmra.mxu1 %vm3260_vm7, %v5232_v35  ;;  %v5236_v28 = vsel %vm3325_vm5, %v5231_v55, %v5235_v0  ;;  %v5234_v52 = vsel %vm3325_vm5, %v5229_v58, %v5233_v6  ;;  %v16434_v55 = vld [vmem:[#allocation166_spill] sm:$0xff] }
 0x6a8   :  { %5678 = vmatmul.f32.gmra.mxu0 %v5230_v57 }
 0x6a9   :  { %v5405_v47 = vpop.f32.mrf.mxu2 }
 0x6aa   :  { %v5518_v53 = vpop.f32.mrf.mxu3 }
 0x6ab   :  { %v5519_v35 = vadd.f32 %v5518_v53, %v5405_v47  ;;  %v5237_v53 = vrot.slane %v16202_v54, 6 }
 0x6ac   :  { %v13839_v57 = vpop.f32.mrf.mxu1 }
 0x6ad   :  { %v13841_v20 = vpop.f32.mrf.mxu0  ;;  %v13844_v11 = vadd.f32 %v5519_v35, %v13299_v18  ;;  %v5239_v18 = vrot.slane %v12193_v13, 6  ;;  %v5238_v58 = vsel %vm3325_vm5, %v5233_v6, %v5237_v53 }
 0x6ae   :  { %5455 = vmatmul.f32.gmra.mxu2 %v5234_v52 }
 0x6af   :  { %8494 = vmatmul.msk.f32.gmra.mxu3 %vm3260_vm7, %v5236_v28  ;;  %8527 = vmatmul.msk.f32.gmra.mxu1 %vm3260_vm7, %v5236_v28  ;;  %v5240_v28 = vsel %vm3325_vm5, %v5235_v0, %v5239_v18  ;;  %v8541_v0 = vld [vmem:[%s15535_s3 + $0x568] sm:$0xff] }
 0x6b0   :  { %5681 = vmatmul.f32.gmra.mxu0 %v5234_v52  ;;  %v8569_v52 = vld [vmem:[%s15535_s3 + $0x648] sm:$0xff] }
 0x6b1   :  { %v5408_v44 = vpop.f32.mrf.mxu2  ;;  %6291 = vmatpush.msrb.mxu1 %v8569_v52  ;;  %6176 = vmatpush.msrb.mxu0 %v8541_v0  ;;  %v5247_v0 = vrot.slane %v12233_v40, 6 }
 0x6b2   :  { %v5521_v60 = vpop.f32.mrf.mxu3 }
 0x6b3   :  { %v5522_v47 = vadd.f32 %v5521_v60, %v5408_v44  ;;  %v8538_v60 = vld [vmem:[%s15535_s3 + $0x550] sm:$0xff] }
 0x6b4   :  { %v13851_v38 = vpop.f32.mrf.mxu1  ;;  %5951 = vmatpush.msrb.mxu2 %v8538_v60 }
 0x6b5   :  { %v13854_v35 = vpop.f32.mrf.mxu0  ;;  %v13857_v2 = vadd.f32 %v5522_v47, %v16434_v55  ;;  %v5243_v47 = vrot.slane %v16205_v49, 6  ;;  %v5241_v55 = vrot.slane %v12212_v22, 6 }
 0x6b6   :  { %5458 = vmatmul.f32.gmra.mxu2 %v5238_v58 }
 0x6b7   :  { %16435 = vst [vmem:[#allocation166_spill] sm:$0xff] %v13857_v2  ;;  %8495 = vmatmul.msk.f32.gmra.mxu3 %vm3260_vm7, %v5240_v28  ;;  %8528 = vmatmul.msk.f32.gmra.mxu1 %vm3260_vm7, %v5240_v28  ;;  %v5244_v2 = vsel %vm3325_vm5, %v5239_v18, %v5243_v47  ;;  %v5242_v52 = vsel %vm3325_vm5, %v5237_v53, %v5241_v55 }
 0x6b8   :  { %5684 = vmatmul.f32.gmra.mxu0 %v5238_v58 }
 0x6b9   :  { %v5411_v6 = vpop.f32.mrf.mxu2 }
 0x6ba   :  { %v5524_v44 = vpop.f32.mrf.mxu3 }
 0x6bb   :  { %v5525_v28 = vadd.f32 %v5524_v44, %v5411_v6  ;;  %v5245_v6 = vrot.slane %v12237_v42, 6 }
 0x6bc   :  { %v13874_v58 = vpop.f32.mrf.mxu1 }
 0x6bd   :  { %v13876_v54 = vpop.f32.mrf.mxu0  ;;  %v13879_v13 = vadd.f32 %v5525_v28, %v13334_v3  ;;  %v5246_v53 = vsel %vm3325_vm5, %v5241_v55, %v5245_v6  ;;  %v8536_v28 = vld [vmem:[%s15535_s3 + $0x540] sm:$0xff]  ;;  %v16437_v55 = vld [vmem:[#allocation104_spill] sm:$0xff] }
 0x6be   :  { %5461 = vmatmul.f32.gmra.mxu2 %v5242_v52 }
 0x6bf   :  { %8496 = vmatmul.msk.f32.gmra.mxu3 %vm3260_vm7, %v5244_v2  ;;  %8529 = vmatmul.msk.f32.gmra.mxu1 %vm3260_vm7, %v5244_v2  ;;  %v5248_v2 = vsel %vm3325_vm5, %v5243_v47, %v5247_v0  ;;  %v5249_v47 = vrot.slane %v16212_v33, 6  ;;  %v16439_v33 = vld [vmem:[#allocation12_spill] sm:$0xff] }
 0x6c0   :  { %5687 = vmatmul.f32.gmra.mxu0 %v5242_v52  ;;  %v8539_v52 = vld [vmem:[%s15535_s3 + $0x558] sm:$0xff]  ;;  %5952 = vmatpush.msrb.mxu2 %v8536_v28 }
 0x6c1   :  { %v5414_v44 = vpop.f32.mrf.mxu2  ;;  %6177 = vmatpush.msrb.mxu0 %v8539_v52  ;;  %v5250_v28 = vsel %vm3325_vm5, %v5245_v6, %v5249_v47 }
 0x6c2   :  { %v5527_v60 = vpop.f32.mrf.mxu3 }
 0x6c3   :  { %v5528_v22 = vadd.f32 %v5527_v60, %v5414_v44 }
 0x6c4   :  { %v13887_v49 = vpop.f32.mrf.mxu1 }
 0x6c5   :  { %v13889_v3 = vpop.f32.mrf.mxu0  ;;  %v13892_v18 = vadd.f32 %v5528_v22, %v13347_v39 }
 0x6c6   :  { %5464 = vmatmul.f32.gmra.mxu2 %v5246_v53 }
 0x6c7   :  { %8497 = vmatmul.msk.f32.gmra.mxu3 %vm3260_vm7, %v5248_v2  ;;  %8530 = vmatmul.msk.f32.gmra.mxu1 %vm3260_vm7, %v5248_v2  ;;  %v5251_v2 = vrot.slane %v16437_v55, 6  ;;  %v5253_v55 = vrot.slane %v16439_v33, 6 }
 0x6c8   :  { %5690 = vmatmul.f32.gmra.mxu0 %v5246_v53 }
 0x6c9   :  { %v5417_v39 = vpop.f32.mrf.mxu2  ;;  %v5252_v40 = vsel %vm3325_vm5, %v5247_v0, %v5251_v2  ;;  %v16440_v0 = vld [vmem:[#allocation176_spill] sm:$0xff]  ;;  %v5254_v6 = vsel %vm3325_vm5, %v5249_v47, %v5253_v55 }
 0x6ca   :  { %v5530_v22 = vpop.f32.mrf.mxu3 }
 0x6cb   :  { %v5531_v60 = vadd.f32 %v5530_v22, %v5417_v39  ;;  %v5255_v22 = vrot.slane %v12277_v56, 6 }
 0x6cc   :  { %v13905_v44 = vpop.f32.mrf.mxu1 }
 0x6cd   :  { %16436 = vst [vmem:[#allocation266_spill] sm:$0xff] %v13905_v44  ;;  %v13908_v53 = vpop.f32.mrf.mxu0  ;;  %v13911_v42 = vadd.f32 %v5531_v60, %v13366_v63 }
 0x6ce   :  { %16438 = vst [vmem:[#allocation267_spill] sm:$0xff] %v13908_v53  ;;  %5467 = vmatmul.f32.gmra.mxu2 %v5250_v28 }
 0x6cf   :  { %8498 = vmatmul.msk.f32.gmra.mxu3 %vm3260_vm7, %v5252_v40  ;;  %8531 = vmatmul.msk.f32.gmra.mxu1 %vm3260_vm7, %v5252_v40  ;;  %v5256_v40 = vsel %vm3325_vm5, %v5251_v2, %v5255_v22 }
 0x6d0   :  { %5693 = vmatmul.f32.gmra.mxu0 %v5250_v28  ;;  %v8537_v28 = vld [vmem:[%s15535_s3 + $0x548] sm:$0xff] }
 0x6d1   :  { %v5420_v39 = vpop.f32.mrf.mxu2  ;;  %6178 = vmatpush.msrb.mxu0 %v8537_v28 }
 0x6d2   :  { %v5533_v52 = vpop.f32.mrf.mxu3 }
 0x6d3   :  { %v5534_v44 = vadd.f32 %v5533_v52, %v5420_v39  ;;  %v5259_v39 = vrot.slane %v12296_v29, 6 }
 0x6d4   :  { %v13919_v53 = vpop.f32.mrf.mxu1 }
 0x6d5   :  { %v13921_v63 = vpop.f32.mrf.mxu0  ;;  %v13924_v60 = vadd.f32 %v5534_v44, %v16440_v0  ;;  %v5257_v0 = vrot.slane %v16220_v5, 6 }
 0x6d6   :  { %5470 = vmatmul.f32.gmra.mxu2 %v5254_v6 }
 0x6d7   :  { %8499 = vmatmul.msk.f32.gmra.mxu3 %vm3260_vm7, %v5256_v40  ;;  %8532 = vmatmul.msk.f32.gmra.mxu1 %vm3260_vm7, %v5256_v40  ;;  %v16443_v40 = vld [vmem:[#allocation179_spill] sm:$0xff]  ;;  %v5258_v28 = vsel %vm3325_vm5, %v5253_v55, %v5257_v0 }
 0x6d8   :  { %5696 = vmatmul.f32.gmra.mxu0 %v5254_v6  ;;  %v5260_v6 = vsel %vm3325_vm5, %v5255_v22, %v5259_v39  ;;  %v16448_v22 = vld [vmem:[#allocation182_spill] sm:$0xff] }
 0x6d9   :  { %v5423_v44 = vpop.f32.mrf.mxu2 }
 0x6da   :  { %v5536_v52 = vpop.f32.mrf.mxu3 }
 0x6db   :  { %v5537_v2 = vadd.f32 %v5536_v52, %v5423_v44  ;;  %v5261_v52 = vrot.slane %v12326_v36, 6 }
 0x6dc   :  { %v13935_v33 = vpop.f32.mrf.mxu1 }
 0x6dd   :  { %16441 = vst [vmem:[#allocation176_spill] sm:$0xff] %v13935_v33  ;;  %v13937_v56 = vpop.f32.mrf.mxu0  ;;  %v13940_v47 = vadd.f32 %v5537_v2, %v16443_v40  ;;  %v5262_v55 = vsel %vm3325_vm5, %v5257_v0, %v5261_v52 }
 0x6de   :  { %16442 = vst [vmem:[#allocation268_spill] sm:$0xff] %v13937_v56  ;;  %5473 = vmatmul.f32.gmra.mxu2 %v5258_v28  ;;  %v16446_v56 = vld [vmem:[#allocation81_spill] sm:$0xff] }
 0x6df   :  { %16444 = vst [vmem:[#allocation179_spill] sm:$0xff] %v13940_v47  ;;  %8500 = vmatmul.msk.f32.gmra.mxu3 %vm3260_vm7, %v5260_v6  ;;  %8533 = vmatmul.msk.f32.gmra.mxu1 %vm3260_vm7, %v5260_v6  ;;  %v5263_v2 = vrot.slane %v16446_v56, 6 }
 0x6e0   :  { %5699 = vmatmul.f32.gmra.mxu0 %v5258_v28 }
 0x6e1   :  { %v5426_v5 = vpop.f32.mrf.mxu2  ;;  %v5264_v6 = vsel %vm3325_vm5, %v5259_v39, %v5263_v2 }
 0x6e2   :  { %v5539_v29 = vpop.f32.mrf.mxu3 }
 0x6e3   :  { %v5540_v44 = vadd.f32 %v5539_v29, %v5426_v5  ;;  %v16449_v5 = vld [vmem:[#allocation108_spill] sm:$0xff] }
 0x6e4   :  { %v13947_v33 = vpop.f32.mrf.mxu1  ;;  %v5265_v28 = vrot.slane %v16449_v5, 6 }
 0x6e5   :  { %16445 = vst [vmem:[#allocation269_spill] sm:$0xff] %v13947_v33  ;;  %v13950_v40 = vpop.f32.mrf.mxu0  ;;  %v13953_v47 = vadd.f32 %v5540_v44, %v16448_v22  ;;  %v16450_v44 = vld [vmem:[#allocation185_spill] sm:$0xff] }
 0x6e6   :  { %16447 = vst [vmem:[#allocation270_spill] sm:$0xff] %v13950_v40  ;;  %5476 = vmatmul.f32.gmra.mxu2 %v5262_v55  ;;  %v5267_v39 = vsel %vm3325_vm5, %v5263_v2, %v5265_v28  ;;  %v5266_v0 = vsel %vm3325_vm5, %v5261_v52, %v5265_v28  ;;  %v16452_v2 = vld [vmem:[#allocation59_spill] sm:$0xff] }
 0x6e7   :  { %8501 = vmatmul.msk.f32.gmra.mxu3 %vm3260_vm7, %v5264_v6  ;;  %8534 = vmatmul.msk.f32.gmra.mxu1 %vm3260_vm7, %v5264_v6 }
 0x6e8   :  { %5702 = vmatmul.f32.gmra.mxu0 %v5262_v55 }
 0x6e9   :  { %v5429_v36 = vpop.f32.mrf.mxu2 }
 0x6ea   :  { %v5542_v29 = vpop.f32.mrf.mxu3 }
 0x6eb   :  { %v5543_v56 = vadd.f32 %v5542_v29, %v5429_v36 }
 0x6ec   :  { %v13960_v33 = vpop.f32.mrf.mxu1 }
 0x6ed   :  { %v13962_v40 = vpop.f32.mrf.mxu0  ;;  %v13965_v22 = vadd.f32 %v5543_v56, %v16450_v44  ;;  %v16451_v44 = vld [vmem:[#allocation24_spill] sm:$0xff] }
 0x6ee   :  { %5479 = vmatmul.f32.gmra.mxu2 %v5266_v0 }
 0x6ef   :  { %8502 = vmatmul.msk.f32.gmra.mxu3 %vm3260_vm7, %v5267_v39  ;;  %8535 = vmatmul.msk.f32.gmra.mxu1 %vm3260_vm7, %v5267_v39 }
 0x6f0   :  { %5705 = vmatmul.f32.gmra.mxu0 %v5266_v0 }
 0x6f1   :  { %v5432_v55 = vpop.f32.mrf.mxu2 }
 0x6f2   :  { %v5545_v6 = vpop.f32.mrf.mxu3 }
 0x6f3   :  { %v5546_v36 = vadd.f32 %v5545_v6, %v5432_v55  ;;  %v16456_v55 = vld [vmem:[#allocation26_spill] sm:$0xff] }
 0x6f4   :  { %v13971_v29 = vpop.f32.mrf.mxu1 }
 0x6f5   :  { %v13973_v5 = vpop.f32.mrf.mxu0  ;;  %v13976_v56 = vadd.f32 %v5546_v36, %v13452_v46  ;;  %v16457_v36 = vld [vmem:[#allocation60_spill] sm:$0xff] }
 0x6f6   :  { %5953 = vmatmul.f32.vlgmr.msrb.gmra.mxu2 %v16452_v2 }
 0x6f7   :  { %8579 = vmatmul.msk.f32.vlgmr.msrb.gmra.mxu3 %vm3260_vm7, %v16451_v44  ;;  %8612 = vmatmul.msk.f32.vlgmr.msrb.gmra.mxu1 %vm3260_vm7, %v16451_v44 }
 0x6f8   :  { %6179 = vmatmul.f32.vlgmr.msrb.gmra.mxu0 %v16452_v2 }
 0x6f9   :  { %v5435_v28 = vpop.f32.mrf.mxu2 }
 0x6fa   :  { %v5548_v52 = vpop.f32.mrf.mxu3 }
 0x6fb   :  { %v5549_v39 = vadd.f32 %v5548_v52, %v5435_v28 }
 0x6fc   :  { %v13984_v0 = vpop.f32.mrf.mxu1 }
 0x6fd   :  { %16453 = vst [vmem:[#allocation182_spill] sm:$0xff] %v13984_v0  ;;  %v13986_v6 = vpop.f32.mrf.mxu0  ;;  %v13989_v46 = vadd.f32 %v5549_v39, %v13471_v43  ;;  %v16462_v39 = vld [vmem:[#allocation63_spill] sm:$0xff] }
 0x6fe   :  { %16454 = vst [vmem:[#allocation185_spill] sm:$0xff] %v13986_v6  ;;  %5956 = vmatmul.f32.gmra.mxu2 %v16457_v36  ;;  %v16460_v6 = vld [vmem:[#allocation193_spill] sm:$0xff] }
 0x6ff   :  { %16455 = vst [vmem:[#allocation24_spill] sm:$0xff] %v13989_v46  ;;  %8580 = vmatmul.msk.f32.gmra.mxu3 %vm3260_vm7, %v16456_v55  ;;  %8613 = vmatmul.msk.f32.gmra.mxu1 %vm3260_vm7, %v16456_v55  ;;  %v16463_v55 = vld [vmem:[#allocation25_spill] sm:$0xff] }
 0x700   :  { %6182 = vmatmul.f32.gmra.mxu0 %v16457_v36 }
 0x701   :  { %v5438_v2 = vpop.f32.mrf.mxu2 }
 0x702   :  { %v5551_v44 = vpop.f32.mrf.mxu3 }
 0x703   :  { %v5552_v52 = vadd.f32 %v5551_v44, %v5438_v2 }
 0x704   :  { %v13997_v28 = vpop.f32.mrf.mxu1 }
 0x705   :  { %16458 = vst [vmem:[#allocation59_spill] sm:$0xff] %v13997_v28  ;;  %v13999_v0 = vpop.f32.mrf.mxu0  ;;  %v14002_v43 = vadd.f32 %v5552_v52, %v16460_v6  ;;  %v16466_v52 = vld [vmem:[#allocation28_spill] sm:$0xff] }
 0x706   :  { %16459 = vst [vmem:[#allocation26_spill] sm:$0xff] %v13999_v0  ;;  %5959 = vmatmul.f32.gmra.mxu2 %v16463_v55  ;;  %v16465_v0 = vld [vmem:[#allocation195_spill] sm:$0xff] }
 0x707   :  { %16461 = vst [vmem:[#allocation60_spill] sm:$0xff] %v14002_v43  ;;  %8581 = vmatmul.msk.f32.gmra.mxu3 %vm3260_vm7, %v16462_v39  ;;  %8614 = vmatmul.msk.f32.gmra.mxu1 %vm3260_vm7, %v16462_v39  ;;  %v16467_v39 = vld [vmem:[#allocation64_spill] sm:$0xff] }
 0x708   :  { %6185 = vmatmul.f32.gmra.mxu0 %v16463_v55 }
 0x709   :  { %v5441_v46 = vpop.f32.mrf.mxu2 }
 0x70a   :  { %v5554_v36 = vpop.f32.mrf.mxu3 }
 0x70b   :  { %v5555_v44 = vadd.f32 %v5554_v36, %v5441_v46 }
 0x70c   :  { %v14010_v2 = vpop.f32.mrf.mxu1 }
 0x70d   :  { %16464 = vst [vmem:[#allocation193_spill] sm:$0xff] %v14010_v2  ;;  %v14012_v28 = vpop.f32.mrf.mxu0  ;;  %v14015_v6 = vadd.f32 %v5555_v44, %v16465_v0  ;;  %v16471_v44 = vld [vmem:[#allocation27_spill] sm:$0xff] }
 0x70e   :  { %5962 = vmatmul.f32.gmra.mxu2 %v16467_v39 }
 0x70f   :  { %8582 = vmatmul.msk.f32.gmra.mxu3 %vm3260_vm7, %v16466_v52  ;;  %8615 = vmatmul.msk.f32.gmra.mxu1 %vm3260_vm7, %v16466_v52 }
 0x710   :  { %6188 = vmatmul.f32.gmra.mxu0 %v16467_v39 }
 0x711   :  { %v5444_v43 = vpop.f32.mrf.mxu2 }
 0x712   :  { %v5557_v55 = vpop.f32.mrf.mxu3 }
 0x713   :  { %v5558_v46 = vadd.f32 %v5557_v55, %v5444_v43 }
 0x714   :  { %v14023_v36 = vpop.f32.mrf.mxu1 }
 0x715   :  { %16468 = vst [vmem:[#allocation63_spill] sm:$0xff] %v14023_v36  ;;  %v14025_v2 = vpop.f32.mrf.mxu0  ;;  %v14028_v0 = vadd.f32 %v5558_v46, %v13519_v34  ;;  %v16476_v46 = vld [vmem:[#allocation68_spill] sm:$0xff] }
 0x716   :  { %16469 = vst [vmem:[#allocation25_spill] sm:$0xff] %v14025_v2  ;;  %5965 = vmatmul.f32.gmra.mxu2 %v16471_v44  ;;  %v16474_v2 = vld [vmem:[#allocation198_spill] sm:$0xff] }
 0x717   :  { %16470 = vst [vmem:[#allocation195_spill] sm:$0xff] %v14028_v0  ;;  %8583 = vmatmul.msk.f32.gmra.mxu3 %vm3260_vm7, %v16241_v25  ;;  %8616 = vmatmul.msk.f32.gmra.mxu1 %vm3260_vm7, %v16241_v25  ;;  %v16477_v25 = vld [vmem:[#allocation30_spill] sm:$0xff] }
 0x718   :  { %6191 = vmatmul.f32.gmra.mxu0 %v16471_v44 }
 0x719   :  { %v5447_v39 = vpop.f32.mrf.mxu2 }
 0x71a   :  { %v5560_v52 = vpop.f32.mrf.mxu3 }
 0x71b   :  { %v5561_v43 = vadd.f32 %v5560_v52, %v5447_v39 }
 0x71c   :  { %v14036_v55 = vpop.f32.mrf.mxu1 }
 0x71d   :  { %16472 = vst [vmem:[#allocation28_spill] sm:$0xff] %v14036_v55  ;;  %v14038_v36 = vpop.f32.mrf.mxu0  ;;  %v14041_v34 = vadd.f32 %v5561_v43, %v16474_v2  ;;  %v16481_v43 = vld [vmem:[#allocation29_spill] sm:$0xff] }
 0x71e   :  { %16473 = vst [vmem:[#allocation64_spill] sm:$0xff] %v14038_v36  ;;  %5968 = vmatmul.f32.gmra.mxu2 %v16477_v25  ;;  %v16479_v36 = vld [vmem:[#allocation200_spill] sm:$0xff] }
 0x71f   :  { %16475 = vst [vmem:[#allocation27_spill] sm:$0xff] %v14041_v34  ;;  %8584 = vmatmul.msk.f32.gmra.mxu3 %vm3260_vm7, %v16476_v46  ;;  %8617 = vmatmul.msk.f32.gmra.mxu1 %vm3260_vm7, %v16476_v46  ;;  %v16482_v46 = vld [vmem:[#allocation71_spill] sm:$0xff] }
 0x720   :  { %6194 = vmatmul.f32.gmra.mxu0 %v16477_v25 }
 0x721   :  { %v5450_v0 = vpop.f32.mrf.mxu2 }
 0x722   :  { %v5563_v44 = vpop.f32.mrf.mxu3 }
 0x723   :  { %v5564_v52 = vadd.f32 %v5563_v44, %v5450_v0 }
 0x724   :  { %v14049_v39 = vpop.f32.mrf.mxu1 }
 0x725   :  { %16478 = vst [vmem:[#allocation198_spill] sm:$0xff] %v14049_v39  ;;  %v14051_v55 = vpop.f32.mrf.mxu0  ;;  %v14054_v2 = vadd.f32 %v5564_v52, %v16479_v36  ;;  %v16485_v52 = vld [vmem:[#allocation72_spill] sm:$0xff] }
 0x726   :  { %5971 = vmatmul.f32.gmra.mxu2 %v16482_v46 }
 0x727   :  { %16480 = vst [vmem:[#allocation68_spill] sm:$0xff] %v14054_v2  ;;  %8585 = vmatmul.msk.f32.gmra.mxu3 %vm3260_vm7, %v16481_v43  ;;  %8618 = vmatmul.msk.f32.gmra.mxu1 %vm3260_vm7, %v16481_v43  ;;  %v16486_v43 = vld [vmem:[#allocation32_spill] sm:$0xff] }
 0x728   :  { %6197 = vmatmul.f32.gmra.mxu0 %v16482_v46 }
 0x729   :  { %v5453_v34 = vpop.f32.mrf.mxu2 }
 0x72a   :  { %v5566_v25 = vpop.f32.mrf.mxu3 }
 0x72b   :  { %v5567_v0 = vadd.f32 %v5566_v25, %v5453_v34 }
 0x72c   :  { %v14062_v44 = vpop.f32.mrf.mxu1 }
 0x72d   :  { %16483 = vst [vmem:[#allocation30_spill] sm:$0xff] %v14062_v44  ;;  %v14064_v39 = vpop.f32.mrf.mxu0  ;;  %v14067_v36 = vadd.f32 %v5567_v0, %v13573_v37  ;;  %v16490_v0 = vld [vmem:[#allocation75_spill] sm:$0xff] }
 0x72e   :  { %5974 = vmatmul.f32.gmra.mxu2 %v16486_v43 }
 0x72f   :  { %16484 = vst [vmem:[#allocation200_spill] sm:$0xff] %v14067_v36  ;;  %8586 = vmatmul.msk.f32.gmra.mxu3 %vm3260_vm7, %v16485_v52  ;;  %8619 = vmatmul.msk.f32.gmra.mxu1 %vm3260_vm7, %v16485_v52  ;;  %v16491_v52 = vld [vmem:[#allocation31_spill] sm:$0xff] }
 0x730   :  { %6200 = vmatmul.f32.gmra.mxu0 %v16486_v43 }
 0x731   :  { %v5456_v2 = vpop.f32.mrf.mxu2 }
 0x732   :  { %v5569_v46 = vpop.f32.mrf.mxu3 }
 0x733   :  { %v5570_v34 = vadd.f32 %v5569_v46, %v5456_v2 }
 0x734   :  { %v14075_v25 = vpop.f32.mrf.mxu1 }
 0x735   :  { %16487 = vst [vmem:[#allocation29_spill] sm:$0xff] %v14075_v25  ;;  %v14077_v44 = vpop.f32.mrf.mxu0  ;;  %v14080_v37 = vadd.f32 %v5570_v34, %v13586_v51  ;;  %v16495_v34 = vld [vmem:[#allocation34_spill] sm:$0xff] }
 0x736   :  { %16488 = vst [vmem:[#allocation71_spill] sm:$0xff] %v14077_v44  ;;  %5977 = vmatmul.f32.gmra.mxu2 %v16491_v52 }
 0x737   :  { %16489 = vst [vmem:[#allocation72_spill] sm:$0xff] %v14080_v37  ;;  %8587 = vmatmul.msk.f32.gmra.mxu3 %vm3260_vm7, %v16490_v0  ;;  %8620 = vmatmul.msk.f32.gmra.mxu1 %vm3260_vm7, %v16490_v0  ;;  %v16496_v0 = vld [vmem:[#allocation76_spill] sm:$0xff] }
 0x738   :  { %6203 = vmatmul.f32.gmra.mxu0 %v16491_v52 }
 0x739   :  { %v5459_v36 = vpop.f32.mrf.mxu2 }
 0x73a   :  { %v5572_v43 = vpop.f32.mrf.mxu3 }
 0x73b   :  { %v5573_v2 = vadd.f32 %v5572_v43, %v5459_v36 }
 0x73c   :  { %v14088_v46 = vpop.f32.mrf.mxu1 }
 0x73d   :  { %16492 = vst [vmem:[#allocation32_spill] sm:$0xff] %v14088_v46  ;;  %v14090_v25 = vpop.f32.mrf.mxu0  ;;  %v14093_v51 = vadd.f32 %v5573_v2, %v13605_v26  ;;  %v16500_v2 = vld [vmem:[#allocation33_spill] sm:$0xff] }
 0x73e   :  { %16493 = vst [vmem:[#allocation75_spill] sm:$0xff] %v14090_v25  ;;  %5980 = vmatmul.f32.gmra.mxu2 %v16496_v0  ;;  %v16551_v25 = vld [vmem:[#allocation218_spill] sm:$0xff] }
 0x73f   :  { %16494 = vst [vmem:[#allocation31_spill] sm:$0xff] %v14093_v51  ;;  %8588 = vmatmul.msk.f32.gmra.mxu3 %vm3260_vm7, %v16495_v34  ;;  %8621 = vmatmul.msk.f32.gmra.mxu1 %vm3260_vm7, %v16495_v34 }
 0x740   :  { %6206 = vmatmul.f32.gmra.mxu0 %v16496_v0 }
 0x741   :  { %v5462_v37 = vpop.f32.mrf.mxu2 }
 0x742   :  { %v5575_v52 = vpop.f32.mrf.mxu3 }
 0x743   :  { %v5576_v36 = vadd.f32 %v5575_v52, %v5462_v37 }
 0x744   :  { %v14101_v43 = vpop.f32.mrf.mxu1 }
 0x745   :  { %16497 = vst [vmem:[#allocation34_spill] sm:$0xff] %v14101_v43  ;;  %v14103_v46 = vpop.f32.mrf.mxu0  ;;  %v14106_v26 = vadd.f32 %v5576_v36, %v13621_v8 }
 0x746   :  { %16498 = vst [vmem:[#allocation76_spill] sm:$0xff] %v14103_v46  ;;  %5983 = vmatmul.f32.gmra.mxu2 %v16500_v2  ;;  %v16540_v46 = vld [vmem:[#allocation217_spill] sm:$0xff] }
 0x747   :  { %16499 = vst [vmem:[#allocation271_spill] sm:$0xff] %v14106_v26  ;;  %8589 = vmatmul.msk.f32.gmra.mxu3 %vm3260_vm7, %v16401_v21  ;;  %8622 = vmatmul.msk.f32.gmra.mxu1 %vm3260_vm7, %v16401_v21 }
 0x748   :  { %6209 = vmatmul.f32.gmra.mxu0 %v16500_v2 }
 0x749   :  { %v5465_v0 = vpop.f32.mrf.mxu2 }
 0x74a   :  { %v5578_v34 = vpop.f32.mrf.mxu3 }
 0x74b   :  { %v5579_v37 = vadd.f32 %v5578_v34, %v5465_v0 }
 0x74c   :  { %v14114_v52 = vpop.f32.mrf.mxu1 }
 0x74d   :  { %16501 = vst [vmem:[#allocation33_spill] sm:$0xff] %v14114_v52  ;;  %v14116_v43 = vpop.f32.mrf.mxu0  ;;  %v14119_v8 = vadd.f32 %v5579_v37, %v13640_v48  ;;  %v16507_v37 = vld [vmem:[#allocation35_spill] sm:$0xff] }
 0x74e   :  { %16502 = vst [vmem:[#allocation272_spill] sm:$0xff] %v14116_v43  ;;  %5986 = vmatmul.f32.gmra.mxu2 %v16280_v24 }
 0x74f   :  { %16503 = vst [vmem:[#allocation273_spill] sm:$0xff] %v14119_v8  ;;  %8590 = vmatmul.msk.f32.gmra.mxu3 %vm3260_vm7, %v16279_v41  ;;  %8623 = vmatmul.msk.f32.gmra.mxu1 %vm3260_vm7, %v16279_v41  ;;  %v16508_v41 = vld [vmem:[#allocation83_spill] sm:$0xff] }
 0x750   :  { %6212 = vmatmul.f32.gmra.mxu0 %v16280_v24 }
 0x751   :  { %v5468_v36 = vpop.f32.mrf.mxu2 }
 0x752   :  { %v5581_v21 = vpop.f32.mrf.mxu3 }
 0x753   :  { %v5582_v2 = vadd.f32 %v5581_v21, %v5468_v36 }
 0x754   :  { %v14127_v34 = vpop.f32.mrf.mxu1 }
 0x755   :  { %16504 = vst [vmem:[#allocation274_spill] sm:$0xff] %v14127_v34  ;;  %v14129_v0 = vpop.f32.mrf.mxu0  ;;  %v14132_v48 = vadd.f32 %v5582_v2, %v13656_v45  ;;  %v16512_v2 = vld [vmem:[#allocation84_spill] sm:$0xff] }
 0x756   :  { %16505 = vst [vmem:[#allocation275_spill] sm:$0xff] %v14129_v0  ;;  %5989 = vmatmul.f32.gmra.mxu2 %v16508_v41 }
 0x757   :  { %16506 = vst [vmem:[#allocation276_spill] sm:$0xff] %v14132_v48  ;;  %8591 = vmatmul.msk.f32.gmra.mxu3 %vm3260_vm7, %v16507_v37  ;;  %8624 = vmatmul.msk.f32.gmra.mxu1 %vm3260_vm7, %v16507_v37  ;;  %v16513_v37 = vld [vmem:[#allocation38_spill] sm:$0xff] }
 0x758   :  { %6215 = vmatmul.f32.gmra.mxu0 %v16508_v41 }
 0x759   :  { %v5471_v8 = vpop.f32.mrf.mxu2 }
 0x75a   :  { %v5584_v24 = vpop.f32.mrf.mxu3 }
 0x75b   :  { %v5585_v21 = vadd.f32 %v5584_v24, %v5471_v8 }
 0x75c   :  { %v14140_v36 = vpop.f32.mrf.mxu1 }
 0x75d   :  { %16509 = vst [vmem:[#allocation35_spill] sm:$0xff] %v14140_v36  ;;  %v14142_v34 = vpop.f32.mrf.mxu0  ;;  %v14145_v45 = vadd.f32 %v5585_v21, %v13675_v9 }
 0x75e   :  { %16510 = vst [vmem:[#allocation83_spill] sm:$0xff] %v14142_v34  ;;  %5992 = vmatmul.f32.gmra.mxu2 %v16513_v37  ;;  %v5727_v34 = vadd.f32 %v13718_v19, %v13720_v23  ;;  %v16533_v23 = vld [vmem:[#allocation215_spill] sm:$0xff]  ;;  %v16534_v19 = vld [vmem:[#allocation214_spill] sm:$0xff] }
 0x75f   :  { %16511 = vst [vmem:[#allocation277_spill] sm:$0xff] %v14145_v45  ;;  %8592 = vmatmul.msk.f32.gmra.mxu3 %vm3260_vm7, %v16512_v2  ;;  %8625 = vmatmul.msk.f32.gmra.mxu1 %vm3260_vm7, %v16512_v2  ;;  %v16519_v45 = vld [vmem:[#allocation92_spill] sm:$0xff] }
 0x760   :  { %6218 = vmatmul.f32.gmra.mxu0 %v16513_v37 }
 0x761   :  { %v5474_v48 = vpop.f32.mrf.mxu2 }
 0x762   :  { %v5587_v41 = vpop.f32.mrf.mxu3 }
 0x763   :  { %v5588_v8 = vadd.f32 %v5587_v41, %v5474_v48 }
 0x764   :  { %v14153_v24 = vpop.f32.mrf.mxu1 }
 0x765   :  { %16514 = vst [vmem:[#allocation84_spill] sm:$0xff] %v14153_v24  ;;  %v14155_v36 = vpop.f32.mrf.mxu0  ;;  %v14158_v9 = vadd.f32 %v5588_v8, %v13688_v61  ;;  %v16520_v61 = vld [vmem:[#allocation39_spill] sm:$0xff]  ;;  %v16523_v24 = vld [vmem:[#allocation37_spill] sm:$0xff] }
 0x766   :  { %16515 = vst [vmem:[#allocation38_spill] sm:$0xff] %v14155_v36  ;;  %5995 = vmatmul.f32.gmra.mxu2 %v16414_v14  ;;  %v3689_v8 = vadd.f32 %v16520_v61, %v16519_v45  ;;  %v16526_v61 = vld [vmem:[#allocation43_spill] sm:$0xff] }
 0x767   :  { %16516 = vst [vmem:[#allocation278_spill] sm:$0xff] %v14158_v9  ;;  %8593 = vmatmul.msk.f32.gmra.mxu3 %vm3260_vm7, %v11957_v31  ;;  %8626 = vmatmul.msk.f32.gmra.mxu1 %vm3260_vm7, %v11957_v31  ;;  %v16522_v31 = vld [vmem:[#allocation144_spill] sm:$0xff] }
 0x768   :  { %6221 = vmatmul.f32.gmra.mxu0 %v16414_v14  ;;  %v4098_v14 = vadd.f32 %v16522_v31, %v3689_v8  ;;  %v16529_v31 = vld [vmem:[#allocation146_spill] sm:$0xff] }
 0x769   :  { %v5477_v2 = vpop.f32.mrf.mxu2 }
 0x76a   :  { %v5590_v21 = vpop.f32.mrf.mxu3 }
 0x76b   :  { %v5591_v48 = vadd.f32 %v5590_v21, %v5477_v2  ;;  %v16524_v21 = vld [vmem:[#allocation213_spill] sm:$0xff]  ;;  %v16525_v2 = vld [vmem:[#allocation142_spill] sm:$0xff] }
 0x76c   :  { %v14166_v37 = vpop.f32.mrf.mxu1 }
 0x76d   :  { %16517 = vst [vmem:[#allocation279_spill] sm:$0xff] %v14166_v37  ;;  %v14168_v41 = vpop.f32.mrf.mxu0  ;;  %v14173_v9 = vadd.f32 %v5591_v48, %v13707_v50  ;;  %v4937_v37 = vadd.f32 %v16525_v2, %v16524_v21  ;;  %v16527_v50 = vld [vmem:[#allocation44_spill] sm:$0xff]  ;;  %v6453_v2 = vld [vmem:[%s15537_s4] sm:$0x3]  ;;  %s8861_s4 = smov 112  }
 0x76e   :  { %16518 = vst [vmem:[#allocation280_spill] sm:$0xff] %v14168_v41  ;;  %5998 = vmatmul.f32.gmra.mxu2 %v16523_v24  ;;  %v3692_v48 = vadd.f32 %v16527_v50, %v16526_v61  ;;  %v16532_v61 = vld [vmem:[#allocation40_spill] sm:$0xff]  ;;  %v14207_v50 = vperm.slane %v6453_v2, 1 }
 0x76f   :  { %16521 = vst [vmem:[#allocation92_spill] sm:$0xff] %v14173_v9  ;;  %8594 = vmatmul.msk.f32.gmra.mxu3 %vm3260_vm7, %v16296_v4  ;;  %8627 = vmatmul.msk.f32.gmra.mxu1 %vm3260_vm7, %v16296_v4  ;;  %v16528_v9 = vld [vmem:[#allocation143_spill] sm:$0xff] }
 0x770   :  { %6224 = vmatmul.f32.gmra.mxu0 %v16523_v24  ;;  %v4211_v36 = vadd.f32 %v16528_v9, %v4098_v14  ;;  %v4101_v52 = vadd.f32 %v16529_v31, %v3692_v48  ;;  %v16530_v24 = vld [vmem:[#allocation262_spill] sm:$0xff]  ;;  %v4940_v9 = vadd.f32 %v16534_v19, %v16533_v23  ;;  %v16535_v14 = vld [vmem:[#allocation91_spill] sm:$0xff] }
 0x771   :  { %v5480_v45 = vpop.f32.mrf.mxu2 }
 0x772   :  { %v5593_v41 = vpop.f32.mrf.mxu3  ;;  %v5033_v43 = vadd.f32 %v4937_v37, %v4211_v36  ;;  %v16536_v36 = vld [vmem:[#allocation145_spill] sm:$0xff]  ;;  %v5730_v37 = vadd.f32 %v13737_v30, %v13739_v17  ;;  %v16541_v30 = vld [vmem:[#allocation216_spill] sm:$0xff] }
 0x773   :  { %v5594_v4 = vadd.f32 %v5593_v41, %v5480_v45  ;;  %v4943_v17 = vadd.f32 %v16541_v30, %v16540_v46  ;;  %v5733_v46 = vadd.f32 %v13749_v32, %v13752_v59  ;;  %v16549_v32 = vld [vmem:[#allocation149_spill] sm:$0xff] }
 0x774   :  { %v6293_v0 = vpop.f32.mrf.mxu1  ;;  %v5823_v41 = vadd.f32 %v5727_v34, %v5033_v43  ;;  %v16539_v34 = vld [vmem:[#allocation148_spill] sm:$0xff] }
 0x775   :  { %v6180_v8 = vpop.f32.mrf.mxu0  ;;  %v14191_v26 = vadd.f32 %v5594_v4, %v16530_v24  ;;  %v16537_v4 = vld [vmem:[#allocation47_spill] sm:$0xff] }
 0x776   :  { %v6294_v21 = vadd.f32 %v6293_v0, %v6180_v8  ;;  %6001 = vmatmul.f32.gmra.mxu2 %v16535_v14  ;;  %v4214_v0 = vadd.f32 %v16536_v36, %v4101_v52  ;;  %v16538_v8 = vld [vmem:[#allocation48_spill] sm:$0xff] }
 0x777   :  { %16531 = vst [vmem:[#allocation39_spill] sm:$0xff] %v14191_v26  ;;  %8595 = vmatmul.msk.f32.gmra.mxu3 %vm3260_vm7, %v16532_v61  ;;  %8628 = vmatmul.msk.f32.gmra.mxu1 %vm3260_vm7, %v16532_v61  ;;  %v3695_v31 = vadd.f32 %v16538_v8, %v16537_v4  ;;  %v16544_v4 = vld [vmem:[#allocation41_spill] sm:$0xff] }
 0x778   :  { %6227 = vmatmul.f32.gmra.mxu0 %v16535_v14  ;;  %v6390_v45 = vadd.f32 %v6294_v21, %v5823_v41  ;;  %v5035_v61 = vadd.f32 %v4940_v9, %v4214_v0  ;;  %v16542_v21 = vld [vmem:[#allocation42_spill] sm:$0xff]  ;;  %v16543_v41 = vld [vmem:[#allocation263_spill] sm:$0xff]  ;;  %v14220_v0 = vperm.slane %v6453_v2, 0 }
 0x779   :  { %v5954_v24 = vpop.f32.mrf.mxu2  ;;  %v4104_v19 = vadd.f32 %v16539_v34, %v3695_v31 }
 0x77a   :  { %v6067_v48 = vpop.f32.mrf.mxu3  ;;  %v5825_v14 = vadd.f32 %v5730_v37, %v5035_v61  ;;  %v6460_v52 = vadd.f32 %v14207_v50, %v6390_v45  ;;  %v16545_v37 = vld [vmem:[#allocation147_spill] sm:$0xff]  ;;  %v16547_v61 = vld [vmem:[#allocation94_spill] sm:$0xff] }
 0x77b   :  { %v6068_v23 = vadd.f32 %v6067_v48, %v5954_v24  ;;  %v16546_v24 = vld [vmem:[#allocation49_spill] sm:$0xff] }
 0x77c   :  { %v6296_v43 = vpop.f32.mrf.mxu1  ;;  %v6524_v31 = vmax.f32 %v6460_v52, 0.0  ;;  %v16550_v52 = vld [vmem:[#allocation219_spill] sm:$0xff] }
 0x77d   :  { %v6183_v26 = vpop.f32.mrf.mxu0  ;;  %v6389_v9 = vadd.f32 %v6068_v23, %v16543_v41  ;;  %v4946_v44 = vadd.f32 %v16551_v25, %v16550_v52  ;;  %v5736_v25 = vadd.f32 %v13772_v27, %v13774_v1 }
 0x77e   :  { %v6297_v36 = vadd.f32 %v6296_v43, %v6183_v26  ;;  %6004 = vmatmul.f32.gmra.mxu2 %v16544_v4  ;;  %v4217_v26 = vadd.f32 %v16545_v37, %v4104_v19  ;;  %v3698_v43 = vadd.f32 %v16547_v61, %v16546_v24  ;;  %v6654_v51 = vrot.slane %v6524_v31, 2  ;;  %v16552_v24 = vld [vmem:[#allocation45_spill] sm:$0xff] }
 0x77f   :  { %8596 = vmatmul.msk.f32.gmra.mxu3 %vm3260_vm7, %v16542_v21  ;;  %8629 = vmatmul.msk.f32.gmra.mxu1 %vm3260_vm7, %v16542_v21  ;;  %v6459_v34 = vadd.f32 %v14220_v0, %v6389_v9  ;;  %v16548_v21 = vld [vmem:[#allocation151_spill] sm:$0xff] }
 0x780   :  { %v6392_v48 = vadd.f32 %v6297_v36, %v5825_v14  ;;  %6230 = vmatmul.f32.gmra.mxu0 %v16544_v4  ;;  %v5037_v23 = vadd.f32 %v4943_v17, %v4217_v26  ;;  %v4107_v41 = vadd.f32 %v16548_v21, %v3698_v43 }
 0x781   :  { %v5957_v2 = vpop.f32.mrf.mxu2  ;;  %v6523_v17 = vmax.f32 %v6459_v34, 0.0 }
 0x782   :  { %v6462_v45 = vadd.f32 %v14207_v50, %v6392_v48  ;;  %v6070_v8 = vpop.f32.mrf.mxu3  ;;  %v5827_v19 = vadd.f32 %v5733_v46, %v5037_v23  ;;  %v16553_v46 = vld [vmem:[#allocation46_spill] sm:$0xff] }
 0x783   :  { %v6071_v36 = vadd.f32 %v6070_v8, %v5957_v2  ;;  %v16554_v8 = vld [vmem:[#allocation150_spill] sm:$0xff]  ;;  %v6651_v21 = vrot.slane %v6523_v17, 2 }
 0x784   :  { %v6526_v14 = vmax.f32 %v6462_v45, 0.0  ;;  %v6299_v30 = vpop.f32.mrf.mxu1  ;;  %v4220_v61 = vadd.f32 %v16554_v8, %v4107_v41 }
 0x785   :  { %v6186_v4 = vpop.f32.mrf.mxu0  ;;  %v6391_v59 = vadd.f32 %v6071_v36, %v16549_v32  ;;  %v16556_v32 = vld [vmem:[#allocation53_spill] sm:$0xff] }
 0x786   :  { %v6655_v37 = vrot.slane %v6526_v14, 2  ;;  %v6300_v48 = vadd.f32 %v6299_v30, %v6186_v4  ;;  %6007 = vmatmul.f32.gmra.mxu2 %v16553_v46  ;;  %v5039_v36 = vadd.f32 %v4946_v44, %v4220_v61 }
 0x787   :  { %8597 = vmatmul.msk.f32.gmra.mxu3 %vm3260_vm7, %v16552_v24  ;;  %8630 = vmatmul.msk.f32.gmra.mxu1 %vm3260_vm7, %v16552_v24  ;;  %v6461_v9 = vadd.f32 %v14220_v0, %v6391_v59  ;;  %v16557_v59 = vld [vmem:[#allocation96_spill] sm:$0xff] }
 0x788   :  { %v6394_v26 = vadd.f32 %v6300_v48, %v5827_v19  ;;  %6233 = vmatmul.f32.gmra.mxu0 %v16553_v46  ;;  %v6656_v45 = vsel %vm824_vm2, %v6654_v51, %v6655_v37  ;;  %v3701_v27 = vadd.f32 %v16557_v59, %v16556_v32  ;;  %v5829_v1 = vadd.f32 %v5736_v25, %v5039_v36  ;;  %v16559_v46 = vld [vmem:[#allocation93_spill] sm:$0xff]  ;;  %v16560_v25 = vld [vmem:[#allocation50_spill] sm:$0xff] }
 0x789   :  { %v14246_v43 = vmax.f32 %v6524_v31, %v6656_v45  ;;  %v6525_v23 = vmax.f32 %v6461_v9, 0.0  ;;  %v5960_v30 = vpop.f32.mrf.mxu2  ;;  %v16558_v9 = vld [vmem:[#allocation153_spill] sm:$0xff] }
 0x78a   :  { %v6464_v2 = vadd.f32 %v14207_v50, %v6394_v26  ;;  %v6073_v34 = vpop.f32.mrf.mxu3  ;;  %v4110_v26 = vadd.f32 %v16558_v9, %v3701_v27  ;;  %v16564_v32 = vld [vmem:[#allocation57_spill] sm:$0xff]  ;;  %v16565_v27 = vld [vmem:[#allocation152_spill] sm:$0xff] }
 0x78b   :  { %16555 = vst [vmem:[#allocation144_spill] sm:$0xff] %v14246_v43  ;;  %6909 = vrot.lane.b32.xlu1 %v14246_v43, %s8861_s4  ;;  %v6652_v19 = vrot.slane %v6525_v23, 2  ;;  %v6074_v4 = vadd.f32 %v6073_v34, %v5960_v30  ;;  %v16562_v34 = vld [vmem:[#allocation220_spill] sm:$0xff]  ;;  %v16570_v43 = vld [vmem:[#allocation95_spill] sm:$0xff] }
 0x78c   :  { %v6528_v51 = vmax.f32 %v6464_v2, 0.0  ;;  %v6302_v41 = vpop.f32.mrf.mxu1  ;;  %v16561_v2 = vld [vmem:[#allocation221_spill] sm:$0xff] }
 0x78d   :  { %v6189_v31 = vpop.f32.mrf.mxu0  ;;  %v6393_v52 = vadd.f32 %v6074_v4, %v13777_v12  ;;  %v6653_v44 = vsel %vm824_vm2, %v6651_v21, %v6652_v19  ;;  %v4949_v36 = vadd.f32 %v16562_v34, %v16561_v2 }
 0x78e   :  { %v6659_v48 = vrot.slane %v6528_v51, 2  ;;  %v6303_v24 = vadd.f32 %v6302_v41, %v6189_v31  ;;  %v14260_v45 = vmax.f32 %v6523_v17, %v6653_v44  ;;  %6010 = vmatmul.f32.gmra.mxu2 %v16560_v25  ;;  %v16563_v17 = vld [vmem:[#allocation3_spill] sm:$0xff] }
 0x78f   :  { %8598 = vmatmul.msk.f32.gmra.mxu3 %vm3260_vm7, %v16559_v46  ;;  %8631 = vmatmul.msk.f32.gmra.mxu1 %vm3260_vm7, %v16559_v46  ;;  %v6463_v8 = vadd.f32 %v14220_v0, %v6393_v52  ;;  %v3704_v59 = vadd.f32 %v16564_v32, %v16563_v17  ;;  %v5739_v52 = vadd.f32 %v13785_v15, %v13787_v10  ;;  %v16566_v46 = vld [vmem:[#allocation156_spill] sm:$0xff]  ;;  %v16568_v32 = vld [vmem:[#allocation223_spill] sm:$0xff] }
 0x790   :  { %v6396_v61 = vadd.f32 %v6303_v24, %v5829_v1  ;;  %6236 = vmatmul.f32.gmra.mxu0 %v16560_v25  ;;  %v6660_v12 = vsel %vm824_vm2, %v6655_v37, %v6659_v48  ;;  %v4223_v1 = vadd.f32 %v16565_v27, %v4110_v26  ;;  %v16569_v26 = vld [vmem:[#allocation222_spill] sm:$0xff] }
 0x791   :  { %v14268_v30 = vmax.f32 %v6526_v14, %v6660_v12  ;;  %v6527_v21 = vmax.f32 %v6463_v8, 0.0  ;;  %v5963_v31 = vpop.f32.mrf.mxu2  ;;  %v4113_v14 = vadd.f32 %v16566_v46, %v3704_v59  ;;  %v4952_v27 = vadd.f32 %v16569_v26, %v16568_v32  ;;  %v16572_v59 = vld [vmem:[#allocation155_spill] sm:$0xff]  ;;  %v16575_v46 = vld [vmem:[#allocation98_spill] sm:$0xff] }
 0x792   :  { %v6466_v4 = vadd.f32 %v14207_v50, %v6396_v61  ;;  %v6076_v41 = vpop.f32.mrf.mxu3  ;;  %v5041_v25 = vadd.f32 %v4949_v36, %v4223_v1  ;;  %v16567_v61 = vld [vmem:[#allocation154_spill] sm:$0xff]  ;;  %v16577_v26 = vld [vmem:[#allocation159_spill] sm:$0xff] }
 0x793   :  { %v6657_v24 = vrot.slane %v6527_v21, 2  ;;  %v6077_v44 = vadd.f32 %v6076_v41, %v5963_v31  ;;  %v4226_v1 = vadd.f32 %v16572_v59, %v4113_v14  ;;  %v16573_v31 = vld [vmem:[#allocation265_spill] sm:$0xff]  ;;  %v16580_v59 = vld [vmem:[#allocation58_spill] sm:$0xff] }
 0x794   :  { %v6530_v37 = vmax.f32 %v6466_v4, 0.0  ;;  %v6305_v9 = vpop.f32.mrf.mxu1  ;;  %v5831_v10 = vadd.f32 %v5739_v52, %v5041_v25  ;;  %v16571_v4 = vld [vmem:[#allocation54_spill] sm:$0xff]  ;;  %v16576_v52 = vld [vmem:[#allocation61_spill] sm:$0xff] }
 0x795   :  { %v6192_v8 = vpop.f32.mrf.mxu0  ;;  %v6395_v2 = vadd.f32 %v6077_v44, %v16567_v61  ;;  %v6658_v17 = vsel %vm824_vm2, %v6652_v19, %v6657_v24  ;;  %v3707_v25 = vadd.f32 %v16576_v52, %v16575_v46  ;;  %v5043_v61 = vadd.f32 %v4952_v27, %v4226_v1  ;;  %v16583_v52 = vld [vmem:[#allocation65_spill] sm:$0xff] }
 0x796   :  { %v6663_v12 = vrot.slane %v6530_v37, 2  ;;  %v6306_v34 = vadd.f32 %v6305_v9, %v6192_v8  ;;  %v14285_v15 = vmax.f32 %v6525_v23, %v6658_v17  ;;  %6013 = vmatmul.f32.gmra.mxu2 %v16571_v4  ;;  %v16574_v37 = vld [vmem:[#allocation264_spill] sm:$0xff] }
 0x797   :  { %8599 = vmatmul.msk.f32.gmra.mxu3 %vm3260_vm7, %v16570_v43  ;;  %8632 = vmatmul.msk.f32.gmra.mxu1 %vm3260_vm7, %v16570_v43  ;;  %v6465_v36 = vadd.f32 %v14220_v0, %v6395_v2  ;;  %v5742_v44 = vadd.f32 %v16574_v37, %v16573_v31  ;;  %v16581_v37 = vld [vmem:[#allocation97_spill] sm:$0xff] }
 0x798   :  { %6239 = vmatmul.f32.gmra.mxu0 %v16571_v4  ;;  %v6664_v19 = vsel %vm824_vm2, %v6659_v48, %v6663_v12  ;;  %v6398_v43 = vadd.f32 %v6306_v34, %v5831_v10  ;;  %v4116_v48 = vadd.f32 %v16577_v26, %v3707_v25  ;;  %v16579_v34 = vld [vmem:[#allocation157_spill] sm:$0xff]  ;;  %v16584_v25 = vld [vmem:[#allocation6_spill] sm:$0xff] }
 0x799   :  { %v14291_v41 = vmax.f32 %v6528_v51, %v6664_v19  ;;  %v6529_v9 = vmax.f32 %v6465_v36, 0.0  ;;  %v5966_v8 = vpop.f32.mrf.mxu2  ;;  %v5833_v12 = vadd.f32 %v5742_v44, %v5043_v61  ;;  %v16578_v36 = vld [vmem:[#allocation224_spill] sm:$0xff]  ;;  %v16582_v44 = vld [vmem:[#allocation158_spill] sm:$0xff] }
 0x79a   :  { %v6079_v23 = vpop.f32.mrf.mxu3  ;;  %v6468_v14 = vadd.f32 %v14207_v50, %v6398_v43  ;;  %v4955_v10 = vadd.f32 %v16579_v34, %v16578_v36  ;;  %v16585_v26 = vld [vmem:[#allocation162_spill] sm:$0xff]  ;;  %v16588_v34 = vld [vmem:[#allocation225_spill] sm:$0xff] }
 0x79b   :  { %v6661_v2 = vrot.slane %v6529_v9, 2  ;;  %v6080_v17 = vadd.f32 %v6079_v23, %v5966_v8  ;;  %v5745_v9 = vadd.f32 %v13817_v16, %v13819_v62  ;;  %v16586_v16 = vld [vmem:[#allocation160_spill] sm:$0xff] }
 0x79c   :  { %v6308_v32 = vpop.f32.mrf.mxu1  ;;  %v6532_v46 = vmax.f32 %v6468_v14, 0.0  ;;  %v16587_v14 = vld [vmem:[#allocation226_spill] sm:$0xff] }
 0x79d   :  { %v6195_v51 = vpop.f32.mrf.mxu0  ;;  %v6662_v19 = vsel %vm824_vm2, %v6657_v24, %v6661_v2  ;;  %v6397_v1 = vadd.f32 %v6080_v17, %v13809_v7  ;;  %v4229_v24 = vadd.f32 %v16582_v44, %v4116_v48  ;;  %v16590_v44 = vld [vmem:[#allocation4_spill] sm:$0xff] }
 0x79e   :  { %v6309_v4 = vadd.f32 %v6308_v32, %v6195_v51  ;;  %v14307_v27 = vmax.f32 %v6527_v21, %v6662_v19  ;;  %6016 = vmatmul.f32.gmra.mxu2 %v16581_v37  ;;  %v3710_v21 = vadd.f32 %v16584_v25, %v16583_v52  ;;  %v6668_v36 = vrot.slane %v6532_v46, 2 }
 0x79f   :  { %8600 = vmatmul.msk.f32.gmra.mxu3 %vm3260_vm7, %v16580_v59  ;;  %8633 = vmatmul.msk.f32.gmra.mxu1 %vm3260_vm7, %v16580_v59  ;;  %v5045_v8 = vadd.f32 %v4955_v10, %v4229_v24  ;;  %v6467_v7 = vadd.f32 %v14220_v0, %v6397_v1  ;;  %v4958_v59 = vadd.f32 %v16588_v34, %v16587_v14  ;;  %v16594_v34 = vld [vmem:[#allocation165_spill] sm:$0xff] }
 0x7a0   :  { %v6400_v31 = vadd.f32 %v6309_v4, %v5833_v12  ;;  %6242 = vmatmul.f32.gmra.mxu0 %v16581_v37  ;;  %v4119_v51 = vadd.f32 %v16585_v26, %v3710_v21 }
 0x7a1   :  { %v5969_v61 = vpop.f32.mrf.mxu2  ;;  %v5835_v48 = vadd.f32 %v5745_v9, %v5045_v8  ;;  %v6531_v10 = vmax.f32 %v6467_v7, 0.0  ;;  %v16591_v9 = vld [vmem:[#allocation161_spill] sm:$0xff] }
 0x7a2   :  { %v6470_v43 = vadd.f32 %v14207_v50, %v6400_v31  ;;  %v6082_v23 = vpop.f32.mrf.mxu3  ;;  %v16589_v31 = vld [vmem:[#allocation62_spill] sm:$0xff] }
 0x7a3   :  { %v6083_v17 = vadd.f32 %v6082_v23, %v5969_v61  ;;  %v5748_v23 = vadd.f32 %v13839_v57, %v13841_v20 }
 0x7a4   :  { %v6534_v2 = vmax.f32 %v6470_v43, 0.0  ;;  %v6311_v32 = vpop.f32.mrf.mxu1  ;;  %v4232_v43 = vadd.f32 %v16591_v9, %v4119_v51  ;;  %v16592_v51 = vld [vmem:[#allocation70_spill] sm:$0xff]  ;;  %v16597_v9 = vld [vmem:[#allocation227_spill] sm:$0xff] }
 0x7a5   :  { %v6198_v12 = vpop.f32.mrf.mxu0  ;;  %v6399_v62 = vadd.f32 %v6083_v17, %v16586_v16  ;;  %v6665_v17 = vrot.slane %v6531_v10, 2  ;;  %v16593_v16 = vld [vmem:[#allocation7_spill] sm:$0xff] }
 0x7a6   :  { %v6669_v4 = vrot.slane %v6534_v2, 2  ;;  %v6312_v19 = vadd.f32 %v6311_v32, %v6198_v12  ;;  %6019 = vmatmul.f32.gmra.mxu2 %v16590_v44  ;;  %v5047_v61 = vadd.f32 %v4958_v59, %v4232_v43  ;;  %v16598_v43 = vld [vmem:[#allocation163_spill] sm:$0xff] }
 0x7a7   :  { %8601 = vmatmul.msk.f32.gmra.mxu3 %vm3260_vm7, %v16589_v31  ;;  %8634 = vmatmul.msk.f32.gmra.mxu1 %vm3260_vm7, %v16589_v31  ;;  %v6469_v1 = vadd.f32 %v14220_v0, %v6399_v62  ;;  %v3713_v62 = vadd.f32 %v16593_v16, %v16592_v51  ;;  %v16595_v31 = vld [vmem:[#allocation5_spill] sm:$0xff]  ;;  %v16601_v51 = vld [vmem:[#allocation164_spill] sm:$0xff] }
 0x7a8   :  { %v6402_v37 = vadd.f32 %v6312_v19, %v5835_v48  ;;  %6245 = vmatmul.f32.gmra.mxu0 %v16590_v44  ;;  %v6670_v24 = vsel %vm824_vm2, %v6668_v36, %v6669_v4  ;;  %v5837_v20 = vadd.f32 %v5748_v23, %v5047_v61  ;;  %v4961_v23 = vadd.f32 %v16598_v43, %v16597_v9  ;;  %v16604_v9 = vld [vmem:[#allocation229_spill] sm:$0xff]  ;;  %v16605_v43 = vld [vmem:[#allocation228_spill] sm:$0xff] }
 0x7a9   :  { %v14334_v52 = vmax.f32 %v6532_v46, %v6670_v24  ;;  %v6533_v25 = vmax.f32 %v6469_v1, 0.0  ;;  %v5972_v7 = vpop.f32.mrf.mxu2  ;;  %v4122_v59 = vadd.f32 %v16594_v34, %v3713_v62  ;;  %v16596_v24 = vld [vmem:[#allocation66_spill] sm:$0xff] }
 0x7aa   :  { %v6472_v21 = vadd.f32 %v14207_v50, %v6402_v37  ;;  %v6085_v8 = vpop.f32.mrf.mxu3 }
 0x7ab   :  { %6921 = vrot.lane.b32.xlu2 %v14334_v52, %s8861_s4  ;;  %v6666_v32 = vrot.slane %v6533_v25, 2  ;;  %v6086_v48 = vadd.f32 %v6085_v8, %v5972_v7  ;;  %v4235_v16 = vadd.f32 %v16601_v51, %v4122_v59  ;;  %v5754_v51 = vadd.f32 %v13874_v58, %v13876_v54  ;;  %v16613_v58 = vld [vmem:[#allocation231_spill] sm:$0xff] }
 0x7ac   :  { %v6536_v26 = vmax.f32 %v6472_v21, 0.0  ;;  %v6314_v12 = vpop.f32.mrf.mxu1 }
 0x7ad   :  { %v6201_v57 = vpop.f32.mrf.mxu0  ;;  %v6401_v19 = vadd.f32 %v6086_v48, %v13844_v11  ;;  %v6667_v14 = vsel %vm824_vm2, %v6665_v17, %v6666_v32  ;;  %v16599_v17 = vld [vmem:[#allocation102_spill] sm:$0xff]  ;;  %v16600_v48 = vld [vmem:[#allocation101_spill] sm:$0xff]  ;;  %v5049_v34 = vadd.f32 %v4961_v23, %v4235_v16 }
 0x7ae   :  { %v6673_v46 = vrot.slane %v6536_v26, 2  ;;  %v6315_v36 = vadd.f32 %v6314_v12, %v6201_v57  ;;  %v14348_v1 = vmax.f32 %v6531_v10, %v6667_v14  ;;  %6022 = vmatmul.f32.gmra.mxu2 %v16596_v24  ;;  %v3716_v12 = vadd.f32 %v16600_v48, %v16599_v17  ;;  %v16606_v17 = vld [vmem:[#allocation100_spill] sm:$0xff]  ;;  %v16609_v48 = vld [vmem:[#allocation167_spill] sm:$0xff] }
 0x7af   :  { %8602 = vmatmul.msk.f32.gmra.mxu3 %vm3260_vm7, %v16595_v31  ;;  %8635 = vmatmul.msk.f32.gmra.mxu1 %vm3260_vm7, %v16595_v31  ;;  %v6471_v37 = vadd.f32 %v14220_v0, %v6401_v19 }
 0x7b0   :  { %v6404_v44 = vadd.f32 %v6315_v36, %v5837_v20  ;;  %6248 = vmatmul.f32.gmra.mxu0 %v16596_v24  ;;  %v6674_v11 = vsel %vm824_vm2, %v6669_v4, %v6673_v46  ;;  %v8756_v21 = vpack.i.bf16 %v14348_v1, %v14260_v45  ;;  %v5751_v4 = vadd.f32 %v13851_v38, %v13854_v35  ;;  %v16602_v36 = vld [vmem:[#allocation168_spill] sm:$0xff] }
 0x7b1   :  { %v14358_v8 = vmax.f32 %v6534_v2, %v6674_v11  ;;  %v6535_v61 = vmax.f32 %v6471_v37, 0.0  ;;  %v5975_v62 = vpop.f32.mrf.mxu2  ;;  %v4125_v14 = vadd.f32 %v16602_v36, %v3716_v12 }
 0x7b2   :  { %v6474_v10 = vadd.f32 %v14207_v50, %v6404_v44  ;;  %v6088_v7 = vpop.f32.mrf.mxu3  ;;  %8757 = vrot.lane.b32.xlu0 %v8756_v21, %s8861_s4  ;;  %v16603_v44 = vld [vmem:[#allocation166_spill] sm:$0xff]  ;;  %v4964_v21 = vadd.f32 %v16605_v43, %v16604_v9  ;;  %v5839_v35 = vadd.f32 %v5751_v4, %v5049_v34  ;;  %v16615_v43 = vld [vmem:[#allocation8_spill] sm:$0xff] }
 0x7b3   :  { %v6671_v20 = vrot.slane %v6535_v61, 2  ;;  %v6089_v19 = vadd.f32 %v6088_v7, %v5975_v62  ;;  %v4238_v12 = vadd.f32 %v16609_v48, %v4125_v14  ;;  %v16611_v4 = vld [vmem:[#allocation10_spill] sm:$0xff] }
 0x7b4   :  { %v6538_v57 = vmax.f32 %v6474_v10, 0.0  ;;  %v6317_v2 = vpop.f32.mrf.mxu1  ;;  %v16608_v10 = vld [vmem:[#allocation99_spill] sm:$0xff] }
 0x7b5   :  { %v6204_v31 = vpop.f32.mrf.mxu0  ;;  %v6403_v24 = vadd.f32 %v6089_v19, %v16603_v44  ;;  %v6672_v59 = vsel %vm824_vm2, %v6666_v32, %v6671_v20  ;;  %v5051_v36 = vadd.f32 %v4964_v21, %v4238_v12 }
 0x7b6   :  { %v6677_v37 = vrot.slane %v6538_v57, 2  ;;  %v6318_v11 = vadd.f32 %v6317_v2, %v6204_v31  ;;  %v14376_v38 = vmax.f32 %v6533_v25, %v6672_v59  ;;  %6025 = vmatmul.f32.gmra.mxu2 %v16608_v10  ;;  %v16610_v57 = vld [vmem:[#allocation73_spill] sm:$0xff] }
 0x7b7   :  { %8603 = vmatmul.msk.f32.gmra.mxu3 %vm3260_vm7, %v16606_v17  ;;  %8636 = vmatmul.msk.f32.gmra.mxu1 %vm3260_vm7, %v16606_v17  ;;  %v6473_v23 = vadd.f32 %v14220_v0, %v6403_v24  ;;  %v3719_v19 = vadd.f32 %v16611_v4, %v16610_v57  ;;  %v16612_v24 = vld [vmem:[#allocation170_spill] sm:$0xff] }
 0x7b8   :  { %16607 = vst [vmem:[#allocation37_spill] sm:$0xff] %v14376_v38  ;;  %6251 = vmatmul.f32.gmra.mxu0 %v16608_v10  ;;  %v6678_v32 = vsel %vm824_vm2, %v6673_v46, %v6677_v37  ;;  %v6406_v62 = vadd.f32 %v6318_v11, %v5839_v35  ;;  %v5841_v37 = vadd.f32 %v5754_v51, %v5051_v36  ;;  %v16614_v11 = vld [vmem:[#allocation230_spill] sm:$0xff]  ;;  %v16617_v10 = vld [vmem:[#allocation169_spill] sm:$0xff]  ;;  %v16620_v36 = vld [vmem:[#allocation172_spill] sm:$0xff] }
 0x7b9   :  { %v14382_v7 = vmax.f32 %v6536_v26, %v6678_v32  ;;  %v6537_v16 = vmax.f32 %v6473_v23, 0.0  ;;  %v5978_v2 = vpop.f32.mrf.mxu2  ;;  %v4128_v46 = vadd.f32 %v16612_v24, %v3719_v19  ;;  %v4967_v9 = vadd.f32 %v16614_v11, %v16613_v58  ;;  %v16616_v23 = vld [vmem:[#allocation69_spill] sm:$0xff] }
 0x7ba   :  { %v6091_v25 = vpop.f32.mrf.mxu3  ;;  %v6476_v14 = vadd.f32 %v14207_v50, %v6406_v62  ;;  %v5757_v32 = vadd.f32 %v13887_v49, %v13889_v3  ;;  %v16619_v62 = vld [vmem:[#allocation20_spill] sm:$0xff] }
 0x7bb   :  { %v6675_v34 = vrot.slane %v6537_v16, 2  ;;  %v6092_v31 = vadd.f32 %v6091_v25, %v5978_v2  ;;  %v16618_v16 = vld [vmem:[#allocation11_spill] sm:$0xff] }
 0x7bc   :  { %v6320_v44 = vpop.f32.mrf.mxu1  ;;  %v6540_v48 = vmax.f32 %v6476_v14, 0.0  ;;  %v16622_v14 = vld [vmem:[#allocation232_spill] sm:$0xff] }
 0x7bd   :  { %v6207_v26 = vpop.f32.mrf.mxu0  ;;  %v6676_v54 = vsel %vm824_vm2, %v6671_v20, %v6675_v34  ;;  %v6405_v17 = vadd.f32 %v6092_v31, %v13879_v13  ;;  %v4241_v20 = vadd.f32 %v16617_v10, %v4128_v46  ;;  %v16627_v10 = vld [vmem:[#allocation266_spill] sm:$0xff] }
 0x7be   :  { %v6321_v59 = vadd.f32 %v6320_v44, %v6207_v26  ;;  %v14398_v21 = vmax.f32 %v6535_v61, %v6676_v54  ;;  %6028 = vmatmul.f32.gmra.mxu2 %v16616_v23  ;;  %v3722_v61 = vadd.f32 %v16619_v62, %v16618_v16  ;;  %v6682_v24 = vrot.slane %v6540_v48, 2  ;;  %v8661_v26 = vld [vmem:[%s15538_s5 + $0x118] sm:$0xff] }
 0x7bf   :  { %8604 = vmatmul.msk.f32.gmra.mxu3 %vm3260_vm7, %v16615_v43  ;;  %8637 = vmatmul.msk.f32.gmra.mxu1 %vm3260_vm7, %v16615_v43  ;;  %v5053_v25 = vadd.f32 %v4967_v9, %v4241_v20  ;;  %v6475_v13 = vadd.f32 %v14220_v0, %v6405_v17  ;;  %v16623_v54 = vld [vmem:[#allocation9_spill] sm:$0xff]  ;;  %v16624_v43 = vld [vmem:[#allocation74_spill] sm:$0xff]  ;;  %v16625_v17 = vld [vmem:[#allocation171_spill] sm:$0xff] }
 0x7c0   :  { %v6408_v35 = vadd.f32 %v6321_v59, %v5841_v37  ;;  %6254 = vmatmul.f32.gmra.mxu0 %v16616_v23  ;;  %v4131_v34 = vadd.f32 %v16620_v36, %v3722_v61  ;;  %v16621_v37 = vld [vmem:[#allocation233_spill] sm:$0xff]  ;;  %v16626_v23 = vld [vmem:[#allocation267_spill] sm:$0xff]  ;;  %7250 = vmatpush.msra.mxu3 %v8661_v26 }
 0x7c1   :  { %v5981_v57 = vpop.f32.mrf.mxu2  ;;  %v5843_v31 = vadd.f32 %v5757_v32, %v5053_v25  ;;  %v4970_v59 = vadd.f32 %v16622_v14, %v16621_v37  ;;  %v6539_v58 = vmax.f32 %v6475_v13, 0.0  ;;  %v5760_v20 = vadd.f32 %v16627_v10, %v16626_v23  ;;  %v16628_v36 = vld [vmem:[#allocation105_spill] sm:$0xff]  ;;  %v16630_v37 = vld [vmem:[#allocation175_spill] sm:$0xff] }
 0x7c2   :  { %v6478_v12 = vadd.f32 %v14207_v50, %v6408_v35  ;;  %v6094_v51 = vpop.f32.mrf.mxu3  ;;  %v4244_v35 = vadd.f32 %v16625_v17, %v4131_v34  ;;  %v16629_v34 = vld [vmem:[#allocation77_spill] sm:$0xff] }
 0x7c3   :  { %v6095_v19 = vadd.f32 %v6094_v51, %v5981_v57  ;;  %v6679_v25 = vrot.slane %v6539_v58, 2  ;;  %v16634_v17 = vld [vmem:[#allocation173_spill] sm:$0xff] }
 0x7c4   :  { %v6542_v4 = vmax.f32 %v6478_v12, 0.0  ;;  %v6323_v2 = vpop.f32.mrf.mxu1  ;;  %v5055_v62 = vadd.f32 %v4970_v59, %v4244_v35  ;;  %v16631_v59 = vld [vmem:[#allocation104_spill] sm:$0xff] }
 0x7c5   :  { %v6210_v44 = vpop.f32.mrf.mxu0  ;;  %v6407_v3 = vadd.f32 %v6095_v19, %v13892_v18 }
 0x7c6   :  { %v6683_v49 = vrot.slane %v6542_v4, 2  ;;  %v6324_v46 = vadd.f32 %v6323_v2, %v6210_v44  ;;  %6031 = vmatmul.f32.gmra.mxu2 %v16624_v43 }
 0x7c7   :  { %8605 = vmatmul.msk.f32.gmra.mxu3 %vm3260_vm7, %v16623_v54  ;;  %8638 = vmatmul.msk.f32.gmra.mxu1 %vm3260_vm7, %v16623_v54  ;;  %v6477_v11 = vadd.f32 %v14220_v0, %v6407_v3 }
 0x7c8   :  { %v6410_v9 = vadd.f32 %v6324_v46, %v5843_v31  ;;  %6257 = vmatmul.f32.gmra.mxu0 %v16624_v43  ;;  %v6684_v18 = vsel %vm824_vm2, %v6682_v24, %v6683_v49  ;;  %v3725_v31 = vadd.f32 %v16629_v34, %v16628_v36  ;;  %v16632_v43 = vld [vmem:[#allocation103_spill] sm:$0xff] }
 0x7c9   :  { %v14428_v32 = vmax.f32 %v6540_v48, %v6684_v18  ;;  %v6541_v12 = vmax.f32 %v6477_v11, 0.0  ;;  %v5984_v61 = vpop.f32.mrf.mxu2  ;;  %v5845_v48 = vadd.f32 %v5760_v20, %v5055_v62  ;;  %v16633_v18 = vld [vmem:[#allocation234_spill] sm:$0xff] }
 0x7ca   :  { %v6480_v51 = vadd.f32 %v14207_v50, %v6410_v9  ;;  %v6097_v16 = vpop.f32.mrf.mxu3  ;;  %v4134_v14 = vadd.f32 %v16630_v37, %v3725_v31  ;;  %v4973_v35 = vadd.f32 %v16634_v17, %v16633_v18  ;;  %v16644_v18 = vld [vmem:[#allocation12_spill] sm:$0xff] }
 0x7cb   :  { %6933 = vrot.lane.b32.xlu0 %v14428_v32, %s8861_s4  ;;  %v6680_v57 = vrot.slane %v6541_v12, 2  ;;  %v6098_v19 = vadd.f32 %v6097_v16, %v5984_v61  ;;  %v16637_v16 = vld [vmem:[#allocation13_spill] sm:$0xff]  ;;  %v16638_v61 = vld [vmem:[#allocation174_spill] sm:$0xff] }
 0x7cc   :  { %v6544_v13 = vmax.f32 %v6480_v51, 0.0  ;;  %v6326_v2 = vpop.f32.mrf.mxu1 }
 0x7cd   :  { %v6213_v44 = vpop.f32.mrf.mxu0  ;;  %v6409_v3 = vadd.f32 %v6098_v19, %v13911_v42  ;;  %v6681_v26 = vsel %vm824_vm2, %v6679_v25, %v6680_v57  ;;  %v4247_v25 = vadd.f32 %v16638_v61, %v4134_v14  ;;  %v8659_v14 = vld [vmem:[%s15538_s5 + $0x108] sm:$0xff] }
 0x7ce   :  { %v6687_v24 = vrot.slane %v6544_v13, 2  ;;  %v6327_v46 = vadd.f32 %v6326_v2, %v6213_v44  ;;  %v14442_v54 = vmax.f32 %v6539_v58, %v6681_v26  ;;  %6034 = vmatmul.f32.gmra.mxu2 %v16632_v43  ;;  %v16636_v58 = vld [vmem:[#allocation82_spill] sm:$0xff]  ;;  %v5763_v2 = vadd.f32 %v13919_v53, %v13921_v63  ;;  %v16641_v53 = vld [vmem:[#allocation235_spill] sm:$0xff] }
 0x7cf   :  { %8606 = vmatmul.msk.f32.gmra.mxu3 %vm3260_vm7, %v16631_v59  ;;  %8639 = vmatmul.msk.f32.gmra.mxu1 %vm3260_vm7, %v16631_v59  ;;  %v6479_v11 = vadd.f32 %v14220_v0, %v6409_v3  ;;  %v3728_v62 = vadd.f32 %v16637_v16, %v16636_v58  ;;  %v5057_v44 = vadd.f32 %v4973_v35, %v4247_v25  ;;  %v16645_v35 = vld [vmem:[#allocation177_spill] sm:$0xff]  ;;  %v16647_v58 = vld [vmem:[#allocation176_spill] sm:$0xff] }
 0x7d0   :  { %v6412_v9 = vadd.f32 %v6327_v46, %v5845_v48  ;;  %6260 = vmatmul.f32.gmra.mxu0 %v16632_v43  ;;  %v6688_v42 = vsel %vm824_vm2, %v6683_v49, %v6687_v24  ;;  %v16639_v48 = vld [vmem:[#allocation178_spill] sm:$0xff]  ;;  %7216 = vmatpush.msra.mxu2 %v8659_v14  ;;  %v16648_v25 = vld [vmem:[#allocation52_spill] sm:$0xff] }
 0x7d1   :  { %v14450_v23 = vmax.f32 %v6542_v4, %v6688_v42  ;;  %v6543_v10 = vmax.f32 %v6479_v11, 0.0  ;;  %v5987_v19 = vpop.f32.mrf.mxu2  ;;  %v4137_v4 = vadd.f32 %v16639_v48, %v3728_v62  ;;  %v16640_v11 = vld [vmem:[#allocation236_spill] sm:$0xff]  ;;  %v5847_v42 = vadd.f32 %v5763_v2, %v5057_v44 }
 0x7d2   :  { %v6482_v20 = vadd.f32 %v14207_v50, %v6412_v9  ;;  %v6100_v51 = vpop.f32.mrf.mxu3  ;;  %v4976_v63 = vadd.f32 %v16641_v53, %v16640_v11  ;;  %v16642_v9 = vld [vmem:[#allocation78_spill] sm:$0xff] }
 0x7d3   :  { %16635 = vst [vmem:[#allocation213_spill] sm:$0xff] %v14450_v23  ;;  %v6685_v36 = vrot.slane %v6543_v10, 2  ;;  %v6101_v34 = vadd.f32 %v6100_v51, %v5987_v19  ;;  %v16646_v51 = vld [vmem:[#allocation268_spill] sm:$0xff]  ;;  %v16649_v19 = vld [vmem:[#allocation107_spill] sm:$0xff]  ;;  %v16653_v53 = vld [vmem:[#allocation106_spill] sm:$0xff] }
 0x7d4   :  { %v6546_v49 = vmax.f32 %v6482_v20, 0.0  ;;  %v6329_v31 = vpop.f32.mrf.mxu1  ;;  %v4250_v20 = vadd.f32 %v16645_v35, %v4137_v4  ;;  %v5766_v16 = vadd.f32 %v16647_v58, %v16646_v51  ;;  %v3731_v2 = vadd.f32 %v16649_v19, %v16648_v25  ;;  %v16657_v35 = vld [vmem:[#allocation270_spill] sm:$0xff] }
 0x7d5   :  { %v6216_v3 = vpop.f32.mrf.mxu0  ;;  %v6411_v26 = vadd.f32 %v6101_v34, %v13924_v60  ;;  %v6686_v59 = vsel %vm824_vm2, %v6680_v57, %v6685_v36 }
 0x7d6   :  { %v6691_v46 = vrot.slane %v6546_v49, 2  ;;  %v6330_v37 = vadd.f32 %v6329_v31, %v6216_v3  ;;  %v14470_v43 = vmax.f32 %v6541_v12, %v6686_v59  ;;  %6037 = vmatmul.f32.gmra.mxu2 %v16644_v18  ;;  %v5059_v34 = vadd.f32 %v4976_v63, %v4250_v20  ;;  %v16651_v59 = vld [vmem:[#allocation238_spill] sm:$0xff]  ;;  %v16658_v20 = vld [vmem:[#allocation269_spill] sm:$0xff] }
 0x7d7   :  { %8607 = vmatmul.msk.f32.gmra.mxu3 %vm3260_vm7, %v16642_v9  ;;  %8640 = vmatmul.msk.f32.gmra.mxu1 %vm3260_vm7, %v16642_v9  ;;  %v6481_v60 = vadd.f32 %v14220_v0, %v6411_v26  ;;  %v16654_v9 = vld [vmem:[#allocation179_spill] sm:$0xff]  ;;  %v5769_v51 = vadd.f32 %v16658_v20, %v16657_v35  ;;  %v5772_v35 = vadd.f32 %v13960_v33, %v13962_v40 }
 0x7d8   :  { %16643 = vst [vmem:[#allocation142_spill] sm:$0xff] %v14470_v43  ;;  %6263 = vmatmul.f32.gmra.mxu0 %v16644_v18  ;;  %v6692_v57 = vsel %vm824_vm2, %v6687_v24, %v6691_v46  ;;  %v6414_v12 = vadd.f32 %v6330_v37, %v5847_v42  ;;  %v16650_v24 = vld [vmem:[#allocation181_spill] sm:$0xff]  ;;  %v5849_v46 = vadd.f32 %v5766_v16, %v5059_v34  ;;  %v16655_v18 = vld [vmem:[#allocation51_spill] sm:$0xff] }
 0x7d9   :  { %v14476_v17 = vmax.f32 %v6544_v13, %v6692_v57  ;;  %v6545_v62 = vmax.f32 %v6481_v60, 0.0  ;;  %v5990_v49 = vpop.f32.mrf.mxu2  ;;  %v4140_v3 = vadd.f32 %v16650_v24, %v3731_v2  ;;  %v16652_v37 = vld [vmem:[#allocation237_spill] sm:$0xff]  ;;  %v16656_v57 = vld [vmem:[#allocation180_spill] sm:$0xff] }
 0x7da   :  { %v6103_v61 = vpop.f32.mrf.mxu3  ;;  %v6484_v4 = vadd.f32 %v14207_v50, %v6414_v12  ;;  %v4979_v11 = vadd.f32 %v16652_v37, %v16651_v59  ;;  %v16659_v12 = vld [vmem:[#allocation15_spill] sm:$0xff]  ;;  %v16662_v59 = vld [vmem:[#allocation240_spill] sm:$0xff] }
 0x7db   :  { %v6689_v31 = vrot.slane %v6545_v62, 2  ;;  %v6104_v48 = vadd.f32 %v6103_v61, %v5990_v49  ;;  %v16660_v61 = vld [vmem:[#allocation19_spill] sm:$0xff] }
 0x7dc   :  { %v6332_v44 = vpop.f32.mrf.mxu1  ;;  %v6548_v58 = vmax.f32 %v6484_v4, 0.0  ;;  %v16663_v37 = vld [vmem:[#allocation239_spill] sm:$0xff] }
 0x7dd   :  { %v6219_v13 = vpop.f32.mrf.mxu0  ;;  %v6690_v14 = vsel %vm824_vm2, %v6685_v36, %v6689_v31  ;;  %v6413_v42 = vadd.f32 %v6104_v48, %v16654_v9  ;;  %v4253_v36 = vadd.f32 %v16656_v57, %v4140_v3  ;;  %v16661_v48 = vld [vmem:[#allocation184_spill] sm:$0xff]  ;;  %v16666_v57 = vld [vmem:[#allocation183_spill] sm:$0xff] }
 0x7de   :  { %v6333_v26 = vadd.f32 %v6332_v44, %v6219_v13  ;;  %v14492_v63 = vmax.f32 %v6543_v10, %v6690_v14  ;;  %6040 = vmatmul.f32.gmra.mxu2 %v16655_v18  ;;  %v3734_v10 = vadd.f32 %v16660_v61, %v16659_v12  ;;  %v6696_v13 = vrot.slane %v6548_v58, 2  ;;  %v8658_v14 = vld [vmem:[%s15538_s5 + $0x100] sm:$0xff] }
 0x7df   :  { %8608 = vmatmul.msk.f32.gmra.mxu3 %vm3260_vm7, %v16653_v53  ;;  %8641 = vmatmul.msk.f32.gmra.mxu1 %vm3260_vm7, %v16653_v53  ;;  %v5061_v25 = vadd.f32 %v4979_v11, %v4253_v36  ;;  %v6483_v2 = vadd.f32 %v14220_v0, %v6413_v42  ;;  %v4982_v11 = vadd.f32 %v16663_v37, %v16662_v59  ;;  %v16664_v53 = vld [vmem:[#allocation81_spill] sm:$0xff]  ;;  %v16670_v37 = vld [vmem:[#allocation187_spill] sm:$0xff] }
 0x7e0   :  { %v6416_v60 = vadd.f32 %v6333_v26, %v5849_v46  ;;  %6266 = vmatmul.f32.gmra.mxu0 %v16655_v18  ;;  %v4143_v44 = vadd.f32 %v16661_v48, %v3734_v10  ;;  %v16665_v18 = vld [vmem:[#allocation14_spill] sm:$0xff]  ;;  %7217 = vmatpush.msra.mxu2 %v8658_v14 }
 0x7e1   :  { %v5993_v19 = vpop.f32.mrf.mxu2  ;;  %v5851_v24 = vadd.f32 %v5769_v51, %v5061_v25  ;;  %v6547_v9 = vmax.f32 %v6483_v2, 0.0 }
 0x7e2   :  { %v6486_v16 = vadd.f32 %v14207_v50, %v6416_v60  ;;  %v6106_v62 = vpop.f32.mrf.mxu3  ;;  %v4256_v36 = vadd.f32 %v16666_v57, %v4143_v44  ;;  %v16673_v57 = vld [vmem:[#allocation23_spill] sm:$0xff] }
 0x7e3   :  { %v6107_v34 = vadd.f32 %v6106_v62, %v5993_v19  ;;  %v6693_v10 = vrot.slane %v6547_v9, 2 }
 0x7e4   :  { %v6550_v49 = vmax.f32 %v6486_v16, 0.0  ;;  %v6335_v31 = vpop.f32.mrf.mxu1  ;;  %v5063_v12 = vadd.f32 %v4982_v11, %v4256_v36 }
 0x7e5   :  { %v6222_v3 = vpop.f32.mrf.mxu0  ;;  %v6415_v4 = vadd.f32 %v6107_v34, %v13953_v47 }
 0x7e6   :  { %v6697_v46 = vrot.slane %v6550_v49, 2  ;;  %v6336_v26 = vadd.f32 %v6335_v31, %v6222_v3  ;;  %6043 = vmatmul.f32.gmra.mxu2 %v16665_v18  ;;  %v5853_v31 = vadd.f32 %v5772_v35, %v5063_v12  ;;  %v16668_v3 = vld [vmem:[#allocation86_spill] sm:$0xff] }
 0x7e7   :  { %8609 = vmatmul.msk.f32.gmra.mxu3 %vm3260_vm7, %v16664_v53  ;;  %8642 = vmatmul.msk.f32.gmra.mxu1 %vm3260_vm7, %v16664_v53  ;;  %v6485_v42 = vadd.f32 %v14220_v0, %v6415_v4  ;;  %v16669_v4 = vld [vmem:[#allocation108_spill] sm:$0xff] }
 0x7e8   :  { %v6418_v60 = vadd.f32 %v6336_v26, %v5851_v24  ;;  %6269 = vmatmul.f32.gmra.mxu0 %v16665_v18  ;;  %v6698_v47 = vsel %vm824_vm2, %v6696_v13, %v6697_v46  ;;  %v16667_v24 = vld [vmem:[#allocation16_spill] sm:$0xff] }
 0x7e9   :  { %v14522_v20 = vmax.f32 %v6548_v58, %v6698_v47  ;;  %v6549_v51 = vmax.f32 %v6485_v42, 0.0  ;;  %v5996_v61 = vpop.f32.mrf.mxu2  ;;  %v3737_v13 = vadd.f32 %v16668_v3, %v16667_v24  ;;  %v16672_v47 = vld [vmem:[#allocation241_spill] sm:$0xff] }
 0x7ea   :  { %v6488_v16 = vadd.f32 %v14207_v50, %v6418_v60  ;;  %v6109_v62 = vpop.f32.mrf.mxu3  ;;  %v4985_v36 = vadd.f32 %v16673_v57, %v16672_v47  ;;  %v8657_v3 = vld [vmem:[%s15538_s5 + $0xf8] sm:$0xff]  ;;  %v16683_v57 = vld [vmem:[#allocation182_spill] sm:$0xff] }
 0x7eb   :  { %6945 = vrot.lane.b32.xlu1 %v14522_v20, %s8861_s4  ;;  %v6694_v25 = vrot.slane %v6549_v51, 2  ;;  %v6110_v2 = vadd.f32 %v6109_v62, %v5996_v61  ;;  %v4146_v11 = vadd.f32 %v16670_v37, %v3737_v13  ;;  %v16675_v62 = vld [vmem:[#allocation85_spill] sm:$0xff]  ;;  %7218 = vmatpush.msra.mxu2 %v8657_v3  ;;  %v16680_v37 = vld [vmem:[#allocation188_spill] sm:$0xff]  ;;  %v16688_v3 = vld [vmem:[#allocation191_spill] sm:$0xff] }
 0x7ec   :  { %v6552_v19 = vmax.f32 %v6488_v16, 0.0  ;;  %v6338_v34 = vpop.f32.mrf.mxu1  ;;  %v16674_v16 = vld [vmem:[#allocation109_spill] sm:$0xff] }
 0x7ed   :  { %v6225_v48 = vpop.f32.mrf.mxu0  ;;  %v6417_v40 = vadd.f32 %v6110_v2, %v13965_v22  ;;  %v6695_v44 = vsel %vm824_vm2, %v6693_v10, %v6694_v25  ;;  %v16682_v47 = vld [vmem:[#allocation185_spill] sm:$0xff] }
 0x7ee   :  { %v6701_v33 = vrot.slane %v6552_v19, 2  ;;  %v6339_v58 = vadd.f32 %v6338_v34, %v6225_v48  ;;  %v14535_v26 = vmax.f32 %v6547_v9, %v6695_v44  ;;  %6046 = vmatmul.f32.gmra.mxu2 %v16669_v4  ;;  %v16676_v34 = vld [vmem:[#allocation186_spill] sm:$0xff] }
 0x7ef   :  { %8610 = vmatmul.msk.f32.gmra.mxu3 %vm3260_vm7, %v16669_v4  ;;  %8643 = vmatmul.msk.f32.gmra.mxu1 %vm3260_vm7, %v16669_v4  ;;  %v6487_v14 = vadd.f32 %v14220_v0, %v6417_v40  ;;  %v16677_v40 = vld [vmem:[#allocation190_spill] sm:$0xff] }
 0x7f0   :  { %v6420_v59 = vadd.f32 %v6339_v58, %v5853_v31  ;;  %6272 = vmatmul.f32.gmra.mxu0 %v16669_v4  ;;  %v6702_v22 = vsel %vm824_vm2, %v6697_v46, %v6701_v33  ;;  %v8761_v53 = vpack.i.bf16 %v14535_v26, %v14442_v54  ;;  %v3740_v46 = vadd.f32 %v16675_v62, %v16674_v16  ;;  %v16684_v62 = vld [vmem:[#allocation17_spill] sm:$0xff] }
 0x7f1   :  { %v14544_v42 = vmax.f32 %v6550_v49, %v6702_v22  ;;  %v6551_v60 = vmax.f32 %v6487_v14, 0.0  ;;  %v5999_v35 = vpop.f32.mrf.mxu2  ;;  %v4259_v49 = vadd.f32 %v16676_v34, %v4146_v11  ;;  %v5775_v31 = vadd.f32 %v13971_v29, %v13973_v5  ;;  %v16679_v22 = vld [vmem:[#allocation242_spill] sm:$0xff] }
 0x7f2   :  { %v6490_v9 = vadd.f32 %v14207_v50, %v6420_v59  ;;  %v6112_v18 = vpop.f32.mrf.mxu3  ;;  %v4149_v58 = vadd.f32 %v16677_v40, %v3740_v46  ;;  %v4988_v5 = vadd.f32 %v16680_v37, %v16679_v22  ;;  %v16685_v46 = vld [vmem:[#allocation22_spill] sm:$0xff]  ;;  %v16689_v22 = vld [vmem:[#allocation24_spill] sm:$0xff] }
 0x7f3   :  { %16671 = vst [vmem:[#allocation43_spill] sm:$0xff] %v14544_v42  ;;  %8762 = vrot.lane.b32.xlu1 %v8761_v53, %s8861_s4  ;;  %v6699_v12 = vrot.slane %v6551_v60, 2  ;;  %v6113_v10 = vadd.f32 %v6112_v18, %v5999_v35  ;;  %v5065_v4 = vadd.f32 %v4985_v36, %v4259_v49 }
 0x7f4   :  { %v6554_v61 = vmax.f32 %v6490_v9, 0.0  ;;  %v6341_v2 = vpop.f32.mrf.mxu1  ;;  %v16681_v9 = vld [vmem:[#allocation189_spill] sm:$0xff] }
 0x7f5   :  { %v6228_v48 = vpop.f32.mrf.mxu0  ;;  %v6419_v24 = vadd.f32 %v6113_v10, %v13976_v56  ;;  %v6700_v13 = vsel %vm824_vm2, %v6694_v25, %v6699_v12  ;;  %v5855_v53 = vadd.f32 %v5775_v31, %v5065_v4  ;;  %v4262_v18 = vadd.f32 %v16681_v9, %v4149_v58  ;;  %v16686_v31 = vld [vmem:[#allocation192_spill] sm:$0xff] }
 0x7f6   :  { %v6705_v44 = vrot.slane %v6554_v61, 2  ;;  %v6342_v14 = vadd.f32 %v6341_v2, %v6228_v48  ;;  %v14561_v59 = vmax.f32 %v6549_v51, %v6700_v13  ;;  %v5778_v25 = vadd.f32 %v16683_v57, %v16682_v47  ;;  %v16693_v57 = vld [vmem:[#allocation89_spill] sm:$0xff] }
 0x7f7   :  { %v6489_v29 = vadd.f32 %v14220_v0, %v6419_v24  ;;  %v3743_v61 = vadd.f32 %v16685_v46, %v16684_v62  ;;  %v5067_v10 = vadd.f32 %v4988_v5, %v4262_v18  ;;  %v16687_v24 = vld [vmem:[#allocation243_spill] sm:$0xff]  ;;  %v16690_v5 = vld [vmem:[#allocation110_spill] sm:$0xff] }
 0x7f8   :  { %16678 = vst [vmem:[#allocation44_spill] sm:$0xff] %v14561_v59  ;;  %v6706_v11 = vsel %vm824_vm2, %v6701_v33, %v6705_v44  ;;  %v6422_v16 = vadd.f32 %v6342_v14, %v5855_v53  ;;  %v4991_v13 = vadd.f32 %v16688_v3, %v16687_v24  ;;  %v16692_v53 = vld [vmem:[#allocation59_spill] sm:$0xff]  ;;  %v16695_v46 = vld [vmem:[#allocation194_spill] sm:$0xff] }
 0x7f9   :  { %v14567_v56 = vmax.f32 %v6552_v19, %v6706_v11  ;;  %v6553_v36 = vmax.f32 %v6489_v29, 0.0  ;;  %v6002_v51 = vpop.f32.mrf.mxu2  ;;  %v4152_v19 = vadd.f32 %v16686_v31, %v3743_v61  ;;  %v5857_v48 = vadd.f32 %v5778_v25, %v5067_v10  ;;  %v16691_v11 = vld [vmem:[#allocation26_spill] sm:$0xff] }
 0x7fa   :  { %v6115_v35 = vpop.f32.mrf.mxu3  ;;  %v6492_v58 = vadd.f32 %v14207_v50, %v6422_v16  ;;  %v5781_v9 = vadd.f32 %v16692_v53, %v16691_v11  ;;  %v16694_v25 = vld [vmem:[#allocation18_spill] sm:$0xff] }
 0x7fb   :  { %v6703_v2 = vrot.slane %v6553_v36, 2  ;;  %v6116_v49 = vadd.f32 %v6115_v35, %v6002_v51  ;;  %v4265_v29 = vadd.f32 %v16690_v5, %v4152_v19  ;;  %v3746_v36 = vadd.f32 %v16694_v25, %v16693_v57 }
 0x7fc   :  { %v6344_v34 = vpop.f32.mrf.mxu1 }
 0x7fd   :  { %v6231_v33 = vpop.f32.mrf.mxu0  ;;  %v6704_v44 = vsel %vm824_vm2, %v6699_v12, %v6703_v2  ;;  %v6421_v37 = vadd.f32 %v6116_v49, %v16689_v22  ;;  %v6556_v12 = vmax.f32 %v6492_v58, 0.0  ;;  %v5069_v16 = vadd.f32 %v4991_v13, %v4265_v29  ;;  %v16697_v58 = vld [vmem:[#allocation245_spill] sm:$0xff] }
 0x7fe   :  { %v6345_v40 = vadd.f32 %v6344_v34, %v6231_v33  ;;  %v14579_v14 = vmax.f32 %v6551_v60, %v6704_v44  ;;  %v4155_v61 = vadd.f32 %v16695_v46, %v3746_v36  ;;  %v16696_v33 = vld [vmem:[#allocation60_spill] sm:$0xff]  ;;  %v16700_v29 = vld [vmem:[#allocation193_spill] sm:$0xff] }
 0x7ff   :  { %v6491_v10 = vadd.f32 %v14220_v0, %v6421_v37  ;;  %v5859_v34 = vadd.f32 %v5781_v9, %v5069_v16  ;;  %v16698_v44 = vld [vmem:[#allocation244_spill] sm:$0xff]  ;;  %v16699_v37 = vld [vmem:[#allocation90_spill] sm:$0xff]  ;;  %v5784_v11 = vadd.f32 %v16700_v29, %v14012_v28 }
 0x800   :  { %v6424_v4 = vadd.f32 %v6345_v40, %v5857_v48  ;;  %v8656_v48 = vld [vmem:[%s15538_s5 + $0xf0] sm:$0xff]  ;;  %v6710_v40 = vrot.slane %v6556_v12, 2  ;;  %v4994_v24 = vadd.f32 %v16698_v44, %v16697_v58  ;;  %v4268_v5 = vadd.f32 %v16699_v37, %v4155_v61 }
 0x801   :  { %v6005_v35 = vpop.f32.mrf.mxu2  ;;  %7219 = vmatpush.msra.mxu2 %v8656_v48  ;;  %v16702_v46 = vld [vmem:[#allocation112_spill] sm:$0xff] }
 0x802   :  { %v6494_v18 = vadd.f32 %v14207_v50, %v6424_v4  ;;  %v6118_v47 = vpop.f32.mrf.mxu3  ;;  %v6555_v4 = vmax.f32 %v6491_v10, 0.0  ;;  %v5071_v25 = vadd.f32 %v4994_v24, %v4268_v5 }
 0x803   :  { %v6119_v62 = vadd.f32 %v6118_v47, %v6005_v35 }
 0x804   :  { %v6558_v51 = vmax.f32 %v6494_v18, 0.0  ;;  %v6347_v60 = vpop.f32.mrf.mxu1  ;;  %v5861_v61 = vadd.f32 %v5784_v11, %v5071_v25  ;;  %v16707_v11 = vld [vmem:[#allocation56_spill] sm:$0xff] }
 0x805   :  { %v6234_v2 = vpop.f32.mrf.mxu0  ;;  %v6423_v31 = vadd.f32 %v6119_v62, %v16696_v33 }
 0x806   :  { %v6711_v49 = vrot.slane %v6558_v51, 2  ;;  %v6348_v19 = vadd.f32 %v6347_v60, %v6234_v2  ;;  %v16701_v60 = vld [vmem:[#allocation55_spill] sm:$0xff]  ;;  %v6707_v2 = vrot.slane %v6555_v4, 2 }
 0x807   :  { %v6493_v3 = vadd.f32 %v14220_v0, %v6423_v31  ;;  %v3749_v10 = vadd.f32 %v16702_v46, %v16701_v60 }
 0x808   :  { %v6426_v13 = vadd.f32 %v6348_v19, %v5859_v34  ;;  %v6712_v22 = vsel %vm824_vm2, %v6710_v40, %v6711_v49 }
 0x809   :  { %v6557_v53 = vmax.f32 %v6493_v3, 0.0  ;;  %v6008_v47 = vpop.f32.mrf.mxu2  ;;  %v14602_v57 = vmax.f32 %v6556_v12, %v6712_v22  ;;  %v16703_v12 = vld [vmem:[#allocation111_spill] sm:$0xff] }
 0x80a   :  { %v6496_v9 = vadd.f32 %v14207_v50, %v6426_v13  ;;  %v6121_v18 = vpop.f32.mrf.mxu3  ;;  %v4158_v19 = vadd.f32 %v16703_v12, %v3749_v10  ;;  %v16705_v3 = vld [vmem:[#allocation247_spill] sm:$0xff]  ;;  %v16706_v13 = vld [vmem:[#allocation246_spill] sm:$0xff] }
 0x80b   :  { %v6708_v36 = vrot.slane %v6557_v53, 2  ;;  %v6122_v16 = vadd.f32 %v6121_v18, %v6008_v47  ;;  %6957 = vrot.lane.b32.xlu0 %v14602_v57, %s8861_s4  ;;  %v4997_v22 = vadd.f32 %v16706_v13, %v16705_v3  ;;  %v16709_v47 = vld [vmem:[#allocation67_spill] sm:$0xff]  ;;  %v16714_v3 = vld [vmem:[#allocation248_spill] sm:$0xff] }
 0x80c   :  { %v6560_v35 = vmax.f32 %v6496_v9, 0.0  ;;  %v6350_v62 = vpop.f32.mrf.mxu1  ;;  %v16708_v9 = vld [vmem:[#allocation21_spill] sm:$0xff]  ;;  %v4271_v25 = vadd.f32 %v16709_v47, %v4158_v19  ;;  %v16713_v12 = vld [vmem:[#allocation195_spill] sm:$0xff]  ;;  %v16715_v13 = vld [vmem:[#allocation196_spill] sm:$0xff] }
 0x80d   :  { %v6237_v28 = vpop.f32.mrf.mxu0  ;;  %v6425_v33 = vadd.f32 %v6122_v16, %v14015_v6  ;;  %v6709_v48 = vsel %vm824_vm2, %v6707_v2, %v6708_v36  ;;  %v3752_v18 = vadd.f32 %v16708_v9, %v16707_v11  ;;  %v8655_v19 = vld [vmem:[%s15538_s5 + $0xe8] sm:$0xff] }
 0x80e   :  { %v6715_v34 = vrot.slane %v6560_v35, 2  ;;  %v6351_v31 = vadd.f32 %v6350_v62, %v6237_v28  ;;  %v14612_v44 = vmax.f32 %v6555_v4, %v6709_v48  ;;  %v16710_v62 = vld [vmem:[#allocation25_spill] sm:$0xff]  ;;  %v16711_v4 = vld [vmem:[#allocation63_spill] sm:$0xff]  ;;  %7220 = vmatpush.msra.mxu2 %v8655_v19 }
 0x80f   :  { %v6495_v40 = vadd.f32 %v14220_v0, %v6425_v33  ;;  %v5787_v60 = vadd.f32 %v16711_v4, %v16710_v62  ;;  %v16712_v28 = vld [vmem:[#allocation197_spill] sm:$0xff] }
 0x810   :  { %v6428_v58 = vadd.f32 %v6351_v31, %v5861_v61  ;;  %16704 = vst [vmem:[#allocation143_spill] sm:$0xff] %v14612_v44  ;;  %v6716_v24 = vsel %vm824_vm2, %v6711_v49, %v6715_v34  ;;  %v5073_v61 = vadd.f32 %v4997_v22, %v4271_v25  ;;  %v5000_v22 = vadd.f32 %v16715_v13, %v16714_v3  ;;  %v16717_v25 = vld [vmem:[#allocation64_spill] sm:$0xff]  ;;  %v16723_v3 = vld [vmem:[#allocation249_spill] sm:$0xff] }
 0x811   :  { %v14617_v37 = vmax.f32 %v6558_v51, %v6716_v24  ;;  %v6559_v5 = vmax.f32 %v6495_v40, 0.0  ;;  %v6011_v16 = vpop.f32.mrf.mxu2  ;;  %v4161_v51 = vadd.f32 %v16712_v28, %v3752_v18  ;;  %v16716_v18 = vld [vmem:[#allocation2_spill] sm:$0xff] }
 0x812   :  { %v6498_v6 = vadd.f32 %v14207_v50, %v6428_v58  ;;  %v6124_v29 = vpop.f32.mrf.mxu3 }
 0x813   :  { %v6713_v46 = vrot.slane %v6559_v5, 2  ;;  %v6125_v10 = vadd.f32 %v6124_v29, %v6011_v16  ;;  %6937 = vrot.lane.b32.xlu0 %v14450_v23, %s8861_s4  ;;  %v4274_v47 = vadd.f32 %v16716_v18, %v4161_v51  ;;  %v16718_v16 = vld [vmem:[#allocation28_spill] sm:$0xff]  ;;  %v16725_v18 = vld [vmem:[#allocation198_spill] sm:$0xff] }
 0x814   :  { %v6562_v49 = vmax.f32 %v6498_v6, 0.0  ;;  %v6353_v2 = vpop.f32.mrf.mxu1  ;;  %v5863_v6 = vadd.f32 %v5787_v60, %v5073_v61  ;;  %v5790_v62 = vadd.f32 %v16718_v16, %v16717_v25  ;;  %v16726_v25 = vld [vmem:[#allocation27_spill] sm:$0xff] }
 0x815   :  { %v6240_v33 = vpop.f32.mrf.mxu0  ;;  %v6427_v48 = vadd.f32 %v6125_v10, %v16713_v12  ;;  %v6714_v58 = vsel %vm824_vm2, %v6708_v36, %v6713_v46  ;;  %v16720_v10 = vld [vmem:[#allocation114_spill] sm:$0xff]  ;;  %v16721_v12 = vld [vmem:[#allocation199_spill] sm:$0xff] }
 0x816   :  { %v6719_v31 = vrot.slane %v6562_v49, 2  ;;  %v6354_v40 = vadd.f32 %v6353_v2, %v6240_v33  ;;  %v14633_v24 = vmax.f32 %v6557_v53, %v6714_v58  ;;  %v16719_v53 = vld [vmem:[#allocation115_spill] sm:$0xff]  ;;  %v5075_v33 = vadd.f32 %v5000_v22, %v4274_v47  ;;  %v16722_v58 = vld [vmem:[#allocation250_spill] sm:$0xff] }
 0x817   :  { %v6497_v29 = vadd.f32 %v14220_v0, %v6427_v48  ;;  %v3755_v2 = vadd.f32 %v16720_v10, %v16719_v53  ;;  %v5003_v13 = vadd.f32 %v16723_v3, %v16722_v58  ;;  %v5793_v47 = vadd.f32 %v16725_v18, %v14051_v55  ;;  %v16728_v53 = vld [vmem:[#allocation117_spill] sm:$0xff]  ;;  %v16731_v58 = vld [vmem:[#allocation252_spill] sm:$0xff]  ;;  %v16732_v3 = vld [vmem:[#allocation251_spill] sm:$0xff] }
 0x818   :  { %v6720_v11 = vsel %vm824_vm2, %v6715_v34, %v6719_v31  ;;  %v6430_v36 = vadd.f32 %v6354_v40, %v5863_v6  ;;  %v5865_v51 = vadd.f32 %v5790_v62, %v5075_v33 }
 0x819   :  { %v14639_v9 = vmax.f32 %v6560_v35, %v6720_v11  ;;  %v6561_v4 = vmax.f32 %v6497_v29, 0.0  ;;  %v6014_v28 = vpop.f32.mrf.mxu2  ;;  %v4164_v48 = vadd.f32 %v16721_v12, %v3755_v2  ;;  %v16724_v29 = vld [vmem:[#allocation113_spill] sm:$0xff] }
 0x81a   :  { %v6127_v49 = vpop.f32.mrf.mxu3  ;;  %v6500_v31 = vadd.f32 %v14207_v50, %v6430_v36 }
 0x81b   :  { %v6717_v60 = vrot.slane %v6561_v4, 2  ;;  %v6128_v34 = vadd.f32 %v6127_v49, %v6014_v28  ;;  %6949 = vrot.lane.b32.xlu0 %v14544_v42, %s8861_s4  ;;  %v4277_v11 = vadd.f32 %v16724_v29, %v4164_v48  ;;  %v16727_v49 = vld [vmem:[#allocation118_spill] sm:$0xff] }
 0x81c   :  { %v6356_v61 = vpop.f32.mrf.mxu1  ;;  %v6564_v4 = vmax.f32 %v6500_v31, 0.0 }
 0x81d   :  { %v6243_v35 = vpop.f32.mrf.mxu0  ;;  %v6718_v40 = vsel %vm824_vm2, %v6713_v46, %v6717_v60  ;;  %v6429_v16 = vadd.f32 %v6128_v34, %v16726_v25  ;;  %v3758_v46 = vadd.f32 %v16728_v53, %v16727_v49  ;;  %v5077_v10 = vadd.f32 %v5003_v13, %v4277_v11  ;;  %v16729_v60 = vld [vmem:[#allocation201_spill] sm:$0xff]  ;;  %v16733_v25 = vld [vmem:[#allocation116_spill] sm:$0xff] }
 0x81e   :  { %v6357_v19 = vadd.f32 %v6356_v61, %v6243_v35  ;;  %v14653_v6 = vmax.f32 %v6559_v5, %v6718_v40  ;;  %v6724_v35 = vrot.slane %v6564_v4, 2  ;;  %v8654_v40 = vld [vmem:[%s15538_s5 + $0xe0] sm:$0xff]  ;;  %v5006_v13 = vadd.f32 %v16732_v3, %v16731_v58 }
 0x81f   :  { %v4167_v61 = vadd.f32 %v16729_v60, %v3758_v46  ;;  %v5867_v12 = vadd.f32 %v5793_v47, %v5077_v10  ;;  %v6499_v48 = vadd.f32 %v14220_v0, %v6429_v16  ;;  %7221 = vmatpush.msra.mxu2 %v8654_v40  ;;  %v16738_v58 = vld [vmem:[#allocation202_spill] sm:$0xff] }
 0x820   :  { %v6432_v22 = vadd.f32 %v6357_v19, %v5865_v51  ;;  %v16730_v51 = vld [vmem:[#allocation68_spill] sm:$0xff] }
 0x821   :  { %v6017_v2 = vpop.f32.mrf.mxu2  ;;  %v6563_v18 = vmax.f32 %v6499_v48, 0.0  ;;  %v4280_v16 = vadd.f32 %v16733_v25, %v4167_v61  ;;  %v16736_v48 = vld [vmem:[#allocation120_spill] sm:$0xff] }
 0x822   :  { %v6502_v62 = vadd.f32 %v14207_v50, %v6432_v22  ;;  %v6130_v36 = vpop.f32.mrf.mxu3 }
 0x823   :  { %v6131_v5 = vadd.f32 %v6130_v36, %v6017_v2  ;;  %v5079_v2 = vadd.f32 %v5006_v13, %v4280_v16  ;;  %v6721_v61 = vrot.slane %v6563_v18, 2  ;;  %v16740_v16 = vld [vmem:[#allocation254_spill] sm:$0xff] }
 0x824   :  { %v6566_v28 = vmax.f32 %v6502_v62, 0.0  ;;  %v6359_v33 = vpop.f32.mrf.mxu1  ;;  %v16734_v62 = vld [vmem:[#allocation30_spill] sm:$0xff] }
 0x825   :  { %v6246_v55 = vpop.f32.mrf.mxu0  ;;  %v6431_v31 = vadd.f32 %v6131_v5, %v16730_v51  ;;  %v5796_v36 = vadd.f32 %v16734_v62, %v14064_v39  ;;  %v16741_v62 = vld [vmem:[#allocation253_spill] sm:$0xff] }
 0x826   :  { %v6725_v34 = vrot.slane %v6566_v28, 2  ;;  %v6360_v19 = vadd.f32 %v6359_v33, %v6246_v55 }
 0x827   :  { %v6501_v22 = vadd.f32 %v14220_v0, %v6431_v31  ;;  %v5869_v51 = vadd.f32 %v5796_v36, %v5079_v2  ;;  %v16737_v31 = vld [vmem:[#allocation200_spill] sm:$0xff] }
 0x828   :  { %v6434_v29 = vadd.f32 %v6360_v19, %v5867_v12  ;;  %v6726_v11 = vsel %vm824_vm2, %v6724_v35, %v6725_v34 }
 0x829   :  { %v14672_v47 = vmax.f32 %v6564_v4, %v6726_v11  ;;  %v6565_v49 = vmax.f32 %v6501_v22, 0.0  ;;  %v6020_v10 = vpop.f32.mrf.mxu2  ;;  %v16735_v4 = vld [vmem:[#allocation121_spill] sm:$0xff] }
 0x82a   :  { %v6504_v53 = vadd.f32 %v14207_v50, %v6434_v29  ;;  %v6133_v46 = vpop.f32.mrf.mxu3  ;;  %v3761_v55 = vadd.f32 %v16736_v48, %v16735_v4  ;;  %v16743_v4 = vld [vmem:[#allocation123_spill] sm:$0xff] }
 0x82b   :  { %6969 = vrot.lane.b32.xlu2 %v14672_v47, %s8861_s4  ;;  %v6722_v5 = vrot.slane %v6565_v49, 2  ;;  %v6134_v60 = vadd.f32 %v6133_v46, %v6020_v10 }
 0x82c   :  { %v6568_v33 = vmax.f32 %v6504_v53, 0.0  ;;  %v6362_v12 = vpop.f32.mrf.mxu1  ;;  %v4170_v3 = vadd.f32 %v16738_v58, %v3761_v55  ;;  %v5009_v53 = vadd.f32 %v16741_v62, %v16740_v16  ;;  %v16744_v55 = vld [vmem:[#allocation119_spill] sm:$0xff]  ;;  %v16747_v58 = vld [vmem:[#allocation204_spill] sm:$0xff] }
 0x82d   :  { %v6249_v35 = vpop.f32.mrf.mxu0  ;;  %v6433_v19 = vadd.f32 %v6134_v60, %v16737_v31  ;;  %v6723_v22 = vsel %vm824_vm2, %v6721_v61, %v6722_v5  ;;  %v16748_v16 = vld [vmem:[#allocation72_spill] sm:$0xff] }
 0x82e   :  { %v6729_v39 = vrot.slane %v6568_v33, 2  ;;  %v6363_v40 = vadd.f32 %v6362_v12, %v6249_v35  ;;  %v14686_v11 = vmax.f32 %v6563_v18, %v6723_v22  ;;  %v16742_v12 = vld [vmem:[#allocation124_spill] sm:$0xff]  ;;  %v4283_v18 = vadd.f32 %v16744_v55, %v4170_v3  ;;  %v16745_v35 = vld [vmem:[#allocation71_spill] sm:$0xff]  ;;  %v8653_v3 = vld [vmem:[%s15538_s5 + $0xd8] sm:$0xff] }
 0x82f   :  { %v6503_v13 = vadd.f32 %v14220_v0, %v6433_v19  ;;  %v3764_v48 = vadd.f32 %v16743_v4, %v16742_v12  ;;  %7222 = vmatpush.msra.mxu2 %v8653_v3 }
 0x830   :  { %v6436_v29 = vadd.f32 %v6363_v40, %v5869_v51  ;;  %16739 = vst [vmem:[#allocation146_spill] sm:$0xff] %v14686_v11  ;;  %v6730_v25 = vsel %vm824_vm2, %v6725_v34, %v6729_v39  ;;  %v8766_v60 = vpack.i.bf16 %v14612_v44, %v14686_v11  ;;  %v16746_v34 = vld [vmem:[#allocation29_spill] sm:$0xff] }
 0x831   :  { %v14691_v46 = vmax.f32 %v6566_v28, %v6730_v25  ;;  %v6567_v36 = vmax.f32 %v6503_v13, 0.0  ;;  %v6023_v61 = vpop.f32.mrf.mxu2  ;;  %v5799_v51 = vadd.f32 %v16746_v34, %v16745_v35  ;;  %v4173_v22 = vadd.f32 %v16747_v58, %v3764_v48  ;;  %v16751_v35 = vld [vmem:[#allocation122_spill] sm:$0xff]  ;;  %v16777_v11 = vld [vmem:[#allocation257_spill] sm:$0xff] }
 0x832   :  { %v6506_v10 = vadd.f32 %v14207_v50, %v6436_v29  ;;  %v6136_v2 = vpop.f32.mrf.mxu3  ;;  %v5081_v13 = vadd.f32 %v5009_v53, %v4283_v18 }
 0x833   :  { %v6727_v31 = vrot.slane %v6567_v36, 2  ;;  %v6137_v28 = vadd.f32 %v6136_v2, %v6023_v61  ;;  %8767 = vrot.lane.b32.xlu2 %v8766_v60, %s8861_s4  ;;  %v16749_v2 = vld [vmem:[#allocation255_spill] sm:$0xff]  ;;  %v4286_v34 = vadd.f32 %v16751_v35, %v4173_v22 }
 0x834   :  { %v6570_v19 = vmax.f32 %v6506_v10, 0.0  ;;  %v6365_v40 = vpop.f32.mrf.mxu1  ;;  %v16750_v60 = vld [vmem:[#allocation203_spill] sm:$0xff]  ;;  %v5871_v61 = vadd.f32 %v5799_v51, %v5081_v13 }
 0x835   :  { %v6252_v29 = vpop.f32.mrf.mxu0  ;;  %v6435_v62 = vadd.f32 %v6137_v28, %v16748_v16  ;;  %v6728_v4 = vsel %vm824_vm2, %v6722_v5, %v6727_v31  ;;  %v5012_v55 = vadd.f32 %v16750_v60, %v16749_v2  ;;  %v16753_v28 = vld [vmem:[#allocation32_spill] sm:$0xff]  ;;  %v16755_v16 = vld [vmem:[#allocation126_spill] sm:$0xff]  ;;  %v16757_v35 = vld [vmem:[#allocation79_spill] sm:$0xff] }
 0x836   :  { %v6733_v25 = vrot.slane %v6570_v19, 2  ;;  %v6366_v12 = vadd.f32 %v6365_v40, %v6252_v29  ;;  %v14708_v10 = vmax.f32 %v6565_v49, %v6728_v4  ;;  %v16752_v19 = vld [vmem:[#allocation75_spill] sm:$0xff]  ;;  %v16756_v60 = vld [vmem:[#allocation206_spill] sm:$0xff] }
 0x837   :  { %v6505_v53 = vadd.f32 %v14220_v0, %v6435_v62  ;;  %v5802_v40 = vadd.f32 %v16753_v28, %v16752_v19  ;;  %v16754_v49 = vld [vmem:[#allocation127_spill] sm:$0xff]  ;;  %v5083_v2 = vadd.f32 %v5012_v55, %v4286_v34  ;;  %v16758_v19 = vld [vmem:[#allocation205_spill] sm:$0xff]  ;;  %v16761_v34 = vld [vmem:[#allocation76_spill] sm:$0xff] }
 0x838   :  { %v6734_v48 = vsel %vm824_vm2, %v6729_v39, %v6733_v25  ;;  %v6438_v5 = vadd.f32 %v6366_v12, %v5871_v61  ;;  %v3767_v3 = vadd.f32 %v16755_v16, %v16754_v49  ;;  %v16759_v61 = vld [vmem:[#allocation31_spill] sm:$0xff]  ;;  %v16760_v16 = vld [vmem:[#allocation125_spill] sm:$0xff] }
 0x839   :  { %v14714_v18 = vmax.f32 %v6568_v33, %v6734_v48  ;;  %v6569_v58 = vmax.f32 %v6505_v53, 0.0  ;;  %v6026_v4 = vpop.f32.mrf.mxu2  ;;  %v5873_v25 = vadd.f32 %v5802_v40, %v5083_v2  ;;  %v5015_v53 = vadd.f32 %v16758_v19, %v16757_v35  ;;  %v16763_v2 = vld [vmem:[#allocation130_spill] sm:$0xff] }
 0x83a   :  { %v6139_v29 = vpop.f32.mrf.mxu3  ;;  %v4176_v39 = vadd.f32 %v16756_v60, %v3767_v3  ;;  %v6508_v22 = vadd.f32 %v14207_v50, %v6438_v5 }
 0x83b   :  { %v6731_v51 = vrot.slane %v6569_v58, 2  ;;  %v6140_v13 = vadd.f32 %v6139_v29, %v6026_v4  ;;  %v16762_v58 = vld [vmem:[#allocation34_spill] sm:$0xff] }
 0x83c   :  { %v6368_v62 = vpop.f32.mrf.mxu1  ;;  %v4289_v55 = vadd.f32 %v16760_v16, %v4176_v39  ;;  %v5805_v29 = vadd.f32 %v16762_v58, %v16761_v34  ;;  %v6572_v3 = vmax.f32 %v6508_v22, 0.0  ;;  %v16765_v39 = vld [vmem:[#allocation36_spill] sm:$0xff]  ;;  %v16766_v22 = vld [vmem:[#allocation271_spill] sm:$0xff] }
 0x83d   :  { %v6255_v33 = vpop.f32.mrf.mxu0  ;;  %v6732_v12 = vsel %vm824_vm2, %v6727_v31, %v6731_v51  ;;  %v6437_v28 = vadd.f32 %v6140_v13, %v16759_v61  ;;  %v8652_v34 = vld [vmem:[%s15538_s5 + $0xd0] sm:$0xff] }
 0x83e   :  { %v6369_v48 = vadd.f32 %v6368_v62, %v6255_v33  ;;  %v14730_v4 = vmax.f32 %v6567_v36, %v6732_v12  ;;  %v16764_v62 = vld [vmem:[#allocation129_spill] sm:$0xff]  ;;  %v5085_v33 = vadd.f32 %v5015_v53, %v4289_v55  ;;  %v6738_v36 = vrot.slane %v6572_v3, 2  ;;  %v8660_v53 = vld [vmem:[%s15538_s5 + $0x110] sm:$0xff]  ;;  %v16768_v55 = vld [vmem:[#allocation207_spill] sm:$0xff]  ;;  %7223 = vmatpush.msra.mxu2 %v8652_v34 }
 0x83f   :  { %v3770_v60 = vadd.f32 %v16764_v62, %v16763_v2  ;;  %v6507_v31 = vadd.f32 %v14220_v0, %v6437_v28  ;;  %v16767_v28 = vld [vmem:[#allocation256_spill] sm:$0xff]  ;;  %7251 = vmatpush.msra.mxu3 %v8660_v53 }
 0x840   :  { %v6440_v49 = vadd.f32 %v6369_v48, %v5873_v25  ;;  %v5875_v19 = vadd.f32 %v5805_v29, %v5085_v33  ;;  %v5018_v58 = vadd.f32 %v16768_v55, %v16767_v28  ;;  %v16769_v62 = vld [vmem:[#allocation80_spill] sm:$0xff] }
 0x841   :  { %v6029_v35 = vpop.f32.mrf.mxu2  ;;  %v4179_v48 = vadd.f32 %v16765_v39, %v3770_v60  ;;  %v6571_v29 = vmax.f32 %v6507_v31, 0.0  ;;  %v16770_v33 = vld [vmem:[#allocation272_spill] sm:$0xff] }
 0x842   :  { %v6510_v40 = vadd.f32 %v14207_v50, %v6440_v49  ;;  %v6142_v5 = vpop.f32.mrf.mxu3  ;;  %v16773_v53 = vld [vmem:[#allocation132_spill] sm:$0xff] }
 0x843   :  { %v6143_v13 = vadd.f32 %v6142_v5, %v6029_v35  ;;  %v4292_v60 = vadd.f32 %v16769_v62, %v4179_v48  ;;  %v16771_v35 = vld [vmem:[#allocation33_spill] sm:$0xff]  ;;  %v6735_v31 = vrot.slane %v6571_v29, 2 }
 0x844   :  { %v6574_v51 = vmax.f32 %v6510_v40, 0.0  ;;  %v6371_v25 = vpop.f32.mrf.mxu1  ;;  %v16772_v48 = vld [vmem:[#allocation133_spill] sm:$0xff] }
 0x845   :  { %v6258_v61 = vpop.f32.mrf.mxu0  ;;  %v6439_v16 = vadd.f32 %v6143_v13, %v16766_v22  ;;  %v5808_v13 = vadd.f32 %v16771_v35, %v16770_v33  ;;  %v5087_v28 = vadd.f32 %v5018_v58, %v4292_v60  ;;  %v3773_v55 = vadd.f32 %v16773_v53, %v16772_v48  ;;  %v16775_v60 = vld [vmem:[#allocation131_spill] sm:$0xff] }
 0x846   :  { %v6739_v12 = vrot.slane %v6574_v51, 2  ;;  %v6372_v49 = vadd.f32 %v6371_v25, %v6258_v61  ;;  %v16778_v53 = vld [vmem:[#allocation135_spill] sm:$0xff] }
 0x847   :  { %v6509_v40 = vadd.f32 %v14220_v0, %v6439_v16  ;;  %v5877_v62 = vadd.f32 %v5808_v13, %v5087_v28  ;;  %v4182_v35 = vadd.f32 %v16775_v60, %v3773_v55  ;;  %v8771_v13 = vpack.i.bf16 %v14470_v43, %v14376_v38  ;;  %v16784_v38 = vld [vmem:[#allocation276_spill] sm:$0xff] }
 0x848   :  { %v6442_v5 = vadd.f32 %v6372_v49, %v5875_v19  ;;  %v6740_v2 = vsel %vm824_vm2, %v6738_v36, %v6739_v12 }
 0x849   :  { %v14751_v25 = vmax.f32 %v6572_v3, %v6740_v2  ;;  %v6573_v39 = vmax.f32 %v6509_v40, 0.0  ;;  %v6032_v34 = vpop.f32.mrf.mxu2  ;;  %v16774_v40 = vld [vmem:[#allocation273_spill] sm:$0xff] }
 0x84a   :  { %v6512_v61 = vadd.f32 %v14207_v50, %v6442_v5  ;;  %v6145_v22 = vpop.f32.mrf.mxu3 }
 0x84b   :  { %6981 = vrot.lane.b32.xlu1 %v14751_v25, %s8861_s4  ;;  %v6736_v19 = vrot.slane %v6573_v39, 2  ;;  %v6146_v36 = vadd.f32 %v6145_v22, %v6032_v34  ;;  %v16776_v34 = vld [vmem:[#allocation258_spill] sm:$0xff] }
 0x84c   :  { %v6576_v16 = vmax.f32 %v6512_v61, 0.0  ;;  %v6374_v49 = vpop.f32.mrf.mxu1  ;;  %v5021_v48 = vadd.f32 %v16777_v11, %v16776_v34 }
 0x84d   :  { %v6261_v3 = vpop.f32.mrf.mxu0  ;;  %v6441_v33 = vadd.f32 %v6146_v36, %v16774_v40  ;;  %v6737_v58 = vsel %vm824_vm2, %v6735_v31, %v6736_v19 }
 0x84e   :  { %v6743_v2 = vrot.slane %v6576_v16, 2  ;;  %v6375_v5 = vadd.f32 %v6374_v49, %v6261_v3  ;;  %v14761_v42 = vmax.f32 %v6571_v29, %v6737_v58  ;;  %v16779_v29 = vld [vmem:[#allocation134_spill] sm:$0xff]  ;;  %v16780_v3 = vld [vmem:[#allocation128_spill] sm:$0xff] }
 0x84f   :  { %v6511_v23 = vadd.f32 %v14220_v0, %v6441_v33  ;;  %v3776_v55 = vadd.f32 %v16779_v29, %v16778_v53  ;;  %v4295_v40 = vadd.f32 %v16780_v3, %v4182_v35  ;;  %v16782_v33 = vld [vmem:[#allocation274_spill] sm:$0xff]  ;;  %v8651_v35 = vld [vmem:[%s15538_s5 + $0xc8] sm:$0xff] }
 0x850   :  { %v6444_v61 = vadd.f32 %v6375_v5, %v5877_v62  ;;  %v6744_v22 = vsel %vm824_vm2, %v6739_v12, %v6743_v2  ;;  %v16781_v12 = vld [vmem:[#allocation275_spill] sm:$0xff]  ;;  %7224 = vmatpush.msra.mxu2 %v8651_v35 }
 0x851   :  { %v14769_v28 = vmax.f32 %v6574_v51, %v6744_v22  ;;  %v6575_v36 = vmax.f32 %v6511_v23, 0.0  ;;  %v6035_v62 = vpop.f32.mrf.mxu2  ;;  %v5811_v11 = vadd.f32 %v16782_v33, %v16781_v12  ;;  %v16783_v22 = vld [vmem:[#allocation210_spill] sm:$0xff]  ;;  %v5089_v34 = vadd.f32 %v5021_v48, %v4295_v40 }
 0x852   :  { %v6514_v31 = vadd.f32 %v14207_v50, %v6444_v61  ;;  %v6148_v49 = vpop.f32.mrf.mxu3  ;;  %v4185_v23 = vadd.f32 %v16783_v22, %v3776_v55  ;;  %v16787_v40 = vld [vmem:[#allocation138_spill] sm:$0xff]  ;;  %v8776_v33 = vpack.i.bf16 %v14561_v59, %v14285_v15  ;;  %v16798_v59 = vld [vmem:[#allocation84_spill] sm:$0xff] }
 0x853   :  { %8772 = vrot.lane.b32.xlu1 %v8771_v13, %s8861_s4  ;;  %v6741_v5 = vrot.slane %v6575_v36, 2  ;;  %v6149_v60 = vadd.f32 %v6148_v49, %v6035_v62  ;;  %v16786_v49 = vld [vmem:[#allocation208_spill] sm:$0xff]  ;;  %v5879_v62 = vadd.f32 %v5811_v11, %v5089_v34 }
 0x854   :  { %v6578_v58 = vmax.f32 %v6514_v31, 0.0  ;;  %v6377_v51 = vpop.f32.mrf.mxu1  ;;  %v16785_v31 = vld [vmem:[#allocation259_spill] sm:$0xff] }
 0x855   :  { %v6264_v61 = vpop.f32.mrf.mxu0  ;;  %v6443_v44 = vadd.f32 %v6149_v60, %v16784_v38  ;;  %v6742_v13 = vsel %vm824_vm2, %v6736_v19, %v6741_v5  ;;  %v5024_v3 = vadd.f32 %v16786_v49, %v16785_v31  ;;  %v16788_v38 = vld [vmem:[#allocation137_spill] sm:$0xff] }
 0x856   :  { %v6747_v43 = vrot.slane %v6578_v58, 2  ;;  %v6378_v53 = vadd.f32 %v6377_v51, %v6264_v61  ;;  %v14784_v29 = vmax.f32 %v6573_v39, %v6742_v13  ;;  %v3779_v12 = vadd.f32 %v16788_v38, %v16787_v40  ;;  %v16790_v19 = vld [vmem:[#allocation209_spill] sm:$0xff]  ;;  %v16791_v39 = vld [vmem:[#allocation83_spill] sm:$0xff]  ;;  %v16794_v38 = vld [vmem:[#allocation260_spill] sm:$0xff] }
 0x857   :  { %v6513_v48 = vadd.f32 %v14220_v0, %v6443_v44  ;;  %v4298_v60 = vadd.f32 %v16790_v19, %v4185_v23  ;;  %v16792_v51 = vld [vmem:[#allocation35_spill] sm:$0xff] }
 0x858   :  { %v6748_v55 = vsel %vm824_vm2, %v6743_v2, %v6747_v43  ;;  %v5814_v22 = vadd.f32 %v16792_v51, %v16791_v39  ;;  %v6446_v35 = vadd.f32 %v6378_v53, %v5879_v62  ;;  %v16793_v43 = vld [vmem:[#allocation211_spill] sm:$0xff]  ;;  %v16796_v62 = vld [vmem:[#allocation136_spill] sm:$0xff] }
 0x859   :  { %v14794_v58 = vmax.f32 %v6576_v16, %v6748_v55  ;;  %v6577_v61 = vmax.f32 %v6513_v48, 0.0  ;;  %v6038_v34 = vpop.f32.mrf.mxu2  ;;  %v4188_v44 = vadd.f32 %v16793_v43, %v3779_v12  ;;  %v5091_v2 = vadd.f32 %v5024_v3, %v4298_v60  ;;  %v16795_v19 = vld [vmem:[#allocation87_spill] sm:$0xff]  ;;  %v16799_v3 = vld [vmem:[#allocation277_spill] sm:$0xff] }
 0x85a   :  { %v6151_v11 = vpop.f32.mrf.mxu3  ;;  %v6516_v55 = vadd.f32 %v14207_v50, %v6446_v35  ;;  %v5027_v39 = vadd.f32 %v16795_v19, %v16794_v38  ;;  %v16800_v43 = vld [vmem:[#allocation141_spill] sm:$0xff] }
 0x85b   :  { %16789 = vst [vmem:[#allocation262_spill] sm:$0xff] %v14794_v58  ;;  %8777 = vrot.lane.b32.xlu1 %v8776_v33, %s8861_s4  ;;  %v6745_v13 = vrot.slane %v6577_v61, 2  ;;  %v6152_v49 = vadd.f32 %v6151_v11, %v6038_v34  ;;  %v5881_v16 = vadd.f32 %v5814_v22, %v5091_v2  ;;  %v4301_v48 = vadd.f32 %v16796_v62, %v4188_v44  ;;  %v16797_v33 = vld [vmem:[#allocation38_spill] sm:$0xff]  ;;  %v16801_v2 = vld [vmem:[#allocation140_spill] sm:$0xff] }
 0x85c   :  { %v6380_v31 = vpop.f32.mrf.mxu1  ;;  %v5817_v12 = vadd.f32 %v16798_v59, %v16797_v33  ;;  %v8781_v61 = vpack.i.bf16 %v14708_v10, %v14633_v24  ;;  %v6580_v35 = vmax.f32 %v6516_v55, 0.0  ;;  %v16805_v33 = vld [vmem:[#allocation212_spill] sm:$0xff] }
 0x85d   :  { %v6267_v40 = vpop.f32.mrf.mxu0  ;;  %v6746_v53 = vsel %vm824_vm2, %v6741_v5, %v6745_v13  ;;  %v6445_v60 = vadd.f32 %v6152_v49, %v16799_v3  ;;  %v3782_v5 = vadd.f32 %v16801_v2, %v16800_v43  ;;  %v5093_v13 = vadd.f32 %v5027_v39, %v4301_v48  ;;  %v8650_v49 = vld [vmem:[%s15538_s5 + $0xc0] sm:$0xff] }
 0x85e   :  { %v6381_v23 = vadd.f32 %v6380_v31, %v6267_v40  ;;  %v14811_v22 = vmax.f32 %v6575_v36, %v6746_v53  ;;  %v16802_v36 = vld [vmem:[#allocation88_spill] sm:$0xff]  ;;  %7225 = vmatpush.msra.mxu2 %v8650_v49  ;;  %v6752_v19 = vrot.slane %v6580_v35, 2  ;;  %v16803_v39 = vld [vmem:[#allocation278_spill] sm:$0xff] }
 0x85f   :  { %v5883_v55 = vadd.f32 %v5817_v12, %v5093_v13  ;;  %v16806_v12 = vld [vmem:[#allocation139_spill] sm:$0xff] }
 0x860   :  { %v6448_v51 = vadd.f32 %v6381_v23, %v5881_v16  ;;  %v4191_v16 = vadd.f32 %v16802_v36, %v3782_v5  ;;  %v6515_v23 = vadd.f32 %v14220_v0, %v6445_v60  ;;  %v16807_v5 = vld [vmem:[#allocation280_spill] sm:$0xff]  ;;  %v16808_v13 = vld [vmem:[#allocation279_spill] sm:$0xff] }
 0x861   :  { %v6041_v44 = vpop.f32.mrf.mxu2 }
 0x862   :  { %v6518_v11 = vadd.f32 %v14207_v50, %v6448_v51  ;;  %v6154_v34 = vpop.f32.mrf.mxu3  ;;  %v16804_v51 = vld [vmem:[#allocation261_spill] sm:$0xff]  ;;  %v6579_v43 = vmax.f32 %v6515_v23, 0.0  ;;  %v4304_v60 = vadd.f32 %v16806_v12, %v4191_v16 }
 0x863   :  { %8782 = vrot.lane.b32.xlu1 %v8781_v61, %s8861_s4  ;;  %v6155_v59 = vadd.f32 %v6154_v34, %v6041_v44  ;;  %v5030_v3 = vadd.f32 %v16805_v33, %v16804_v51  ;;  %v5820_v44 = vadd.f32 %v16808_v13, %v16807_v5  ;;  %v16809_v33 = vld [vmem:[#allocation92_spill] sm:$0xff] }
 0x864   :  { %v6582_v31 = vmax.f32 %v6518_v11, 0.0  ;;  %v6383_v40 = vpop.f32.mrf.mxu1  ;;  %v6749_v23 = vrot.slane %v6579_v43, 2 }
 0x865   :  { %v6270_v38 = vpop.f32.mrf.mxu0  ;;  %v6447_v62 = vadd.f32 %v6155_v59, %v16803_v39 }
 0x866   :  { %v6753_v53 = vrot.slane %v6582_v31, 2  ;;  %v6384_v48 = vadd.f32 %v6383_v40, %v6270_v38  ;;  %v5095_v38 = vadd.f32 %v5030_v3, %v4304_v60 }
 0x867   :  { %v6517_v61 = vadd.f32 %v14220_v0, %v6447_v62 }
 0x868   :  { %v6450_v11 = vadd.f32 %v6384_v48, %v5883_v55  ;;  %v6754_v34 = vsel %vm824_vm2, %v6752_v19, %v6753_v53  ;;  %v5885_v48 = vadd.f32 %v5820_v44, %v5095_v38 }
 0x869   :  { %v14827_v2 = vmax.f32 %v6580_v35, %v6754_v34  ;;  %v6581_v49 = vmax.f32 %v6517_v61, 0.0  ;;  %v6044_v36 = vpop.f32.mrf.mxu2 }
 0x86a   :  { %v6520_v59 = vadd.f32 %v14207_v50, %v6450_v11  ;;  %v6157_v40 = vpop.f32.mrf.mxu3 }
 0x86b   :  { %6993 = vrot.lane.b32.xlu2 %v14827_v2, %s8861_s4  ;;  %v6750_v55 = vrot.slane %v6581_v49, 2  ;;  %v6158_v35 = vadd.f32 %v6157_v40, %v6044_v36 }
 0x86c   :  { %v6584_v39 = vmax.f32 %v6520_v59, 0.0  ;;  %v6386_v19 = vpop.f32.mrf.mxu1 }
 0x86d   :  { %v6273_v62 = vpop.f32.mrf.mxu0  ;;  %v6449_v34 = vadd.f32 %v6158_v35, %v16809_v33  ;;  %v6751_v61 = vsel %vm824_vm2, %v6749_v23, %v6750_v55 }
 0x86e   :  { %v6757_v16 = vrot.slane %v6584_v39, 2  ;;  %v6387_v51 = vadd.f32 %v6386_v19, %v6273_v62  ;;  %v14837_v12 = vmax.f32 %v6579_v43, %v6751_v61  ;;  %v16810_v19 = vld [vmem:[#allocation39_spill] sm:$0xff] }
 0x86f   :  { %v6519_v3 = vadd.f32 %v14220_v0, %v6449_v34 }
 0x870   :  { %v6452_v11 = vadd.f32 %v6387_v51, %v5885_v48  ;;  %v6758_v5 = vsel %vm824_vm2, %v6753_v53, %v6757_v16  ;;  %v8786_v44 = vpack.i.bf16 %v14837_v12, %v14761_v42 }
 0x871   :  { %v14841_v60 = vmax.f32 %v6582_v31, %v6758_v5  ;;  %v6583_v40 = vmax.f32 %v6519_v3, 0.0  ;;  %v6047_v36 = vpop.f32.mrf.mxu2  ;;  %v8649_v31 = vld [vmem:[%s15538_s5 + $0xb8] sm:$0xff]  ;;  %v8647_v5 = vld [vmem:[%s15538_s5 + $0xa8] sm:$0xff]  ;;  %v8806_v3 = vpack.i.bf16 %v14730_v4, %v14653_v6 }
 0x872   :  { %v6522_v13 = vadd.f32 %v14207_v50, %v6452_v11  ;;  %v6160_v59 = vpop.f32.mrf.mxu3  ;;  %8787 = vrot.lane.b32.xlu0 %v8786_v44, %s8861_s4  ;;  %7226 = vmatpush.msra.mxu2 %v8649_v31  ;;  %v14909_v44 = vpop.permute.xlu1 %6909  ;;  %v8645_v31 = vld [vmem:[%s15538_s5 + $0x98] sm:$0xff] }
 0x873   :  { %6925 = vrot.lane.b32.xlu2 %v14358_v8, %s8861_s4  ;;  %v6161_v43 = vadd.f32 %v6160_v59, %v6047_v36  ;;  %v6755_v53 = vrot.slane %v6583_v40, 2  ;;  %v8646_v59 = vld [vmem:[%s15538_s5 + $0xa0] sm:$0xff] }
 0x874   :  { %v6586_v38 = vmax.f32 %v6522_v13, 0.0 }
 0x875   :  { %v6451_v23 = vadd.f32 %v6161_v43, %v16810_v19  ;;  %v6756_v35 = vsel %vm824_vm2, %v6750_v55, %v6755_v53  ;;  %v8644_v19 = vld [vmem:[%s15538_s5 + $0x90] sm:$0xff] }
 0x876   :  { %v6761_v50 = vrot.slane %v6586_v38, 2  ;;  %v14855_v48 = vmax.f32 %v6581_v49, %v6756_v35  ;;  %v14919_v38 = vpop.permute.xlu0 %8757 }
 0x877   :  { %v6521_v62 = vadd.f32 %v14220_v0, %v6451_v23  ;;  %v8648_v0 = vld [vmem:[%s15538_s5 + $0xb0] sm:$0xff]  ;;  %v7139_v23 = vld [vmem:[%s15538_s5 + $0x78] sm:$0xff] }
 0x878   :  { %v6762_v51 = vsel %vm824_vm2, %v6757_v16, %v6761_v50  ;;  %v8791_v61 = vpack.i.bf16 %v14855_v48, %v14784_v29  ;;  %7227 = vmatpush.msra.mxu2 %v8648_v0  ;;  %v8801_v16 = vpack.i.bf16 %v14579_v14, %v14307_v27  ;;  %v7140_v50 = vld [vmem:[%s15538_s5 + $0x80] sm:$0xff] }
 0x879   :  { %v14858_v33 = vmax.f32 %v6584_v39, %v6762_v51  ;;  %v6585_v34 = vmax.f32 %v6521_v62, 0.0  ;;  %v8796_v39 = vpack.i.bf16 %v14492_v63, %v14398_v21 }
 0x87a   :  { %8792 = vrot.lane.b32.xlu1 %v8791_v61, %s8861_s4  ;;  %6973 = vrot.lane.b32.xlu0 %v14691_v46, %s8861_s4  ;;  %v14917_v36 = vpop.permute.xlu1 %6945  ;;  %v7137_v61 = vld [vmem:[%s15538_s5 + $0x68] sm:$0xff] }
 0x87b   :  { %6913 = vrot.lane.b32.xlu2 %v14268_v30, %s8861_s4  ;;  %v6759_v11 = vrot.slane %v6585_v34, 2  ;;  %7228 = vmatpush.msra.mxu2 %v8647_v5  ;;  %v7138_v34 = vld [vmem:[%s15538_s5 + $0x70] sm:$0xff]  ;;  %v7136_v5 = vld [vmem:[%s15538_s5 + $0x60] sm:$0xff] }
 0x87d   :  { %v6760_v49 = vsel %vm824_vm2, %v6755_v53, %v6759_v11  ;;  %7229 = vmatpush.msra.mxu2 %v8646_v59  ;;  %v7141_v53 = vld [vmem:[%s15538_s5 + $0x88] sm:$0xff]  ;;  %v7135_v59 = vld [vmem:[%s15538_s5 + $0x58] sm:$0xff]  ;;  %vm7697_vm2 = vcmask 687104  }
 0x87e   :  { %v14871_v55 = vmax.f32 %v6583_v40, %v6760_v49  ;;  %v14913_v40 = vpop.permute.xlu2 %6921  ;;  %7321 = vmatpush.msrb.mxu3 %v7141_v53  ;;  %v14940_v62 = vpop.permute.xlu0 %6933  ;;  %v16811_v49 = vld [vmem:[#allocation144_spill] sm:$0xff] }
 0x87f   :  { %7230 = vmatpush.msra.mxu2 %v8645_v31  ;;  %v7083_v51 = vmax.f32 %v14334_v52, %v14913_v40  ;;  %v7089_v11 = vmax.f32 %v14428_v32, %v14940_v62  ;;  %v7095_v52 = vmax.f32 %v14522_v20, %v14917_v36 }
 0x880   :  { %v8811_v13 = vpack.i.bf16 %v14871_v55, %v14811_v22  ;;  %7322 = vmatpush.msrb.mxu3 %v7140_v50 }
 0x881   :  { %7231 = vmatpush.msra.mxu2 %v8644_v19  ;;  %v7201_v20 = vrot.slane %v7089_v11, 2  ;;  %v7203_v50 = vrot.slane %v7095_v52, 1 }
 0x882   :  { %8797 = vrot.lane.b32.xlu1 %v8796_v39, %s8861_s4  ;;  %6997 = vrot.lane.b32.xlu0 %v14841_v60, %s8861_s4  ;;  %v14938_v35 = vpop.permute.xlu1 %8762  ;;  %v7077_v39 = vmax.f32 %v16811_v49, %v14909_v44 }
 0x883   :  { %6961 = vrot.lane.b32.xlu2 %v14617_v37, %s8861_s4  ;;  %7287 = vmatpush.msrb.mxu2 %v7139_v23 }
 0x884   :  { %v7198_v53 = vrot.slane %v7077_v39, 4 }
 0x885   :  { %7288 = vmatpush.msrb.mxu2 %v7138_v34 }
 0x886   :  { %v14921_v43 = vpop.permute.xlu2 %6969 }
 0x887   :  { %7289 = vmatpush.msrb.mxu2 %v7137_v61  ;;  %v14967_v32 = vmax.f32 %v14672_v47, %v14921_v43  ;;  %v7134_v47 = vld [vmem:[%s15538_s5 + $0x50] sm:$0xff] }
 0x889   :  { %7290 = vmatpush.msrb.mxu2 %v7136_v5  ;;  %v7206_v34 = vrot.slane %v14967_v32, 7 }
 0x88a   :  { %8802 = vrot.lane.b32.xlu1 %v8801_v16, %s8861_s4  ;;  %6941 = vrot.lane.b32.xlu0 %v14476_v17, %s8861_s4 }
 0x88b   :  { %6985 = vrot.lane.b32.xlu2 %v14769_v28, %s8861_s4  ;;  %7291 = vmatpush.msrb.mxu2 %v7135_v59  ;;  %v7132_v59 = vld [vmem:[%s15538_s5 + $0x40] sm:$0xff] }
 0x88d   :  { %7292 = vmatpush.msrb.mxu2 %v7134_v47  ;;  %v7272_v47 = vrot.slane %v7089_v11, 6 }
 0x88e   :  { %v14952_v0 = vpop.permute.xlu2 %8767 }
 0x892   :  { %8807 = vrot.lane.b32.xlu1 %v8806_v3, %s8861_s4  ;;  %6953 = vrot.lane.b32.xlu0 %v14567_v56, %s8861_s4  ;;  %v7199_v3 = vrot.slane %v7083_v51, 3 }
 0x893   :  { %6929 = vrot.lane.b32.xlu2 %v14382_v7, %s8861_s4 }
 0x894   :  { %v7200_v23 = vsel %vm7179_vm8, %v7199_v3, %v7198_v53 }
 0x895   :  { %v7202_v61 = vsel %vm7182_vm9, %v7201_v20, %v7200_v23  ;;  %v7270_v20 = vrot.slane %v7083_v51, 7 }
 0x897   :  { %v7271_v11 = vsel %vm7179_vm8, %v7270_v20, %v7077_v39  ;;  %v8677_v39 = vld [vmem:[%s15538_s5 + $0x188] sm:$0xff] }
 0x89a   :  { %6977 = vrot.lane.b32.xlu0 %v14714_v18, %s8861_s4  ;;  %8812 = vrot.lane.b32.xlu1 %v8811_v13, %s8861_s4  ;;  %v14963_v13 = vpop.permute.xlu0 %6957 }
 0x89b   :  { %6917 = vrot.lane.b32.xlu2 %v14291_v41, %s8861_s4  ;;  %v7101_v19 = vmax.f32 %v14602_v57, %v14963_v13  ;;  %v7204_v57 = vsel %vm7185_vm10, %v7203_v50, %v7202_v61  ;;  %v7131_v50 = vld [vmem:[%s15538_s5 + $0x38] sm:$0xff] }
 0x89c   :  { %v8679_v61 = vld [vmem:[%s15538_s5 + $0x198] sm:$0xff] }
 0x89d   :  { %v7205_v53 = vsel %vm7187_vm11, %v7101_v19, %v7204_v57  ;;  %v7274_v57 = vrot.slane %v7095_v52, 5  ;;  %v7276_v51 = vrot.slane %v7101_v19, 4  ;;  %v7273_v52 = vsel %vm7182_vm9, %v7272_v47, %v7271_v11  ;;  %v8674_v11 = vld [vmem:[%s15538_s5 + $0x170] sm:$0xff] }
 0x89e   :  { %v7207_v23 = vsel %vm7190_vm12, %v7206_v34, %v7205_v53  ;;  %v8678_v34 = vld [vmem:[%s15538_s5 + $0x190] sm:$0xff] }
 0x8a2   :  { %7001 = vrot.lane.b32.xlu0 %v14858_v33, %s8861_s4 }
 0x8a3   :  { %6965 = vrot.lane.b32.xlu2 %v14639_v9, %s8861_s4 }
 0x8ab   :  { %6989 = vrot.lane.b32.xlu2 %v14794_v58, %s8861_s4 }
 0x8bd   :  { %v14958_v16 = vpop.permute.xlu1 %6981 }
 0x8be   :  { %v7113_v31 = vmax.f32 %v14751_v25, %v14958_v16  ;;  %v7133_v25 = vld [vmem:[%s15538_s5 + $0x48] sm:$0xff] }
 0x8bf   :  { %7293 = vmatpush.msrb.mxu2 %v7133_v25 }
 0x8c0   :  { %v7208_v49 = vrot.slane %v7113_v31, 6  ;;  %v7280_v19 = vrot.slane %v7113_v31, 2  ;;  %v8676_v31 = vld [vmem:[%s15538_s5 + $0x180] sm:$0xff] }
 0x8c1   :  { %7294 = vmatpush.msrb.mxu2 %v7132_v59  ;;  %v7130_v59 = vld [vmem:[%s15538_s5 + $0x30] sm:$0xff] }
 0x8c3   :  { %7295 = vmatpush.msrb.mxu2 %v7131_v50 }
 0x8c5   :  { %v14985_v5 = vpop.permute.xlu2 %6993  ;;  %7296 = vmatpush.msrb.mxu2 %v7130_v59  ;;  %v15047_v59 = vpop.permute.xlu0 %6937 }
 0x8c6   :  { %v7119_v3 = vmax.f32 %v14827_v2, %v14985_v5  ;;  %v7209_v2 = vsel %vm7193_vm13, %v7208_v49, %v7207_v23  ;;  %v7278_v49 = vrot.slane %v14967_v32, 3  ;;  %v7275_v32 = vsel %vm7185_vm10, %v7274_v57, %v7273_v52  ;;  %v7128_v23 = vld [vmem:[%s15538_s5 + $0x20] sm:$0xff] }
 0x8c7   :  { %v7277_v50 = vsel %vm7187_vm11, %v7276_v51, %v7275_v32  ;;  %v8760_v51 = vunpack.i.h.bf16 %v14919_v38 }
 0x8c8   :  { %v7210_v58 = vrot.slane %v7119_v3, 5  ;;  %v7282_v20 = vrot.slane %v7119_v3, 1  ;;  %v7279_v47 = vsel %vm7190_vm12, %v7278_v49, %v7277_v50  ;;  %v8764_v49 = vunpack.i.l.bf16 %v14938_v35  ;;  %v8672_v50 = vld [vmem:[%s15538_s5 + $0x160] sm:$0xff] }
 0x8c9   :  { %v7281_v3 = vsel %vm7193_vm13, %v7280_v19, %v7279_v47  ;;  %v7125_v19 = vld [vmem:[%s15538_s5 + $0x8] sm:$0xff]  ;;  %v7007_v32 = vsel %vm7003_vm0, %v8760_v51, %v14913_v40  ;;  %v8671_v47 = vld [vmem:[%s15538_s5 + $0x158] sm:$0xff] }
 0x8ca   :  { %v7211_v25 = vsel %vm7196_vm14, %v7210_v58, %v7209_v2  ;;  %v7129_v58 = vld [vmem:[%s15538_s5 + $0x28] sm:$0xff]  ;;  %v7127_v2 = vld [vmem:[%s15538_s5 + $0x18] sm:$0xff]  ;;  %v7283_v57 = vsel %vm7196_vm14, %v7282_v20, %v7281_v3  ;;  %v7082_v40 = vmax.f32 %v14348_v1, %v7007_v32 }
 0x8cb   :  { %8662 = vmatmul.msk.f32.vlgmr.msra.gmra.mxu3 %vm7213_vm15, %v7211_v25  ;;  %7297 = vmatpush.msrb.mxu2 %v7129_v58  ;;  %v15038_v25 = vpop.permute.xlu1 %8772  ;;  %v7126_v58 = vld [vmem:[%s15538_s5 + $0x10] sm:$0xff] }
 0x8cc   :  { %7393 = vmatpush.msra.mxu3 %v8679_v61  ;;  %v8675_v61 = vld [vmem:[%s15538_s5 + $0x178] sm:$0xff] }
 0x8cd   :  { %v15016_v53 = vpop.permute.xlu2 %6925  ;;  %7298 = vmatpush.msrb.mxu2 %v7128_v23  ;;  %v8765_v23 = vunpack.i.h.bf16 %v14938_v35 }
 0x8ce   :  { %7394 = vmatpush.msra.mxu3 %v8678_v34  ;;  %v8759_v34 = vunpack.i.l.bf16 %v14919_v38  ;;  %v8673_v38 = vld [vmem:[%s15538_s5 + $0x168] sm:$0xff] }
 0x8cf   :  { %7299 = vmatpush.msrb.mxu2 %v7127_v2  ;;  %v7013_v35 = vsel %vm7003_vm0, %v8765_v23, %v14917_v36  ;;  %v7178_v36 = vrot.slane %v7082_v40, 3  ;;  %v8666_v23 = vld [vmem:[%s15538_s5 + $0x130] sm:$0xff] }
 0x8d0   :  { %7395 = vmatpush.msra.mxu3 %v8677_v39  ;;  %v7124_v39 = vld [vmem:[%s15538_s5] sm:$0xff]  ;;  %v7004_v20 = vsel %vm7003_vm0, %v8759_v34, %v14909_v44  ;;  %v15094_v34 = vpop.permute.xlu0 %6949 }
 0x8d1   :  { %7300 = vmatpush.msrb.mxu2 %v7126_v58  ;;  %v7076_v44 = vmax.f32 %v14260_v45, %v7004_v20  ;;  %v8669_v45 = vld [vmem:[%s15538_s5 + $0x148] sm:$0xff] }
 0x8d2   :  { %7396 = vmatpush.msra.mxu3 %v8676_v31  ;;  %v7010_v31 = vsel %vm7003_vm0, %v8764_v49, %v14940_v62  ;;  %v8670_v62 = vld [vmem:[%s15538_s5 + $0x150] sm:$0xff]  ;;  %v8668_v49 = vld [vmem:[%s15538_s5 + $0x140] sm:$0xff] }
 0x8d3   :  { %8663 = vmatmul.msk.f32.vlgmr.msrb.gmra.mxu3 %vm7213_vm15, %v7283_v57  ;;  %7301 = vmatpush.msrb.mxu2 %v7125_v19  ;;  %v7088_v2 = vmax.f32 %v14442_v54, %v7010_v31  ;;  %v15084_v3 = vpop.permute.xlu1 %8777  ;;  %v8769_v57 = vunpack.i.l.bf16 %v14952_v0  ;;  %v7177_v51 = vrot.slane %v7076_v44, 4  ;;  %v7094_v54 = vmax.f32 %v14535_v26, %v7013_v35  ;;  %v8667_v26 = vld [vmem:[%s15538_s5 + $0x138] sm:$0xff]  ;;  %v16813_v31 = vld [vmem:[#allocation146_spill] sm:$0xff] }
 0x8d4   :  { %7397 = vmatpush.msra.mxu3 %v8675_v61  ;;  %v8770_v61 = vunpack.i.h.bf16 %v14952_v0  ;;  %v7256_v0 = vrot.slane %v7082_v40, 7  ;;  %v8774_v40 = vunpack.i.l.bf16 %v15038_v25 }
 0x8d5   :  { %v15052_v52 = vpop.permute.xlu2 %6913  ;;  %7302 = vmatpush.msrb.mxu2 %v7124_v39  ;;  %v7180_v19 = vsel %vm7179_vm8, %v7178_v36, %v7177_v51  ;;  %v7184_v39 = vrot.slane %v7094_v54, 1  ;;  %v7258_v32 = vrot.slane %v7088_v2, 6 }
 0x8d6   :  { %7398 = vmatpush.msra.mxu3 %v8674_v11  ;;  %v7181_v11 = vrot.slane %v7088_v2, 2  ;;  %v7016_v58 = vsel %vm7003_vm0, %v8770_v61, %v14963_v13  ;;  %v7257_v35 = vsel %vm7179_vm8, %v7256_v0, %v7076_v44  ;;  %v7260_v2 = vrot.slane %v7094_v54, 5 }
 0x8d7   :  { %v7008_v51 = vsel %vm7003_vm0, %v8774_v40, %v15016_v53  ;;  %v8780_v44 = vunpack.i.h.bf16 %v15084_v3  ;;  %v8779_v54 = vunpack.i.l.bf16 %v15084_v3  ;;  %v8700_v3 = vld [vmem:[%s15538_s5 + $0x238] sm:$0xff] }
 0x8d8   :  { %7399 = vmatpush.msra.mxu3 %v8673_v38  ;;  %v7019_v38 = vsel %vm7003_vm0, %v8769_v57, %v14921_v43  ;;  %v7183_v20 = vsel %vm7182_vm9, %v7181_v11, %v7180_v19  ;;  %v8775_v43 = vunpack.i.h.bf16 %v15038_v25  ;;  %v7259_v57 = vsel %vm7182_vm9, %v7258_v32, %v7257_v35 }
 0x8d9   :  { %v7186_v61 = vsel %vm7185_vm10, %v7184_v39, %v7183_v20  ;;  %v15145_v20 = vmax.f32 %v14358_v8, %v15016_v53  ;;  %v8699_v8 = vld [vmem:[%s15538_s5 + $0x230] sm:$0xff]  ;;  %v7261_v53 = vsel %vm7185_vm10, %v7260_v2, %v7259_v57 }
 0x8da   :  { %7400 = vmatpush.msra.mxu3 %v8672_v50  ;;  %v16812_v50 = vld [vmem:[#allocation143_spill] sm:$0xff]  ;;  %v7011_v32 = vsel %vm7003_vm0, %v8775_v43, %v15047_v59 }
 0x8db   :  { %v7100_v13 = vmax.f32 %v16812_v50, %v7016_v58  ;;  %v8783_v25 = vpop.permute.xlu1 %8782 }
 0x8dc   :  { %7401 = vmatpush.msra.mxu3 %v8671_v47  ;;  %v15113_v47 = vmax.f32 %v16813_v31, %v7019_v38  ;;  %v8664_v38 = vld [vmem:[%s15538_s5 + $0x120] sm:$0xff]  ;;  %v16815_v31 = vld [vmem:[#allocation37_spill] sm:$0xff]  ;;  %v8784_v43 = vunpack.i.l.bf16 %v8783_v25  ;;  %v8785_v2 = vunpack.i.h.bf16 %v8783_v25 }
 0x8dd   :  { %v15088_v1 = vpop.permute.xlu2 %6961  ;;  %v7262_v39 = vrot.slane %v7100_v13, 4 }
 0x8de   :  { %7402 = vmatpush.msra.mxu3 %v8670_v62  ;;  %v8665_v62 = vld [vmem:[%s15538_s5 + $0x128] sm:$0xff]  ;;  %v7189_v19 = vrot.slane %v15113_v47, 7 }
 0x8e0   :  { %7403 = vmatpush.msra.mxu3 %v8669_v45  ;;  %v16814_v45 = vld [vmem:[#allocation213_spill] sm:$0xff] }
 0x8e1   :  { %v15125_v36 = vmax.f32 %v16814_v45, %v15047_v59  ;;  %v15154_v59 = vmax.f32 %v16815_v31, %v7008_v51  ;;  %v16816_v51 = vld [vmem:[#allocation142_spill] sm:$0xff] }
 0x8e2   :  { %7404 = vmatpush.msra.mxu3 %v8668_v49 }
 0x8e4   :  { %7405 = vmatpush.msra.mxu3 %v8667_v26  ;;  %v8788_v11 = vpop.permute.xlu0 %8787  ;;  %v7188_v26 = vsel %vm7187_vm11, %v7100_v13, %v7186_v61 }
 0x8e5   :  { %v15131_v49 = vpop.permute.xlu2 %6985  ;;  %v8790_v0 = vunpack.i.h.bf16 %v8788_v11  ;;  %v8789_v58 = vunpack.i.l.bf16 %v8788_v11  ;;  %v15175_v11 = vmax.f32 %v16816_v51, %v7011_v32  ;;  %v7191_v57 = vsel %vm7190_vm12, %v7189_v19, %v7188_v26 }
 0x8e6   :  { %7406 = vmatpush.msra.mxu3 %v8666_v23  ;;  %v7005_v23 = vsel %vm7003_vm0, %v8779_v54, %v15052_v52  ;;  %v7079_v54 = vmax.f32 %v14268_v30, %v15052_v52 }
 0x8e7   :  { %v7025_v50 = vsel %vm7003_vm0, %v8790_v0, %v14985_v5  ;;  %v7022_v13 = vsel %vm7003_vm0, %v8789_v58, %v14958_v16  ;;  %v7378_v5 = vrot.slane %v15125_v36, 6  ;;  %v7264_v16 = vrot.slane %v15113_v47, 3 }
 0x8e8   :  { %7407 = vmatpush.msra.mxu3 %v8665_v62  ;;  %v15157_v40 = vmax.f32 %v14837_v12, %v7025_v50  ;;  %v7112_v35 = vmax.f32 %v14761_v42, %v7022_v13  ;;  %v7014_v62 = vsel %vm7003_vm0, %v8780_v44, %v15094_v34  ;;  %v15169_v12 = vmax.f32 %v14285_v15, %v7005_v23  ;;  %v16818_v13 = vld [vmem:[#allocation43_spill] sm:$0xff] }
 0x8e9   :  { %v7017_v42 = vsel %vm7003_vm0, %v8784_v43, %v15088_v1  ;;  %v7263_v47 = vsel %vm7187_vm11, %v7262_v39, %v7261_v53  ;;  %v7362_v44 = vrot.slane %v15154_v59, 7  ;;  %v7376_v15 = vrot.slane %v15145_v20, 7  ;;  %v8681_v39 = vld [vmem:[%s15538_s5 + $0x1a8] sm:$0xff] }
 0x8ea   :  { %7408 = vmatpush.msra.mxu3 %v8664_v38  ;;  %v7195_v61 = vrot.slane %v15157_v40, 5  ;;  %v7192_v45 = vrot.slane %v7112_v35, 6  ;;  %v15188_v25 = vmax.f32 %v14633_v24, %v7017_v42  ;;  %v7266_v52 = vrot.slane %v7112_v35, 2  ;;  %v8680_v35 = vld [vmem:[%s15538_s5 + $0x1a0] sm:$0xff] }
 0x8eb   :  { %v7363_v30 = vsel %vm7179_vm8, %v7362_v44, %v15169_v12  ;;  %v15202_v24 = vmax.f32 %v16818_v13, %v15094_v34  ;;  %v7364_v31 = vrot.slane %v15175_v11, 6  ;;  %v7468_v53 = vrot.slane %v15145_v20, 3  ;;  %v8697_v13 = vld [vmem:[%s15538_s5 + $0x220] sm:$0xff] }
 0x8ec   :  { %7518 = vmatpush.msrb.mxu3 %v8700_v3  ;;  %v8793_v0 = vpop.permute.xlu1 %8792  ;;  %v6974_v58 = vpop.permute.xlu0 %6973  ;;  %v7194_v38 = vsel %vm7193_vm13, %v7192_v45, %v7191_v57  ;;  %v16817_v3 = vld [vmem:[#allocation44_spill] sm:$0xff]  ;;  %v7467_v34 = vrot.slane %v7079_v54, 4  ;;  %v7103_v42 = vmax.f32 %v14617_v37, %v15088_v1  ;;  %v7368_v45 = vrot.slane %v15188_v25, 4 }
 0x8ed   :  { %v15185_v32 = vmax.f32 %v16817_v3, %v7014_v62  ;;  %v8794_v26 = vunpack.i.l.bf16 %v8793_v0  ;;  %v7020_v19 = vsel %vm7003_vm0, %v8785_v2, %v6974_v58  ;;  %v7197_v50 = vsel %vm7196_vm14, %v7195_v61, %v7194_v38  ;;  %v15205_v43 = vpop.permute.xlu2 %6929 }
 0x8ee   :  { %7519 = vmatpush.msrb.mxu3 %v8699_v8  ;;  %v15197_v23 = vmax.f32 %v14708_v10, %v7020_v19  ;;  %7232 = vmatmul.f32.vlgmr.msra.gmra.mxu2 %v7197_v50  ;;  %v7265_v10 = vsel %vm7190_vm12, %v7264_v16, %v7263_v47  ;;  %v7377_v62 = vsel %vm7179_vm8, %v7376_v15, %v7079_v54  ;;  %v7268_v51 = vrot.slane %v15157_v40, 1 }
 0x8ef   :  { %v7023_v8 = vsel %vm7003_vm0, %v8794_v26, %v15131_v49  ;;  %7427 = vmatpush.msra.mxu2 %v8681_v39  ;;  %v7365_v61 = vsel %vm7182_vm9, %v7364_v31, %v7363_v30  ;;  %v7366_v16 = vrot.slane %v15185_v32, 5  ;;  %v7109_v20 = vmax.f32 %v14691_v46, %v6974_v58 }
 0x8f0   :  { %v15221_v2 = vmax.f32 %v14784_v29, %v7023_v8  ;;  %v7370_v57 = vrot.slane %v15197_v23, 3  ;;  %v7267_v47 = vsel %vm7193_vm13, %v7266_v52, %v7265_v10  ;;  %v7380_v37 = vrot.slane %v15202_v24, 5  ;;  %v8717_v10 = vld [vmem:[%s15538_s5 + $0x2b8] sm:$0xff] }
 0x8f1   :  { %7428 = vmatpush.msra.mxu2 %v8680_v35  ;;  %v8795_v1 = vunpack.i.h.bf16 %v8793_v0  ;;  %v7379_v44 = vsel %vm7182_vm9, %v7378_v5, %v7377_v62  ;;  %v7469_v15 = vsel %vm7179_vm8, %v7468_v53, %v7467_v34  ;;  %v7367_v40 = vsel %vm7185_vm10, %v7366_v16, %v7365_v61  ;;  %v8698_v5 = vld [vmem:[%s15538_s5 + $0x228] sm:$0xff] }
 0x8f2   :  { %v7382_v29 = vrot.slane %v7103_v42, 4  ;;  %v7369_v46 = vsel %vm7187_vm11, %v7368_v45, %v7367_v40  ;;  %v7372_v58 = vrot.slane %v15221_v2, 2  ;;  %v7269_v26 = vsel %vm7196_vm14, %v7268_v51, %v7267_v47  ;;  %v8695_v45 = vld [vmem:[%s15538_s5 + $0x210] sm:$0xff] }
 0x8f3   :  { %v7371_v0 = vsel %vm7190_vm12, %v7370_v57, %v7369_v46  ;;  %v7384_v19 = vrot.slane %v7109_v20, 3  ;;  %v7470_v52 = vrot.slane %v15125_v36, 2  ;;  %v7115_v50 = vmax.f32 %v14769_v28, %v15131_v49  ;;  %v8696_v28 = vld [vmem:[%s15538_s5 + $0x218] sm:$0xff]  ;;  %v8716_v51 = vld [vmem:[%s15538_s5 + $0x2b0] sm:$0xff]  ;;  %v8714_v46 = vld [vmem:[%s15538_s5 + $0x2a0] sm:$0xff] }
 0x8f4   :  { %v15231_v54 = vpop.permute.xlu1 %8797  ;;  %v6998_v38 = vpop.permute.xlu0 %6997  ;;  %v7381_v31 = vsel %vm7185_vm10, %v7380_v37, %v7379_v44  ;;  %v7373_v49 = vsel %vm7193_vm13, %v7372_v58, %v7371_v0  ;;  %v7475_v62 = vrot.slane %v7109_v20, 7  ;;  %v8715_v44 = vld [vmem:[%s15538_s5 + $0x2a8] sm:$0xff] }
 0x8f5   :  { %v7026_v3 = vsel %vm7003_vm0, %v8795_v1, %v6998_v38  ;;  %v7121_v30 = vmax.f32 %v14841_v60, %v6998_v38  ;;  %v7471_v35 = vsel %vm7182_vm9, %v7470_v52, %v7469_v15  ;;  %v7383_v60 = vsel %vm7187_vm11, %v7382_v29, %v7381_v31  ;;  %v15256_v36 = vpop.permute.xlu2 %6917  ;;  %v8694_v1 = vld [vmem:[%s15538_s5 + $0x208] sm:$0xff] }
 0x8f6   :  { %v15242_v39 = vmax.f32 %v14855_v48, %v7026_v3  ;;  %7303 = vmatmul.f32.vlgmr.msrb.gmra.mxu2 %v7269_v26  ;;  %v7472_v48 = vrot.slane %v15202_v24, 1  ;;  %v7385_v53 = vsel %vm7190_vm12, %v7384_v19, %v7383_v60  ;;  %v7386_v61 = vrot.slane %v7115_v50, 2  ;;  %v8692_v26 = vld [vmem:[%s15538_s5 + $0x1f8] sm:$0xff] }
 0x8f7   :  { %7484 = vmatpush.msrb.mxu2 %v8698_v5  ;;  %v7388_v24 = vrot.slane %v7121_v30, 1  ;;  %v7479_v29 = vrot.slane %v7121_v30, 5  ;;  %v7477_v38 = vrot.slane %v7115_v50, 6  ;;  %v8799_v58 = vunpack.i.l.bf16 %v15231_v54  ;;  %v8713_v5 = vld [vmem:[%s15538_s5 + $0x298] sm:$0xff]  ;;  %v8691_v50 = vld [vmem:[%s15538_s5 + $0x1f0] sm:$0xff] }
 0x8f8   :  { %v7374_v8 = vrot.slane %v15242_v39, 1  ;;  %v7473_v16 = vsel %vm7185_vm10, %v7472_v48, %v7471_v35  ;;  %v7387_v37 = vsel %vm7193_vm13, %v7386_v61, %v7385_v53  ;;  %v8800_v19 = vunpack.i.h.bf16 %v15231_v54 }
 0x8f9   :  { %7485 = vmatpush.msrb.mxu2 %v8697_v13  ;;  %v7474_v47 = vsel %vm7187_vm11, %v7103_v42, %v7473_v16  ;;  %v7389_v40 = vsel %vm7196_vm14, %v7388_v24, %v7387_v37  ;;  %v8693_v42 = vld [vmem:[%s15538_s5 + $0x200] sm:$0xff]  ;;  %v8712_v13 = vld [vmem:[%s15538_s5 + $0x290] sm:$0xff]  ;;  %v7453_v31 = vrot.slane %v15169_v12, 4  ;;  %v7009_v54 = vsel %vm7003_vm0, %v8799_v58, %v15205_v43  ;;  %v8711_v12 = vld [vmem:[%s15538_s5 + $0x288] sm:$0xff] }
 0x8fa   :  { %v7375_v34 = vsel %vm7196_vm14, %v7374_v8, %v7373_v49  ;;  %v7476_v15 = vsel %vm7190_vm12, %v7475_v62, %v7474_v47  ;;  %v7454_v49 = vrot.slane %v15154_v59, 3  ;;  %v8689_v24 = vld [vmem:[%s15538_s5 + $0x1e0] sm:$0xff]  ;;  %v7086_v59 = vmax.f32 %v14398_v21, %v7009_v54  ;;  %v8688_v16 = vld [vmem:[%s15538_s5 + $0x1d8] sm:$0xff] }
 0x8fb   :  { %7409 = vmatmul.f32.vlgmr.msra.gmra.mxu3 %v7375_v34  ;;  %7486 = vmatpush.msrb.mxu2 %v8696_v28  ;;  %v7478_v3 = vsel %vm7193_vm13, %v7477_v38, %v7476_v15  ;;  %v8690_v28 = vld [vmem:[%s15538_s5 + $0x1e8] sm:$0xff]  ;;  %v8710_v34 = vld [vmem:[%s15538_s5 + $0x280] sm:$0xff]  ;;  %v8687_v15 = vld [vmem:[%s15538_s5 + $0x1d0] sm:$0xff] }
 0x8fc   :  { %v8803_v57 = vpop.permute.xlu1 %8802  ;;  %7591 = vmatpush.msra.mxu3 %v8717_v10  ;;  %v15274_v20 = vpop.permute.xlu0 %6941  ;;  %v7480_v0 = vsel %vm7196_vm14, %v7479_v29, %v7478_v3  ;;  %v7455_v61 = vsel %vm7179_vm8, %v7454_v49, %v7453_v31  ;;  %v8684_v54 = vld [vmem:[%s15538_s5 + $0x1b8] sm:$0xff] }
 0x8fd   :  { %7487 = vmatpush.msrb.mxu2 %v8695_v45  ;;  %v15303_v30 = vpop.permute.xlu2 %6965  ;;  %v8804_v52 = vunpack.i.l.bf16 %v8803_v57  ;;  %v8805_v35 = vunpack.i.h.bf16 %v8803_v57  ;;  %v7012_v60 = vsel %vm7003_vm0, %v8800_v19, %v15274_v20  ;;  %v8709_v57 = vld [vmem:[%s15538_s5 + $0x278] sm:$0xff]  ;;  %v7081_v19 = vmax.f32 %v14291_v41, %v15256_v36 }
 0x8fe   :  { %7592 = vmatpush.msra.mxu3 %v8716_v51  ;;  %8682 = vmatmul.msk.f32.vlgmr.msra.gmra.mxu2 %vm7213_vm15, %v7389_v40  ;;  %v7092_v45 = vmax.f32 %v14492_v63, %v7012_v60  ;;  %v7456_v51 = vrot.slane %v15175_v11, 2  ;;  %v7458_v63 = vrot.slane %v15185_v32, 1  ;;  %v7560_v40 = vrot.slane %v7086_v59, 7 }
 0x8ff   :  { %7488 = vmatpush.msrb.mxu2 %v8694_v1  ;;  %v7006_v53 = vsel %vm7003_vm0, %v8804_v52, %v15256_v36  ;;  %v7087_v1 = vmax.f32 %v14382_v7, %v15205_v43  ;;  %v7093_v32 = vmax.f32 %v14476_v17, %v15274_v20  ;;  %v8707_v17 = vld [vmem:[%s15538_s5 + $0x268] sm:$0xff] }
 0x900   :  { %7593 = vmatpush.msra.mxu3 %v8715_v44  ;;  %v7080_v47 = vmax.f32 %v14307_v27, %v7006_v53  ;;  %v7457_v11 = vsel %vm7182_vm9, %v7456_v51, %v7455_v61  ;;  %v8708_v27 = vld [vmem:[%s15538_s5 + $0x270] sm:$0xff]  ;;  %v7562_v29 = vrot.slane %v7092_v45, 6  ;;  %v8719_v45 = vld [vmem:[%s15538_s5 + $0x2c8] sm:$0xff] }
 0x901   :  { %7489 = vmatpush.msrb.mxu2 %v8693_v42  ;;  %v7459_v20 = vsel %vm7185_vm10, %v7458_v63, %v7457_v11  ;;  %v8703_v51 = vld [vmem:[%s15538_s5 + $0x248] sm:$0xff]  ;;  %v16819_v63 = vld [vmem:[#allocation262_spill] sm:$0xff] }
 0x902   :  { %7594 = vmatpush.msra.mxu3 %v8714_v46  ;;  %v7561_v3 = vsel %vm7179_vm8, %v7560_v40, %v7080_v47 }
 0x903   :  { %8701 = vmatmul.msk.f32.vlgmr.msrb.gmra.mxu3 %vm7213_vm15, %v7480_v0  ;;  %7490 = vmatpush.msrb.mxu2 %v8692_v26  ;;  %v7463_v0 = vrot.slane %v15221_v2, 6  ;;  %v7576_v2 = vrot.slane %v7093_v32, 6  ;;  %v7563_v41 = vsel %vm7182_vm9, %v7562_v29, %v7561_v3 }
 0x904   :  { %v8808_v8 = vpop.permute.xlu1 %8807  ;;  %7595 = vmatpush.msra.mxu3 %v8713_v5  ;;  %v15313_v48 = vpop.permute.xlu0 %6953  ;;  %v7460_v5 = vsel %vm7187_vm11, %v15188_v25, %v7459_v20  ;;  %v7465_v25 = vrot.slane %v15242_v39, 5  ;;  %v7645_v20 = vld [vmem:[%s15541_s7 + $0x38] sm:$0xff] }
 0x905   :  { %v8809_v10 = vunpack.i.l.bf16 %v8808_v8  ;;  %7491 = vmatpush.msrb.mxu2 %v8691_v50  ;;  %v7015_v62 = vsel %vm7003_vm0, %v8805_v35, %v15313_v48  ;;  %v8810_v44 = vunpack.i.h.bf16 %v8808_v8  ;;  %v7099_v42 = vmax.f32 %v14567_v56, %v15313_v48  ;;  %v15375_v26 = vpop.permute.xlu2 %6989  ;;  %v8685_v50 = vld [vmem:[%s15538_s5 + $0x1c0] sm:$0xff]  ;;  %v8705_v35 = vld [vmem:[%s15538_s5 + $0x258] sm:$0xff] }
 0x906   :  { %7596 = vmatpush.msra.mxu3 %v8712_v13  ;;  %v7098_v21 = vmax.f32 %v14579_v14, %v7015_v62  ;;  %v7461_v14 = vrot.slane %v15197_v23, 7  ;;  %v8686_v23 = vld [vmem:[%s15538_s5 + $0x1c8] sm:$0xff]  ;;  %v7574_v13 = vrot.slane %v7087_v1, 7  ;;  %v8704_v62 = vld [vmem:[%s15538_s5 + $0x250] sm:$0xff]  ;;  %v7117_v11 = vmax.f32 %v16819_v63, %v15375_v26  ;;  %v8718_v1 = vld [vmem:[%s15538_s5 + $0x2c0] sm:$0xff] }
 0x907   :  { %7492 = vmatpush.msrb.mxu2 %v8690_v28  ;;  %v7018_v37 = vsel %vm7003_vm0, %v8809_v10, %v15303_v30  ;;  %v7578_v8 = vrot.slane %v7099_v42, 5  ;;  %v8683_v10 = vld [vmem:[%s15538_s5 + $0x1b0] sm:$0xff]  ;;  %v7650_v42 = vld [vmem:[%s15541_s7 + $0x60] sm:$0xff] }
 0x908   :  { %7597 = vmatpush.msra.mxu3 %v8711_v12  ;;  %v7104_v43 = vmax.f32 %v14653_v6, %v7018_v37  ;;  %v7564_v6 = vrot.slane %v7098_v21, 5  ;;  %v7462_v31 = vsel %vm7190_vm12, %v7461_v14, %v7460_v5  ;;  %v7575_v12 = vsel %vm7179_vm8, %v7574_v13, %v7081_v19  ;;  %v7642_v19 = vld [vmem:[%s15541_s7 + $0x20] sm:$0xff]  ;;  %v7691_v13 = vld [vmem:[%s15542_s9 + $0x48] sm:$0xff] }
 0x909   :  { %7493 = vmatpush.msrb.mxu2 %v8689_v24  ;;  %v7464_v53 = vsel %vm7193_vm13, %v7463_v0, %v7462_v31  ;;  %v7584_v32 = vrot.slane %v7117_v11, 2  ;;  %v7639_v31 = vld [vmem:[%s15541_s7 + $0x8] sm:$0xff]  ;;  %v8818_v11 = vld [vmem:[%s15543_s10] ss:$0 sm:$0xff] }
 0x90a   :  { %7598 = vmatpush.msra.mxu3 %v8710_v34  ;;  %v7566_v36 = vrot.slane %v7104_v43, 4  ;;  %v7565_v60 = vsel %vm7185_vm10, %v7564_v6, %v7563_v41  ;;  %v7466_v34 = vsel %vm7196_vm14, %v7465_v25, %v7464_v53  ;;  %v7651_v43 = vld [vmem:[%s15541_s7 + $0x68] sm:$0xff]  ;;  %v7644_v6 = vld [vmem:[%s15541_s7 + $0x30] sm:$0xff]  ;;  %v7690_v25 = vld [vmem:[%s15542_s9 + $0x40] sm:$0xff] }
 0x90b   :  { %7494 = vmatpush.msrb.mxu2 %v8688_v16  ;;  %v7689_v41 = vld [vmem:[%s15542_s9 + $0x38] sm:$0xff] }
 0x90c   :  { %7599 = vmatpush.msra.mxu3 %v8709_v57  ;;  %v6978_v38 = vpop.permute.xlu0 %6977  ;;  %v8813_v7 = vpop.permute.xlu1 %8812 }
 0x90d   :  { %v7021_v46 = vsel %vm7003_vm0, %v8810_v44, %v6978_v38  ;;  %v8814_v58 = vunpack.i.l.bf16 %v8813_v7  ;;  %7495 = vmatpush.msrb.mxu2 %v8687_v15  ;;  %v7111_v39 = vmax.f32 %v14714_v18, %v6978_v38  ;;  %v8815_v49 = vunpack.i.h.bf16 %v8813_v7  ;;  %v8702_v44 = vld [vmem:[%s15538_s5 + $0x240] sm:$0xff]  ;;  %v7652_v7 = vld [vmem:[%s15541_s7 + $0x70] sm:$0xff] }
 0x90e   :  { %v7110_v56 = vmax.f32 %v14730_v4, %v7021_v46  ;;  %7600 = vmatpush.msra.mxu3 %v8708_v27  ;;  %v8706_v4 = vld [vmem:[%s15538_s5 + $0x260] sm:$0xff]  ;;  %v7577_v18 = vsel %vm7182_vm9, %v7576_v2, %v7575_v12  ;;  %v7649_v46 = vld [vmem:[%s15541_s7 + $0x58] sm:$0xff] }
 0x90f   :  { %v7024_v52 = vsel %vm7003_vm0, %v8814_v58, %v15375_v26  ;;  %7496 = vmatpush.msrb.mxu2 %v8686_v23  ;;  %v7582_v57 = vrot.slane %v7111_v39, 3  ;;  %v7648_v58 = vld [vmem:[%s15541_s7 + $0x50] sm:$0xff]  ;;  %v7647_v23 = vld [vmem:[%s15541_s7 + $0x48] sm:$0xff]  ;;  %v7638_v2 = vld [vmem:[%s15541_s7] sm:$0xff] }
 0x910   :  { %7601 = vmatpush.msra.mxu3 %v8707_v17  ;;  %v7116_v48 = vmax.f32 %v14811_v22, %v7024_v52  ;;  %v7568_v28 = vrot.slane %v7110_v56, 3  ;;  %v7105_v22 = vmax.f32 %v14639_v9, %v15303_v30  ;;  %v7579_v9 = vsel %vm7185_vm10, %v7578_v8, %v7577_v18  ;;  %v7646_v17 = vld [vmem:[%s15541_s7 + $0x40] sm:$0xff]  ;;  %v7643_v56 = vld [vmem:[%s15541_s7 + $0x28] sm:$0xff]  ;;  %v7641_v52 = vld [vmem:[%s15541_s7 + $0x18] sm:$0xff] }
 0x911   :  { %7497 = vmatpush.msrb.mxu2 %v8685_v50  ;;  %v7567_v30 = vsel %vm7187_vm11, %v7566_v36, %v7565_v60  ;;  %v7640_v50 = vld [vmem:[%s15541_s7 + $0x10] sm:$0xff]  ;;  %v7685_v60 = vld [vmem:[%s15542_s9 + $0x18] sm:$0xff] }
 0x912   :  { %7602 = vmatpush.msra.mxu3 %v8706_v4  ;;  %v7570_v61 = vrot.slane %v7116_v48, 2  ;;  %v7569_v16 = vsel %vm7190_vm12, %v7568_v28, %v7567_v30  ;;  %v7580_v21 = vrot.slane %v7105_v22, 4  ;;  %v7692_v4 = vld [vmem:[%s15542_s9 + $0x50] sm:$0xf]  ;;  %v8816_v30 = vld [vmem:[%s15539_s6] ss:$0 sm:$0xff] }
 0x913   :  { %7498 = vmatpush.msrb.mxu2 %v8684_v54  ;;  %v7688_v8 = vld [vmem:[%s15542_s9 + $0x30] sm:$0xff]  ;;  %v7687_v54 = vld [vmem:[%s15542_s9 + $0x28] sm:$0xff] }
 0x914   :  { %7603 = vmatpush.msra.mxu3 %v8705_v35  ;;  %v7002_v24 = vpop.permute.xlu0 %7001  ;;  %v7686_v35 = vld [vmem:[%s15542_s9 + $0x20] sm:$0xff] }
 0x915   :  { %v7027_v59 = vsel %vm7003_vm0, %v8815_v49, %v7002_v24  ;;  %v7123_v37 = vmax.f32 %v14858_v33, %v7002_v24  ;;  %7499 = vmatpush.msrb.mxu2 %v8683_v10  ;;  %v7581_v33 = vsel %vm7187_vm11, %v7580_v21, %v7579_v9 }
 0x916   :  { %v7122_v47 = vmax.f32 %v14871_v55, %v7027_v59  ;;  %7604 = vmatpush.msra.mxu3 %v8704_v62  ;;  %7500 = vmatmul.f32.vlgmr.msrb.gmra.mxu2 %v7466_v34  ;;  %v7571_v55 = vsel %vm7193_vm13, %v7570_v61, %v7569_v16  ;;  %v7583_v27 = vsel %vm7190_vm12, %v7582_v57, %v7581_v33  ;;  %v7683_v16 = vld [vmem:[%s15542_s9 + $0x8] sm:$0xff]  ;;  %v7682_v57 = vld [vmem:[%s15542_s9] sm:$0xff] }
 0x917   :  { %7625 = vmatpush.msra.mxu2 %v8719_v45  ;;  %v7586_v14 = vrot.slane %v7123_v37, 1  ;;  %v7585_v29 = vsel %vm7193_vm13, %v7584_v32, %v7583_v27 }
 0x918   :  { %v7572_v15 = vrot.slane %v7122_v47, 1  ;;  %7605 = vmatpush.msra.mxu3 %v8703_v51  ;;  %v7684_v51 = vld [vmem:[%s15542_s9 + $0x10] sm:$0xff]  ;;  %v8817_v47 = vld [vmem:[%s15540_s8] ss:$0 sm:$0xff] }
 0x919   :  { %7626 = vmatpush.msra.mxu2 %v8718_v1  ;;  %v7587_v38 = vsel %vm7196_vm14, %v7586_v14, %v7585_v29 }
 0x91a   :  { %7606 = vmatpush.msra.mxu3 %v8702_v44  ;;  %v7573_v40 = vsel %vm7196_vm14, %v7572_v15, %v7571_v55 }
 0x91b   :  { %7607 = vmatmul.f32.vlgmr.msra.gmra.mxu3 %v7573_v40  ;;  %7662 = vmatpush.msrb.mxu2 %v7652_v7 }
 0x91c   :  { %8722 = vmatpush.msk.msrb.mxu3 %vm1714_vm4, %v7692_v4 }
 0x91d   :  { %7663 = vmatpush.msrb.mxu2 %v7651_v43 }
 0x91e   :  { %8720 = vmatmul.msk.f32.vlgmr.msra.gmra.mxu2 %vm7213_vm15, %v7587_v38  ;;  %7710 = vmatpush.msrb.mxu3 %v7691_v13 }
 0x91f   :  { %7664 = vmatpush.msrb.mxu2 %v7650_v42 }
 0x920   :  { %7711 = vmatpush.msrb.mxu3 %v7690_v25 }
 0x921   :  { %7665 = vmatpush.msrb.mxu2 %v7649_v46 }
 0x922   :  { %7712 = vmatpush.msrb.mxu3 %v7689_v41 }
 0x923   :  { %7666 = vmatpush.msrb.mxu2 %v7648_v58 }
 0x924   :  { %7713 = vmatpush.msrb.mxu3 %v7688_v8 }
 0x925   :  { %7667 = vmatpush.msrb.mxu2 %v7647_v23 }
 0x926   :  { %7714 = vmatpush.msrb.mxu3 %v7687_v54 }
 0x927   :  { %7668 = vmatpush.msrb.mxu2 %v7646_v17 }
 0x928   :  { %7715 = vmatpush.msrb.mxu3 %v7686_v35 }
 0x929   :  { %7669 = vmatpush.msrb.mxu2 %v7645_v20 }
 0x92a   :  { %7716 = vmatpush.msrb.mxu3 %v7685_v60 }
 0x92b   :  { %7670 = vmatpush.msrb.mxu2 %v7644_v6 }
 0x92c   :  { %7717 = vmatpush.msrb.mxu3 %v7684_v51 }
 0x92d   :  { %7671 = vmatpush.msrb.mxu2 %v7643_v56 }
 0x92e   :  { %7718 = vmatpush.msrb.mxu3 %v7683_v16 }
 0x92f   :  { %7672 = vmatpush.msrb.mxu2 %v7642_v19 }
 0x930   :  { %7719 = vmatpush.msrb.mxu3 %v7682_v57 }
 0x931   :  { %7673 = vmatpush.msrb.mxu2 %v7641_v52 }
 0x933   :  { %7674 = vmatpush.msrb.mxu2 %v7640_v50 }
 0x935   :  { %7675 = vmatpush.msrb.mxu2 %v7639_v31 }
 0x937   :  { %7676 = vmatpush.msrb.mxu2 %v7638_v2 }
 0x94e   :  { %v7253_v3 = vpop.f32.mrf.mxu3 }
 0x956   :  { %v7324_v5 = vpop.f32.mrf.mxu3 }
 0x971   :  { %v7233_v26 = vpop.f32.mrf.mxu2 }
 0x972   :  { %v7254_v39 = vadd.f32 %v7253_v3, %v7233_v26 }
 0x979   :  { %v7304_v0 = vpop.f32.mrf.mxu2 }
 0x97a   :  { %v7305_v22 = vadd.f32 %v7304_v0, %v7254_v39 }
 0x97c   :  { %v7325_v10 = vadd.f32 %v7324_v5, %v7305_v22 }
 0x97e   :  { %v7410_v36 = vpop.f32.mrf.mxu3 }
 0x981   :  { %v7430_v48 = vpop.f32.mrf.mxu2 }
 0x982   :  { %v7431_v49 = vadd.f32 %v7430_v48, %v7410_v36 }
 0x984   :  { %v7433_v62 = vadd.f32 %v7431_v49, %v7325_v10 }
 0x986   :  { %v7521_v28 = vpop.f32.mrf.mxu3 }
 0x999   :  { %v7501_v12 = vpop.f32.mrf.mxu2 }
 0x99a   :  { %v7522_v53 = vadd.f32 %v7521_v28, %v7501_v12 }
 0x99c   :  { %v7524_v34 = vadd.f32 %v7522_v53, %v7433_v62 }
 0x99e   :  { %v7608_v18 = vpop.f32.mrf.mxu3 }
 0x9a1   :  { %v7628_v24 = vpop.f32.mrf.mxu2 }
 0x9a2   :  { %v7629_v9 = vadd.f32 %v7628_v24, %v7608_v18 }
 0x9a4   :  { %v7631_v61 = vadd.f32 %v7629_v9, %v7524_v34 }
 0x9a6   :  { %v7636_v59 = vadd.f32 %v8816_v30, %v7631_v61 }
 0x9a8   :  { %v7637_v45 = vmax.f32 %v7636_v59, 0.0 }
 0x9aa   :  { %8721 = vmatmul.msk.f32.vlgmr.msrb.gmra.mxu2 %vm7657_vm1, %v7637_v45 }
 0xa2d   :  { %v7678_v37 = vpop.f32.mrf.mxu2 }
 0xa2e   :  { %v7679_v21 = vadd.f32 %v8817_v47, %v7678_v37 }
 0xa30   :  { %v7681_v63 = vmax.f32 %v7679_v21, 0.0 }
 0xa32   :  { %8723 = vmatmul.msk.f32.vlgmr.msrb.gmra.mxu3 %vm7697_vm2, %v7681_v63 }
 0xab5   :  { %v7721_v1 = vpop.f32.mrf.mxu3 }
 0xab6   :  { %v7722_v44 = vadd.f32 %v8818_v11, %v7721_v1 }
 0xab8   :  { %7725 = vst.msk [vmem:[%s15544_s11] sm:$0xff] %vm7724_vm3, %v7722_v44 }

</bundles_post_ra>
